<compile_context>
chip_gen: v6e
topology: v6e:2x2x1
jax: 0.10.0
libtpu: 0.0.40
codegen_flags: <defaults>
</compile_context>

<pallas_src>
import jax
import jax.numpy as jnp
from jax.experimental import pallas as pl
from jax.experimental.pallas import tpu as pltpu


NEG_SLOPE = 0.2                  # LeakyReLU slope from the PyTorch module
LAYER_DIMS = (2048, 1024, 256, 64, 32, 1)
OUT_PAD = 128                    # final layer padded to 128 lanes (lane-dense store)


def _round_up(x, m):
    return -(-x // m) * m


def _linear(h, w, b):
    # bf16 operands on the MXU, f32 accumulation + f32 bias add.
    return jnp.dot(h, w, preferred_element_type=jnp.float32) + b


def _lrelu_bf16(y):
    # LeakyReLU in f32, cast back to bf16 for the next MXU matmul.
    return jnp.where(y > 0, y, NEG_SLOPE * y).astype(jnp.bfloat16)


def _disc_kernel_resident(x_ref,
                          w1_ref, b1_ref, w2_ref, b2_ref, w3_ref, b3_ref,
                          w4_ref, b4_ref, w5_ref, b5_ref, w6_ref, b6_ref,
                          o_ref):
    """All six layers fused; all weights resident (single-buffered) in VMEM."""
    h = _lrelu_bf16(_linear(x_ref[...], w1_ref[...], b1_ref[...]))   # d_in -> 2048
    h = _lrelu_bf16(_linear(h, w2_ref[...], b2_ref[...]))            # 2048 -> 1024 (dropout=id)
    h = _lrelu_bf16(_linear(h, w3_ref[...], b3_ref[...]))            # 1024 -> 256  (dropout=id)
    h = _lrelu_bf16(_linear(h, w4_ref[...], b4_ref[...]))            # 256  -> 64   (dropout=id)
    h = _lrelu_bf16(_linear(h, w5_ref[...], b5_ref[...]))            # 64   -> 32   (dropout=id)
    o_ref[...] = _linear(h, w6_ref[...], b6_ref[...])                # 32 -> 128 pad (col 0 real)


def _disc_kernel_overlap(x_ref,
                         w1_ref, b1_ref, w2_hbm_ref, b2_ref, w3_ref, b3_ref,
                         w4_ref, b4_ref, w5_ref, b5_ref, w6_ref, b6_ref,
                         o_ref, w2_buf, w2_sem):
    """Single-grid-step (small batch) variant: the ~4 MB W2 DMA is started at
    kernel entry and hidden behind the layer-1 matmul + LeakyReLU."""
    cp = pltpu.make_async_copy(w2_hbm_ref, w2_buf, w2_sem)
    cp.start()
    h = _lrelu_bf16(_linear(x_ref[...], w1_ref[...], b1_ref[...]))   # overlaps W2 DMA
    cp.wait()
    h = _lrelu_bf16(_linear(h, w2_buf[...], b2_ref[...]))
    h = _lrelu_bf16(_linear(h, w3_ref[...], b3_ref[...]))
    h = _lrelu_bf16(_linear(h, w4_ref[...], b4_ref[...]))
    h = _lrelu_bf16(_linear(h, w5_ref[...], b5_ref[...]))
    o_ref[...] = _linear(h, w6_ref[...], b6_ref[...])


def _chip_traits():
    """(megacore, big_vmem) from the local device kind; conservative fallback."""
    try:
        kind = jax.devices()[0].device_kind.lower()
    except Exception:
        return False, False
    megacore = any(tag in kind for tag in ("v7", "v4", "v5p"))   # 2 TensorCores / chip
    big_vmem = "v6" in kind                                      # 128 MiB physical VMEM
    return megacore, big_vmem


def prepare_params(params):
    """One-time parameter prep (do this at init, NOT per forward call):
    weights -> bf16, biases -> f32, final layer padded to OUT_PAD lanes."""
    prepared = []
    n = len(params)
    for idx, (w, b) in enumerate(params):
        w = jnp.asarray(w)
        b = jnp.asarray(b).reshape(1, -1)
        if idx == n - 1:
            w = jnp.pad(w, ((0, 0), (0, OUT_PAD - w.shape[1])))
            b = jnp.pad(b, ((0, 0), (0, OUT_PAD - b.shape[1])))
        prepared.append((w.astype(jnp.bfloat16), b.astype(jnp.float32)))
    return prepared


def discriminator_forward(d_in, prepared_params, *, bm=None):
    """d_in: (B, d_in_dim) float. prepared_params: output of prepare_params()."""
    B, d_in_dim = d_in.shape
    megacore, big_vmem = _chip_traits()
    B8 = _round_up(B, 8)

    # Generation-aware batch tile.
    if bm is None:
        if megacore:
            if B8 <= 16:
                bm = B8                                   # tiny batch: 1 step
            elif B8 <= 512:
                bm = _round_up(-(-B8 // 2), 8)            # 2 balanced steps for 2 TCs
            else:
                bm = 256                                  # many 256-aligned steps
        else:
            if B8 <= 512:
                bm = B8                                   # single step on single-TC chips
            elif big_vmem and B8 >= 2048:
                bm = 1024                                 # v6e: 128 MiB VMEM -> bigger tile
            else:
                bm = 512
    bm = _round_up(max(bm, 8), 8)
    B_pad = _round_up(B8, bm)
    if megacore and B_pad // bm > 1:
        B_pad = _round_up(B_pad, 2 * bm)                  # even step count for 2 TCs
    n_steps = B_pad // bm

    # bf16 input tile (halves x DMA + double-buffer footprint; f32 accum in-kernel).
    x = d_in.astype(jnp.bfloat16)
    if B_pad != B:
        x = jnp.pad(x, ((0, B_pad - B), (0, 0)))

    flat_params = []
    for w, b in prepared_params:
        flat_params += [w, b]

    resident = pl.BlockSpec(memory_space=pltpu.MemorySpace.VMEM)
    in_specs = [pl.BlockSpec((bm, d_in_dim), lambda i: (i, 0))]
    scratch_shapes = []

    if n_steps == 1:
        # Small batch / latency-bound: W2 stays in HBM (pl.ANY) and is DMA'd
        # manually so the copy overlaps the layer-1 matmul.
        kernel = _disc_kernel_overlap
        for layer_idx in range(len(prepared_params)):
            if layer_idx == 1:
                in_specs += [pl.BlockSpec(memory_space=pl.ANY), resident]
            else:
                in_specs += [resident, resident]
        w2 = prepared_params[1][0]
        scratch_shapes = [pltpu.VMEM(w2.shape, jnp.bfloat16),
                          pltpu.SemaphoreType.DMA(())]
        w2_extra_bytes = w2.size * 2
    else:
        kernel = _disc_kernel_resident
        in_specs += [resident] * (2 * len(prepared_params))
        w2_extra_bytes = 0

    # VMEM budget computed from actual usage (weights + scratch + tiles +
    # generous activation margin), instead of a flat over-reservation.
    weight_bytes = sum(w.size * w.dtype.itemsize + b.size * b.dtype.itemsize
                       for w, b in prepared_params)
    act_bytes = bm * 48 * 1024                                     # per-row activation margin
    io_bytes = 2 * (bm * d_in_dim * 2 + bm * OUT_PAD * 4)          # double-buffered x / out tiles
    vmem_limit = weight_bytes + w2_extra_bytes + act_bytes + io_bytes + (6 << 20)
    cap = (100 << 20) if big_vmem else (48 << 20)
    vmem_limit = int(min(max(vmem_limit, 24 << 20), cap))

    out = pl.pallas_call(
        kernel,
        out_shape=jax.ShapeDtypeStruct((B_pad, OUT_PAD), jnp.float32),
        grid_spec=pltpu.PrefetchScalarGridSpec(
            num_scalar_prefetch=0,
            grid=(n_steps,),
            in_specs=in_specs,
            out_specs=pl.BlockSpec((bm, OUT_PAD), lambda i: (i, 0)),
            scratch_shapes=scratch_shapes,
        ),
        compiler_params=pltpu.CompilerParams(
            dimension_semantics=("parallel",),
            vmem_limit_bytes=vmem_limit,
        ),
    )(x, *flat_params)

    return out[:B, :1]


def init_params(key, d_in_dim):
    """nn.Linear-style init: U(-1/sqrt(fan_in), +1/sqrt(fan_in)).
    Weights stored as (in, out) so the kernel computes x @ W."""
    dims = (d_in_dim,) + LAYER_DIMS
    params = []
    for fan_in, fan_out in zip(dims[:-1], dims[1:]):
        key, kw, kb = jax.random.split(key, 3)
        bound = 1.0 / (fan_in ** 0.5)
        w = jax.random.uniform(kw, (fan_in, fan_out), jnp.float32, -bound, bound)
        b = jax.random.uniform(kb, (1, fan_out), jnp.float32, -bound, bound)
        params.append((w, b))
    return params


def reference_forward(d_in, params):
    """Plain-JAX reference with the same mixed precision as the kernel
    (bf16 matmul operands, f32 accumulation/bias/activation)."""
    h = d_in.astype(jnp.bfloat16)
    n = len(params)
    out = None
    for idx, (w, b) in enumerate(params):
        y = jnp.dot(h, w.astype(jnp.bfloat16),
                    preferred_element_type=jnp.float32) + b
        if idx < n - 1:
            h = jnp.where(y > 0, y, NEG_SLOPE * y).astype(jnp.bfloat16)
        else:
            out = y
    return out


if __name__ == "__main__":
    # Small dims consistent with the module's __init__ signature.
    Stru_dim, Time_dim, Dose_dim, Measurement_dim = 8, 4, 4, 16
    d_in_dim = Stru_dim + Time_dim + Dose_dim + Measurement_dim  # 32
    B = 8

    key = jax.random.PRNGKey(0)
    key, km, ks, kt, kd = jax.random.split(key, 5)
    Measurement = jax.random.normal(km, (B, Measurement_dim), jnp.float32)
    Stru = jax.random.normal(ks, (B, Stru_dim), jnp.float32)
    Time = jax.random.normal(kt, (B, Time_dim), jnp.float32)
    Dose = jax.random.normal(kd, (B, Dose_dim), jnp.float32)

    params = init_params(jax.random.PRNGKey(42), d_in_dim)
    prepared = prepare_params(params)   # one-time bf16 cast + tail padding

    # torch.cat((Measurement, Stru, Time, Dose), -1) — glue, kept in plain JAX.
    d_in = jnp.concatenate([Measurement, Stru, Time, Dose], axis=-1)

    # Path 1: small batch -> single grid step -> W2-overlap kernel.
    validity = discriminator_forward(d_in, prepared)
    validity = jax.block_until_ready(validity)
    ref = reference_forward(d_in, params)
    assert validity.shape == (B, 1)
    assert jnp.allclose(validity, ref, atol=2e-2, rtol=2e-2), (
        "Pallas output mismatch vs reference (single-step path)"
    )

    # Path 2: multi-step grid (resident-weights kernel) with explicit tile.
    B2 = 48
    key, kx = jax.random.split(key)
    d_in2 = jax.random.normal(kx, (B2, d_in_dim), jnp.float32)
    validity2 = discriminator_forward(d_in2, prepared, bm=16)
    validity2 = jax.block_until_ready(validity2)
    ref2 = reference_forward(d_in2, params)
    assert validity2.shape == (B2, 1)
    assert jnp.allclose(validity2, ref2, atol=2e-2, rtol=2e-2), (
        "Pallas output mismatch vs reference (multi-step path)"
    )

    print("KERNEL_OK")
</pallas_src>

<mosaic_0001>
module attributes {stable_mosaic.version = 11 : i64} {
  func.func @_disc_kernel_overlap(%arg0: i32, %arg1: memref<8x32xbf16, #tpu.memory_space<vmem>>, %arg2: memref<32x2048xbf16, #tpu.memory_space<vmem>>, %arg3: memref<1x2048xf32, #tpu.memory_space<vmem>>, %arg4: memref<2048x1024xbf16, #tpu.memory_space<any>>, %arg5: memref<1x1024xf32, #tpu.memory_space<vmem>>, %arg6: memref<1024x256xbf16, #tpu.memory_space<vmem>>, %arg7: memref<1x256xf32, #tpu.memory_space<vmem>>, %arg8: memref<256x64xbf16, #tpu.memory_space<vmem>>, %arg9: memref<1x64xf32, #tpu.memory_space<vmem>>, %arg10: memref<64x32xbf16, #tpu.memory_space<vmem>>, %arg11: memref<1x32xf32, #tpu.memory_space<vmem>>, %arg12: memref<32x128xbf16, #tpu.memory_space<vmem>>, %arg13: memref<1x128xf32, #tpu.memory_space<vmem>>, %arg14: memref<8x128xf32, #tpu.memory_space<vmem>>, %arg15: memref<2048x1024xbf16, #tpu.memory_space<vmem>>, %arg16: memref<!tpu.dma_semaphore, #tpu.memory_space<semaphore_mem>>) attributes {dimension_semantics = [#tpu.dimension_semantics<parallel>], iteration_bounds = array<i64: 1>, scalar_prefetch = 0 : i64, scratch_operands = 2 : i64, tpu.core_type = #tpu.core_type<tc>, window_params = [{transform_indices = @transform_0, window_bounds = array<i64: 8, 32>}, {pipeline_mode = #tpu.pipeline_mode<synchronous>, transform_indices = @transform_1, window_bounds = array<i64: 32, 2048>}, {pipeline_mode = #tpu.pipeline_mode<synchronous>, transform_indices = @transform_2, window_bounds = array<i64: 1, 2048>}, {}, {pipeline_mode = #tpu.pipeline_mode<synchronous>, transform_indices = @transform_4, window_bounds = array<i64: 1, 1024>}, {pipeline_mode = #tpu.pipeline_mode<synchronous>, transform_indices = @transform_5, window_bounds = array<i64: 1024, 256>}, {pipeline_mode = #tpu.pipeline_mode<synchronous>, transform_indices = @transform_6, window_bounds = array<i64: 1, 256>}, {pipeline_mode = #tpu.pipeline_mode<synchronous>, transform_indices = @transform_7, window_bounds = array<i64: 256, 64>}, {pipeline_mode = #tpu.pipeline_mode<synchronous>, transform_indices = @transform_8, window_bounds = array<i64: 1, 64>}, {pipeline_mode = #tpu.pipeline_mode<synchronous>, transform_indices = @transform_9, window_bounds = array<i64: 64, 32>}, {pipeline_mode = #tpu.pipeline_mode<synchronous>, transform_indices = @transform_10, window_bounds = array<i64: 1, 32>}, {pipeline_mode = #tpu.pipeline_mode<synchronous>, transform_indices = @transform_11, window_bounds = array<i64: 32, 128>}, {pipeline_mode = #tpu.pipeline_mode<synchronous>, transform_indices = @transform_12, window_bounds = array<i64: 1, 128>}, {transform_indices = @transform_13, window_bounds = array<i64: 8, 128>}]} {
    tpu.enqueue_dma source(%arg4 : memref<2048x1024xbf16, #tpu.memory_space<any>>) target(%arg15 : memref<2048x1024xbf16, #tpu.memory_space<vmem>>) target_semaphore(%arg16 : memref<!tpu.dma_semaphore, #tpu.memory_space<semaphore_mem>>)
    %c0 = arith.constant 0 : index
    %c0_0 = arith.constant 0 : index
    %0 = vector.load %arg1[%c0, %c0_0] : memref<8x32xbf16, #tpu.memory_space<vmem>>, vector<8x32xbf16>
    %c0_1 = arith.constant 0 : index
    %c0_2 = arith.constant 0 : index
    %1 = vector.load %arg2[%c0_1, %c0_2] : memref<32x2048xbf16, #tpu.memory_space<vmem>>, vector<32x2048xbf16>
    %c0_3 = arith.constant 0 : index
    %c0_4 = arith.constant 0 : index
    %2 = vector.load %arg3[%c0_3, %c0_4] : memref<1x2048xf32, #tpu.memory_space<vmem>>, vector<1x2048xf32>
    %cst = arith.constant dense<0.000000e+00> : vector<8x2048xf32>
    %3 = tpu.matmul %0, %1, %cst {dimension_numbers = #tpu.dot_dimension_numbers<[1], [0], [0], [1], [0, 0, 1, 1], [], []>} : vector<8x32xbf16>, vector<32x2048xbf16>, vector<8x2048xf32> -> vector<8x2048xf32>
    %4 = vector.broadcast %2 : vector<1x2048xf32> to vector<8x2048xf32>
    %5 = arith.addf %3, %4 : vector<8x2048xf32>
    %cst_5 = arith.constant 0.000000e+00 : f32
    %6 = vector.broadcast %cst_5 : f32 to vector<8x2048xf32>
    %7 = arith.cmpf ogt, %5, %6 : vector<8x2048xf32>
    %cst_6 = arith.constant 2.000000e-01 : f32
    %8 = vector.broadcast %cst_6 : f32 to vector<8x2048xf32>
    %9 = arith.mulf %8, %5 : vector<8x2048xf32>
    %10 = arith.select %7, %5, %9 : vector<8x2048xi1>, vector<8x2048xf32>
    %11 = arith.truncf %10 : vector<8x2048xf32> to vector<8x2048xbf16>
    tpu.wait_dma2 semaphore(%arg16 : memref<!tpu.dma_semaphore, #tpu.memory_space<semaphore_mem>>) src(%arg4 : memref<2048x1024xbf16, #tpu.memory_space<any>>) dst(%arg15 : memref<2048x1024xbf16, #tpu.memory_space<vmem>>)
    %c0_7 = arith.constant 0 : index
    %c0_8 = arith.constant 0 : index
    %12 = vector.load %arg15[%c0_7, %c0_8] : memref<2048x1024xbf16, #tpu.memory_space<vmem>>, vector<2048x1024xbf16>
    %c0_9 = arith.constant 0 : index
    %c0_10 = arith.constant 0 : index
    %13 = vector.load %arg5[%c0_9, %c0_10] : memref<1x1024xf32, #tpu.memory_space<vmem>>, vector<1x1024xf32>
    %cst_11 = arith.constant dense<0.000000e+00> : vector<8x1024xf32>
    %14 = tpu.matmul %11, %12, %cst_11 {dimension_numbers = #tpu.dot_dimension_numbers<[1], [0], [0], [1], [0, 0, 1, 1], [], []>} : vector<8x2048xbf16>, vector<2048x1024xbf16>, vector<8x1024xf32> -> vector<8x1024xf32>
    %15 = vector.broadcast %13 : vector<1x1024xf32> to vector<8x1024xf32>
    %16 = arith.addf %14, %15 : vector<8x1024xf32>
    %cst_12 = arith.constant 0.000000e+00 : f32
    %17 = vector.broadcast %cst_12 : f32 to vector<8x1024xf32>
    %18 = arith.cmpf ogt, %16, %17 : vector<8x1024xf32>
    %cst_13 = arith.constant 2.000000e-01 : f32
    %19 = vector.broadcast %cst_13 : f32 to vector<8x1024xf32>
    %20 = arith.mulf %19, %16 : vector<8x1024xf32>
    %21 = arith.select %18, %16, %20 : vector<8x1024xi1>, vector<8x1024xf32>
    %22 = arith.truncf %21 : vector<8x1024xf32> to vector<8x1024xbf16>
    %c0_14 = arith.constant 0 : index
    %c0_15 = arith.constant 0 : index
    %23 = vector.load %arg6[%c0_14, %c0_15] : memref<1024x256xbf16, #tpu.memory_space<vmem>>, vector<1024x256xbf16>
    %c0_16 = arith.constant 0 : index
    %c0_17 = arith.constant 0 : index
    %24 = vector.load %arg7[%c0_16, %c0_17] : memref<1x256xf32, #tpu.memory_space<vmem>>, vector<1x256xf32>
    %cst_18 = arith.constant dense<0.000000e+00> : vector<8x256xf32>
    %25 = tpu.matmul %22, %23, %cst_18 {dimension_numbers = #tpu.dot_dimension_numbers<[1], [0], [0], [1], [0, 0, 1, 1], [], []>} : vector<8x1024xbf16>, vector<1024x256xbf16>, vector<8x256xf32> -> vector<8x256xf32>
    %26 = vector.broadcast %24 : vector<1x256xf32> to vector<8x256xf32>
    %27 = arith.addf %25, %26 : vector<8x256xf32>
    %cst_19 = arith.constant 0.000000e+00 : f32
    %28 = vector.broadcast %cst_19 : f32 to vector<8x256xf32>
    %29 = arith.cmpf ogt, %27, %28 : vector<8x256xf32>
    %cst_20 = arith.constant 2.000000e-01 : f32
    %30 = vector.broadcast %cst_20 : f32 to vector<8x256xf32>
    %31 = arith.mulf %30, %27 : vector<8x256xf32>
    %32 = arith.select %29, %27, %31 : vector<8x256xi1>, vector<8x256xf32>
    %33 = arith.truncf %32 : vector<8x256xf32> to vector<8x256xbf16>
    %c0_21 = arith.constant 0 : index
    %c0_22 = arith.constant 0 : index
    %34 = vector.load %arg8[%c0_21, %c0_22] : memref<256x64xbf16, #tpu.memory_space<vmem>>, vector<256x64xbf16>
    %c0_23 = arith.constant 0 : index
    %c0_24 = arith.constant 0 : index
    %35 = vector.load %arg9[%c0_23, %c0_24] : memref<1x64xf32, #tpu.memory_space<vmem>>, vector<1x64xf32>
    %cst_25 = arith.constant dense<0.000000e+00> : vector<8x64xf32>
    %36 = tpu.matmul %33, %34, %cst_25 {dimension_numbers = #tpu.dot_dimension_numbers<[1], [0], [0], [1], [0, 0, 1, 1], [], []>} : vector<8x256xbf16>, vector<256x64xbf16>, vector<8x64xf32> -> vector<8x64xf32>
    %37 = vector.broadcast %35 : vector<1x64xf32> to vector<8x64xf32>
    %38 = arith.addf %36, %37 : vector<8x64xf32>
    %cst_26 = arith.constant 0.000000e+00 : f32
    %39 = vector.broadcast %cst_26 : f32 to vector<8x64xf32>
    %40 = arith.cmpf ogt, %38, %39 : vector<8x64xf32>
    %cst_27 = arith.constant 2.000000e-01 : f32
    %41 = vector.broadcast %cst_27 : f32 to vector<8x64xf32>
    %42 = arith.mulf %41, %38 : vector<8x64xf32>
    %43 = arith.select %40, %38, %42 : vector<8x64xi1>, vector<8x64xf32>
    %44 = arith.truncf %43 : vector<8x64xf32> to vector<8x64xbf16>
    %c0_28 = arith.constant 0 : index
    %c0_29 = arith.constant 0 : index
    %45 = vector.load %arg10[%c0_28, %c0_29] : memref<64x32xbf16, #tpu.memory_space<vmem>>, vector<64x32xbf16>
    %c0_30 = arith.constant 0 : index
    %c0_31 = arith.constant 0 : index
    %46 = vector.load %arg11[%c0_30, %c0_31] : memref<1x32xf32, #tpu.memory_space<vmem>>, vector<1x32xf32>
    %cst_32 = arith.constant dense<0.000000e+00> : vector<8x32xf32>
    %47 = tpu.matmul %44, %45, %cst_32 {dimension_numbers = #tpu.dot_dimension_numbers<[1], [0], [0], [1], [0, 0, 1, 1], [], []>} : vector<8x64xbf16>, vector<64x32xbf16>, vector<8x32xf32> -> vector<8x32xf32>
    %48 = vector.broadcast %46 : vector<1x32xf32> to vector<8x32xf32>
    %49 = arith.addf %47, %48 : vector<8x32xf32>
    %cst_33 = arith.constant 0.000000e+00 : f32
    %50 = vector.broadcast %cst_33 : f32 to vector<8x32xf32>
    %51 = arith.cmpf ogt, %49, %50 : vector<8x32xf32>
    %cst_34 = arith.constant 2.000000e-01 : f32
    %52 = vector.broadcast %cst_34 : f32 to vector<8x32xf32>
    %53 = arith.mulf %52, %49 : vector<8x32xf32>
    %54 = arith.select %51, %49, %53 : vector<8x32xi1>, vector<8x32xf32>
    %55 = arith.truncf %54 : vector<8x32xf32> to vector<8x32xbf16>
    %c0_35 = arith.constant 0 : index
    %c0_36 = arith.constant 0 : index
    %56 = vector.load %arg12[%c0_35, %c0_36] : memref<32x128xbf16, #tpu.memory_space<vmem>>, vector<32x128xbf16>
    %c0_37 = arith.constant 0 : index
    %c0_38 = arith.constant 0 : index
    %57 = vector.load %arg13[%c0_37, %c0_38] : memref<1x128xf32, #tpu.memory_space<vmem>>, vector<1x128xf32>
    %cst_39 = arith.constant dense<0.000000e+00> : vector<8x128xf32>
    %58 = tpu.matmul %55, %56, %cst_39 {dimension_numbers = #tpu.dot_dimension_numbers<[1], [0], [0], [1], [0, 0, 1, 1], [], []>} : vector<8x32xbf16>, vector<32x128xbf16>, vector<8x128xf32> -> vector<8x128xf32>
    %59 = vector.broadcast %57 : vector<1x128xf32> to vector<8x128xf32>
    %60 = arith.addf %58, %59 : vector<8x128xf32>
    %c0_40 = arith.constant 0 : index
    %c0_41 = arith.constant 0 : index
    %61 = vector.load %arg14[%c0_40, %c0_41] : memref<8x128xf32, #tpu.memory_space<vmem>>, vector<8x128xf32>
    tpu.vector_store %arg14[%c0_40, %c0_41], %60 {strides = array<i32>} : memref<8x128xf32, #tpu.memory_space<vmem>>, vector<8x128xf32>,
    return
  }
  func.func @transform_0(%arg0: i32) -> (i32, i32) {
    %c0_i32 = arith.constant 0 : i32
    %c0_i32_0 = arith.constant 0 : i32
    return %arg0, %c0_i32 : i32, i32
  }
  func.func @transform_1(%arg0: i32) -> (i32, i32) {
    %c0_i32 = arith.constant 0 : i32
    %c0_i32_0 = arith.constant 0 : i32
    %c0_i32_1 = arith.constant 0 : i32
    return %c0_i32, %c0_i32_0 : i32, i32
  }
  func.func @transform_2(%arg0: i32) -> (i32, i32) {
    %c0_i32 = arith.constant 0 : i32
    %c0_i32_0 = arith.constant 0 : i32
    %c0_i32_1 = arith.constant 0 : i32
    return %c0_i32, %c0_i32_0 : i32, i32
  }
  func.func @transform_4(%arg0: i32) -> (i32, i32) {
    %c0_i32 = arith.constant 0 : i32
    %c0_i32_0 = arith.constant 0 : i32
    %c0_i32_1 = arith.constant 0 : i32
    return %c0_i32, %c0_i32_0 : i32, i32
  }
  func.func @transform_5(%arg0: i32) -> (i32, i32) {
    %c0_i32 = arith.constant 0 : i32
    %c0_i32_0 = arith.constant 0 : i32
    %c0_i32_1 = arith.constant 0 : i32
    return %c0_i32, %c0_i32_0 : i32, i32
  }
  func.func @transform_6(%arg0: i32) -> (i32, i32) {
    %c0_i32 = arith.constant 0 : i32
    %c0_i32_0 = arith.constant 0 : i32
    %c0_i32_1 = arith.constant 0 : i32
    return %c0_i32, %c0_i32_0 : i32, i32
  }
  func.func @transform_7(%arg0: i32) -> (i32, i32) {
    %c0_i32 = arith.constant 0 : i32
    %c0_i32_0 = arith.constant 0 : i32
    %c0_i32_1 = arith.constant 0 : i32
    return %c0_i32, %c0_i32_0 : i32, i32
  }
  func.func @transform_8(%arg0: i32) -> (i32, i32) {
    %c0_i32 = arith.constant 0 : i32
    %c0_i32_0 = arith.constant 0 : i32
    %c0_i32_1 = arith.constant 0 : i32
    return %c0_i32, %c0_i32_0 : i32, i32
  }
  func.func @transform_9(%arg0: i32) -> (i32, i32) {
    %c0_i32 = arith.constant 0 : i32
    %c0_i32_0 = arith.constant 0 : i32
    %c0_i32_1 = arith.constant 0 : i32
    return %c0_i32, %c0_i32_0 : i32, i32
  }
  func.func @transform_10(%arg0: i32) -> (i32, i32) {
    %c0_i32 = arith.constant 0 : i32
    %c0_i32_0 = arith.constant 0 : i32
    %c0_i32_1 = arith.constant 0 : i32
    return %c0_i32, %c0_i32_0 : i32, i32
  }
  func.func @transform_11(%arg0: i32) -> (i32, i32) {
    %c0_i32 = arith.constant 0 : i32
    %c0_i32_0 = arith.constant 0 : i32
    %c0_i32_1 = arith.constant 0 : i32
    return %c0_i32, %c0_i32_0 : i32, i32
  }
  func.func @transform_12(%arg0: i32) -> (i32, i32) {
    %c0_i32 = arith.constant 0 : i32
    %c0_i32_0 = arith.constant 0 : i32
    %c0_i32_1 = arith.constant 0 : i32
    return %c0_i32, %c0_i32_0 : i32, i32
  }
  func.func @transform_13(%arg0: i32) -> (i32, i32) {
    %c0_i32 = arith.constant 0 : i32
    %c0_i32_0 = arith.constant 0 : i32
    return %arg0, %c0_i32 : i32, i32
  }
}

</mosaic_0001>

<bundles_post_ra>
// kernel: tpu_custom_call.1
= control target key start
LH: loop header
LB: loop body
LE: loop exit
PB: predicated region body
PF: predicated region fallthrough
CT: control target
= control target key end

     0   :  { %18 = vsyncpa [#allocation5], 0  ;;  %s11920_s0 = inlined_call_operand.hbm [shape: bf16[8,32], index: 0, kind: input, shape index: {}]   ;;  %s11921_s1 = inlined_call_operand.hbm [shape: bf16[32,2048], index: 1, kind: input, shape index: {}]   ;;  %s11922_s2 = inlined_call_operand.hbm [shape: f32[1,2048], index: 2, kind: input, shape index: {}]   ;;  %s11923_s3 = inlined_call_operand.hbm [shape: bf16[2048,1024], index: 3, kind: input, shape index: {}]   ;;  %s11924_s4 = inlined_call_operand.hbm [shape: f32[1,1024], index: 4, kind: input, shape index: {}]   ;;  %s11925_s5 = inlined_call_operand.hbm [shape: bf16[1024,256], index: 5, kind: input, shape index: {}]   ;;  %s11926_s6 = inlined_call_operand.hbm [shape: f32[1,256], index: 6, kind: input, shape index: {}]   ;;  %s11927_s7 = inlined_call_operand.vmem [shape: bf16[256,64], index: 7, kind: input, shape index: {}]   ;;  %s11928_s8 = inlined_call_operand.hbm [shape: f32[1,64], index: 8, kind: input, shape index: {}]   ;;  %s11929_s9 = inlined_call_operand.vmem [shape: bf16[64,32], index: 9, kind: input, shape index: {}]   ;;  %s11930_s10 = inlined_call_operand.hbm [shape: f32[1,32], index: 10, kind: input, shape index: {}]   ;;  %s11931_s11 = inlined_call_operand.hbm [shape: bf16[32,128], index: 11, kind: input, shape index: {}]   ;;  %s11932_s12 = inlined_call_operand.hbm [shape: f32[1,128], index: 12, kind: input, shape index: {}]   ;;  %s11933_s13 = inlined_call_operand.hbm [shape: f32[8,128], index: 13, kind: output, shape index: {}]  }
   0x1   :  { %19 = vsyncpa [#allocation8], 0 }
   0x2   :  { %20 = vsyncpa [#allocation11], 0 }
   0x3   :  { %21 = vsyncpa [#allocation14], 0 }
   0x4   :  { %22 = vsyncpa [#allocation17], 0 }
   0x5   :  { %23 = vsyncpa [#allocation20], 0 }
   0x6   :  { %24 = vsyncpa [#allocation6], 0  ;;  %s11458_s25 = smov [#allocation7]  }
   0x7   :  { %s40_s26 = sshll.u32 %s11458_s25, 4  ;;  %s41_s26 = int_to_ptr.vmem [resolvable:$true] %s40_s26 }
   0x8   :  { %s11210_s27 = scalar_lea.vmem %s41_s26, 4096  ;;  %p11215_p1 = scmp.lt.s32.totalorder %s41_s26, %s41_s26 }
   0x9   :  { %p11211_p0 = scmp.ne.s32.totalorder %s41_s26, %s11210_s27  ;;  %p11216_p2 = scmp.lt.s32.totalorder %s11210_s27, %s11210_s27 }
   0xb   :  { %p11217_p3 = por %p11216_p2, %p11215_p1 }
   0xd   :  { %p11218_p4 = pnand %p11217_p3, %p11211_p0 }
   0xf   :  { %11221 = shalt.err (!%p11218_p4)
}
  0x10   :  { %s11459_s28 = smov 1024   ;;  %s11460_s29 = smov 64  }
  0x11   :  { %46 = dma.hbm_to_vmem [thread:$0]  %s11921_s1, 4096, %s41_s26, [#allocation8], %s11459_s28, %s11459_s28, %s11460_s29  }
  0x12   :  { %s11461_s15 = smov [#allocation10]   ;;  %s11462_s17 = smov [#allocation13]  }
  0x13   :  { %s63_s16 = sshll.u32 %s11461_s15, 4  ;;  %s85_s18 = sshll.u32 %s11462_s17, 4  ;;  %s64_s16 = int_to_ptr.vmem [resolvable:$true] %s63_s16  ;;  %s86_s18 = int_to_ptr.vmem [resolvable:$true] %s85_s18 }
  0x14   :  { %s11230_s19 = scalar_lea.vmem %s64_s16, 128  ;;  %p11235_p6 = scmp.lt.s32.totalorder %s64_s16, %s64_s16 }
  0x15   :  { %p11231_p5 = scmp.ne.s32.totalorder %s64_s16, %s11230_s19  ;;  %p11236_p7 = scmp.lt.s32.totalorder %s11230_s19, %s11230_s19 }
  0x17   :  { %p11237_p8 = por %p11236_p7, %p11235_p6 }
  0x19   :  { %p11238_p9 = pnand %p11237_p8, %p11231_p5 }
  0x1b   :  { %11241 = shalt.err (!%p11238_p9)
}
  0x1c   :  { %66 = dma.hbm_to_vmem [thread:$0]  %s11924_s4, 128, %s64_s16, [#allocation11]  }
  0x1d   :  { %s11250_s22 = scalar_lea.vmem %s86_s18, 32  ;;  %p11255_p11 = scmp.lt.s32.totalorder %s86_s18, %s86_s18 }
  0x1e   :  { %p11251_p10 = scmp.ne.s32.totalorder %s86_s18, %s11250_s22  ;;  %p11256_p12 = scmp.lt.s32.totalorder %s11250_s22, %s11250_s22 }
  0x20   :  { %p11257_p13 = por %p11256_p12, %p11255_p11 }
  0x22   :  { %p11258_p0 = pnand %p11257_p13, %p11251_p10 }
  0x24   :  { %11261 = shalt.err (!%p11258_p0)
}
  0x25   :  { %88 = dma.hbm_to_vmem [thread:$0]  %s11926_s6, 32, %s86_s18, [#allocation14]  }
  0x26   :  { %s11463_s24 = smov [#allocation16]   ;;  %s11464_s26 = smov [#allocation4]  }
  0x27   :  { %s109_s25 = sshll.u32 %s11463_s24, 4  ;;  %s31_s27 = sshll.u32 %s11464_s26, 4  ;;  %s110_s25 = int_to_ptr.vmem [resolvable:$true] %s109_s25  ;;  %s32_s27 = int_to_ptr.vmem [resolvable:$true] %s31_s27 }
  0x28   :  { %s11270_s28 = scalar_lea.vmem %s110_s25, 16  ;;  %s11274_s4 = scalar_lea.vmem %s110_s25, 32 }
  0x29   :  { %p11271_p1 = scmp.ne.s32.totalorder %s110_s25, %s11270_s28  ;;  %p11275_p2 = scmp.lt.s32.totalorder %s110_s25, %s110_s25 }
  0x2a   :  { %p11276_p3 = scmp.lt.s32.totalorder %s11274_s4, %s11270_s28 }
  0x2c   :  { %p11277_p4 = por %p11276_p3, %p11275_p2 }
  0x2e   :  { %p11278_p5 = pnand %p11277_p4, %p11271_p1 }
  0x30   :  { %11281 = shalt.err (!%p11278_p5)
}
  0x31   :  { %112 = dma.hbm_to_vmem [thread:$0]  %s11930_s10, 16, %s110_s25, [#allocation17]  }
  0x32   :  { %s11290_s15 = scalar_lea.vmem %s32_s27, 64  ;;  %p11295_p7 = scmp.lt.s32.totalorder %s32_s27, %s32_s27 }
  0x33   :  { %p11291_p6 = scmp.ne.s32.totalorder %s32_s27, %s11290_s15  ;;  %p11296_p8 = scmp.lt.s32.totalorder %s11290_s15, %s11290_s15 }
  0x35   :  { %p11297_p9 = por %p11296_p8, %p11295_p7 }
  0x37   :  { %p11298_p10 = pnand %p11297_p9, %p11291_p6 }
  0x39   :  { %11301 = shalt.err (!%p11298_p10)
}
  0x3a   :  { %34 = dma.hbm_to_vmem [thread:$0]  %s11920_s0, 64, %s32_s27, [#allocation5]  }
  0x3b   :  { %s11465_s17 = smov [#allocation9]   ;;  %s11466_s19 = smov [#allocation12]  }
  0x3c   :  { %s53_s18 = sshll.u32 %s11465_s17, 4  ;;  %s72_s20 = sshll.u32 %s11466_s19, 4  ;;  %s54_s18 = int_to_ptr.vmem [resolvable:$true] %s53_s18  ;;  %s73_s20 = int_to_ptr.vmem [resolvable:$true] %s72_s20 }
  0x3d   :  { %s11310_s21 = scalar_lea.vmem %s54_s18, 256  ;;  %p11315_p12 = scmp.lt.s32.totalorder %s54_s18, %s54_s18 }
  0x3e   :  { %p11311_p11 = scmp.ne.s32.totalorder %s54_s18, %s11310_s21  ;;  %p11316_p13 = scmp.lt.s32.totalorder %s11310_s21, %s11310_s21 }
  0x40   :  { %p11317_p0 = por %p11316_p13, %p11315_p12 }
  0x42   :  { %p11318_p1 = pnand %p11317_p0, %p11311_p11 }
  0x44   :  { %11321 = shalt.err (!%p11318_p1)
}
  0x45   :  { %56 = dma.hbm_to_vmem [thread:$0]  %s11922_s2, 256, %s54_s18, [#allocation8]  }
  0x46   :  { %s11330_s1 = scalar_lea.vmem %s73_s20, 16384  ;;  %p11335_p3 = scmp.lt.s32.totalorder %s73_s20, %s73_s20 }
  0x47   :  { %p11331_p2 = scmp.ne.s32.totalorder %s73_s20, %s11330_s1  ;;  %p11336_p4 = scmp.lt.s32.totalorder %s11330_s1, %s11330_s1 }
  0x49   :  { %p11337_p5 = por %p11336_p4, %p11335_p3 }
  0x4b   :  { %p11338_p6 = pnand %p11337_p5, %p11331_p2 }
  0x4d   :  { %11341 = shalt.err (!%p11338_p6)
}
  0x4e   :  { %s11467_s0 = smov 128   ;;  %s11468_s23 = smov 8  }
  0x4f   :  { %78 = dma.hbm_to_vmem [thread:$0]  %s11925_s5, 16384, %s73_s20, [#allocation11], %s11467_s0, %s11467_s0, %s11468_s23  }
  0x50   :  { %s11469_s26 = smov [#allocation15]   ;;  %s11470_s28 = smov [#allocation18]  }
  0x51   :  { %s97_s27 = sshll.u32 %s11469_s26, 4  ;;  %s118_s4 = sshll.u32 %s11470_s28, 4  ;;  %s98_s27 = int_to_ptr.vmem [resolvable:$true] %s97_s27  ;;  %s119_s4 = int_to_ptr.vmem [resolvable:$true] %s118_s4 }
  0x52   :  { %s11350_s2 = scalar_lea.vmem %s98_s27, 16  ;;  %s11354_s30 = scalar_lea.vmem %s98_s27, 32 }
  0x53   :  { %p11351_p7 = scmp.ne.s32.totalorder %s98_s27, %s11350_s2  ;;  %p11355_p8 = scmp.lt.s32.totalorder %s98_s27, %s98_s27 }
  0x54   :  { %p11356_p9 = scmp.lt.s32.totalorder %s11354_s30, %s11350_s2 }
  0x56   :  { %p11357_p10 = por %p11356_p9, %p11355_p8 }
  0x58   :  { %p11358_p11 = pnand %p11357_p10, %p11351_p7 }
  0x5a   :  { %11361 = shalt.err (!%p11358_p11)
}
  0x5b   :  { %100 = dma.hbm_to_vmem [thread:$0]  %s11928_s8, 16, %s98_s27, [#allocation14]  }
  0x5c   :  { %s11370_s6 = scalar_lea.vmem %s119_s4, 256  ;;  %p11375_p13 = scmp.lt.s32.totalorder %s119_s4, %s119_s4 }
  0x5d   :  { %p11371_p12 = scmp.ne.s32.totalorder %s119_s4, %s11370_s6  ;;  %p11376_p0 = scmp.lt.s32.totalorder %s11370_s6, %s11370_s6 }
  0x5f   :  { %p11377_p1 = por %p11376_p0, %p11375_p13 }
  0x61   :  { %p11378_p2 = pnand %p11377_p1, %p11371_p12 }
  0x63   :  { %11381 = shalt.err (!%p11378_p2)
}
  0x64   :  { %s11471_s5 = smov 4   ;;  %s11472_s18 = smov [#allocation19]  }
  0x65   :  { %124 = dma.hbm_to_vmem [thread:$0]  %s11931_s11, 256, %s119_s4, [#allocation17], %s11460_s29, %s11460_s29, %s11471_s5  }
  0x66   :  { %s131_s19 = sshll.u32 %s11472_s18, 4  ;;  %s132_s19 = int_to_ptr.vmem [resolvable:$true] %s131_s19 }
  0x67   :  { %s11390_s20 = scalar_lea.vmem %s132_s19, 16  ;;  %s11394_s8 = scalar_lea.vmem %s132_s19, 32 }
  0x68   :  { %p11391_p3 = scmp.ne.s32.totalorder %s132_s19, %s11390_s20  ;;  %p11395_p4 = scmp.lt.s32.totalorder %s132_s19, %s132_s19 }
  0x69   :  { %p11396_p5 = scmp.lt.s32.totalorder %s11394_s8, %s11390_s20 }
  0x6b   :  { %p11397_p6 = por %p11396_p5, %p11395_p4 }
  0x6d   :  { %p11398_p7 = pnand %p11397_p6, %p11391_p3 }
  0x6f   :  { %11401 = shalt.err (!%p11398_p7)
}
  0x70   :  { %134 = dma.hbm_to_vmem [thread:$0]  %s11932_s12, 16, %s132_s19, [#allocation20]  }
  0x71   :  { %11442 = dma.done.wait [#allocation5], 64  }
  0x72   :  { %11443 = vsyncadd [#allocation5], 4294967232 }
  0x73   :  { %11444 = dma.done.wait [#allocation8], 4352  }
  0x74   :  { %11445 = vsyncadd [#allocation8], 4294962944 }
  0x75   :  { %11446 = dma.done.wait [#allocation11], 16512  }
  0x76   :  { %11447 = vsyncadd [#allocation11], 4294950784 }
  0x77   :  { %11448 = dma.done.wait [#allocation14], 48  }
  0x78   :  { %11449 = vsyncadd [#allocation14], 4294967248 }
  0x79   :  { %11450 = dma.done.wait [#allocation17], 272  }
  0x7a   :  { %11451 = vsyncadd [#allocation17], 4294967024 }
  0x7b   :  { %11452 = dma.done.wait [#allocation20], 16  }
  0x7c   :  { %11453 = vsyncadd [#allocation20], 4294967280  ;;  %v11473_v0 = vmov 0   ;;  %v194_v1 = vld [vmem:[#allocation7 + $0x80] sm:$0xff]  ;;  %v195_v3 = vld [vmem:[#allocation7 + $0x88] sm:$0xff]  ;;  %vm454_vm0 = vcmask 261120  }
  0x7d   :  { %490 = vmatprep.mubr.bf16.mxu0 %v11473_v0  ;;  %531 = vmatprep.mubr.bf16.mxu1 %v11473_v0  ;;  %v202_v2 = vld [vmem:[#allocation7 + $0xc0] sm:$0xff]  ;;  %v203_v5 = vld [vmem:[#allocation7 + $0xc8] sm:$0xff]  ;;  %v196_v15 = vld [vmem:[#allocation7 + $0x90] sm:$0xff]  ;;  %s11474_s11 = smov [#allocation2]  }
  0x7e   :  { %v9712_v4 = vcombine.high %v194_v1, %v202_v2  ;;  %v9711_v6 = vcombine.low %v194_v1, %v202_v2  ;;  %v178_v7 = vld [vmem:[#allocation7] sm:$0xff]  ;;  %v9714_v9 = vcombine.high %v195_v3, %v203_v5  ;;  %v9713_v10 = vcombine.low %v195_v3, %v203_v5  ;;  %v179_v12 = vld [vmem:[#allocation7 + $0x8] sm:$0xff]  ;;  %v204_v16 = vld [vmem:[#allocation7 + $0xd0] sm:$0xff]  ;;  %s173_s12 = sshll.u32 %s11474_s11, 4  ;;  %s174_s12 = int_to_ptr.vmem [resolvable:$true] %s173_s12 }
  0x7f   :  { %v186_v8 = vld [vmem:[#allocation7 + $0x40] sm:$0xff]  ;;  %v187_v13 = vld [vmem:[#allocation7 + $0x48] sm:$0xff]  ;;  %v197_v17 = vld [vmem:[#allocation7 + $0x98] sm:$0xff]  ;;  %v9716_v21 = vcombine.high %v196_v15, %v204_v16  ;;  %v9715_v28 = vcombine.low %v196_v15, %v204_v16  ;;  %s11410_s29 = scalar_lea.vmem %s174_s12, 131072  ;;  %p11415_p9 = scmp.lt.s32.totalorder %s174_s12, %s174_s12 }
  0x80   :  { %v9696_v11 = vcombine.high %v178_v7, %v186_v8  ;;  %470 = vmatprep.subr.bf16.mxu0 %v9712_v4  ;;  %v9698_v14 = vcombine.high %v179_v12, %v187_v13  ;;  %511 = vmatprep.subr.bf16.mxu1 %v9714_v9  ;;  %v9695_v18 = vcombine.low %v178_v7, %v186_v8  ;;  %v205_v19 = vld [vmem:[#allocation7 + $0xd8] sm:$0xff]  ;;  %v180_v23 = vld [vmem:[#allocation7 + $0x10] sm:$0xff]  ;;  %v198_v32 = vld [vmem:[#allocation7 + $0xa0] sm:$0xff]  ;;  %p11411_p8 = scmp.ne.s32.totalorder %s174_s12, %s11410_s29  ;;  %p11416_p10 = scmp.lt.s32.totalorder %s11410_s29, %s11410_s29 }
  0x81   :  { %471 = vmatpush1.bf16.msra.mxu0 %v9711_v6  ;;  %512 = vmatpush1.bf16.msra.mxu1 %v9713_v10  ;;  %v9697_v20 = vcombine.low %v179_v12, %v187_v13  ;;  %v9718_v22 = vcombine.high %v197_v17, %v205_v19  ;;  %v188_v24 = vld [vmem:[#allocation7 + $0x50] sm:$0xff]  ;;  %v181_v25 = vld [vmem:[#allocation7 + $0x18] sm:$0xff]  ;;  %v9717_v29 = vcombine.low %v197_v17, %v205_v19  ;;  %v206_v33 = vld [vmem:[#allocation7 + $0xe0] sm:$0xff] }
  0x82   :  { %472 = vmatprep.subr.bf16.mxu0 %v9696_v11  ;;  %513 = vmatprep.subr.bf16.mxu1 %v9698_v14  ;;  %v189_v26 = vld [vmem:[#allocation7 + $0x58] sm:$0xff]  ;;  %v9700_v30 = vcombine.high %v180_v23, %v188_v24  ;;  %v199_v34 = vld [vmem:[#allocation7 + $0xa8] sm:$0xff]  ;;  %v9699_v36 = vcombine.low %v180_v23, %v188_v24  ;;  %v9720_v38 = vcombine.high %v198_v32, %v206_v33  ;;  %v182_v40 = vld [vmem:[#allocation7 + $0x20] sm:$0xff]  ;;  %p11417_p11 = por %p11416_p10, %p11415_p9 }
  0x83   :  { %v11583_v27 = vld [vmem:[#allocation4] sm:$0xf]  ;;  %v9702_v31 = vcombine.high %v181_v25, %v189_v26  ;;  %v207_v35 = vld [vmem:[#allocation7 + $0xe8] sm:$0xff]  ;;  %v9701_v37 = vcombine.low %v181_v25, %v189_v26  ;;  %v190_v41 = vld [vmem:[#allocation7 + $0x60] sm:$0xff]  ;;  %v9719_v44 = vcombine.low %v198_v32, %v206_v33 }
  0x84   :  { %v9722_v39 = vcombine.high %v199_v34, %v207_v35  ;;  %v183_v42 = vld [vmem:[#allocation7 + $0x28] sm:$0xff]  ;;  %v9721_v45 = vcombine.low %v199_v34, %v207_v35  ;;  %v9704_v46 = vcombine.high %v182_v40, %v190_v41  ;;  %v200_v48 = vld [vmem:[#allocation7 + $0xb0] sm:$0xff]  ;;  %v201_v50 = vld [vmem:[#allocation7 + $0xb8] sm:$0xff]  ;;  %v9703_v52 = vcombine.low %v182_v40, %v190_v41  ;;  %p11418_p12 = pnand %p11417_p11, %p11411_p8 }
  0x85   :  { %473 = vmatpush1.bf16.msra.mxu0 %v9695_v18  ;;  %514 = vmatpush1.bf16.msra.mxu1 %v9697_v20  ;;  %v191_v43 = vld [vmem:[#allocation7 + $0x68] sm:$0xff]  ;;  %v208_v49 = vld [vmem:[#allocation7 + $0xf0] sm:$0xff]  ;;  %v209_v51 = vld [vmem:[#allocation7 + $0xf8] sm:$0xff] }
  0x86   :  { %552 = vmatprep.subr.bf16.mxu0 %v9716_v21  ;;  %593 = vmatprep.subr.bf16.mxu1 %v9718_v22  ;;  %v9706_v47 = vcombine.high %v183_v42, %v191_v43  ;;  %v9705_v53 = vcombine.low %v183_v42, %v191_v43  ;;  %v9724_v54 = vcombine.high %v200_v48, %v208_v49  ;;  %v184_v56 = vld [vmem:[#allocation7 + $0x30] sm:$0xff]  ;;  %v185_v58 = vld [vmem:[#allocation7 + $0x38] sm:$0xff] }
  0x87   :  { %v9726_v55 = vcombine.high %v201_v50, %v209_v51  ;;  %v192_v57 = vld [vmem:[#allocation7 + $0x70] sm:$0xff]  ;;  %v193_v59 = vld [vmem:[#allocation7 + $0x78] sm:$0xff]  ;;  %v9723_v60 = vcombine.low %v200_v48, %v208_v49  ;;  %v9725_v61 = vcombine.low %v201_v50, %v209_v51 }
  0x88   :  { %9727 = vmatmul.mubr.msk.bf16.vlgmr.msra.gmra.mxu0 %vm454_vm0, %v11583_v27  ;;  %9728 = vmatmul.mubr.msk.bf16.vlgmr.msra.gmra.mxu1 %vm454_vm0, %v11583_v27  ;;  %v9708_v62 = vcombine.high %v184_v56, %v192_v57  ;;  %v9710_v63 = vcombine.high %v185_v58, %v193_v59  ;;  %v9707_v1 = vcombine.low %v184_v56, %v192_v57 }
  0x89   :  { %553 = vmatpush1.bf16.msra.mxu0 %v9715_v28  ;;  %594 = vmatpush1.bf16.msra.mxu1 %v9717_v29  ;;  %v9709_v2 = vcombine.low %v185_v58, %v193_v59 }
  0x8a   :  { %554 = vmatprep.subr.bf16.mxu0 %v9700_v30  ;;  %595 = vmatprep.subr.bf16.mxu1 %v9702_v31 }
  0x8b   :  { %572 = vmatprep.mubr.bf16.mxu0 %v11473_v0  ;;  %613 = vmatprep.mubr.bf16.mxu1 %v11473_v0 }
  0x8d   :  { %555 = vmatpush1.bf16.msra.mxu0 %v9699_v36  ;;  %596 = vmatpush1.bf16.msra.mxu1 %v9701_v37 }
  0x8e   :  { %634 = vmatprep.subr.bf16.mxu0 %v9720_v38  ;;  %675 = vmatprep.subr.bf16.mxu1 %v9722_v39 }
  0x90   :  { %9729 = vmatmul.mubr.msk.bf16.vlgmr.msra.gmra.mxu0 %vm454_vm0, %v11583_v27  ;;  %9730 = vmatmul.mubr.msk.bf16.vlgmr.msra.gmra.mxu1 %vm454_vm0, %v11583_v27 }
  0x91   :  { %635 = vmatpush1.bf16.msra.mxu0 %v9719_v44  ;;  %676 = vmatpush1.bf16.msra.mxu1 %v9721_v45 }
  0x92   :  { %636 = vmatprep.subr.bf16.mxu0 %v9704_v46  ;;  %677 = vmatprep.subr.bf16.mxu1 %v9706_v47 }
  0x93   :  { %654 = vmatprep.mubr.bf16.mxu0 %v11473_v0  ;;  %695 = vmatprep.mubr.bf16.mxu1 %v11473_v0 }
  0x95   :  { %637 = vmatpush1.bf16.msra.mxu0 %v9703_v52  ;;  %678 = vmatpush1.bf16.msra.mxu1 %v9705_v53 }
  0x96   :  { %716 = vmatprep.subr.bf16.mxu0 %v9724_v54  ;;  %757 = vmatprep.subr.bf16.mxu1 %v9726_v55 }
  0x98   :  { %9731 = vmatmul.mubr.msk.bf16.vlgmr.msra.gmra.mxu0 %vm454_vm0, %v11583_v27  ;;  %9732 = vmatmul.mubr.msk.bf16.vlgmr.msra.gmra.mxu1 %vm454_vm0, %v11583_v27 }
  0x99   :  { %717 = vmatpush1.bf16.msra.mxu0 %v9723_v60  ;;  %758 = vmatpush1.bf16.msra.mxu1 %v9725_v61 }
  0x9a   :  { %718 = vmatprep.subr.bf16.mxu0 %v9708_v62  ;;  %759 = vmatprep.subr.bf16.mxu1 %v9710_v63 }
  0x9b   :  { %736 = vmatprep.mubr.bf16.mxu0 %v11473_v0  ;;  %777 = vmatprep.mubr.bf16.mxu1 %v11473_v0 }
  0x9d   :  { %719 = vmatpush1.bf16.msra.mxu0 %v9707_v1  ;;  %760 = vmatpush1.bf16.msra.mxu1 %v9709_v2 }
  0xa0   :  { %9733 = vmatmul.mubr.msk.bf16.vlgmr.msra.gmra.mxu0 %vm454_vm0, %v11583_v27  ;;  %9734 = vmatmul.mubr.msk.bf16.vlgmr.msra.gmra.mxu1 %vm454_vm0, %v11583_v27 }
  0xa1   :  { %11421 = shalt.err (!%p11418_p12)  }
  0xa2   :  { %176 = dma.hbm_to_vmem [thread:$0]  %s11923_s3, 131072, %s174_s12, [#allocation3]  ;;  %v214_v0 = vlaneseq  ;;  %v210_v5 = vld [vmem:[#allocation9] sm:$0xff]  ;;  %v11642_v48 = vld [vmem:[#allocation9 + $0x8] sm:$0xff] }
  0xa4   :  { %v215_v3 = vshrl.u32 %v214_v0, 7 }
  0xa6   :  { %v11610_v4 = vsub.s32 0, %v215_v3  ;;  %v11612_v6 = vsub.s32 2, %v215_v3  ;;  %v11614_v7 = vsub.s32 1, %v215_v3  ;;  %v11616_v8 = vsub.s32 3, %v215_v3 }
  0xa7   :  { %v11620_v11 = vsub.s32 4, %v215_v3  ;;  %v11624_v17 = vsub.s32 6, %v215_v3  ;;  %v11627_v24 = vsub.s32 5, %v215_v3  ;;  %v11629_v28 = vsub.s32 7, %v215_v3 }
  0xa8   :  { %v217_v9 = vrot.slane %v210_v5, %v11610_v4  ;;  %v225_v10 = vrot.slane %v210_v5, %v11612_v6  ;;  %v221_v12 = vrot.slane %v210_v5, %v11614_v7  ;;  %v229_v14 = vrot.slane %v210_v5, %v11616_v8 }
  0xa9   :  { %v233_v20 = vrot.slane %v210_v5, %v11620_v11  ;;  %v241_v32 = vrot.slane %v210_v5, %v11624_v17  ;;  %v237_v40 = vrot.slane %v210_v5, %v11627_v24  ;;  %v245_v44 = vrot.slane %v210_v5, %v11629_v28 }
  0xaa   :  { %v249_v57 = vrot.slane %v11642_v48, %v11610_v4  ;;  %v257_v61 = vrot.slane %v11642_v48, %v11612_v6 }
 0x148   :  { %v492_v13 = vpop.f32.mrf.mxu0  ;;  %v533_v16 = vpop.f32.mrf.mxu1 }
 0x149   :  { %v493_v15 = vadd.f32 %v492_v13, %v217_v9  ;;  %v534_v18 = vadd.f32 %v533_v16, %v225_v10  ;;  %v253_v9 = vrot.slane %v11642_v48, %v11614_v7 }
 0x14a   :  { %v494_v19 = vpop.f32.mrf.mxu0  ;;  %v535_v23 = vpop.f32.mrf.mxu1 }
 0x14b   :  { %vm786_vm1 = vcmp.gt.f32.partialorder %v493_v15, 0.0  ;;  %v802_v21 = vmul.f32 0.2, %v493_v15  ;;  %v495_v22 = vadd.f32 %v494_v19, %v221_v12  ;;  %vm788_vm2 = vcmp.gt.f32.partialorder %v534_v18, 0.0 }
 0x14c   :  { %v804_v25 = vmul.f32 0.2, %v534_v18  ;;  %v536_v26 = vadd.f32 %v535_v23, %v229_v14  ;;  %v496_v27 = vpop.f32.mrf.mxu0  ;;  %v537_v31 = vpop.f32.mrf.mxu1  ;;  %v261_v14 = vrot.slane %v11642_v48, %v11616_v8 }
 0x14d   :  { %v818_v29 = vsel %vm786_vm1, %v493_v15, %v802_v21  ;;  %vm787_vm3 = vcmp.gt.f32.partialorder %v495_v22, 0.0  ;;  %v803_v30 = vmul.f32 0.2, %v495_v22 }
 0x14e   :  { %v11632_v33 = vpack.c.bf16 %v818_v29, %v818_v29  ;;  %v820_v34 = vsel %vm788_vm2, %v534_v18, %v804_v25  ;;  %vm789_vm4 = vcmp.gt.f32.partialorder %v536_v26, 0.0  ;;  %v805_v35 = vmul.f32 0.2, %v536_v26  ;;  %v497_v36 = vpop.f32.mrf.mxu0  ;;  %v538_v39 = vpop.f32.mrf.mxu1 }
 0x14f   :  { %v11634_v37 = vpack.c.bf16 %v820_v34, %v820_v34  ;;  %v819_v38 = vsel %vm787_vm3, %v495_v22, %v803_v30  ;;  %v265_v29 = vrot.slane %v11642_v48, %v11620_v11  ;;  %v273_v34 = vrot.slane %v11642_v48, %v11624_v17 }
 0x150   :  { %v11637_v41 = vpack.c.bf16 %v819_v38, %v819_v38  ;;  %v821_v42 = vsel %vm789_vm4, %v536_v26, %v805_v35  ;;  %v574_v43 = vpop.f32.mrf.mxu0  ;;  %v615_v47 = vpop.f32.mrf.mxu1 }
 0x151   :  { %v11640_v45 = vpack.c.bf16 %v821_v42, %v821_v42  ;;  %v575_v46 = vadd.f32 %v574_v43, %v233_v20  ;;  %v616_v49 = vadd.f32 %v615_v47, %v241_v32 }
 0x152   :  { %v576_v50 = vpop.f32.mrf.mxu0  ;;  %v617_v53 = vpop.f32.mrf.mxu1 }
 0x153   :  { %vm790_vm5 = vcmp.gt.f32.partialorder %v575_v46, 0.0  ;;  %v806_v51 = vmul.f32 0.2, %v575_v46  ;;  %v577_v52 = vadd.f32 %v576_v50, %v237_v40  ;;  %vm792_vm6 = vcmp.gt.f32.partialorder %v616_v49, 0.0 }
 0x154   :  { %v808_v54 = vmul.f32 0.2, %v616_v49  ;;  %v618_v55 = vadd.f32 %v617_v53, %v245_v44  ;;  %v578_v56 = vpop.f32.mrf.mxu0  ;;  %v619_v60 = vpop.f32.mrf.mxu1  ;;  %v269_v44 = vrot.slane %v11642_v48, %v11627_v24  ;;  %v277_v50 = vrot.slane %v11642_v48, %v11629_v28 }
 0x155   :  { %v822_v58 = vsel %vm790_vm5, %v575_v46, %v806_v51  ;;  %vm791_vm7 = vcmp.gt.f32.partialorder %v577_v52, 0.0  ;;  %v807_v59 = vmul.f32 0.2, %v577_v52 }
 0x156   :  { %v11648_v62 = vpack.c.bf16 %v822_v58, %v822_v58  ;;  %v824_v63 = vsel %vm792_vm6, %v616_v49, %v808_v54  ;;  %vm793_vm8 = vcmp.gt.f32.partialorder %v618_v55, 0.0  ;;  %v809_v1 = vmul.f32 0.2, %v618_v55  ;;  %v579_v2 = vpop.f32.mrf.mxu0  ;;  %v620_v5 = vpop.f32.mrf.mxu1 }
 0x157   :  { %v11650_v0 = vpack.c.bf16 %v824_v63, %v824_v63  ;;  %v823_v3 = vsel %vm791_vm7, %v577_v52, %v807_v59 }
 0x158   :  { %v11654_v10 = vpack.c.bf16 %v823_v3, %v823_v3  ;;  %v825_v12 = vsel %vm793_vm8, %v618_v55, %v809_v1  ;;  %v656_v13 = vpop.f32.mrf.mxu0  ;;  %v697_v18 = vpop.f32.mrf.mxu1 }
 0x159   :  { %v11658_v15 = vpack.c.bf16 %v825_v12, %v825_v12  ;;  %v657_v16 = vadd.f32 %v656_v13, %v249_v57  ;;  %v698_v19 = vadd.f32 %v697_v18, %v257_v61 }
 0x15a   :  { %v658_v20 = vpop.f32.mrf.mxu0  ;;  %v699_v23 = vpop.f32.mrf.mxu1 }
 0x15b   :  { %vm794_vm9 = vcmp.gt.f32.partialorder %v657_v16, 0.0  ;;  %v810_v21 = vmul.f32 0.2, %v657_v16  ;;  %v659_v22 = vadd.f32 %v658_v20, %v253_v9  ;;  %vm796_vm10 = vcmp.gt.f32.partialorder %v698_v19, 0.0 }
 0x15c   :  { %v812_v25 = vmul.f32 0.2, %v698_v19  ;;  %v700_v26 = vadd.f32 %v699_v23, %v261_v14  ;;  %v660_v27 = vpop.f32.mrf.mxu0  ;;  %v701_v32 = vpop.f32.mrf.mxu1 }
 0x15d   :  { %v826_v30 = vsel %vm794_vm9, %v657_v16, %v810_v21  ;;  %vm795_vm11 = vcmp.gt.f32.partialorder %v659_v22, 0.0  ;;  %v811_v31 = vmul.f32 0.2, %v659_v22 }
 0x15e   :  { %v11664_v35 = vpack.c.bf16 %v826_v30, %v826_v30  ;;  %v828_v36 = vsel %vm796_vm10, %v698_v19, %v812_v25  ;;  %vm797_vm12 = vcmp.gt.f32.partialorder %v700_v26, 0.0  ;;  %v813_v38 = vmul.f32 0.2, %v700_v26  ;;  %v661_v39 = vpop.f32.mrf.mxu0  ;;  %v702_v43 = vpop.f32.mrf.mxu1 }
 0x15f   :  { %v11666_v40 = vpack.c.bf16 %v828_v36, %v828_v36  ;;  %v827_v42 = vsel %vm795_vm11, %v659_v22, %v811_v31 }
 0x160   :  { %v11670_v46 = vpack.c.bf16 %v827_v42, %v827_v42  ;;  %v829_v47 = vsel %vm797_vm12, %v700_v26, %v813_v38  ;;  %v738_v49 = vpop.f32.mrf.mxu0  ;;  %v779_v53 = vpop.f32.mrf.mxu1 }
 0x161   :  { %v11674_v51 = vpack.c.bf16 %v829_v47, %v829_v47  ;;  %v739_v52 = vadd.f32 %v738_v49, %v265_v29  ;;  %v780_v54 = vadd.f32 %v779_v53, %v273_v34 }
 0x162   :  { %v740_v55 = vpop.f32.mrf.mxu0  ;;  %v781_v58 = vpop.f32.mrf.mxu1 }
 0x163   :  { %vm798_vm13 = vcmp.gt.f32.partialorder %v739_v52, 0.0  ;;  %v814_v56 = vmul.f32 0.2, %v739_v52  ;;  %v741_v57 = vadd.f32 %v740_v55, %v269_v44  ;;  %vm800_vm14 = vcmp.gt.f32.partialorder %v780_v54, 0.0 }
 0x164   :  { %v816_v59 = vmul.f32 0.2, %v780_v54  ;;  %v782_v60 = vadd.f32 %v781_v58, %v277_v50  ;;  %v742_v61 = vpop.f32.mrf.mxu0  ;;  %v783_v2 = vpop.f32.mrf.mxu1 }
 0x165   :  { %v830_v63 = vsel %vm798_vm13, %v739_v52, %v814_v56  ;;  %vm799_vm15 = vcmp.gt.f32.partialorder %v741_v57, 0.0  ;;  %v815_v1 = vmul.f32 0.2, %v741_v57 }
 0x166   :  { %v11676_v3 = vpack.c.bf16 %v830_v63, %v830_v63  ;;  %v832_v48 = vsel %vm800_vm14, %v780_v54, %v816_v59  ;;  %vm801_vm1 = vcmp.gt.f32.partialorder %v782_v60, 0.0  ;;  %v817_v5 = vmul.f32 0.2, %v782_v60  ;;  %v743_v9 = vpop.f32.mrf.mxu0  ;;  %v784_v14 = vpop.f32.mrf.mxu1 }
 0x167   :  { %v11678_v12 = vpack.c.bf16 %v832_v48, %v832_v48  ;;  %v831_v13 = vsel %vm799_vm15, %v741_v57, %v815_v1 }
 0x168   :  { %v11680_v16 = vpack.c.bf16 %v831_v13, %v831_v13  ;;  %v833_v18 = vsel %vm801_vm1, %v782_v60, %v817_v5 }
 0x169   :  { %v11682_v19 = vpack.c.bf16 %v833_v18, %v833_v18 }
 0x16a   :  { %11454 = dma.done.wait [#allocation3], 131072 }
 0x16b   :  { %11455 = vsyncadd [#allocation3], 4294836224  ;;  %7072 = vmatprep.mubr.bf16.mxu0 %v11637_v41  ;;  %7113 = vmatprep.mubr.bf16.mxu1 %v11640_v45  ;;  %v910_v20 = vld [vmem:[#allocation2 + $0x1c0] sm:$0xff]  ;;  %vm11476_vm12 = vmmov 0   ;;  %vm9554_vm14 = vcmask 523264  }
 0x16c   :  { %v914_v21 = vld [vmem:[#allocation2 + $0x1e0] sm:$0xff] }
 0x16d   :  { %v1038_v22 = vld [vmem:[#allocation2 + $0x5c0] sm:$0xff]  ;;  %v9792_v23 = vcombine.high %v910_v20, %v914_v21  ;;  %v9791_v26 = vcombine.low %v910_v20, %v914_v21 }
 0x16e   :  { %v1042_v25 = vld [vmem:[#allocation2 + $0x5e0] sm:$0xff] }
 0x16f   :  { %v902_v27 = vld [vmem:[#allocation2 + $0x180] sm:$0xff]  ;;  %v9920_v30 = vcombine.high %v1038_v22, %v1042_v25  ;;  %v9919_v31 = vcombine.low %v1038_v22, %v1042_v25  ;;  %7040 = vmatprep.subr.bf16.mxu0 %v9792_v23 }
 0x170   :  { %v906_v29 = vld [vmem:[#allocation2 + $0x1a0] sm:$0xff]  ;;  %7041 = vmatpush1.bf16.msra.mxu0 %v9791_v26 }
 0x171   :  { %v9784_v32 = vcombine.high %v902_v27, %v906_v29  ;;  %v1030_v34 = vld [vmem:[#allocation2 + $0x580] sm:$0xff]  ;;  %7081 = vmatprep.subr.bf16.mxu1 %v9920_v30  ;;  %v9783_v47 = vcombine.low %v902_v27, %v906_v29 }
 0x172   :  { %v1034_v36 = vld [vmem:[#allocation2 + $0x5a0] sm:$0xff]  ;;  %7082 = vmatpush1.bf16.msra.mxu1 %v9919_v31 }
 0x173   :  { %v894_v38 = vld [vmem:[#allocation2 + $0x140] sm:$0xff]  ;;  %v9912_v39 = vcombine.high %v1030_v34, %v1034_v36  ;;  %7042 = vmatprep.subr.bf16.mxu0 %v9784_v32  ;;  %v9911_v49 = vcombine.low %v1030_v34, %v1034_v36 }
 0x174   :  { %v898_v42 = vld [vmem:[#allocation2 + $0x160] sm:$0xff]  ;;  %7043 = vmatpush1.bf16.msra.mxu0 %v9783_v47 }
 0x175   :  { %v1022_v43 = vld [vmem:[#allocation2 + $0x540] sm:$0xff]  ;;  %v9776_v50 = vcombine.high %v894_v38, %v898_v42  ;;  %7083 = vmatprep.subr.bf16.mxu1 %v9912_v39  ;;  %v9775_v57 = vcombine.low %v894_v38, %v898_v42 }
 0x176   :  { %v1026_v44 = vld [vmem:[#allocation2 + $0x560] sm:$0xff]  ;;  %7084 = vmatpush1.bf16.msra.mxu1 %v9911_v49 }
 0x177   :  { %v9904_v52 = vcombine.high %v1022_v43, %v1026_v44  ;;  %v886_v53 = vld [vmem:[#allocation2 + $0x100] sm:$0xff]  ;;  %7044 = vmatprep.subr.bf16.mxu0 %v9776_v50  ;;  %v9903_v58 = vcombine.low %v1022_v43, %v1026_v44 }
 0x178   :  { %v890_v54 = vld [vmem:[#allocation2 + $0x120] sm:$0xff]  ;;  %7045 = vmatpush1.bf16.msra.mxu0 %v9775_v57 }
 0x179   :  { %v1014_v55 = vld [vmem:[#allocation2 + $0x500] sm:$0xff]  ;;  %v9768_v59 = vcombine.high %v886_v53, %v890_v54  ;;  %7085 = vmatprep.subr.bf16.mxu1 %v9904_v52  ;;  %v9767_v48 = vcombine.low %v886_v53, %v890_v54 }
 0x17a   :  { %v1018_v56 = vld [vmem:[#allocation2 + $0x520] sm:$0xff]  ;;  %7086 = vmatpush1.bf16.msra.mxu1 %v9903_v58 }
 0x17b   :  { %v9896_v60 = vcombine.high %v1014_v55, %v1018_v56  ;;  %v878_v61 = vld [vmem:[#allocation2 + $0xc0] sm:$0xff]  ;;  %7046 = vmatprep.subr.bf16.mxu0 %v9768_v59  ;;  %v9895_v5 = vcombine.low %v1014_v55, %v1018_v56 }
 0x17c   :  { %v882_v63 = vld [vmem:[#allocation2 + $0xe0] sm:$0xff]  ;;  %7047 = vmatpush1.bf16.msra.mxu0 %v9767_v48 }
 0x17d   :  { %v1006_v1 = vld [vmem:[#allocation2 + $0x4c0] sm:$0xff]  ;;  %v9760_v9 = vcombine.high %v878_v61, %v882_v63  ;;  %7087 = vmatprep.subr.bf16.mxu1 %v9896_v60  ;;  %v9759_v22 = vcombine.low %v878_v61, %v882_v63 }
 0x17e   :  { %v1010_v2 = vld [vmem:[#allocation2 + $0x4e0] sm:$0xff]  ;;  %7088 = vmatpush1.bf16.msra.mxu1 %v9895_v5 }
 0x17f   :  { %v9888_v13 = vcombine.high %v1006_v1, %v1010_v2  ;;  %v870_v14 = vld [vmem:[#allocation2 + $0x80] sm:$0xff]  ;;  %7048 = vmatprep.subr.bf16.mxu0 %v9760_v9  ;;  %v9887_v23 = vcombine.low %v1006_v1, %v1010_v2 }
 0x180   :  { %v874_v18 = vld [vmem:[#allocation2 + $0xa0] sm:$0xff]  ;;  %7049 = vmatpush1.bf16.msra.mxu0 %v9759_v22 }
 0x181   :  { %v998_v20 = vld [vmem:[#allocation2 + $0x480] sm:$0xff]  ;;  %v9752_v25 = vcombine.high %v870_v14, %v874_v18  ;;  %7089 = vmatprep.subr.bf16.mxu1 %v9888_v13  ;;  %v9751_v32 = vcombine.low %v870_v14, %v874_v18 }
 0x182   :  { %v1002_v21 = vld [vmem:[#allocation2 + $0x4a0] sm:$0xff]  ;;  %7090 = vmatpush1.bf16.msra.mxu1 %v9887_v23 }
 0x183   :  { %v9880_v26 = vcombine.high %v998_v20, %v1002_v21  ;;  %v862_v27 = vld [vmem:[#allocation2 + $0x40] sm:$0xff]  ;;  %7050 = vmatprep.subr.bf16.mxu0 %v9752_v25  ;;  %v9879_v34 = vcombine.low %v998_v20, %v1002_v21 }
 0x184   :  { %v866_v29 = vld [vmem:[#allocation2 + $0x60] sm:$0xff]  ;;  %7051 = vmatpush1.bf16.msra.mxu0 %v9751_v32 }
 0x185   :  { %v990_v30 = vld [vmem:[#allocation2 + $0x440] sm:$0xff]  ;;  %v9744_v36 = vcombine.high %v862_v27, %v866_v29  ;;  %7091 = vmatprep.subr.bf16.mxu1 %v9880_v26  ;;  %v9743_v47 = vcombine.low %v862_v27, %v866_v29 }
 0x186   :  { %v994_v31 = vld [vmem:[#allocation2 + $0x460] sm:$0xff]  ;;  %7092 = vmatpush1.bf16.msra.mxu1 %v9879_v34 }
 0x187   :  { %v9872_v38 = vcombine.high %v990_v30, %v994_v31  ;;  %v854_v39 = vld [vmem:[#allocation2] sm:$0xff]  ;;  %7052 = vmatprep.subr.bf16.mxu0 %v9744_v36  ;;  %v9871_v49 = vcombine.low %v990_v30, %v994_v31 }
 0x188   :  { %v858_v42 = vld [vmem:[#allocation2 + $0x20] sm:$0xff]  ;;  %7053 = vmatpush1.bf16.msra.mxu0 %v9743_v47 }
 0x189   :  { %v982_v43 = vld [vmem:[#allocation2 + $0x400] sm:$0xff]  ;;  %v9736_v50 = vcombine.high %v854_v39, %v858_v42  ;;  %7093 = vmatprep.subr.bf16.mxu1 %v9872_v38  ;;  %v9735_v57 = vcombine.low %v854_v39, %v858_v42 }
 0x18a   :  { %v986_v44 = vld [vmem:[#allocation2 + $0x420] sm:$0xff]  ;;  %7094 = vmatpush1.bf16.msra.mxu1 %v9871_v49 }
 0x18b   :  { %v9864_v52 = vcombine.high %v982_v43, %v986_v44  ;;  %v974_v53 = vld [vmem:[#allocation2 + $0x3c0] sm:$0xff]  ;;  %7054 = vmatprep.subr.bf16.mxu0 %v9736_v50  ;;  %v9863_v58 = vcombine.low %v982_v43, %v986_v44 }
 0x18c   :  { %v978_v54 = vld [vmem:[#allocation2 + $0x3e0] sm:$0xff]  ;;  %7055 = vmatpush1.bf16.msra.mxu0 %v9735_v57 }
 0x18d   :  { %v1102_v55 = vld [vmem:[#allocation2 + $0x7c0] sm:$0xff]  ;;  %v9856_v59 = vcombine.high %v974_v53, %v978_v54  ;;  %7095 = vmatprep.subr.bf16.mxu1 %v9864_v52  ;;  %v9855_v48 = vcombine.low %v974_v53, %v978_v54 }
 0x18e   :  { %v1106_v56 = vld [vmem:[#allocation2 + $0x7e0] sm:$0xff]  ;;  %7096 = vmatpush1.bf16.msra.mxu1 %v9863_v58 }
 0x18f   :  { %v9984_v60 = vcombine.high %v1102_v55, %v1106_v56  ;;  %v966_v61 = vld [vmem:[#allocation2 + $0x380] sm:$0xff]  ;;  %7056 = vmatprep.subr.bf16.mxu0 %v9856_v59  ;;  %v9983_v5 = vcombine.low %v1102_v55, %v1106_v56 }
 0x190   :  { %v970_v63 = vld [vmem:[#allocation2 + $0x3a0] sm:$0xff]  ;;  %7057 = vmatpush2.bf16.msra.mxu0 %v9855_v48 }
 0x191   :  { %v1094_v1 = vld [vmem:[#allocation2 + $0x780] sm:$0xff]  ;;  %v9848_v9 = vcombine.high %v966_v61, %v970_v63  ;;  %7097 = vmatprep.subr.bf16.mxu1 %v9984_v60  ;;  %v9847_v22 = vcombine.low %v966_v61, %v970_v63 }
 0x192   :  { %v1098_v2 = vld [vmem:[#allocation2 + $0x7a0] sm:$0xff]  ;;  %7098 = vmatpush2.bf16.msra.mxu1 %v9983_v5 }
 0x193   :  { %v9976_v13 = vcombine.high %v1094_v1, %v1098_v2  ;;  %v958_v14 = vld [vmem:[#allocation2 + $0x340] sm:$0xff]  ;;  %7058 = vmatprep.subr.bf16.mxu0 %v9848_v9  ;;  %v9975_v23 = vcombine.low %v1094_v1, %v1098_v2 }
 0x194   :  { %v962_v18 = vld [vmem:[#allocation2 + $0x360] sm:$0xff]  ;;  %7059 = vmatpush2.bf16.msra.mxu0 %v9847_v22 }
 0x195   :  { %v1086_v20 = vld [vmem:[#allocation2 + $0x740] sm:$0xff]  ;;  %v9840_v25 = vcombine.high %v958_v14, %v962_v18  ;;  %7099 = vmatprep.subr.bf16.mxu1 %v9976_v13  ;;  %v9839_v32 = vcombine.low %v958_v14, %v962_v18 }
 0x196   :  { %v1090_v21 = vld [vmem:[#allocation2 + $0x760] sm:$0xff]  ;;  %7100 = vmatpush2.bf16.msra.mxu1 %v9975_v23 }
 0x197   :  { %v9968_v26 = vcombine.high %v1086_v20, %v1090_v21  ;;  %v950_v27 = vld [vmem:[#allocation2 + $0x300] sm:$0xff]  ;;  %7060 = vmatprep.subr.bf16.mxu0 %v9840_v25  ;;  %v9967_v34 = vcombine.low %v1086_v20, %v1090_v21 }
 0x198   :  { %v954_v29 = vld [vmem:[#allocation2 + $0x320] sm:$0xff]  ;;  %7061 = vmatpush2.bf16.msra.mxu0 %v9839_v32 }
 0x199   :  { %v1078_v30 = vld [vmem:[#allocation2 + $0x700] sm:$0xff]  ;;  %v9832_v36 = vcombine.high %v950_v27, %v954_v29  ;;  %7101 = vmatprep.subr.bf16.mxu1 %v9968_v26  ;;  %v9831_v47 = vcombine.low %v950_v27, %v954_v29 }
 0x19a   :  { %v1082_v31 = vld [vmem:[#allocation2 + $0x720] sm:$0xff]  ;;  %7102 = vmatpush2.bf16.msra.mxu1 %v9967_v34 }
 0x19b   :  { %v9960_v38 = vcombine.high %v1078_v30, %v1082_v31  ;;  %v942_v39 = vld [vmem:[#allocation2 + $0x2c0] sm:$0xff]  ;;  %7062 = vmatprep.subr.bf16.mxu0 %v9832_v36  ;;  %v9959_v49 = vcombine.low %v1078_v30, %v1082_v31 }
 0x19c   :  { %v946_v42 = vld [vmem:[#allocation2 + $0x2e0] sm:$0xff]  ;;  %7063 = vmatpush2.bf16.msra.mxu0 %v9831_v47 }
 0x19d   :  { %v1070_v43 = vld [vmem:[#allocation2 + $0x6c0] sm:$0xff]  ;;  %v9824_v50 = vcombine.high %v942_v39, %v946_v42  ;;  %7103 = vmatprep.subr.bf16.mxu1 %v9960_v38  ;;  %v9823_v57 = vcombine.low %v942_v39, %v946_v42 }
 0x19e   :  { %v1074_v44 = vld [vmem:[#allocation2 + $0x6e0] sm:$0xff]  ;;  %7104 = vmatpush2.bf16.msra.mxu1 %v9959_v49 }
 0x19f   :  { %v9952_v52 = vcombine.high %v1070_v43, %v1074_v44  ;;  %v934_v53 = vld [vmem:[#allocation2 + $0x280] sm:$0xff]  ;;  %7064 = vmatprep.subr.bf16.mxu0 %v9824_v50  ;;  %v9951_v58 = vcombine.low %v1070_v43, %v1074_v44 }
 0x1a0   :  { %v938_v54 = vld [vmem:[#allocation2 + $0x2a0] sm:$0xff]  ;;  %7065 = vmatpush2.bf16.msra.mxu0 %v9823_v57 }
 0x1a1   :  { %v1062_v55 = vld [vmem:[#allocation2 + $0x680] sm:$0xff]  ;;  %v9816_v59 = vcombine.high %v934_v53, %v938_v54  ;;  %7105 = vmatprep.subr.bf16.mxu1 %v9952_v52  ;;  %v9815_v48 = vcombine.low %v934_v53, %v938_v54 }
 0x1a2   :  { %v1066_v56 = vld [vmem:[#allocation2 + $0x6a0] sm:$0xff]  ;;  %7106 = vmatpush2.bf16.msra.mxu1 %v9951_v58 }
 0x1a3   :  { %v9944_v60 = vcombine.high %v1062_v55, %v1066_v56  ;;  %v926_v61 = vld [vmem:[#allocation2 + $0x240] sm:$0xff]  ;;  %7066 = vmatprep.subr.bf16.mxu0 %v9816_v59  ;;  %v9943_v5 = vcombine.low %v1062_v55, %v1066_v56 }
 0x1a4   :  { %v930_v63 = vld [vmem:[#allocation2 + $0x260] sm:$0xff]  ;;  %7067 = vmatpush2.bf16.msra.mxu0 %v9815_v48 }
 0x1a5   :  { %v1054_v1 = vld [vmem:[#allocation2 + $0x640] sm:$0xff]  ;;  %v9808_v9 = vcombine.high %v926_v61, %v930_v63  ;;  %7107 = vmatprep.subr.bf16.mxu1 %v9944_v60  ;;  %v9807_v22 = vcombine.low %v926_v61, %v930_v63 }
 0x1a6   :  { %v1058_v2 = vld [vmem:[#allocation2 + $0x660] sm:$0xff]  ;;  %7108 = vmatpush2.bf16.msra.mxu1 %v9943_v5 }
 0x1a7   :  { %v9936_v13 = vcombine.high %v1054_v1, %v1058_v2  ;;  %v918_v14 = vld [vmem:[#allocation2 + $0x200] sm:$0xff]  ;;  %7068 = vmatprep.subr.bf16.mxu0 %v9808_v9  ;;  %v9935_v23 = vcombine.low %v1054_v1, %v1058_v2 }
 0x1a8   :  { %v922_v18 = vld [vmem:[#allocation2 + $0x220] sm:$0xff]  ;;  %7069 = vmatpush2.bf16.msra.mxu0 %v9807_v22 }
 0x1a9   :  { %v1046_v20 = vld [vmem:[#allocation2 + $0x600] sm:$0xff]  ;;  %v9800_v25 = vcombine.high %v918_v14, %v922_v18  ;;  %7109 = vmatprep.subr.bf16.mxu1 %v9936_v13  ;;  %v9799_v32 = vcombine.low %v918_v14, %v922_v18 }
 0x1aa   :  { %v1050_v21 = vld [vmem:[#allocation2 + $0x620] sm:$0xff]  ;;  %7110 = vmatpush2.bf16.msra.mxu1 %v9935_v23 }
 0x1ab   :  { %v9928_v26 = vcombine.high %v1046_v20, %v1050_v21  ;;  %v1166_v27 = vld [vmem:[#allocation2 + $0x9c0] sm:$0xff]  ;;  %7070 = vmatprep.subr.bf16.mxu0 %v9800_v25  ;;  %v9927_v34 = vcombine.low %v1046_v20, %v1050_v21 }
 0x1ac   :  { %v1170_v29 = vld [vmem:[#allocation2 + $0x9e0] sm:$0xff]  ;;  %7071 = vmatpush2.bf16.msra.mxu0 %v9799_v32 }
 0x1ad   :  { %v1294_v30 = vld [vmem:[#allocation2 + $0xdc0] sm:$0xff]  ;;  %v10048_v36 = vcombine.high %v1166_v27, %v1170_v29  ;;  %7111 = vmatprep.subr.bf16.mxu1 %v9928_v26  ;;  %v10047_v47 = vcombine.low %v1166_v27, %v1170_v29 }
 0x1ae   :  { %v1298_v31 = vld [vmem:[#allocation2 + $0xde0] sm:$0xff]  ;;  %7112 = vmatpush2.bf16.msra.mxu1 %v9927_v34 }
 0x1af   :  { %v10176_v38 = vcombine.high %v1294_v30, %v1298_v31  ;;  %v1158_v39 = vld [vmem:[#allocation2 + $0x980] sm:$0xff]  ;;  %7122 = vmatprep.subr.bf16.mxu0 %v10048_v36  ;;  %v10175_v49 = vcombine.low %v1294_v30, %v1298_v31  ;;  %7073 = vmatmul.mubr.bf16.vlgmr.msra.gmra.mxu0 %v11632_v33 }
 0x1b0   :  { %v1162_v42 = vld [vmem:[#allocation2 + $0x9a0] sm:$0xff]  ;;  %7123 = vmatpush1.bf16.msra.mxu0 %v10047_v47  ;;  %7154 = vmatprep.mubr.bf16.mxu0 %v11654_v10 }
 0x1b1   :  { %v1286_v43 = vld [vmem:[#allocation2 + $0xd80] sm:$0xff]  ;;  %v10040_v50 = vcombine.high %v1158_v39, %v1162_v42  ;;  %7163 = vmatprep.subr.bf16.mxu1 %v10176_v38  ;;  %7114 = vmatmul.mubr.bf16.vlgmr.msra.gmra.mxu1 %v11634_v37  ;;  %v10039_v57 = vcombine.low %v1158_v39, %v1162_v42 }
 0x1b2   :  { %v1290_v44 = vld [vmem:[#allocation2 + $0xda0] sm:$0xff]  ;;  %7164 = vmatpush1.bf16.msra.mxu1 %v10175_v49  ;;  %7195 = vmatprep.mubr.bf16.mxu1 %v11658_v15 }
 0x1b3   :  { %v1150_v52 = vld [vmem:[#allocation2 + $0x940] sm:$0xff]  ;;  %v10168_v55 = vcombine.high %v1286_v43, %v1290_v44  ;;  %7124 = vmatprep.subr.bf16.mxu0 %v10040_v50  ;;  %v10167_v58 = vcombine.low %v1286_v43, %v1290_v44 }
 0x1b4   :  { %v1154_v53 = vld [vmem:[#allocation2 + $0x960] sm:$0xff]  ;;  %7125 = vmatpush1.bf16.msra.mxu0 %v10039_v57 }
 0x1b5   :  { %v1278_v54 = vld [vmem:[#allocation2 + $0xd40] sm:$0xff]  ;;  %v10032_v59 = vcombine.high %v1150_v52, %v1154_v53  ;;  %7165 = vmatprep.subr.bf16.mxu1 %v10168_v55  ;;  %v10031_v48 = vcombine.low %v1150_v52, %v1154_v53 }
 0x1b6   :  { %v1282_v56 = vld [vmem:[#allocation2 + $0xd60] sm:$0xff]  ;;  %7166 = vmatpush1.bf16.msra.mxu1 %v10167_v58 }
 0x1b7   :  { %v1142_v60 = vld [vmem:[#allocation2 + $0x900] sm:$0xff]  ;;  %v10160_v1 = vcombine.high %v1278_v54, %v1282_v56  ;;  %7126 = vmatprep.subr.bf16.mxu0 %v10032_v59  ;;  %v10159_v5 = vcombine.low %v1278_v54, %v1282_v56 }
 0x1b8   :  { %v1146_v61 = vld [vmem:[#allocation2 + $0x920] sm:$0xff]  ;;  %7127 = vmatpush1.bf16.msra.mxu0 %v10031_v48 }
 0x1b9   :  { %v1270_v63 = vld [vmem:[#allocation2 + $0xd00] sm:$0xff]  ;;  %v10024_v9 = vcombine.high %v1142_v60, %v1146_v61  ;;  %7167 = vmatprep.subr.bf16.mxu1 %v10160_v1  ;;  %v10023_v22 = vcombine.low %v1142_v60, %v1146_v61 }
 0x1ba   :  { %v1274_v2 = vld [vmem:[#allocation2 + $0xd20] sm:$0xff]  ;;  %7168 = vmatpush1.bf16.msra.mxu1 %v10159_v5 }
 0x1bb   :  { %v1134_v13 = vld [vmem:[#allocation2 + $0x8c0] sm:$0xff]  ;;  %v10152_v20 = vcombine.high %v1270_v63, %v1274_v2  ;;  %7128 = vmatprep.subr.bf16.mxu0 %v10024_v9  ;;  %v10151_v23 = vcombine.low %v1270_v63, %v1274_v2 }
 0x1bc   :  { %v1138_v14 = vld [vmem:[#allocation2 + $0x8e0] sm:$0xff]  ;;  %7129 = vmatpush1.bf16.msra.mxu0 %v10023_v22 }
 0x1bd   :  { %v1262_v18 = vld [vmem:[#allocation2 + $0xcc0] sm:$0xff]  ;;  %v10016_v25 = vcombine.high %v1134_v13, %v1138_v14  ;;  %7169 = vmatprep.subr.bf16.mxu1 %v10152_v20  ;;  %v10015_v32 = vcombine.low %v1134_v13, %v1138_v14 }
 0x1be   :  { %v1266_v21 = vld [vmem:[#allocation2 + $0xce0] sm:$0xff]  ;;  %7170 = vmatpush1.bf16.msra.mxu1 %v10151_v23 }
 0x1bf   :  { %v1126_v26 = vld [vmem:[#allocation2 + $0x880] sm:$0xff]  ;;  %v10144_v30 = vcombine.high %v1262_v18, %v1266_v21  ;;  %7130 = vmatprep.subr.bf16.mxu0 %v10016_v25  ;;  %v10143_v34 = vcombine.low %v1262_v18, %v1266_v21 }
 0x1c0   :  { %v1130_v27 = vld [vmem:[#allocation2 + $0x8a0] sm:$0xff]  ;;  %7131 = vmatpush1.bf16.msra.mxu0 %v10015_v32 }
 0x1c1   :  { %v1254_v29 = vld [vmem:[#allocation2 + $0xc80] sm:$0xff]  ;;  %v10008_v36 = vcombine.high %v1126_v26, %v1130_v27  ;;  %7171 = vmatprep.subr.bf16.mxu1 %v10144_v30  ;;  %v10007_v47 = vcombine.low %v1126_v26, %v1130_v27 }
 0x1c2   :  { %v1258_v31 = vld [vmem:[#allocation2 + $0xca0] sm:$0xff]  ;;  %7172 = vmatpush1.bf16.msra.mxu1 %v10143_v34 }
 0x1c3   :  { %v1118_v38 = vld [vmem:[#allocation2 + $0x840] sm:$0xff]  ;;  %v10136_v43 = vcombine.high %v1254_v29, %v1258_v31  ;;  %7132 = vmatprep.subr.bf16.mxu0 %v10008_v36  ;;  %v10135_v49 = vcombine.low %v1254_v29, %v1258_v31 }
 0x1c4   :  { %v1122_v39 = vld [vmem:[#allocation2 + $0x860] sm:$0xff]  ;;  %7133 = vmatpush1.bf16.msra.mxu0 %v10007_v47 }
 0x1c5   :  { %v1246_v42 = vld [vmem:[#allocation2 + $0xc40] sm:$0xff]  ;;  %v10000_v50 = vcombine.high %v1118_v38, %v1122_v39  ;;  %7173 = vmatprep.subr.bf16.mxu1 %v10136_v43  ;;  %v9999_v57 = vcombine.low %v1118_v38, %v1122_v39 }
 0x1c6   :  { %v1250_v44 = vld [vmem:[#allocation2 + $0xc60] sm:$0xff]  ;;  %7174 = vmatpush1.bf16.msra.mxu1 %v10135_v49 }
 0x1c7   :  { %v1110_v52 = vld [vmem:[#allocation2 + $0x800] sm:$0xff]  ;;  %v10128_v55 = vcombine.high %v1246_v42, %v1250_v44  ;;  %7134 = vmatprep.subr.bf16.mxu0 %v10000_v50  ;;  %v10127_v58 = vcombine.low %v1246_v42, %v1250_v44 }
 0x1c8   :  { %v1114_v53 = vld [vmem:[#allocation2 + $0x820] sm:$0xff]  ;;  %7135 = vmatpush1.bf16.msra.mxu0 %v9999_v57 }
 0x1c9   :  { %v1238_v54 = vld [vmem:[#allocation2 + $0xc00] sm:$0xff]  ;;  %v9992_v59 = vcombine.high %v1110_v52, %v1114_v53  ;;  %7175 = vmatprep.subr.bf16.mxu1 %v10128_v55  ;;  %v9991_v48 = vcombine.low %v1110_v52, %v1114_v53 }
 0x1ca   :  { %v1242_v56 = vld [vmem:[#allocation2 + $0xc20] sm:$0xff]  ;;  %7176 = vmatpush1.bf16.msra.mxu1 %v10127_v58 }
 0x1cb   :  { %v1230_v60 = vld [vmem:[#allocation2 + $0xbc0] sm:$0xff]  ;;  %v10120_v1 = vcombine.high %v1238_v54, %v1242_v56  ;;  %7136 = vmatprep.subr.bf16.mxu0 %v9992_v59  ;;  %v10119_v5 = vcombine.low %v1238_v54, %v1242_v56 }
 0x1cc   :  { %v1234_v61 = vld [vmem:[#allocation2 + $0xbe0] sm:$0xff]  ;;  %7137 = vmatpush1.bf16.msra.mxu0 %v9991_v48 }
 0x1cd   :  { %v1358_v63 = vld [vmem:[#allocation2 + $0xfc0] sm:$0xff]  ;;  %v10112_v9 = vcombine.high %v1230_v60, %v1234_v61  ;;  %7177 = vmatprep.subr.bf16.mxu1 %v10120_v1  ;;  %v10111_v22 = vcombine.low %v1230_v60, %v1234_v61 }
 0x1ce   :  { %v1362_v2 = vld [vmem:[#allocation2 + $0xfe0] sm:$0xff]  ;;  %7178 = vmatpush1.bf16.msra.mxu1 %v10119_v5 }
 0x1cf   :  { %v1222_v13 = vld [vmem:[#allocation2 + $0xb80] sm:$0xff]  ;;  %v10240_v20 = vcombine.high %v1358_v63, %v1362_v2  ;;  %7138 = vmatprep.subr.bf16.mxu0 %v10112_v9  ;;  %v10239_v23 = vcombine.low %v1358_v63, %v1362_v2 }
 0x1d0   :  { %v1226_v14 = vld [vmem:[#allocation2 + $0xba0] sm:$0xff]  ;;  %7139 = vmatpush2.bf16.msra.mxu0 %v10111_v22 }
 0x1d1   :  { %v1350_v18 = vld [vmem:[#allocation2 + $0xf80] sm:$0xff]  ;;  %v10104_v25 = vcombine.high %v1222_v13, %v1226_v14  ;;  %7179 = vmatprep.subr.bf16.mxu1 %v10240_v20  ;;  %v10103_v32 = vcombine.low %v1222_v13, %v1226_v14 }
 0x1d2   :  { %v1354_v21 = vld [vmem:[#allocation2 + $0xfa0] sm:$0xff]  ;;  %7180 = vmatpush2.bf16.msra.mxu1 %v10239_v23 }
 0x1d3   :  { %v1214_v26 = vld [vmem:[#allocation2 + $0xb40] sm:$0xff]  ;;  %v10232_v30 = vcombine.high %v1350_v18, %v1354_v21  ;;  %7140 = vmatprep.subr.bf16.mxu0 %v10104_v25  ;;  %v10231_v34 = vcombine.low %v1350_v18, %v1354_v21 }
 0x1d4   :  { %v1218_v27 = vld [vmem:[#allocation2 + $0xb60] sm:$0xff]  ;;  %7141 = vmatpush2.bf16.msra.mxu0 %v10103_v32 }
 0x1d5   :  { %v1342_v29 = vld [vmem:[#allocation2 + $0xf40] sm:$0xff]  ;;  %v10096_v36 = vcombine.high %v1214_v26, %v1218_v27  ;;  %7181 = vmatprep.subr.bf16.mxu1 %v10232_v30  ;;  %v10095_v47 = vcombine.low %v1214_v26, %v1218_v27 }
 0x1d6   :  { %v1346_v31 = vld [vmem:[#allocation2 + $0xf60] sm:$0xff]  ;;  %7182 = vmatpush2.bf16.msra.mxu1 %v10231_v34 }
 0x1d7   :  { %v1206_v38 = vld [vmem:[#allocation2 + $0xb00] sm:$0xff]  ;;  %v10224_v43 = vcombine.high %v1342_v29, %v1346_v31  ;;  %7142 = vmatprep.subr.bf16.mxu0 %v10096_v36  ;;  %v10223_v49 = vcombine.low %v1342_v29, %v1346_v31 }
 0x1d8   :  { %v1210_v39 = vld [vmem:[#allocation2 + $0xb20] sm:$0xff]  ;;  %7143 = vmatpush2.bf16.msra.mxu0 %v10095_v47 }
 0x1d9   :  { %v1334_v42 = vld [vmem:[#allocation2 + $0xf00] sm:$0xff]  ;;  %v10088_v50 = vcombine.high %v1206_v38, %v1210_v39  ;;  %7183 = vmatprep.subr.bf16.mxu1 %v10224_v43  ;;  %v10087_v57 = vcombine.low %v1206_v38, %v1210_v39 }
 0x1da   :  { %v1338_v44 = vld [vmem:[#allocation2 + $0xf20] sm:$0xff]  ;;  %7184 = vmatpush2.bf16.msra.mxu1 %v10223_v49 }
 0x1db   :  { %v1198_v52 = vld [vmem:[#allocation2 + $0xac0] sm:$0xff]  ;;  %v10216_v55 = vcombine.high %v1334_v42, %v1338_v44  ;;  %7144 = vmatprep.subr.bf16.mxu0 %v10088_v50  ;;  %v10215_v58 = vcombine.low %v1334_v42, %v1338_v44 }
 0x1dc   :  { %v1202_v53 = vld [vmem:[#allocation2 + $0xae0] sm:$0xff]  ;;  %7145 = vmatpush2.bf16.msra.mxu0 %v10087_v57 }
 0x1dd   :  { %v1326_v54 = vld [vmem:[#allocation2 + $0xec0] sm:$0xff]  ;;  %v10080_v59 = vcombine.high %v1198_v52, %v1202_v53  ;;  %7185 = vmatprep.subr.bf16.mxu1 %v10216_v55  ;;  %v10079_v48 = vcombine.low %v1198_v52, %v1202_v53 }
 0x1de   :  { %v1330_v56 = vld [vmem:[#allocation2 + $0xee0] sm:$0xff]  ;;  %7186 = vmatpush2.bf16.msra.mxu1 %v10215_v58 }
 0x1df   :  { %v1190_v60 = vld [vmem:[#allocation2 + $0xa80] sm:$0xff]  ;;  %v10208_v1 = vcombine.high %v1326_v54, %v1330_v56  ;;  %7146 = vmatprep.subr.bf16.mxu0 %v10080_v59  ;;  %v10207_v5 = vcombine.low %v1326_v54, %v1330_v56 }
 0x1e0   :  { %v1194_v61 = vld [vmem:[#allocation2 + $0xaa0] sm:$0xff]  ;;  %7147 = vmatpush2.bf16.msra.mxu0 %v10079_v48 }
 0x1e1   :  { %v1318_v63 = vld [vmem:[#allocation2 + $0xe80] sm:$0xff]  ;;  %v10072_v9 = vcombine.high %v1190_v60, %v1194_v61  ;;  %7187 = vmatprep.subr.bf16.mxu1 %v10208_v1  ;;  %v10071_v22 = vcombine.low %v1190_v60, %v1194_v61 }
 0x1e2   :  { %v1322_v2 = vld [vmem:[#allocation2 + $0xea0] sm:$0xff]  ;;  %7188 = vmatpush2.bf16.msra.mxu1 %v10207_v5 }
 0x1e3   :  { %v1182_v13 = vld [vmem:[#allocation2 + $0xa40] sm:$0xff]  ;;  %v10200_v20 = vcombine.high %v1318_v63, %v1322_v2  ;;  %7148 = vmatprep.subr.bf16.mxu0 %v10072_v9  ;;  %v10199_v23 = vcombine.low %v1318_v63, %v1322_v2 }
 0x1e4   :  { %v1186_v14 = vld [vmem:[#allocation2 + $0xa60] sm:$0xff]  ;;  %7149 = vmatpush2.bf16.msra.mxu0 %v10071_v22 }
 0x1e5   :  { %v1310_v18 = vld [vmem:[#allocation2 + $0xe40] sm:$0xff]  ;;  %v10064_v25 = vcombine.high %v1182_v13, %v1186_v14  ;;  %7189 = vmatprep.subr.bf16.mxu1 %v10200_v20  ;;  %v10063_v32 = vcombine.low %v1182_v13, %v1186_v14 }
 0x1e6   :  { %v1314_v21 = vld [vmem:[#allocation2 + $0xe60] sm:$0xff]  ;;  %7190 = vmatpush2.bf16.msra.mxu1 %v10199_v23 }
 0x1e7   :  { %v1174_v26 = vld [vmem:[#allocation2 + $0xa00] sm:$0xff]  ;;  %v10192_v30 = vcombine.high %v1310_v18, %v1314_v21  ;;  %7150 = vmatprep.subr.bf16.mxu0 %v10064_v25  ;;  %v10191_v34 = vcombine.low %v1310_v18, %v1314_v21 }
 0x1e8   :  { %v1178_v27 = vld [vmem:[#allocation2 + $0xa20] sm:$0xff]  ;;  %7151 = vmatpush2.bf16.msra.mxu0 %v10063_v32 }
 0x1e9   :  { %v1302_v29 = vld [vmem:[#allocation2 + $0xe00] sm:$0xff]  ;;  %v10056_v36 = vcombine.high %v1174_v26, %v1178_v27  ;;  %7191 = vmatprep.subr.bf16.mxu1 %v10192_v30  ;;  %v10055_v47 = vcombine.low %v1174_v26, %v1178_v27 }
 0x1ea   :  { %v1306_v31 = vld [vmem:[#allocation2 + $0xe20] sm:$0xff]  ;;  %7192 = vmatpush2.bf16.msra.mxu1 %v10191_v34 }
 0x1eb   :  { %v1422_v38 = vld [vmem:[#allocation2 + $0x11c0] sm:$0xff]  ;;  %v10184_v43 = vcombine.high %v1302_v29, %v1306_v31  ;;  %7152 = vmatprep.subr.bf16.mxu0 %v10056_v36  ;;  %v10183_v49 = vcombine.low %v1302_v29, %v1306_v31 }
 0x1ec   :  { %v1426_v39 = vld [vmem:[#allocation2 + $0x11e0] sm:$0xff]  ;;  %7153 = vmatpush2.bf16.msra.mxu0 %v10055_v47 }
 0x1ed   :  { %v1550_v42 = vld [vmem:[#allocation2 + $0x15c0] sm:$0xff]  ;;  %v10304_v50 = vcombine.high %v1422_v38, %v1426_v39  ;;  %7193 = vmatprep.subr.bf16.mxu1 %v10184_v43  ;;  %v10303_v57 = vcombine.low %v1422_v38, %v1426_v39 }
 0x1ee   :  { %v1554_v44 = vld [vmem:[#allocation2 + $0x15e0] sm:$0xff]  ;;  %7194 = vmatpush2.bf16.msra.mxu1 %v10183_v49 }
 0x1ef   :  { %v1414_v52 = vld [vmem:[#allocation2 + $0x1180] sm:$0xff]  ;;  %v10432_v55 = vcombine.high %v1550_v42, %v1554_v44  ;;  %7204 = vmatprep.subr.bf16.mxu0 %v10304_v50  ;;  %v10431_v58 = vcombine.low %v1550_v42, %v1554_v44  ;;  %7155 = vmatmul.mubr.bf16.vlgmr.msra.gmra.mxu0 %v11648_v62 }
 0x1f0   :  { %v1418_v53 = vld [vmem:[#allocation2 + $0x11a0] sm:$0xff]  ;;  %7205 = vmatpush1.bf16.msra.mxu0 %v10303_v57  ;;  %7236 = vmatprep.mubr.bf16.mxu0 %v11670_v46 }
 0x1f1   :  { %v1542_v54 = vld [vmem:[#allocation2 + $0x1580] sm:$0xff]  ;;  %v10296_v59 = vcombine.high %v1414_v52, %v1418_v53  ;;  %7245 = vmatprep.subr.bf16.mxu1 %v10432_v55  ;;  %7196 = vmatmul.mubr.bf16.vlgmr.msra.gmra.mxu1 %v11650_v0  ;;  %v10295_v48 = vcombine.low %v1414_v52, %v1418_v53 }
 0x1f2   :  { %v1546_v56 = vld [vmem:[#allocation2 + $0x15a0] sm:$0xff]  ;;  %7246 = vmatpush1.bf16.msra.mxu1 %v10431_v58  ;;  %7277 = vmatprep.mubr.bf16.mxu1 %v11674_v51 }
 0x1f3   :  { %v1406_v60 = vld [vmem:[#allocation2 + $0x1140] sm:$0xff]  ;;  %v10424_v63 = vcombine.high %v1542_v54, %v1546_v56  ;;  %7206 = vmatprep.subr.bf16.mxu0 %v10296_v59  ;;  %v10423_v5 = vcombine.low %v1542_v54, %v1546_v56 }
 0x1f4   :  { %v1410_v61 = vld [vmem:[#allocation2 + $0x1160] sm:$0xff]  ;;  %7207 = vmatpush1.bf16.msra.mxu0 %v10295_v48 }
 0x1f5   :  { %v1534_v1 = vld [vmem:[#allocation2 + $0x1540] sm:$0xff]  ;;  %v10288_v9 = vcombine.high %v1406_v60, %v1410_v61  ;;  %7247 = vmatprep.subr.bf16.mxu1 %v10424_v63  ;;  %v10287_v22 = vcombine.low %v1406_v60, %v1410_v61 }
 0x1f6   :  { %v1538_v2 = vld [vmem:[#allocation2 + $0x1560] sm:$0xff]  ;;  %7248 = vmatpush1.bf16.msra.mxu1 %v10423_v5 }
 0x1f7   :  { %v1398_v13 = vld [vmem:[#allocation2 + $0x1100] sm:$0xff]  ;;  %v10416_v20 = vcombine.high %v1534_v1, %v1538_v2  ;;  %7208 = vmatprep.subr.bf16.mxu0 %v10288_v9  ;;  %v10415_v23 = vcombine.low %v1534_v1, %v1538_v2 }
 0x1f8   :  { %v1402_v14 = vld [vmem:[#allocation2 + $0x1120] sm:$0xff]  ;;  %7209 = vmatpush1.bf16.msra.mxu0 %v10287_v22 }
 0x1f9   :  { %v1526_v18 = vld [vmem:[#allocation2 + $0x1500] sm:$0xff]  ;;  %v10280_v25 = vcombine.high %v1398_v13, %v1402_v14  ;;  %7249 = vmatprep.subr.bf16.mxu1 %v10416_v20  ;;  %v10279_v32 = vcombine.low %v1398_v13, %v1402_v14 }
 0x1fa   :  { %v1530_v21 = vld [vmem:[#allocation2 + $0x1520] sm:$0xff]  ;;  %7250 = vmatpush1.bf16.msra.mxu1 %v10415_v23 }
 0x1fb   :  { %v1390_v26 = vld [vmem:[#allocation2 + $0x10c0] sm:$0xff]  ;;  %v10408_v30 = vcombine.high %v1526_v18, %v1530_v21  ;;  %7210 = vmatprep.subr.bf16.mxu0 %v10280_v25  ;;  %v10407_v34 = vcombine.low %v1526_v18, %v1530_v21 }
 0x1fc   :  { %v1394_v27 = vld [vmem:[#allocation2 + $0x10e0] sm:$0xff]  ;;  %7211 = vmatpush1.bf16.msra.mxu0 %v10279_v32 }
 0x1fd   :  { %v1518_v29 = vld [vmem:[#allocation2 + $0x14c0] sm:$0xff]  ;;  %v10272_v36 = vcombine.high %v1390_v26, %v1394_v27  ;;  %7251 = vmatprep.subr.bf16.mxu1 %v10408_v30  ;;  %v10271_v47 = vcombine.low %v1390_v26, %v1394_v27 }
 0x1fe   :  { %v1522_v31 = vld [vmem:[#allocation2 + $0x14e0] sm:$0xff]  ;;  %7252 = vmatpush1.bf16.msra.mxu1 %v10407_v34 }
 0x1ff   :  { %v1382_v38 = vld [vmem:[#allocation2 + $0x1080] sm:$0xff]  ;;  %v10400_v43 = vcombine.high %v1518_v29, %v1522_v31  ;;  %7212 = vmatprep.subr.bf16.mxu0 %v10272_v36  ;;  %v10399_v49 = vcombine.low %v1518_v29, %v1522_v31 }
 0x200   :  { %v1386_v39 = vld [vmem:[#allocation2 + $0x10a0] sm:$0xff]  ;;  %7213 = vmatpush1.bf16.msra.mxu0 %v10271_v47 }
 0x201   :  { %v1510_v42 = vld [vmem:[#allocation2 + $0x1480] sm:$0xff]  ;;  %v10264_v50 = vcombine.high %v1382_v38, %v1386_v39  ;;  %7253 = vmatprep.subr.bf16.mxu1 %v10400_v43  ;;  %v10263_v57 = vcombine.low %v1382_v38, %v1386_v39 }
 0x202   :  { %v1514_v44 = vld [vmem:[#allocation2 + $0x14a0] sm:$0xff]  ;;  %7254 = vmatpush1.bf16.msra.mxu1 %v10399_v49 }
 0x203   :  { %v1374_v52 = vld [vmem:[#allocation2 + $0x1040] sm:$0xff]  ;;  %v10392_v55 = vcombine.high %v1510_v42, %v1514_v44  ;;  %7214 = vmatprep.subr.bf16.mxu0 %v10264_v50  ;;  %v10391_v58 = vcombine.low %v1510_v42, %v1514_v44 }
 0x204   :  { %v1378_v53 = vld [vmem:[#allocation2 + $0x1060] sm:$0xff]  ;;  %7215 = vmatpush1.bf16.msra.mxu0 %v10263_v57 }
 0x205   :  { %v1502_v54 = vld [vmem:[#allocation2 + $0x1440] sm:$0xff]  ;;  %v10256_v59 = vcombine.high %v1374_v52, %v1378_v53  ;;  %7255 = vmatprep.subr.bf16.mxu1 %v10392_v55  ;;  %v10255_v48 = vcombine.low %v1374_v52, %v1378_v53 }
 0x206   :  { %v1506_v56 = vld [vmem:[#allocation2 + $0x1460] sm:$0xff]  ;;  %7256 = vmatpush1.bf16.msra.mxu1 %v10391_v58 }
 0x207   :  { %v1366_v60 = vld [vmem:[#allocation2 + $0x1000] sm:$0xff]  ;;  %v10384_v61 = vcombine.high %v1502_v54, %v1506_v56  ;;  %7216 = vmatprep.subr.bf16.mxu0 %v10256_v59  ;;  %v10383_v5 = vcombine.low %v1502_v54, %v1506_v56 }
 0x208   :  { %v1370_v63 = vld [vmem:[#allocation2 + $0x1020] sm:$0xff]  ;;  %7217 = vmatpush1.bf16.msra.mxu0 %v10255_v48 }
 0x209   :  { %v1494_v1 = vld [vmem:[#allocation2 + $0x1400] sm:$0xff]  ;;  %v10248_v9 = vcombine.high %v1366_v60, %v1370_v63  ;;  %7257 = vmatprep.subr.bf16.mxu1 %v10384_v61  ;;  %v10247_v22 = vcombine.low %v1366_v60, %v1370_v63 }
 0x20a   :  { %v1498_v2 = vld [vmem:[#allocation2 + $0x1420] sm:$0xff]  ;;  %7258 = vmatpush1.bf16.msra.mxu1 %v10383_v5 }
 0x20b   :  { %v10376_v13 = vcombine.high %v1494_v1, %v1498_v2  ;;  %v1486_v14 = vld [vmem:[#allocation2 + $0x13c0] sm:$0xff]  ;;  %7218 = vmatprep.subr.bf16.mxu0 %v10248_v9  ;;  %v10375_v23 = vcombine.low %v1494_v1, %v1498_v2 }
 0x20c   :  { %v1490_v18 = vld [vmem:[#allocation2 + $0x13e0] sm:$0xff]  ;;  %7219 = vmatpush1.bf16.msra.mxu0 %v10247_v22 }
 0x20d   :  { %v1614_v20 = vld [vmem:[#allocation2 + $0x17c0] sm:$0xff]  ;;  %v10368_v25 = vcombine.high %v1486_v14, %v1490_v18  ;;  %7259 = vmatprep.subr.bf16.mxu1 %v10376_v13  ;;  %v10367_v32 = vcombine.low %v1486_v14, %v1490_v18 }
 0x20e   :  { %v1618_v21 = vld [vmem:[#allocation2 + $0x17e0] sm:$0xff]  ;;  %7260 = vmatpush1.bf16.msra.mxu1 %v10375_v23 }
 0x20f   :  { %v10496_v26 = vcombine.high %v1614_v20, %v1618_v21  ;;  %v1478_v27 = vld [vmem:[#allocation2 + $0x1380] sm:$0xff]  ;;  %7220 = vmatprep.subr.bf16.mxu0 %v10368_v25  ;;  %v10495_v34 = vcombine.low %v1614_v20, %v1618_v21 }
 0x210   :  { %v1482_v29 = vld [vmem:[#allocation2 + $0x13a0] sm:$0xff]  ;;  %7221 = vmatpush2.bf16.msra.mxu0 %v10367_v32 }
 0x211   :  { %v1606_v30 = vld [vmem:[#allocation2 + $0x1780] sm:$0xff]  ;;  %v10360_v36 = vcombine.high %v1478_v27, %v1482_v29  ;;  %7261 = vmatprep.subr.bf16.mxu1 %v10496_v26  ;;  %v10359_v47 = vcombine.low %v1478_v27, %v1482_v29 }
 0x212   :  { %v1610_v31 = vld [vmem:[#allocation2 + $0x17a0] sm:$0xff]  ;;  %7262 = vmatpush2.bf16.msra.mxu1 %v10495_v34 }
 0x213   :  { %v10488_v38 = vcombine.high %v1606_v30, %v1610_v31  ;;  %v1470_v39 = vld [vmem:[#allocation2 + $0x1340] sm:$0xff]  ;;  %7222 = vmatprep.subr.bf16.mxu0 %v10360_v36  ;;  %v10487_v49 = vcombine.low %v1606_v30, %v1610_v31 }
 0x214   :  { %v1474_v42 = vld [vmem:[#allocation2 + $0x1360] sm:$0xff]  ;;  %7223 = vmatpush2.bf16.msra.mxu0 %v10359_v47 }
 0x215   :  { %v1598_v43 = vld [vmem:[#allocation2 + $0x1740] sm:$0xff]  ;;  %v10352_v50 = vcombine.high %v1470_v39, %v1474_v42  ;;  %7263 = vmatprep.subr.bf16.mxu1 %v10488_v38  ;;  %v10351_v57 = vcombine.low %v1470_v39, %v1474_v42 }
 0x216   :  { %v1602_v44 = vld [vmem:[#allocation2 + $0x1760] sm:$0xff]  ;;  %7264 = vmatpush2.bf16.msra.mxu1 %v10487_v49 }
 0x217   :  { %v10480_v52 = vcombine.high %v1598_v43, %v1602_v44  ;;  %v1462_v53 = vld [vmem:[#allocation2 + $0x1300] sm:$0xff]  ;;  %7224 = vmatprep.subr.bf16.mxu0 %v10352_v50  ;;  %v10479_v58 = vcombine.low %v1598_v43, %v1602_v44 }
 0x218   :  { %v1466_v54 = vld [vmem:[#allocation2 + $0x1320] sm:$0xff]  ;;  %7225 = vmatpush2.bf16.msra.mxu0 %v10351_v57 }
 0x219   :  { %v1590_v55 = vld [vmem:[#allocation2 + $0x1700] sm:$0xff]  ;;  %v10344_v59 = vcombine.high %v1462_v53, %v1466_v54  ;;  %7265 = vmatprep.subr.bf16.mxu1 %v10480_v52  ;;  %v10343_v48 = vcombine.low %v1462_v53, %v1466_v54 }
 0x21a   :  { %v1594_v56 = vld [vmem:[#allocation2 + $0x1720] sm:$0xff]  ;;  %7266 = vmatpush2.bf16.msra.mxu1 %v10479_v58 }
 0x21b   :  { %v10472_v60 = vcombine.high %v1590_v55, %v1594_v56  ;;  %v1454_v61 = vld [vmem:[#allocation2 + $0x12c0] sm:$0xff]  ;;  %7226 = vmatprep.subr.bf16.mxu0 %v10344_v59  ;;  %v10471_v5 = vcombine.low %v1590_v55, %v1594_v56 }
 0x21c   :  { %v1458_v63 = vld [vmem:[#allocation2 + $0x12e0] sm:$0xff]  ;;  %7227 = vmatpush2.bf16.msra.mxu0 %v10343_v48 }
 0x21d   :  { %v1582_v1 = vld [vmem:[#allocation2 + $0x16c0] sm:$0xff]  ;;  %v10336_v9 = vcombine.high %v1454_v61, %v1458_v63  ;;  %7267 = vmatprep.subr.bf16.mxu1 %v10472_v60  ;;  %v10335_v22 = vcombine.low %v1454_v61, %v1458_v63 }
 0x21e   :  { %v1586_v2 = vld [vmem:[#allocation2 + $0x16e0] sm:$0xff]  ;;  %7268 = vmatpush2.bf16.msra.mxu1 %v10471_v5 }
 0x21f   :  { %v10464_v13 = vcombine.high %v1582_v1, %v1586_v2  ;;  %v1446_v14 = vld [vmem:[#allocation2 + $0x1280] sm:$0xff]  ;;  %7228 = vmatprep.subr.bf16.mxu0 %v10336_v9  ;;  %v10463_v23 = vcombine.low %v1582_v1, %v1586_v2 }
 0x220   :  { %v1450_v18 = vld [vmem:[#allocation2 + $0x12a0] sm:$0xff]  ;;  %7229 = vmatpush2.bf16.msra.mxu0 %v10335_v22 }
 0x221   :  { %v1574_v20 = vld [vmem:[#allocation2 + $0x1680] sm:$0xff]  ;;  %v10328_v25 = vcombine.high %v1446_v14, %v1450_v18  ;;  %7269 = vmatprep.subr.bf16.mxu1 %v10464_v13  ;;  %v10327_v32 = vcombine.low %v1446_v14, %v1450_v18 }
 0x222   :  { %v1578_v21 = vld [vmem:[#allocation2 + $0x16a0] sm:$0xff]  ;;  %7270 = vmatpush2.bf16.msra.mxu1 %v10463_v23 }
 0x223   :  { %v10456_v26 = vcombine.high %v1574_v20, %v1578_v21  ;;  %v1438_v27 = vld [vmem:[#allocation2 + $0x1240] sm:$0xff]  ;;  %7230 = vmatprep.subr.bf16.mxu0 %v10328_v25  ;;  %v10455_v34 = vcombine.low %v1574_v20, %v1578_v21 }
 0x224   :  { %v1442_v29 = vld [vmem:[#allocation2 + $0x1260] sm:$0xff]  ;;  %7231 = vmatpush2.bf16.msra.mxu0 %v10327_v32 }
 0x225   :  { %v1566_v30 = vld [vmem:[#allocation2 + $0x1640] sm:$0xff]  ;;  %v10320_v36 = vcombine.high %v1438_v27, %v1442_v29  ;;  %7271 = vmatprep.subr.bf16.mxu1 %v10456_v26  ;;  %v10319_v47 = vcombine.low %v1438_v27, %v1442_v29 }
 0x226   :  { %v1570_v31 = vld [vmem:[#allocation2 + $0x1660] sm:$0xff]  ;;  %7272 = vmatpush2.bf16.msra.mxu1 %v10455_v34 }
 0x227   :  { %v10448_v38 = vcombine.high %v1566_v30, %v1570_v31  ;;  %v1430_v39 = vld [vmem:[#allocation2 + $0x1200] sm:$0xff]  ;;  %7232 = vmatprep.subr.bf16.mxu0 %v10320_v36  ;;  %v10447_v49 = vcombine.low %v1566_v30, %v1570_v31 }
 0x228   :  { %v1434_v42 = vld [vmem:[#allocation2 + $0x1220] sm:$0xff]  ;;  %7233 = vmatpush2.bf16.msra.mxu0 %v10319_v47 }
 0x229   :  { %v1558_v43 = vld [vmem:[#allocation2 + $0x1600] sm:$0xff]  ;;  %v10312_v50 = vcombine.high %v1430_v39, %v1434_v42  ;;  %7273 = vmatprep.subr.bf16.mxu1 %v10448_v38  ;;  %v10311_v57 = vcombine.low %v1430_v39, %v1434_v42 }
 0x22a   :  { %v1562_v44 = vld [vmem:[#allocation2 + $0x1620] sm:$0xff]  ;;  %7274 = vmatpush2.bf16.msra.mxu1 %v10447_v49 }
 0x22b   :  { %v10440_v52 = vcombine.high %v1558_v43, %v1562_v44  ;;  %v1678_v53 = vld [vmem:[#allocation2 + $0x19c0] sm:$0xff]  ;;  %7234 = vmatprep.subr.bf16.mxu0 %v10312_v50  ;;  %v10439_v58 = vcombine.low %v1558_v43, %v1562_v44 }
 0x22c   :  { %v1682_v54 = vld [vmem:[#allocation2 + $0x19e0] sm:$0xff]  ;;  %7235 = vmatpush2.bf16.msra.mxu0 %v10311_v57 }
 0x22d   :  { %v1806_v55 = vld [vmem:[#allocation2 + $0x1dc0] sm:$0xff]  ;;  %v10560_v59 = vcombine.high %v1678_v53, %v1682_v54  ;;  %7275 = vmatprep.subr.bf16.mxu1 %v10440_v52  ;;  %v10559_v48 = vcombine.low %v1678_v53, %v1682_v54 }
 0x22e   :  { %v1810_v56 = vld [vmem:[#allocation2 + $0x1de0] sm:$0xff]  ;;  %7276 = vmatpush2.bf16.msra.mxu1 %v10439_v58 }
 0x22f   :  { %v10688_v60 = vcombine.high %v1806_v55, %v1810_v56  ;;  %v1670_v61 = vld [vmem:[#allocation2 + $0x1980] sm:$0xff]  ;;  %7286 = vmatprep.subr.bf16.mxu0 %v10560_v59  ;;  %v10687_v5 = vcombine.low %v1806_v55, %v1810_v56  ;;  %7237 = vmatmul.mubr.bf16.vlgmr.msra.gmra.mxu0 %v11664_v35 }
 0x230   :  { %v1674_v63 = vld [vmem:[#allocation2 + $0x19a0] sm:$0xff]  ;;  %7287 = vmatpush1.bf16.msra.mxu0 %v10559_v48  ;;  %7318 = vmatprep.mubr.bf16.mxu0 %v11680_v16 }
 0x231   :  { %v1798_v1 = vld [vmem:[#allocation2 + $0x1d80] sm:$0xff]  ;;  %v10552_v9 = vcombine.high %v1670_v61, %v1674_v63  ;;  %7327 = vmatprep.subr.bf16.mxu1 %v10688_v60  ;;  %7278 = vmatmul.mubr.bf16.vlgmr.msra.gmra.mxu1 %v11666_v40  ;;  %v10551_v22 = vcombine.low %v1670_v61, %v1674_v63 }
 0x232   :  { %v1802_v2 = vld [vmem:[#allocation2 + $0x1da0] sm:$0xff]  ;;  %7328 = vmatpush1.bf16.msra.mxu1 %v10687_v5  ;;  %7359 = vmatprep.mubr.bf16.mxu1 %v11682_v19 }
 0x233   :  { %v10680_v13 = vcombine.high %v1798_v1, %v1802_v2  ;;  %v1662_v14 = vld [vmem:[#allocation2 + $0x1940] sm:$0xff]  ;;  %7288 = vmatprep.subr.bf16.mxu0 %v10552_v9  ;;  %v10679_v23 = vcombine.low %v1798_v1, %v1802_v2 }
 0x234   :  { %v1666_v18 = vld [vmem:[#allocation2 + $0x1960] sm:$0xff]  ;;  %7289 = vmatpush1.bf16.msra.mxu0 %v10551_v22 }
 0x235   :  { %v1790_v20 = vld [vmem:[#allocation2 + $0x1d40] sm:$0xff]  ;;  %v10544_v25 = vcombine.high %v1662_v14, %v1666_v18  ;;  %7329 = vmatprep.subr.bf16.mxu1 %v10680_v13  ;;  %v10543_v32 = vcombine.low %v1662_v14, %v1666_v18 }
 0x236   :  { %v1794_v21 = vld [vmem:[#allocation2 + $0x1d60] sm:$0xff]  ;;  %7330 = vmatpush1.bf16.msra.mxu1 %v10679_v23 }
 0x237   :  { %v10672_v26 = vcombine.high %v1790_v20, %v1794_v21  ;;  %v1654_v27 = vld [vmem:[#allocation2 + $0x1900] sm:$0xff]  ;;  %7290 = vmatprep.subr.bf16.mxu0 %v10544_v25  ;;  %v10671_v34 = vcombine.low %v1790_v20, %v1794_v21 }
 0x238   :  { %v1658_v29 = vld [vmem:[#allocation2 + $0x1920] sm:$0xff]  ;;  %7291 = vmatpush1.bf16.msra.mxu0 %v10543_v32 }
 0x239   :  { %v1782_v30 = vld [vmem:[#allocation2 + $0x1d00] sm:$0xff]  ;;  %v10536_v36 = vcombine.high %v1654_v27, %v1658_v29  ;;  %7331 = vmatprep.subr.bf16.mxu1 %v10672_v26  ;;  %v10535_v47 = vcombine.low %v1654_v27, %v1658_v29 }
 0x23a   :  { %v1786_v31 = vld [vmem:[#allocation2 + $0x1d20] sm:$0xff]  ;;  %7332 = vmatpush1.bf16.msra.mxu1 %v10671_v34 }
 0x23b   :  { %v10664_v38 = vcombine.high %v1782_v30, %v1786_v31  ;;  %v1646_v39 = vld [vmem:[#allocation2 + $0x18c0] sm:$0xff]  ;;  %7292 = vmatprep.subr.bf16.mxu0 %v10536_v36  ;;  %v10663_v49 = vcombine.low %v1782_v30, %v1786_v31 }
 0x23c   :  { %v1650_v42 = vld [vmem:[#allocation2 + $0x18e0] sm:$0xff]  ;;  %7293 = vmatpush1.bf16.msra.mxu0 %v10535_v47 }
 0x23d   :  { %v1774_v43 = vld [vmem:[#allocation2 + $0x1cc0] sm:$0xff]  ;;  %v10528_v50 = vcombine.high %v1646_v39, %v1650_v42  ;;  %7333 = vmatprep.subr.bf16.mxu1 %v10664_v38  ;;  %v10527_v57 = vcombine.low %v1646_v39, %v1650_v42 }
 0x23e   :  { %v1778_v44 = vld [vmem:[#allocation2 + $0x1ce0] sm:$0xff]  ;;  %7334 = vmatpush1.bf16.msra.mxu1 %v10663_v49 }
 0x23f   :  { %v10656_v52 = vcombine.high %v1774_v43, %v1778_v44  ;;  %v1638_v53 = vld [vmem:[#allocation2 + $0x1880] sm:$0xff]  ;;  %7294 = vmatprep.subr.bf16.mxu0 %v10528_v50  ;;  %v10655_v58 = vcombine.low %v1774_v43, %v1778_v44 }
 0x240   :  { %v1642_v54 = vld [vmem:[#allocation2 + $0x18a0] sm:$0xff]  ;;  %7295 = vmatpush1.bf16.msra.mxu0 %v10527_v57 }
 0x241   :  { %v1766_v55 = vld [vmem:[#allocation2 + $0x1c80] sm:$0xff]  ;;  %v10520_v59 = vcombine.high %v1638_v53, %v1642_v54  ;;  %7335 = vmatprep.subr.bf16.mxu1 %v10656_v52  ;;  %v10519_v48 = vcombine.low %v1638_v53, %v1642_v54 }
 0x242   :  { %v1770_v56 = vld [vmem:[#allocation2 + $0x1ca0] sm:$0xff]  ;;  %7336 = vmatpush1.bf16.msra.mxu1 %v10655_v58 }
 0x243   :  { %v10648_v60 = vcombine.high %v1766_v55, %v1770_v56  ;;  %v1630_v61 = vld [vmem:[#allocation2 + $0x1840] sm:$0xff]  ;;  %7296 = vmatprep.subr.bf16.mxu0 %v10520_v59  ;;  %v10647_v5 = vcombine.low %v1766_v55, %v1770_v56 }
 0x244   :  { %v1634_v63 = vld [vmem:[#allocation2 + $0x1860] sm:$0xff]  ;;  %7297 = vmatpush1.bf16.msra.mxu0 %v10519_v48 }
 0x245   :  { %v1758_v1 = vld [vmem:[#allocation2 + $0x1c40] sm:$0xff]  ;;  %v10512_v9 = vcombine.high %v1630_v61, %v1634_v63  ;;  %7337 = vmatprep.subr.bf16.mxu1 %v10648_v60  ;;  %v10511_v22 = vcombine.low %v1630_v61, %v1634_v63 }
 0x246   :  { %v1762_v2 = vld [vmem:[#allocation2 + $0x1c60] sm:$0xff]  ;;  %7338 = vmatpush1.bf16.msra.mxu1 %v10647_v5 }
 0x247   :  { %v10640_v13 = vcombine.high %v1758_v1, %v1762_v2  ;;  %v1622_v14 = vld [vmem:[#allocation2 + $0x1800] sm:$0xff]  ;;  %7298 = vmatprep.subr.bf16.mxu0 %v10512_v9  ;;  %v10639_v23 = vcombine.low %v1758_v1, %v1762_v2 }
 0x248   :  { %v1626_v18 = vld [vmem:[#allocation2 + $0x1820] sm:$0xff]  ;;  %7299 = vmatpush1.bf16.msra.mxu0 %v10511_v22 }
 0x249   :  { %v1750_v20 = vld [vmem:[#allocation2 + $0x1c00] sm:$0xff]  ;;  %v10504_v25 = vcombine.high %v1622_v14, %v1626_v18  ;;  %7339 = vmatprep.subr.bf16.mxu1 %v10640_v13  ;;  %v10503_v32 = vcombine.low %v1622_v14, %v1626_v18 }
 0x24a   :  { %v1754_v21 = vld [vmem:[#allocation2 + $0x1c20] sm:$0xff]  ;;  %7340 = vmatpush1.bf16.msra.mxu1 %v10639_v23 }
 0x24b   :  { %v10632_v26 = vcombine.high %v1750_v20, %v1754_v21  ;;  %v1742_v27 = vld [vmem:[#allocation2 + $0x1bc0] sm:$0xff]  ;;  %7300 = vmatprep.subr.bf16.mxu0 %v10504_v25  ;;  %v10631_v34 = vcombine.low %v1750_v20, %v1754_v21 }
 0x24c   :  { %v1746_v29 = vld [vmem:[#allocation2 + $0x1be0] sm:$0xff]  ;;  %7301 = vmatpush1.bf16.msra.mxu0 %v10503_v32 }
 0x24d   :  { %v1870_v30 = vld [vmem:[#allocation2 + $0x1fc0] sm:$0xff]  ;;  %v10624_v36 = vcombine.high %v1742_v27, %v1746_v29  ;;  %7341 = vmatprep.subr.bf16.mxu1 %v10632_v26  ;;  %v10623_v47 = vcombine.low %v1742_v27, %v1746_v29 }
 0x24e   :  { %v1874_v31 = vld [vmem:[#allocation2 + $0x1fe0] sm:$0xff]  ;;  %7342 = vmatpush1.bf16.msra.mxu1 %v10631_v34 }
 0x24f   :  { %v10752_v38 = vcombine.high %v1870_v30, %v1874_v31  ;;  %v1734_v39 = vld [vmem:[#allocation2 + $0x1b80] sm:$0xff]  ;;  %7302 = vmatprep.subr.bf16.mxu0 %v10624_v36  ;;  %v10751_v49 = vcombine.low %v1870_v30, %v1874_v31 }
 0x250   :  { %v1738_v42 = vld [vmem:[#allocation2 + $0x1ba0] sm:$0xff]  ;;  %7303 = vmatpush2.bf16.msra.mxu0 %v10623_v47 }
 0x251   :  { %v1862_v43 = vld [vmem:[#allocation2 + $0x1f80] sm:$0xff]  ;;  %v10616_v50 = vcombine.high %v1734_v39, %v1738_v42  ;;  %7343 = vmatprep.subr.bf16.mxu1 %v10752_v38  ;;  %v10615_v57 = vcombine.low %v1734_v39, %v1738_v42 }
 0x252   :  { %v1866_v44 = vld [vmem:[#allocation2 + $0x1fa0] sm:$0xff]  ;;  %7344 = vmatpush2.bf16.msra.mxu1 %v10751_v49 }
 0x253   :  { %v10744_v52 = vcombine.high %v1862_v43, %v1866_v44  ;;  %v1726_v53 = vld [vmem:[#allocation2 + $0x1b40] sm:$0xff]  ;;  %7304 = vmatprep.subr.bf16.mxu0 %v10616_v50  ;;  %v10743_v58 = vcombine.low %v1862_v43, %v1866_v44 }
 0x254   :  { %v1730_v54 = vld [vmem:[#allocation2 + $0x1b60] sm:$0xff]  ;;  %7305 = vmatpush2.bf16.msra.mxu0 %v10615_v57 }
 0x255   :  { %v1854_v55 = vld [vmem:[#allocation2 + $0x1f40] sm:$0xff]  ;;  %v10608_v59 = vcombine.high %v1726_v53, %v1730_v54  ;;  %7345 = vmatprep.subr.bf16.mxu1 %v10744_v52  ;;  %v10607_v48 = vcombine.low %v1726_v53, %v1730_v54 }
 0x256   :  { %v1858_v56 = vld [vmem:[#allocation2 + $0x1f60] sm:$0xff]  ;;  %7346 = vmatpush2.bf16.msra.mxu1 %v10743_v58 }
 0x257   :  { %v10736_v60 = vcombine.high %v1854_v55, %v1858_v56  ;;  %v1718_v61 = vld [vmem:[#allocation2 + $0x1b00] sm:$0xff]  ;;  %7306 = vmatprep.subr.bf16.mxu0 %v10608_v59  ;;  %v10735_v5 = vcombine.low %v1854_v55, %v1858_v56 }
 0x258   :  { %v1722_v63 = vld [vmem:[#allocation2 + $0x1b20] sm:$0xff]  ;;  %7307 = vmatpush2.bf16.msra.mxu0 %v10607_v48 }
 0x259   :  { %v1846_v1 = vld [vmem:[#allocation2 + $0x1f00] sm:$0xff]  ;;  %v10600_v9 = vcombine.high %v1718_v61, %v1722_v63  ;;  %7347 = vmatprep.subr.bf16.mxu1 %v10736_v60  ;;  %v10599_v22 = vcombine.low %v1718_v61, %v1722_v63  ;;  %v911_v61 = vld [vmem:[#allocation2 + $0x1c8] sm:$0xff] }
 0x25a   :  { %v1850_v2 = vld [vmem:[#allocation2 + $0x1f20] sm:$0xff]  ;;  %7348 = vmatpush2.bf16.msra.mxu1 %v10735_v5  ;;  %v915_v63 = vld [vmem:[#allocation2 + $0x1e8] sm:$0xff] }
 0x25b   :  { %v10728_v13 = vcombine.high %v1846_v1, %v1850_v2  ;;  %v1710_v14 = vld [vmem:[#allocation2 + $0x1ac0] sm:$0xff]  ;;  %7308 = vmatprep.subr.bf16.mxu0 %v10600_v9  ;;  %v10727_v23 = vcombine.low %v1846_v1, %v1850_v2  ;;  %v1039_v1 = vld [vmem:[#allocation2 + $0x5c8] sm:$0xff]  ;;  %v1878_v9 = vld [vmem:[#allocation10] sm:$0xff] }
 0x25c   :  { %v1714_v18 = vld [vmem:[#allocation2 + $0x1ae0] sm:$0xff]  ;;  %7309 = vmatpush2.bf16.msra.mxu0 %v10599_v22  ;;  %v1043_v2 = vld [vmem:[#allocation2 + $0x5e8] sm:$0xff] }
 0x25d   :  { %v1838_v20 = vld [vmem:[#allocation2 + $0x1ec0] sm:$0xff]  ;;  %v10592_v25 = vcombine.high %v1710_v14, %v1714_v18  ;;  %7349 = vmatprep.subr.bf16.mxu1 %v10728_v13  ;;  %v10591_v32 = vcombine.low %v1710_v14, %v1714_v18  ;;  %v9794_v13 = vcombine.high %v911_v61, %v915_v63  ;;  %v9922_v14 = vcombine.high %v1039_v1, %v1043_v2  ;;  %v903_v18 = vld [vmem:[#allocation2 + $0x188] sm:$0xff] }
 0x25e   :  { %v1842_v21 = vld [vmem:[#allocation2 + $0x1ee0] sm:$0xff]  ;;  %7350 = vmatpush2.bf16.msra.mxu1 %v10727_v23  ;;  %v1035_v22 = vld [vmem:[#allocation2 + $0x5a8] sm:$0xff]  ;;  %v1883_v23 = vrot.slane %v1878_v9, %v11610_v4 }
 0x25f   :  { %v10720_v26 = vcombine.high %v1838_v20, %v1842_v21  ;;  %v1702_v27 = vld [vmem:[#allocation2 + $0x1a80] sm:$0xff]  ;;  %7310 = vmatprep.subr.bf16.mxu0 %v10592_v25  ;;  %v10719_v34 = vcombine.low %v1838_v20, %v1842_v21  ;;  %v907_v20 = vld [vmem:[#allocation2 + $0x1a8] sm:$0xff]  ;;  %v9793_v25 = vcombine.low %v911_v61, %v915_v63 }
 0x260   :  { %v1706_v29 = vld [vmem:[#allocation2 + $0x1aa0] sm:$0xff]  ;;  %7311 = vmatpush2.bf16.msra.mxu0 %v10591_v32  ;;  %v1031_v21 = vld [vmem:[#allocation2 + $0x588] sm:$0xff] }
 0x261   :  { %v1830_v30 = vld [vmem:[#allocation2 + $0x1e80] sm:$0xff]  ;;  %v10584_v36 = vcombine.high %v1702_v27, %v1706_v29  ;;  %7351 = vmatprep.subr.bf16.mxu1 %v10720_v26  ;;  %v10583_v47 = vcombine.low %v1702_v27, %v1706_v29  ;;  %v9921_v26 = vcombine.low %v1039_v1, %v1043_v2  ;;  %v9786_v27 = vcombine.high %v903_v18, %v907_v20  ;;  %v899_v32 = vld [vmem:[#allocation2 + $0x168] sm:$0xff] }
 0x262   :  { %v1834_v31 = vld [vmem:[#allocation2 + $0x1ea0] sm:$0xff]  ;;  %7352 = vmatpush2.bf16.msra.mxu1 %v10719_v34  ;;  %v1887_v29 = vrot.slane %v1878_v9, %v11614_v7 }
 0x263   :  { %v10712_v38 = vcombine.high %v1830_v30, %v1834_v31  ;;  %v1694_v39 = vld [vmem:[#allocation2 + $0x1a40] sm:$0xff]  ;;  %7312 = vmatprep.subr.bf16.mxu0 %v10584_v36  ;;  %v10711_v49 = vcombine.low %v1830_v30, %v1834_v31  ;;  %v9914_v30 = vcombine.high %v1031_v21, %v1035_v22  ;;  %v895_v31 = vld [vmem:[#allocation2 + $0x148] sm:$0xff] }
 0x264   :  { %v1698_v42 = vld [vmem:[#allocation2 + $0x1a60] sm:$0xff]  ;;  %7313 = vmatpush2.bf16.msra.mxu0 %v10583_v47  ;;  %v1023_v36 = vld [vmem:[#allocation2 + $0x548] sm:$0xff]  ;;  %v9913_v47 = vcombine.low %v1031_v21, %v1035_v22  ;;  %v9777_v63 = vcombine.low %v895_v31, %v899_v32 }
 0x265   :  { %v1822_v43 = vld [vmem:[#allocation2 + $0x1e40] sm:$0xff]  ;;  %v10576_v50 = vcombine.high %v1694_v39, %v1698_v42  ;;  %7353 = vmatprep.subr.bf16.mxu1 %v10712_v38  ;;  %v10575_v57 = vcombine.low %v1694_v39, %v1698_v42  ;;  %v1027_v38 = vld [vmem:[#allocation2 + $0x568] sm:$0xff] }
 0x266   :  { %v1826_v44 = vld [vmem:[#allocation2 + $0x1e60] sm:$0xff]  ;;  %7354 = vmatpush2.bf16.msra.mxu1 %v10711_v49  ;;  %v9778_v49 = vcombine.high %v895_v31, %v899_v32  ;;  %v9905_v2 = vcombine.low %v1023_v36, %v1027_v38 }
 0x267   :  { %v10704_v52 = vcombine.high %v1822_v43, %v1826_v44  ;;  %v1686_v53 = vld [vmem:[#allocation2 + $0x1a00] sm:$0xff]  ;;  %7314 = vmatprep.subr.bf16.mxu0 %v10576_v50  ;;  %v10703_v58 = vcombine.low %v1822_v43, %v1826_v44  ;;  %v9785_v43 = vcombine.low %v903_v18, %v907_v20  ;;  %v1007_v18 = vld [vmem:[#allocation2 + $0x4c8] sm:$0xff] }
 0x268   :  { %v1690_v54 = vld [vmem:[#allocation2 + $0x1a20] sm:$0xff]  ;;  %7315 = vmatpush2.bf16.msra.mxu0 %v10575_v57  ;;  %v1011_v20 = vld [vmem:[#allocation2 + $0x4e8] sm:$0xff] }
 0x269   :  { %v1814_v55 = vld [vmem:[#allocation2 + $0x1e00] sm:$0xff]  ;;  %v10568_v59 = vcombine.high %v1686_v53, %v1690_v54  ;;  %7355 = vmatprep.subr.bf16.mxu1 %v10704_v52  ;;  %v10567_v48 = vcombine.low %v1686_v53, %v1690_v54  ;;  %v9906_v54 = vcombine.high %v1023_v36, %v1027_v38  ;;  %v9889_v32 = vcombine.low %v1007_v18, %v1011_v20  ;;  %v863_v38 = vld [vmem:[#allocation2 + $0x48] sm:$0xff] }
 0x26a   :  { %v1818_v56 = vld [vmem:[#allocation2 + $0x1e20] sm:$0xff]  ;;  %7356 = vmatpush2.bf16.msra.mxu1 %v10703_v58  ;;  %v1015_v58 = vld [vmem:[#allocation2 + $0x508] sm:$0xff] }
 0x26b   :  { %v10696_v60 = vcombine.high %v1814_v55, %v1818_v56  ;;  %7316 = vmatprep.subr.bf16.mxu0 %v10568_v59  ;;  %v10695_v5 = vcombine.low %v1814_v55, %v1818_v56  ;;  %v887_v55 = vld [vmem:[#allocation2 + $0x108] sm:$0xff] }
 0x26c   :  { %7317 = vmatpush2.bf16.msra.mxu0 %v10567_v48  ;;  %v891_v56 = vld [vmem:[#allocation2 + $0x128] sm:$0xff] }
 0x26d   :  { %7357 = vmatprep.subr.bf16.mxu1 %v10696_v60  ;;  %7368 = vmatprep.subr.bf16.mxu0 %v9794_v13  ;;  %v1019_v59 = vld [vmem:[#allocation2 + $0x528] sm:$0xff]  ;;  %v9770_v48 = vcombine.high %v887_v55, %v891_v56  ;;  %v9769_v21 = vcombine.low %v887_v55, %v891_v56 }
 0x26e   :  { %7358 = vmatpush2.bf16.msra.mxu1 %v10695_v5  ;;  %v9898_v9 = vcombine.high %v1015_v58, %v1019_v59  ;;  %v879_v13 = vld [vmem:[#allocation2 + $0xc8] sm:$0xff]  ;;  %v9897_v22 = vcombine.low %v1015_v58, %v1019_v59 }
 0x26f   :  { %7409 = vmatprep.subr.bf16.mxu1 %v9922_v14  ;;  %v7074_v34 = vpop.f32.mrf.mxu0  ;;  %7319 = vmatmul.mubr.bf16.vlgmr.msra.gmra.mxu0 %v11676_v3  ;;  %v883_v14 = vld [vmem:[#allocation2 + $0xe8] sm:$0xff] }
 0x270   :  { %v7075_v39 = vadd.f32 %v7074_v34, %v1883_v23  ;;  %7369 = vmatpush1.bf16.msra.mxu0 %v9793_v25  ;;  %7400 = vmatprep.mubr.bf16.mxu0 %v11637_v41  ;;  %v9762_v23 = vcombine.high %v879_v13, %v883_v14  ;;  %v9890_v25 = vcombine.high %v1007_v18, %v1011_v20  ;;  %v983_v55 = vld [vmem:[#allocation2 + $0x408] sm:$0xff] }
 0x271   :  { %v7115_v42 = vpop.f32.mrf.mxu1  ;;  %7360 = vmatmul.mubr.bf16.vlgmr.msra.gmra.mxu1 %v11678_v12  ;;  %v7076_v44 = vpop.f32.mrf.mxu0  ;;  %7370 = vmatprep.subr.bf16.mxu0 %v9786_v27  ;;  %v875_v27 = vld [vmem:[#allocation2 + $0xa8] sm:$0xff]  ;;  %v9761_v31 = vcombine.low %v879_v13, %v883_v14 }
 0x272   :  { %7410 = vmatpush1.bf16.msra.mxu1 %v9921_v26  ;;  %v11702_v50 = vadd.f32 %v7115_v42, %v7075_v39  ;;  %v7077_v52 = vadd.f32 %v7076_v44, %v1887_v29  ;;  %7441 = vmatprep.mubr.bf16.mxu1 %v11640_v45  ;;  %v871_v26 = vld [vmem:[#allocation2 + $0x88] sm:$0xff] }
 0x273   :  { %v7117_v53 = vpop.f32.mrf.mxu1  ;;  %7411 = vmatprep.subr.bf16.mxu1 %v9914_v30  ;;  %v7078_v57 = vpop.f32.mrf.mxu0  ;;  %v999_v29 = vld [vmem:[#allocation2 + $0x488] sm:$0xff]  ;;  %v9754_v34 = vcombine.high %v871_v26, %v875_v27  ;;  %v9753_v44 = vcombine.low %v871_v26, %v875_v27 }
 0x274   :  { %v11706_v60 = vadd.f32 %v7117_v53, %v7077_v52  ;;  %7371 = vmatpush1.bf16.msra.mxu0 %v9785_v43  ;;  %v1003_v30 = vld [vmem:[#allocation2 + $0x4a8] sm:$0xff] }
 0x275   :  { %v7119_v61 = vpop.f32.mrf.mxu1  ;;  %v7079_v1 = vpop.f32.mrf.mxu0  ;;  %7372 = vmatprep.subr.bf16.mxu0 %v9778_v49  ;;  %v9882_v36 = vcombine.high %v999_v29, %v1003_v30  ;;  %v867_v39 = vld [vmem:[#allocation2 + $0x68] sm:$0xff] }
 0x276   :  { %7412 = vmatpush1.bf16.msra.mxu1 %v9913_v47  ;;  %v991_v42 = vld [vmem:[#allocation2 + $0x448] sm:$0xff]  ;;  %v9881_v47 = vcombine.low %v999_v29, %v1003_v30  ;;  %v9746_v49 = vcombine.high %v863_v38, %v867_v39  ;;  %v9745_v57 = vcombine.low %v863_v38, %v867_v39 }
 0x277   :  { %v7120_v5 = vpop.f32.mrf.mxu1  ;;  %7413 = vmatprep.subr.bf16.mxu1 %v9906_v54  ;;  %v995_v43 = vld [vmem:[#allocation2 + $0x468] sm:$0xff] }
 0x278   :  { %7373 = vmatpush1.bf16.msra.mxu0 %v9777_v63  ;;  %v9874_v52 = vcombine.high %v991_v42, %v995_v43  ;;  %v855_v53 = vld [vmem:[#allocation2 + $0x8] sm:$0xff]  ;;  %v9873_v58 = vcombine.low %v991_v42, %v995_v43 }
 0x279   :  { %7374 = vmatprep.subr.bf16.mxu0 %v9770_v48  ;;  %v859_v54 = vld [vmem:[#allocation2 + $0x28] sm:$0xff] }
 0x27a   :  { %7414 = vmatpush1.bf16.msra.mxu1 %v9905_v2  ;;  %v987_v56 = vld [vmem:[#allocation2 + $0x428] sm:$0xff]  ;;  %v9738_v59 = vcombine.high %v855_v53, %v859_v54  ;;  %v9737_v5 = vcombine.low %v855_v53, %v859_v54 }
 0x27b   :  { %7415 = vmatprep.subr.bf16.mxu1 %v9898_v9  ;;  %v9866_v61 = vcombine.high %v983_v55, %v987_v56  ;;  %v975_v63 = vld [vmem:[#allocation2 + $0x3c8] sm:$0xff]  ;;  %v9865_v9 = vcombine.low %v983_v55, %v987_v56 }
 0x27c   :  { %7375 = vmatpush1.bf16.msra.mxu0 %v9769_v21  ;;  %v979_v1 = vld [vmem:[#allocation2 + $0x3e8] sm:$0xff] }
 0x27d   :  { %7376 = vmatprep.subr.bf16.mxu0 %v9762_v23  ;;  %v1103_v2 = vld [vmem:[#allocation2 + $0x7c8] sm:$0xff]  ;;  %v9858_v13 = vcombine.high %v975_v63, %v979_v1  ;;  %v9857_v23 = vcombine.low %v975_v63, %v979_v1 }
 0x27e   :  { %7416 = vmatpush1.bf16.msra.mxu1 %v9897_v22  ;;  %v1107_v48 = vld [vmem:[#allocation2 + $0x7e8] sm:$0xff] }
 0x27f   :  { %7417 = vmatprep.subr.bf16.mxu1 %v9890_v25  ;;  %v9986_v14 = vcombine.high %v1103_v2, %v1107_v48  ;;  %v967_v18 = vld [vmem:[#allocation2 + $0x388] sm:$0xff]  ;;  %v9985_v25 = vcombine.low %v1103_v2, %v1107_v48 }
 0x280   :  { %7377 = vmatpush1.bf16.msra.mxu0 %v9761_v31  ;;  %v971_v20 = vld [vmem:[#allocation2 + $0x3a8] sm:$0xff] }
 0x281   :  { %7378 = vmatprep.subr.bf16.mxu0 %v9754_v34  ;;  %v1095_v21 = vld [vmem:[#allocation2 + $0x788] sm:$0xff]  ;;  %v9850_v26 = vcombine.high %v967_v18, %v971_v20  ;;  %v9849_v34 = vcombine.low %v967_v18, %v971_v20 }
 0x282   :  { %7418 = vmatpush1.bf16.msra.mxu1 %v9889_v32  ;;  %v1099_v22 = vld [vmem:[#allocation2 + $0x7a8] sm:$0xff] }
 0x283   :  { %7419 = vmatprep.subr.bf16.mxu1 %v9882_v36  ;;  %v9978_v27 = vcombine.high %v1095_v21, %v1099_v22  ;;  %v959_v29 = vld [vmem:[#allocation2 + $0x348] sm:$0xff]  ;;  %v9977_v36 = vcombine.low %v1095_v21, %v1099_v22 }
 0x284   :  { %7379 = vmatpush1.bf16.msra.mxu0 %v9753_v44  ;;  %v963_v30 = vld [vmem:[#allocation2 + $0x368] sm:$0xff] }
 0x285   :  { %7380 = vmatprep.subr.bf16.mxu0 %v9746_v49  ;;  %v1087_v31 = vld [vmem:[#allocation2 + $0x748] sm:$0xff]  ;;  %v9842_v38 = vcombine.high %v959_v29, %v963_v30  ;;  %v9841_v49 = vcombine.low %v959_v29, %v963_v30 }
 0x286   :  { %7420 = vmatpush1.bf16.msra.mxu1 %v9881_v47  ;;  %v1091_v32 = vld [vmem:[#allocation2 + $0x768] sm:$0xff] }
 0x287   :  { %7421 = vmatprep.subr.bf16.mxu1 %v9874_v52  ;;  %v9970_v39 = vcombine.high %v1087_v31, %v1091_v32  ;;  %v951_v42 = vld [vmem:[#allocation2 + $0x308] sm:$0xff]  ;;  %v9969_v52 = vcombine.low %v1087_v31, %v1091_v32 }
 0x288   :  { %7381 = vmatpush1.bf16.msra.mxu0 %v9745_v57  ;;  %v955_v43 = vld [vmem:[#allocation2 + $0x328] sm:$0xff] }
 0x289   :  { %7382 = vmatprep.subr.bf16.mxu0 %v9738_v59  ;;  %v1079_v44 = vld [vmem:[#allocation2 + $0x708] sm:$0xff]  ;;  %v9834_v53 = vcombine.high %v951_v42, %v955_v43  ;;  %v9833_v59 = vcombine.low %v951_v42, %v955_v43 }
 0x28a   :  { %7422 = vmatpush1.bf16.msra.mxu1 %v9873_v58  ;;  %v1083_v47 = vld [vmem:[#allocation2 + $0x728] sm:$0xff] }
 0x28b   :  { %7423 = vmatprep.subr.bf16.mxu1 %v9866_v61  ;;  %v9962_v54 = vcombine.high %v1079_v44, %v1083_v47  ;;  %v943_v55 = vld [vmem:[#allocation2 + $0x2c8] sm:$0xff]  ;;  %v9961_v61 = vcombine.low %v1079_v44, %v1083_v47 }
 0x28c   :  { %7383 = vmatpush1.bf16.msra.mxu0 %v9737_v5  ;;  %v947_v56 = vld [vmem:[#allocation2 + $0x2e8] sm:$0xff] }
 0x28d   :  { %7384 = vmatprep.subr.bf16.mxu0 %v9858_v13  ;;  %v1071_v57 = vld [vmem:[#allocation2 + $0x6c8] sm:$0xff]  ;;  %v9826_v63 = vcombine.high %v943_v55, %v947_v56  ;;  %v9825_v13 = vcombine.low %v943_v55, %v947_v56 }
 0x28e   :  { %7424 = vmatpush1.bf16.msra.mxu1 %v9865_v9  ;;  %v1075_v58 = vld [vmem:[#allocation2 + $0x6e8] sm:$0xff] }
 0x28f   :  { %7425 = vmatprep.subr.bf16.mxu1 %v9986_v14  ;;  %v9954_v1 = vcombine.high %v1071_v57, %v1075_v58  ;;  %v935_v2 = vld [vmem:[#allocation2 + $0x288] sm:$0xff]  ;;  %v9953_v14 = vcombine.low %v1071_v57, %v1075_v58 }
 0x290   :  { %7385 = vmatpush2.bf16.msra.mxu0 %v9857_v23  ;;  %v939_v48 = vld [vmem:[#allocation2 + $0x2a8] sm:$0xff] }
 0x291   :  { %7386 = vmatprep.subr.bf16.mxu0 %v9850_v26  ;;  %v1063_v5 = vld [vmem:[#allocation2 + $0x688] sm:$0xff]  ;;  %v9818_v18 = vcombine.high %v935_v2, %v939_v48  ;;  %v9817_v26 = vcombine.low %v935_v2, %v939_v48 }
 0x292   :  { %7426 = vmatpush2.bf16.msra.mxu1 %v9985_v25  ;;  %v1067_v9 = vld [vmem:[#allocation2 + $0x6a8] sm:$0xff] }
 0x293   :  { %7427 = vmatprep.subr.bf16.mxu1 %v9978_v27  ;;  %v9946_v20 = vcombine.high %v1063_v5, %v1067_v9  ;;  %v927_v21 = vld [vmem:[#allocation2 + $0x248] sm:$0xff]  ;;  %v9945_v27 = vcombine.low %v1063_v5, %v1067_v9 }
 0x294   :  { %7387 = vmatpush2.bf16.msra.mxu0 %v9849_v34  ;;  %v931_v22 = vld [vmem:[#allocation2 + $0x268] sm:$0xff] }
 0x295   :  { %7388 = vmatprep.subr.bf16.mxu0 %v9842_v38  ;;  %v1055_v23 = vld [vmem:[#allocation2 + $0x648] sm:$0xff]  ;;  %v9810_v29 = vcombine.high %v927_v21, %v931_v22  ;;  %v9809_v38 = vcombine.low %v927_v21, %v931_v22 }
 0x296   :  { %7428 = vmatpush2.bf16.msra.mxu1 %v9977_v36  ;;  %v1059_v25 = vld [vmem:[#allocation2 + $0x668] sm:$0xff] }
 0x297   :  { %7429 = vmatprep.subr.bf16.mxu1 %v9970_v39  ;;  %v9938_v30 = vcombine.high %v1055_v23, %v1059_v25  ;;  %v919_v31 = vld [vmem:[#allocation2 + $0x208] sm:$0xff]  ;;  %v9937_v39 = vcombine.low %v1055_v23, %v1059_v25 }
 0x298   :  { %7389 = vmatpush2.bf16.msra.mxu0 %v9841_v49  ;;  %v923_v32 = vld [vmem:[#allocation2 + $0x228] sm:$0xff] }
 0x299   :  { %7390 = vmatprep.subr.bf16.mxu0 %v9834_v53  ;;  %v1047_v34 = vld [vmem:[#allocation2 + $0x608] sm:$0xff]  ;;  %v9802_v42 = vcombine.high %v919_v31, %v923_v32  ;;  %v9801_v53 = vcombine.low %v919_v31, %v923_v32 }
 0x29a   :  { %7430 = vmatpush2.bf16.msra.mxu1 %v9969_v52  ;;  %v1051_v36 = vld [vmem:[#allocation2 + $0x628] sm:$0xff] }
 0x29b   :  { %7431 = vmatprep.subr.bf16.mxu1 %v9962_v54  ;;  %v9930_v43 = vcombine.high %v1047_v34, %v1051_v36  ;;  %v1167_v44 = vld [vmem:[#allocation2 + $0x9c8] sm:$0xff]  ;;  %v9929_v54 = vcombine.low %v1047_v34, %v1051_v36 }
 0x29c   :  { %7391 = vmatpush2.bf16.msra.mxu0 %v9833_v59  ;;  %v1171_v47 = vld [vmem:[#allocation2 + $0x9e8] sm:$0xff] }
 0x29d   :  { %7392 = vmatprep.subr.bf16.mxu0 %v9826_v63  ;;  %v1295_v49 = vld [vmem:[#allocation2 + $0xdc8] sm:$0xff]  ;;  %v10050_v55 = vcombine.high %v1167_v44, %v1171_v47  ;;  %v10049_v63 = vcombine.low %v1167_v44, %v1171_v47 }
 0x29e   :  { %7432 = vmatpush2.bf16.msra.mxu1 %v9961_v61  ;;  %v1299_v52 = vld [vmem:[#allocation2 + $0xde8] sm:$0xff] }
 0x29f   :  { %7433 = vmatprep.subr.bf16.mxu1 %v9954_v1  ;;  %v10178_v56 = vcombine.high %v1295_v49, %v1299_v52  ;;  %v1159_v57 = vld [vmem:[#allocation2 + $0x988] sm:$0xff]  ;;  %v10177_v1 = vcombine.low %v1295_v49, %v1299_v52 }
 0x2a0   :  { %7393 = vmatpush2.bf16.msra.mxu0 %v9825_v13  ;;  %v1163_v58 = vld [vmem:[#allocation2 + $0x9a8] sm:$0xff] }
 0x2a1   :  { %7394 = vmatprep.subr.bf16.mxu0 %v9818_v18  ;;  %v1287_v59 = vld [vmem:[#allocation2 + $0xd88] sm:$0xff]  ;;  %v10042_v2 = vcombine.high %v1159_v57, %v1163_v58  ;;  %v10041_v22 = vcombine.low %v1159_v57, %v1163_v58 }
 0x2a2   :  { %7434 = vmatpush2.bf16.msra.mxu1 %v9953_v14  ;;  %v1291_v61 = vld [vmem:[#allocation2 + $0xda8] sm:$0xff] }
 0x2a3   :  { %7435 = vmatprep.subr.bf16.mxu1 %v9946_v20  ;;  %v10170_v48 = vcombine.high %v1287_v59, %v1291_v61  ;;  %v1151_v5 = vld [vmem:[#allocation2 + $0x948] sm:$0xff]  ;;  %v10169_v25 = vcombine.low %v1287_v59, %v1291_v61 }
 0x2a4   :  { %7395 = vmatpush2.bf16.msra.mxu0 %v9817_v26  ;;  %v1155_v9 = vld [vmem:[#allocation2 + $0x968] sm:$0xff] }
 0x2a5   :  { %7396 = vmatprep.subr.bf16.mxu0 %v9810_v29  ;;  %v1279_v14 = vld [vmem:[#allocation2 + $0xd48] sm:$0xff]  ;;  %v10034_v26 = vcombine.high %v1151_v5, %v1155_v9 }
 0x2a6   :  { %7436 = vmatpush2.bf16.msra.mxu1 %v9945_v27  ;;  %v1283_v18 = vld [vmem:[#allocation2 + $0xd68] sm:$0xff] }
 0x2a7   :  { %7437 = vmatprep.subr.bf16.mxu1 %v9938_v30  ;;  %v10162_v31 = vcombine.high %v1279_v14, %v1283_v18  ;;  %v1143_v32 = vld [vmem:[#allocation2 + $0x908] sm:$0xff] }
 0x2a8   :  { %7397 = vmatpush2.bf16.msra.mxu0 %v9809_v38  ;;  %v1147_v34 = vld [vmem:[#allocation2 + $0x928] sm:$0xff] }
 0x2a9   :  { %7398 = vmatprep.subr.bf16.mxu0 %v9802_v42  ;;  %v1271_v36 = vld [vmem:[#allocation2 + $0xd08] sm:$0xff]  ;;  %v10026_v47 = vcombine.high %v1143_v32, %v1147_v34  ;;  %v10025_v57 = vcombine.low %v1143_v32, %v1147_v34 }
 0x2aa   :  { %7438 = vmatpush2.bf16.msra.mxu1 %v9937_v39  ;;  %v1275_v38 = vld [vmem:[#allocation2 + $0xd28] sm:$0xff] }
 0x2ab   :  { %7439 = vmatprep.subr.bf16.mxu1 %v9930_v43  ;;  %v10033_v43 = vcombine.low %v1151_v5, %v1155_v9  ;;  %v10154_v52 = vcombine.high %v1271_v36, %v1275_v38  ;;  %v10153_v58 = vcombine.low %v1271_v36, %v1275_v38  ;;  %v1239_v32 = vld [vmem:[#allocation2 + $0xc08] sm:$0xff] }
 0x2ac   :  { %7399 = vmatpush2.bf16.msra.mxu0 %v9801_v53  ;;  %v1135_v53 = vld [vmem:[#allocation2 + $0x8c8] sm:$0xff] }
 0x2ad   :  { %7450 = vmatprep.subr.bf16.mxu0 %v10050_v55  ;;  %v1263_v55 = vld [vmem:[#allocation2 + $0xcc8] sm:$0xff] }
 0x2ae   :  { %7440 = vmatpush2.bf16.msra.mxu1 %v9929_v54  ;;  %v1139_v54 = vld [vmem:[#allocation2 + $0x8e8] sm:$0xff] }
 0x2af   :  { %7491 = vmatprep.subr.bf16.mxu1 %v10178_v56  ;;  %v7156_v13 = vpop.f32.mrf.mxu0  ;;  %7401 = vmatmul.mubr.bf16.vlgmr.msra.gmra.mxu0 %v11632_v33  ;;  %v1267_v56 = vld [vmem:[#allocation2 + $0xce8] sm:$0xff]  ;;  %v10018_v59 = vcombine.high %v1135_v53, %v1139_v54  ;;  %v10017_v5 = vcombine.low %v1135_v53, %v1139_v54 }
 0x2b0   :  { %v7157_v20 = vadd.f32 %v7156_v13, %v11702_v50  ;;  %7451 = vmatpush1.bf16.msra.mxu0 %v10049_v63  ;;  %7482 = vmatprep.mubr.bf16.mxu0 %v11654_v10  ;;  %v10146_v61 = vcombine.high %v1263_v55, %v1267_v56  ;;  %v1127_v63 = vld [vmem:[#allocation2 + $0x888] sm:$0xff]  ;;  %v10145_v9 = vcombine.low %v1263_v55, %v1267_v56 }
 0x2b1   :  { %v7197_v21 = vpop.f32.mrf.mxu1  ;;  %7442 = vmatmul.mubr.bf16.vlgmr.msra.gmra.mxu1 %v11634_v37  ;;  %v7158_v23 = vpop.f32.mrf.mxu0  ;;  %7452 = vmatprep.subr.bf16.mxu0 %v10042_v2  ;;  %v1255_v2 = vld [vmem:[#allocation2 + $0xc88] sm:$0xff] }
 0x2b2   :  { %7492 = vmatpush1.bf16.msra.mxu1 %v10177_v1  ;;  %v11711_v27 = vadd.f32 %v7197_v21, %v7157_v20  ;;  %v7159_v29 = vadd.f32 %v7158_v23, %v11706_v60  ;;  %7523 = vmatprep.mubr.bf16.mxu1 %v11658_v15  ;;  %v10161_v60 = vcombine.low %v1279_v14, %v1283_v18  ;;  %v1131_v1 = vld [vmem:[#allocation2 + $0x8a8] sm:$0xff] }
 0x2b3   :  { %v7199_v30 = vpop.f32.mrf.mxu1  ;;  %7493 = vmatprep.subr.bf16.mxu1 %v10170_v48  ;;  %v7160_v50 = vpop.f32.mrf.mxu0  ;;  %v1259_v48 = vld [vmem:[#allocation2 + $0xca8] sm:$0xff]  ;;  %v10010_v13 = vcombine.high %v1127_v63, %v1131_v1  ;;  %v10009_v23 = vcombine.low %v1127_v63, %v1131_v1 }
 0x2b4   :  { %v11716_v39 = vadd.f32 %v7199_v30, %v7159_v29  ;;  %7453 = vmatpush1.bf16.msra.mxu0 %v10041_v22  ;;  %v10138_v14 = vcombine.high %v1255_v2, %v1259_v48  ;;  %v1119_v18 = vld [vmem:[#allocation2 + $0x848] sm:$0xff] }
 0x2b5   :  { %v7201_v42 = vpop.f32.mrf.mxu1  ;;  %v7161_v44 = vpop.f32.mrf.mxu0  ;;  %7454 = vmatprep.subr.bf16.mxu0 %v10034_v26  ;;  %v1123_v20 = vld [vmem:[#allocation2 + $0x868] sm:$0xff] }
 0x2b6   :  { %7494 = vmatpush1.bf16.msra.mxu1 %v10169_v25  ;;  %v1247_v21 = vld [vmem:[#allocation2 + $0xc48] sm:$0xff]  ;;  %v10137_v25 = vcombine.low %v1255_v2, %v1259_v48  ;;  %v10002_v26 = vcombine.high %v1119_v18, %v1123_v20  ;;  %v10001_v50 = vcombine.low %v1119_v18, %v1123_v20 }
 0x2b7   :  { %v7202_v49 = vpop.f32.mrf.mxu1  ;;  %7495 = vmatprep.subr.bf16.mxu1 %v10162_v31  ;;  %v1251_v22 = vld [vmem:[#allocation2 + $0xc68] sm:$0xff] }
 0x2b8   :  { %7455 = vmatpush1.bf16.msra.mxu0 %v10033_v43  ;;  %v10130_v29 = vcombine.high %v1247_v21, %v1251_v22  ;;  %v1111_v30 = vld [vmem:[#allocation2 + $0x808] sm:$0xff]  ;;  %v10129_v36 = vcombine.low %v1247_v21, %v1251_v22 }
 0x2b9   :  { %7456 = vmatprep.subr.bf16.mxu0 %v10026_v47  ;;  %v1115_v31 = vld [vmem:[#allocation2 + $0x828] sm:$0xff] }
 0x2ba   :  { %7496 = vmatpush1.bf16.msra.mxu1 %v10161_v60  ;;  %v1243_v34 = vld [vmem:[#allocation2 + $0xc28] sm:$0xff]  ;;  %v9994_v38 = vcombine.high %v1111_v30, %v1115_v31  ;;  %v9993_v49 = vcombine.low %v1111_v30, %v1115_v31 }
 0x2bb   :  { %7497 = vmatprep.subr.bf16.mxu1 %v10154_v52  ;;  %v10122_v42 = vcombine.high %v1239_v32, %v1243_v34  ;;  %v1231_v43 = vld [vmem:[#allocation2 + $0xbc8] sm:$0xff]  ;;  %v10121_v52 = vcombine.low %v1239_v32, %v1243_v34 }
 0x2bc   :  { %7457 = vmatpush1.bf16.msra.mxu0 %v10025_v57  ;;  %v1235_v44 = vld [vmem:[#allocation2 + $0xbe8] sm:$0xff] }
 0x2bd   :  { %7458 = vmatprep.subr.bf16.mxu0 %v10018_v59  ;;  %v1359_v60 = vld [vmem:[#allocation2 + $0xfc8] sm:$0xff]  ;;  %v10114_v53 = vcombine.high %v1231_v43, %v1235_v44  ;;  %v10113_v59 = vcombine.low %v1231_v43, %v1235_v44 }
 0x2be   :  { %7498 = vmatpush1.bf16.msra.mxu1 %v10153_v58  ;;  %v1363_v47 = vld [vmem:[#allocation2 + $0xfe8] sm:$0xff] }
 0x2bf   :  { %7499 = vmatprep.subr.bf16.mxu1 %v10146_v61  ;;  %v10242_v54 = vcombine.high %v1359_v60, %v1363_v47  ;;  %v1223_v55 = vld [vmem:[#allocation2 + $0xb88] sm:$0xff]  ;;  %v10241_v61 = vcombine.low %v1359_v60, %v1363_v47 }
 0x2c0   :  { %7459 = vmatpush1.bf16.msra.mxu0 %v10017_v5  ;;  %v1227_v56 = vld [vmem:[#allocation2 + $0xba8] sm:$0xff] }
 0x2c1   :  { %7460 = vmatprep.subr.bf16.mxu0 %v10010_v13  ;;  %v1351_v57 = vld [vmem:[#allocation2 + $0xf88] sm:$0xff]  ;;  %v10106_v63 = vcombine.high %v1223_v55, %v1227_v56  ;;  %v10105_v13 = vcombine.low %v1223_v55, %v1227_v56 }
 0x2c2   :  { %7500 = vmatpush1.bf16.msra.mxu1 %v10145_v9  ;;  %v1355_v58 = vld [vmem:[#allocation2 + $0xfa8] sm:$0xff] }
 0x2c3   :  { %7501 = vmatprep.subr.bf16.mxu1 %v10138_v14  ;;  %v10234_v1 = vcombine.high %v1351_v57, %v1355_v58  ;;  %v1215_v2 = vld [vmem:[#allocation2 + $0xb48] sm:$0xff]  ;;  %v10233_v14 = vcombine.low %v1351_v57, %v1355_v58 }
 0x2c4   :  { %7461 = vmatpush1.bf16.msra.mxu0 %v10009_v23  ;;  %v1219_v48 = vld [vmem:[#allocation2 + $0xb68] sm:$0xff] }
 0x2c5   :  { %7462 = vmatprep.subr.bf16.mxu0 %v10002_v26  ;;  %v1343_v5 = vld [vmem:[#allocation2 + $0xf48] sm:$0xff]  ;;  %v10098_v18 = vcombine.high %v1215_v2, %v1219_v48  ;;  %v10097_v26 = vcombine.low %v1215_v2, %v1219_v48 }
 0x2c6   :  { %7502 = vmatpush1.bf16.msra.mxu1 %v10137_v25  ;;  %v1347_v9 = vld [vmem:[#allocation2 + $0xf68] sm:$0xff] }
 0x2c7   :  { %7503 = vmatprep.subr.bf16.mxu1 %v10130_v29  ;;  %v10226_v20 = vcombine.high %v1343_v5, %v1347_v9  ;;  %v1207_v21 = vld [vmem:[#allocation2 + $0xb08] sm:$0xff]  ;;  %v10225_v29 = vcombine.low %v1343_v5, %v1347_v9 }
 0x2c8   :  { %7463 = vmatpush1.bf16.msra.mxu0 %v10001_v50  ;;  %v1211_v22 = vld [vmem:[#allocation2 + $0xb28] sm:$0xff] }
 0x2c9   :  { %7464 = vmatprep.subr.bf16.mxu0 %v9994_v38  ;;  %v1335_v23 = vld [vmem:[#allocation2 + $0xf08] sm:$0xff]  ;;  %v10090_v30 = vcombine.high %v1207_v21, %v1211_v22  ;;  %v10089_v38 = vcombine.low %v1207_v21, %v1211_v22 }
 0x2ca   :  { %7504 = vmatpush1.bf16.msra.mxu1 %v10129_v36  ;;  %v1339_v25 = vld [vmem:[#allocation2 + $0xf28] sm:$0xff] }
 0x2cb   :  { %7505 = vmatprep.subr.bf16.mxu1 %v10122_v42  ;;  %v10218_v31 = vcombine.high %v1335_v23, %v1339_v25  ;;  %v1199_v32 = vld [vmem:[#allocation2 + $0xac8] sm:$0xff]  ;;  %v10217_v42 = vcombine.low %v1335_v23, %v1339_v25 }
 0x2cc   :  { %7465 = vmatpush1.bf16.msra.mxu0 %v9993_v49  ;;  %v1203_v34 = vld [vmem:[#allocation2 + $0xae8] sm:$0xff] }
 0x2cd   :  { %7466 = vmatprep.subr.bf16.mxu0 %v10114_v53  ;;  %v1327_v50 = vld [vmem:[#allocation2 + $0xec8] sm:$0xff]  ;;  %v10082_v43 = vcombine.high %v1199_v32, %v1203_v34  ;;  %v10081_v53 = vcombine.low %v1199_v32, %v1203_v34 }
 0x2ce   :  { %7506 = vmatpush1.bf16.msra.mxu1 %v10121_v52  ;;  %v1331_v36 = vld [vmem:[#allocation2 + $0xee8] sm:$0xff] }
 0x2cf   :  { %7507 = vmatprep.subr.bf16.mxu1 %v10242_v54  ;;  %v10210_v44 = vcombine.high %v1327_v50, %v1331_v36  ;;  %v1191_v60 = vld [vmem:[#allocation2 + $0xa88] sm:$0xff]  ;;  %v10209_v54 = vcombine.low %v1327_v50, %v1331_v36 }
 0x2d0   :  { %7467 = vmatpush2.bf16.msra.mxu0 %v10113_v59  ;;  %v1195_v47 = vld [vmem:[#allocation2 + $0xaa8] sm:$0xff] }
 0x2d1   :  { %7468 = vmatprep.subr.bf16.mxu0 %v10106_v63  ;;  %v1319_v49 = vld [vmem:[#allocation2 + $0xe88] sm:$0xff]  ;;  %v10074_v55 = vcombine.high %v1191_v60, %v1195_v47  ;;  %v10073_v63 = vcombine.low %v1191_v60, %v1195_v47 }
 0x2d2   :  { %7508 = vmatpush2.bf16.msra.mxu1 %v10241_v61  ;;  %v1323_v52 = vld [vmem:[#allocation2 + $0xea8] sm:$0xff] }
 0x2d3   :  { %7509 = vmatprep.subr.bf16.mxu1 %v10234_v1  ;;  %v10202_v56 = vcombine.high %v1319_v49, %v1323_v52  ;;  %v1183_v57 = vld [vmem:[#allocation2 + $0xa48] sm:$0xff]  ;;  %v10201_v1 = vcombine.low %v1319_v49, %v1323_v52 }
 0x2d4   :  { %7469 = vmatpush2.bf16.msra.mxu0 %v10105_v13  ;;  %v1187_v58 = vld [vmem:[#allocation2 + $0xa68] sm:$0xff] }
 0x2d5   :  { %7470 = vmatprep.subr.bf16.mxu0 %v10098_v18  ;;  %v1311_v59 = vld [vmem:[#allocation2 + $0xe48] sm:$0xff]  ;;  %v10066_v2 = vcombine.high %v1183_v57, %v1187_v58  ;;  %v10065_v18 = vcombine.low %v1183_v57, %v1187_v58 }
 0x2d6   :  { %7510 = vmatpush2.bf16.msra.mxu1 %v10233_v14  ;;  %v1315_v61 = vld [vmem:[#allocation2 + $0xe68] sm:$0xff] }
 0x2d7   :  { %7511 = vmatprep.subr.bf16.mxu1 %v10226_v20  ;;  %v10194_v48 = vcombine.high %v1311_v59, %v1315_v61  ;;  %v1175_v5 = vld [vmem:[#allocation2 + $0xa08] sm:$0xff]  ;;  %v10193_v20 = vcombine.low %v1311_v59, %v1315_v61 }
 0x2d8   :  { %7471 = vmatpush2.bf16.msra.mxu0 %v10097_v26  ;;  %v1179_v9 = vld [vmem:[#allocation2 + $0xa28] sm:$0xff] }
 0x2d9   :  { %7472 = vmatprep.subr.bf16.mxu0 %v10090_v30  ;;  %v1303_v13 = vld [vmem:[#allocation2 + $0xe08] sm:$0xff]  ;;  %v10058_v21 = vcombine.high %v1175_v5, %v1179_v9  ;;  %v10057_v30 = vcombine.low %v1175_v5, %v1179_v9 }
 0x2da   :  { %7512 = vmatpush2.bf16.msra.mxu1 %v10225_v29  ;;  %v1307_v14 = vld [vmem:[#allocation2 + $0xe28] sm:$0xff] }
 0x2db   :  { %7513 = vmatprep.subr.bf16.mxu1 %v10218_v31  ;;  %v10186_v22 = vcombine.high %v1303_v13, %v1307_v14  ;;  %v1423_v23 = vld [vmem:[#allocation2 + $0x11c8] sm:$0xff]  ;;  %v10185_v31 = vcombine.low %v1303_v13, %v1307_v14 }
 0x2dc   :  { %7473 = vmatpush2.bf16.msra.mxu0 %v10089_v38  ;;  %v1427_v25 = vld [vmem:[#allocation2 + $0x11e8] sm:$0xff] }
 0x2dd   :  { %7474 = vmatprep.subr.bf16.mxu0 %v10082_v43  ;;  %v1551_v26 = vld [vmem:[#allocation2 + $0x15c8] sm:$0xff]  ;;  %v10306_v32 = vcombine.high %v1423_v23, %v1427_v25  ;;  %v10305_v43 = vcombine.low %v1423_v23, %v1427_v25 }
 0x2de   :  { %7514 = vmatpush2.bf16.msra.mxu1 %v10217_v42  ;;  %v1555_v29 = vld [vmem:[#allocation2 + $0x15e8] sm:$0xff] }
 0x2df   :  { %7515 = vmatprep.subr.bf16.mxu1 %v10210_v44  ;;  %v10434_v34 = vcombine.high %v1551_v26, %v1555_v29  ;;  %v1415_v50 = vld [vmem:[#allocation2 + $0x1188] sm:$0xff]  ;;  %v10433_v44 = vcombine.low %v1551_v26, %v1555_v29 }
 0x2e0   :  { %7475 = vmatpush2.bf16.msra.mxu0 %v10081_v53  ;;  %v1419_v36 = vld [vmem:[#allocation2 + $0x11a8] sm:$0xff] }
 0x2e1   :  { %7476 = vmatprep.subr.bf16.mxu0 %v10074_v55  ;;  %v1543_v38 = vld [vmem:[#allocation2 + $0x1588] sm:$0xff]  ;;  %v10298_v60 = vcombine.high %v1415_v50, %v1419_v36  ;;  %v10297_v58 = vcombine.low %v1415_v50, %v1419_v36 }
 0x2e2   :  { %7516 = vmatpush2.bf16.msra.mxu1 %v10209_v54  ;;  %v1547_v42 = vld [vmem:[#allocation2 + $0x15a8] sm:$0xff] }
 0x2e3   :  { %7517 = vmatprep.subr.bf16.mxu1 %v10202_v56  ;;  %v10426_v47 = vcombine.high %v1543_v38, %v1547_v42  ;;  %v1407_v49 = vld [vmem:[#allocation2 + $0x1148] sm:$0xff]  ;;  %v10425_v61 = vcombine.low %v1543_v38, %v1547_v42 }
 0x2e4   :  { %7477 = vmatpush2.bf16.msra.mxu0 %v10073_v63  ;;  %v1411_v52 = vld [vmem:[#allocation2 + $0x1168] sm:$0xff] }
 0x2e5   :  { %7478 = vmatprep.subr.bf16.mxu0 %v10066_v2  ;;  %v1535_v54 = vld [vmem:[#allocation2 + $0x1548] sm:$0xff]  ;;  %v10290_v63 = vcombine.high %v1407_v49, %v1411_v52 }
 0x2e6   :  { %7518 = vmatpush2.bf16.msra.mxu1 %v10201_v1  ;;  %v1539_v55 = vld [vmem:[#allocation2 + $0x1568] sm:$0xff] }
 0x2e7   :  { %7519 = vmatprep.subr.bf16.mxu1 %v10194_v48  ;;  %v10418_v5 = vcombine.high %v1535_v54, %v1539_v55  ;;  %v1399_v9 = vld [vmem:[#allocation2 + $0x1108] sm:$0xff] }
 0x2e8   :  { %7479 = vmatpush2.bf16.msra.mxu0 %v10065_v18  ;;  %v1403_v13 = vld [vmem:[#allocation2 + $0x1128] sm:$0xff] }
 0x2e9   :  { %7480 = vmatprep.subr.bf16.mxu0 %v10058_v21  ;;  %v1527_v14 = vld [vmem:[#allocation2 + $0x1508] sm:$0xff]  ;;  %v10282_v25 = vcombine.high %v1399_v9, %v1403_v13  ;;  %v10281_v50 = vcombine.low %v1399_v9, %v1403_v13 }
 0x2ea   :  { %7520 = vmatpush2.bf16.msra.mxu1 %v10193_v20  ;;  %v1531_v18 = vld [vmem:[#allocation2 + $0x1528] sm:$0xff] }
 0x2eb   :  { %7521 = vmatprep.subr.bf16.mxu1 %v10186_v22  ;;  %v10289_v22 = vcombine.low %v1407_v49, %v1411_v52  ;;  %v10410_v29 = vcombine.high %v1527_v14, %v1531_v18  ;;  %v10409_v36 = vcombine.low %v1527_v14, %v1531_v18  ;;  %v1495_v9 = vld [vmem:[#allocation2 + $0x1408] sm:$0xff] }
 0x2ec   :  { %7481 = vmatpush2.bf16.msra.mxu0 %v10057_v30  ;;  %v1391_v30 = vld [vmem:[#allocation2 + $0x10c8] sm:$0xff] }
 0x2ed   :  { %7532 = vmatprep.subr.bf16.mxu0 %v10306_v32  ;;  %v1519_v32 = vld [vmem:[#allocation2 + $0x14c8] sm:$0xff] }
 0x2ee   :  { %7522 = vmatpush2.bf16.msra.mxu1 %v10185_v31  ;;  %v1395_v31 = vld [vmem:[#allocation2 + $0x10e8] sm:$0xff] }
 0x2ef   :  { %7573 = vmatprep.subr.bf16.mxu1 %v10434_v34  ;;  %v7238_v53 = vpop.f32.mrf.mxu0  ;;  %7483 = vmatmul.mubr.bf16.vlgmr.msra.gmra.mxu0 %v11648_v62  ;;  %v1523_v34 = vld [vmem:[#allocation2 + $0x14e8] sm:$0xff]  ;;  %v10274_v38 = vcombine.high %v1391_v30, %v1395_v31  ;;  %v10273_v49 = vcombine.low %v1391_v30, %v1395_v31 }
 0x2f0   :  { %v7239_v56 = vadd.f32 %v7238_v53, %v11711_v27  ;;  %7533 = vmatpush1.bf16.msra.mxu0 %v10305_v43  ;;  %7564 = vmatprep.mubr.bf16.mxu0 %v11670_v46  ;;  %v10402_v42 = vcombine.high %v1519_v32, %v1523_v34  ;;  %v1383_v43 = vld [vmem:[#allocation2 + $0x1088] sm:$0xff]  ;;  %v10401_v52 = vcombine.low %v1519_v32, %v1523_v34 }
 0x2f1   :  { %v7279_v57 = vpop.f32.mrf.mxu1  ;;  %7524 = vmatmul.mubr.bf16.vlgmr.msra.gmra.mxu1 %v11650_v0  ;;  %v7240_v59 = vpop.f32.mrf.mxu0  ;;  %7534 = vmatprep.subr.bf16.mxu0 %v10298_v60  ;;  %v1511_v60 = vld [vmem:[#allocation2 + $0x1488] sm:$0xff] }
 0x2f2   :  { %7574 = vmatpush1.bf16.msra.mxu1 %v10433_v44  ;;  %v11721_v1 = vadd.f32 %v7279_v57, %v7239_v56  ;;  %v7241_v2 = vadd.f32 %v7240_v59, %v11716_v39  ;;  %7605 = vmatprep.mubr.bf16.mxu1 %v11674_v51  ;;  %v10417_v39 = vcombine.low %v1535_v54, %v1539_v55  ;;  %v1387_v44 = vld [vmem:[#allocation2 + $0x10a8] sm:$0xff] }
 0x2f3   :  { %v7281_v48 = vpop.f32.mrf.mxu1  ;;  %7575 = vmatprep.subr.bf16.mxu1 %v10426_v47  ;;  %v7242_v27 = vpop.f32.mrf.mxu0  ;;  %v1515_v47 = vld [vmem:[#allocation2 + $0x14a8] sm:$0xff]  ;;  %v10266_v53 = vcombine.high %v1383_v43, %v1387_v44  ;;  %v10265_v59 = vcombine.low %v1383_v43, %v1387_v44 }
 0x2f4   :  { %v11726_v20 = vadd.f32 %v7281_v48, %v7241_v2  ;;  %7535 = vmatpush1.bf16.msra.mxu0 %v10297_v58  ;;  %v10394_v54 = vcombine.high %v1511_v60, %v1515_v47  ;;  %v1375_v55 = vld [vmem:[#allocation2 + $0x1048] sm:$0xff] }
 0x2f5   :  { %v7283_v21 = vpop.f32.mrf.mxu1  ;;  %v7243_v23 = vpop.f32.mrf.mxu0  ;;  %7536 = vmatprep.subr.bf16.mxu0 %v10290_v63  ;;  %v1379_v56 = vld [vmem:[#allocation2 + $0x1068] sm:$0xff] }
 0x2f6   :  { %7576 = vmatpush1.bf16.msra.mxu1 %v10425_v61  ;;  %v1503_v57 = vld [vmem:[#allocation2 + $0x1448] sm:$0xff]  ;;  %v10393_v61 = vcombine.low %v1511_v60, %v1515_v47  ;;  %v10258_v63 = vcombine.high %v1375_v55, %v1379_v56  ;;  %v10257_v27 = vcombine.low %v1375_v55, %v1379_v56 }
 0x2f7   :  { %v7284_v26 = vpop.f32.mrf.mxu1  ;;  %7577 = vmatprep.subr.bf16.mxu1 %v10418_v5  ;;  %v1507_v58 = vld [vmem:[#allocation2 + $0x1468] sm:$0xff] }
 0x2f8   :  { %7537 = vmatpush1.bf16.msra.mxu0 %v10289_v22  ;;  %v10386_v2 = vcombine.high %v1503_v57, %v1507_v58  ;;  %v1367_v48 = vld [vmem:[#allocation2 + $0x1008] sm:$0xff]  ;;  %v10385_v14 = vcombine.low %v1503_v57, %v1507_v58 }
 0x2f9   :  { %7538 = vmatprep.subr.bf16.mxu0 %v10282_v25  ;;  %v1371_v5 = vld [vmem:[#allocation2 + $0x1028] sm:$0xff] }
 0x2fa   :  { %7578 = vmatpush1.bf16.msra.mxu1 %v10417_v39  ;;  %v1499_v13 = vld [vmem:[#allocation2 + $0x1428] sm:$0xff]  ;;  %v10250_v18 = vcombine.high %v1367_v48, %v1371_v5  ;;  %v10249_v26 = vcombine.low %v1367_v48, %v1371_v5 }
 0x2fb   :  { %7579 = vmatprep.subr.bf16.mxu1 %v10410_v29  ;;  %v10378_v21 = vcombine.high %v1495_v9, %v1499_v13  ;;  %v1487_v22 = vld [vmem:[#allocation2 + $0x13c8] sm:$0xff]  ;;  %v10377_v29 = vcombine.low %v1495_v9, %v1499_v13 }
 0x2fc   :  { %7539 = vmatpush1.bf16.msra.mxu0 %v10281_v50  ;;  %v1491_v23 = vld [vmem:[#allocation2 + $0x13e8] sm:$0xff] }
 0x2fd   :  { %7540 = vmatprep.subr.bf16.mxu0 %v10274_v38  ;;  %v1615_v39 = vld [vmem:[#allocation2 + $0x17c8] sm:$0xff]  ;;  %v10370_v30 = vcombine.high %v1487_v22, %v1491_v23  ;;  %v10369_v38 = vcombine.low %v1487_v22, %v1491_v23 }
 0x2fe   :  { %7580 = vmatpush1.bf16.msra.mxu1 %v10409_v36  ;;  %v1619_v25 = vld [vmem:[#allocation2 + $0x17e8] sm:$0xff] }
 0x2ff   :  { %7581 = vmatprep.subr.bf16.mxu1 %v10402_v42  ;;  %v10498_v31 = vcombine.high %v1615_v39, %v1619_v25  ;;  %v1479_v32 = vld [vmem:[#allocation2 + $0x1388] sm:$0xff]  ;;  %v10497_v42 = vcombine.low %v1615_v39, %v1619_v25 }
 0x300   :  { %7541 = vmatpush1.bf16.msra.mxu0 %v10273_v49  ;;  %v1483_v34 = vld [vmem:[#allocation2 + $0x13a8] sm:$0xff] }
 0x301   :  { %7542 = vmatprep.subr.bf16.mxu0 %v10266_v53  ;;  %v1607_v50 = vld [vmem:[#allocation2 + $0x1788] sm:$0xff]  ;;  %v10362_v43 = vcombine.high %v1479_v32, %v1483_v34  ;;  %v10361_v53 = vcombine.low %v1479_v32, %v1483_v34 }
 0x302   :  { %7582 = vmatpush1.bf16.msra.mxu1 %v10401_v52  ;;  %v1611_v36 = vld [vmem:[#allocation2 + $0x17a8] sm:$0xff] }
 0x303   :  { %7583 = vmatprep.subr.bf16.mxu1 %v10394_v54  ;;  %v10490_v44 = vcombine.high %v1607_v50, %v1611_v36  ;;  %v1471_v60 = vld [vmem:[#allocation2 + $0x1348] sm:$0xff]  ;;  %v10489_v54 = vcombine.low %v1607_v50, %v1611_v36 }
 0x304   :  { %7543 = vmatpush1.bf16.msra.mxu0 %v10265_v59  ;;  %v1475_v47 = vld [vmem:[#allocation2 + $0x1368] sm:$0xff] }
 0x305   :  { %7544 = vmatprep.subr.bf16.mxu0 %v10258_v63  ;;  %v1599_v49 = vld [vmem:[#allocation2 + $0x1748] sm:$0xff]  ;;  %v10354_v55 = vcombine.high %v1471_v60, %v1475_v47  ;;  %v10353_v63 = vcombine.low %v1471_v60, %v1475_v47 }
 0x306   :  { %7584 = vmatpush1.bf16.msra.mxu1 %v10393_v61  ;;  %v1603_v52 = vld [vmem:[#allocation2 + $0x1768] sm:$0xff] }
 0x307   :  { %7585 = vmatprep.subr.bf16.mxu1 %v10386_v2  ;;  %v10482_v56 = vcombine.high %v1599_v49, %v1603_v52  ;;  %v1463_v57 = vld [vmem:[#allocation2 + $0x1308] sm:$0xff]  ;;  %v10481_v2 = vcombine.low %v1599_v49, %v1603_v52 }
 0x308   :  { %7545 = vmatpush1.bf16.msra.mxu0 %v10257_v27  ;;  %v1467_v58 = vld [vmem:[#allocation2 + $0x1328] sm:$0xff] }
 0x309   :  { %7546 = vmatprep.subr.bf16.mxu0 %v10250_v18  ;;  %v1591_v59 = vld [vmem:[#allocation2 + $0x1708] sm:$0xff]  ;;  %v10346_v48 = vcombine.high %v1463_v57, %v1467_v58  ;;  %v10345_v18 = vcombine.low %v1463_v57, %v1467_v58 }
 0x30a   :  { %7586 = vmatpush1.bf16.msra.mxu1 %v10385_v14  ;;  %v1595_v61 = vld [vmem:[#allocation2 + $0x1728] sm:$0xff] }
 0x30b   :  { %7587 = vmatprep.subr.bf16.mxu1 %v10378_v21  ;;  %v10474_v5 = vcombine.high %v1591_v59, %v1595_v61  ;;  %v1455_v9 = vld [vmem:[#allocation2 + $0x12c8] sm:$0xff]  ;;  %v10473_v21 = vcombine.low %v1591_v59, %v1595_v61 }
 0x30c   :  { %7547 = vmatpush1.bf16.msra.mxu0 %v10249_v26  ;;  %v1459_v13 = vld [vmem:[#allocation2 + $0x12e8] sm:$0xff] }
 0x30d   :  { %7548 = vmatprep.subr.bf16.mxu0 %v10370_v30  ;;  %v1583_v27 = vld [vmem:[#allocation2 + $0x16c8] sm:$0xff]  ;;  %v10338_v22 = vcombine.high %v1455_v9, %v1459_v13  ;;  %v10337_v30 = vcombine.low %v1455_v9, %v1459_v13 }
 0x30e   :  { %7588 = vmatpush1.bf16.msra.mxu1 %v10377_v29  ;;  %v1587_v14 = vld [vmem:[#allocation2 + $0x16e8] sm:$0xff] }
 0x30f   :  { %7589 = vmatprep.subr.bf16.mxu1 %v10498_v31  ;;  %v10466_v23 = vcombine.high %v1583_v27, %v1587_v14  ;;  %v1447_v39 = vld [vmem:[#allocation2 + $0x1288] sm:$0xff]  ;;  %v10465_v31 = vcombine.low %v1583_v27, %v1587_v14 }
 0x310   :  { %7549 = vmatpush2.bf16.msra.mxu0 %v10369_v38  ;;  %v1451_v25 = vld [vmem:[#allocation2 + $0x12a8] sm:$0xff] }
 0x311   :  { %7550 = vmatprep.subr.bf16.mxu0 %v10362_v43  ;;  %v1575_v26 = vld [vmem:[#allocation2 + $0x1688] sm:$0xff]  ;;  %v10330_v32 = vcombine.high %v1447_v39, %v1451_v25  ;;  %v10329_v43 = vcombine.low %v1447_v39, %v1451_v25 }
 0x312   :  { %7590 = vmatpush2.bf16.msra.mxu1 %v10497_v42  ;;  %v1579_v29 = vld [vmem:[#allocation2 + $0x16a8] sm:$0xff] }
 0x313   :  { %7591 = vmatprep.subr.bf16.mxu1 %v10490_v44  ;;  %v10458_v34 = vcombine.high %v1575_v26, %v1579_v29  ;;  %v1439_v50 = vld [vmem:[#allocation2 + $0x1248] sm:$0xff]  ;;  %v10457_v44 = vcombine.low %v1575_v26, %v1579_v29 }
 0x314   :  { %7551 = vmatpush2.bf16.msra.mxu0 %v10361_v53  ;;  %v1443_v36 = vld [vmem:[#allocation2 + $0x1268] sm:$0xff] }
 0x315   :  { %7552 = vmatprep.subr.bf16.mxu0 %v10354_v55  ;;  %v1567_v38 = vld [vmem:[#allocation2 + $0x1648] sm:$0xff]  ;;  %v10322_v60 = vcombine.high %v1439_v50, %v1443_v36  ;;  %v10321_v55 = vcombine.low %v1439_v50, %v1443_v36 }
 0x316   :  { %7592 = vmatpush2.bf16.msra.mxu1 %v10489_v54  ;;  %v1571_v42 = vld [vmem:[#allocation2 + $0x1668] sm:$0xff] }
 0x317   :  { %7593 = vmatprep.subr.bf16.mxu1 %v10482_v56  ;;  %v10450_v47 = vcombine.high %v1567_v38, %v1571_v42  ;;  %v1431_v49 = vld [vmem:[#allocation2 + $0x1208] sm:$0xff]  ;;  %v10449_v56 = vcombine.low %v1567_v38, %v1571_v42 }
 0x318   :  { %7553 = vmatpush2.bf16.msra.mxu0 %v10353_v63  ;;  %v1435_v52 = vld [vmem:[#allocation2 + $0x1228] sm:$0xff] }
 0x319   :  { %7554 = vmatprep.subr.bf16.mxu0 %v10346_v48  ;;  %v1559_v53 = vld [vmem:[#allocation2 + $0x1608] sm:$0xff]  ;;  %v10314_v57 = vcombine.high %v1431_v49, %v1435_v52  ;;  %v10313_v48 = vcombine.low %v1431_v49, %v1435_v52 }
 0x31a   :  { %7594 = vmatpush2.bf16.msra.mxu1 %v10481_v2  ;;  %v1563_v54 = vld [vmem:[#allocation2 + $0x1628] sm:$0xff] }
 0x31b   :  { %7595 = vmatprep.subr.bf16.mxu1 %v10474_v5  ;;  %v10442_v58 = vcombine.high %v1559_v53, %v1563_v54  ;;  %v1679_v59 = vld [vmem:[#allocation2 + $0x19c8] sm:$0xff]  ;;  %v10441_v5 = vcombine.low %v1559_v53, %v1563_v54 }
 0x31c   :  { %7555 = vmatpush2.bf16.msra.mxu0 %v10345_v18  ;;  %v1683_v61 = vld [vmem:[#allocation2 + $0x19e8] sm:$0xff] }
 0x31d   :  { %7556 = vmatprep.subr.bf16.mxu0 %v10338_v22  ;;  %v1807_v63 = vld [vmem:[#allocation2 + $0x1dc8] sm:$0xff]  ;;  %v10562_v9 = vcombine.high %v1679_v59, %v1683_v61  ;;  %v10561_v22 = vcombine.low %v1679_v59, %v1683_v61 }
 0x31e   :  { %7596 = vmatpush2.bf16.msra.mxu1 %v10473_v21  ;;  %v1811_v2 = vld [vmem:[#allocation2 + $0x1de8] sm:$0xff] }
 0x31f   :  { %7597 = vmatprep.subr.bf16.mxu1 %v10466_v23  ;;  %v10690_v13 = vcombine.high %v1807_v63, %v1811_v2  ;;  %v1671_v27 = vld [vmem:[#allocation2 + $0x1988] sm:$0xff]  ;;  %v10689_v23 = vcombine.low %v1807_v63, %v1811_v2 }
 0x320   :  { %7557 = vmatpush2.bf16.msra.mxu0 %v10337_v30  ;;  %v1675_v14 = vld [vmem:[#allocation2 + $0x19a8] sm:$0xff] }
 0x321   :  { %7558 = vmatprep.subr.bf16.mxu0 %v10330_v32  ;;  %v1799_v18 = vld [vmem:[#allocation2 + $0x1d88] sm:$0xff]  ;;  %v10554_v39 = vcombine.high %v1671_v27, %v1675_v14  ;;  %v10553_v36 = vcombine.low %v1671_v27, %v1675_v14 }
 0x322   :  { %7598 = vmatpush2.bf16.msra.mxu1 %v10465_v31  ;;  %v1803_v21 = vld [vmem:[#allocation2 + $0x1da8] sm:$0xff] }
 0x323   :  { %7599 = vmatprep.subr.bf16.mxu1 %v10458_v34  ;;  %v10682_v25 = vcombine.high %v1799_v18, %v1803_v21  ;;  %v1663_v26 = vld [vmem:[#allocation2 + $0x1948] sm:$0xff]  ;;  %v10681_v42 = vcombine.low %v1799_v18, %v1803_v21 }
 0x324   :  { %7559 = vmatpush2.bf16.msra.mxu0 %v10329_v43  ;;  %v1667_v29 = vld [vmem:[#allocation2 + $0x1968] sm:$0xff] }
 0x325   :  { %7560 = vmatprep.subr.bf16.mxu0 %v10322_v60  ;;  %v1791_v31 = vld [vmem:[#allocation2 + $0x1d48] sm:$0xff]  ;;  %v10546_v43 = vcombine.high %v1663_v26, %v1667_v29 }
 0x326   :  { %7600 = vmatpush2.bf16.msra.mxu1 %v10457_v44  ;;  %v1795_v32 = vld [vmem:[#allocation2 + $0x1d68] sm:$0xff] }
 0x327   :  { %7601 = vmatprep.subr.bf16.mxu1 %v10450_v47  ;;  %v10674_v49 = vcombine.high %v1791_v31, %v1795_v32  ;;  %v1655_v52 = vld [vmem:[#allocation2 + $0x1908] sm:$0xff] }
 0x328   :  { %7561 = vmatpush2.bf16.msra.mxu0 %v10321_v55  ;;  %v1659_v53 = vld [vmem:[#allocation2 + $0x1928] sm:$0xff] }
 0x329   :  { %7562 = vmatprep.subr.bf16.mxu0 %v10314_v57  ;;  %v1783_v54 = vld [vmem:[#allocation2 + $0x1d08] sm:$0xff]  ;;  %v10538_v61 = vcombine.high %v1655_v52, %v1659_v53  ;;  %v10537_v27 = vcombine.low %v1655_v52, %v1659_v53 }
 0x32a   :  { %7602 = vmatpush2.bf16.msra.mxu1 %v10449_v56  ;;  %v1787_v55 = vld [vmem:[#allocation2 + $0x1d28] sm:$0xff] }
 0x32b   :  { %7603 = vmatprep.subr.bf16.mxu1 %v10442_v58  ;;  %v10545_v58 = vcombine.low %v1663_v26, %v1667_v29  ;;  %v10666_v2 = vcombine.high %v1783_v54, %v1787_v55  ;;  %v10665_v14 = vcombine.low %v1783_v54, %v1787_v55  ;;  %v1751_v52 = vld [vmem:[#allocation2 + $0x1c08] sm:$0xff] }
 0x32c   :  { %7563 = vmatpush2.bf16.msra.mxu0 %v10313_v48  ;;  %v1647_v48 = vld [vmem:[#allocation2 + $0x18c8] sm:$0xff] }
 0x32d   :  { %7614 = vmatprep.subr.bf16.mxu0 %v10562_v9  ;;  %v1775_v9 = vld [vmem:[#allocation2 + $0x1cc8] sm:$0xff] }
 0x32e   :  { %7604 = vmatpush2.bf16.msra.mxu1 %v10441_v5  ;;  %v1651_v5 = vld [vmem:[#allocation2 + $0x18e8] sm:$0xff] }
 0x32f   :  { %7655 = vmatprep.subr.bf16.mxu1 %v10690_v13  ;;  %v7320_v30 = vpop.f32.mrf.mxu0  ;;  %7565 = vmatmul.mubr.bf16.vlgmr.msra.gmra.mxu0 %v11664_v35  ;;  %v1779_v13 = vld [vmem:[#allocation2 + $0x1ce8] sm:$0xff]  ;;  %v10530_v18 = vcombine.high %v1647_v48, %v1651_v5  ;;  %v10529_v26 = vcombine.low %v1647_v48, %v1651_v5 }
 0x330   :  { %v7321_v34 = vadd.f32 %v7320_v30, %v11721_v1  ;;  %7615 = vmatpush1.bf16.msra.mxu0 %v10561_v22  ;;  %7646 = vmatprep.mubr.bf16.mxu0 %v11680_v16  ;;  %v10658_v21 = vcombine.high %v1775_v9, %v1779_v13  ;;  %v1639_v22 = vld [vmem:[#allocation2 + $0x1888] sm:$0xff]  ;;  %v10657_v29 = vcombine.low %v1775_v9, %v1779_v13 }
 0x331   :  { %v7361_v50 = vpop.f32.mrf.mxu1  ;;  %7606 = vmatmul.mubr.bf16.vlgmr.msra.gmra.mxu1 %v11666_v40  ;;  %v7322_v38 = vpop.f32.mrf.mxu0  ;;  %7616 = vmatprep.subr.bf16.mxu0 %v10554_v39  ;;  %v1767_v39 = vld [vmem:[#allocation2 + $0x1c88] sm:$0xff] }
 0x332   :  { %7656 = vmatpush1.bf16.msra.mxu1 %v10689_v23  ;;  %v11731_v44 = vadd.f32 %v7361_v50, %v7321_v34  ;;  %v7323_v60 = vadd.f32 %v7322_v38, %v11726_v20  ;;  %7687 = vmatprep.mubr.bf16.mxu1 %v11682_v19  ;;  %v10673_v20 = vcombine.low %v1791_v31, %v1795_v32  ;;  %v1643_v23 = vld [vmem:[#allocation2 + $0x18a8] sm:$0xff] }
 0x333   :  { %v7363_v47 = vpop.f32.mrf.mxu1  ;;  %7657 = vmatprep.subr.bf16.mxu1 %v10682_v25  ;;  %v7324_v1 = vpop.f32.mrf.mxu0  ;;  %v1771_v25 = vld [vmem:[#allocation2 + $0x1ca8] sm:$0xff]  ;;  %v10522_v30 = vcombine.high %v1639_v22, %v1643_v23  ;;  %v10521_v38 = vcombine.low %v1639_v22, %v1643_v23 }
 0x334   :  { %v11736_v56 = vadd.f32 %v7363_v47, %v7323_v60  ;;  %7617 = vmatpush1.bf16.msra.mxu0 %v10553_v36  ;;  %v10650_v31 = vcombine.high %v1767_v39, %v1771_v25  ;;  %v1631_v32 = vld [vmem:[#allocation2 + $0x1848] sm:$0xff]  ;;  %vm8352_vm4 = vcmp.gt.f32.partialorder %v11731_v44, 0.0 }
 0x335   :  { %v7365_v57 = vpop.f32.mrf.mxu1  ;;  %v7325_v59 = vpop.f32.mrf.mxu0  ;;  %7618 = vmatprep.subr.bf16.mxu0 %v10546_v43  ;;  %v1635_v34 = vld [vmem:[#allocation2 + $0x1868] sm:$0xff] }
 0x336   :  { %7658 = vmatpush1.bf16.msra.mxu1 %v10681_v42  ;;  %v1759_v50 = vld [vmem:[#allocation2 + $0x1c48] sm:$0xff]  ;;  %v10649_v42 = vcombine.low %v1767_v39, %v1771_v25  ;;  %v10514_v43 = vcombine.high %v1631_v32, %v1635_v34  ;;  %v10513_v1 = vcombine.low %v1631_v32, %v1635_v34  ;;  %vm8353_vm2 = vcmp.gt.f32.partialorder %v11736_v56, 0.0 }
 0x337   :  { %v7366_v63 = vpop.f32.mrf.mxu1  ;;  %7659 = vmatprep.subr.bf16.mxu1 %v10674_v49  ;;  %v1763_v36 = vld [vmem:[#allocation2 + $0x1c68] sm:$0xff] }
 0x338   :  { %7619 = vmatpush1.bf16.msra.mxu0 %v10545_v58  ;;  %v10642_v60 = vcombine.high %v1759_v50, %v1763_v36  ;;  %v1623_v47 = vld [vmem:[#allocation2 + $0x1808] sm:$0xff]  ;;  %v10641_v54 = vcombine.low %v1759_v50, %v1763_v36 }
 0x339   :  { %7620 = vmatprep.subr.bf16.mxu0 %v10538_v61  ;;  %v1627_v49 = vld [vmem:[#allocation2 + $0x1828] sm:$0xff] }
 0x33a   :  { %7660 = vmatpush1.bf16.msra.mxu1 %v10673_v20  ;;  %v1755_v53 = vld [vmem:[#allocation2 + $0x1c28] sm:$0xff]  ;;  %v10506_v55 = vcombine.high %v1623_v47, %v1627_v49  ;;  %v10505_v63 = vcombine.low %v1623_v47, %v1627_v49 }
 0x33b   :  { %7661 = vmatprep.subr.bf16.mxu1 %v10666_v2  ;;  %v10634_v57 = vcombine.high %v1751_v52, %v1755_v53  ;;  %v1743_v58 = vld [vmem:[#allocation2 + $0x1bc8] sm:$0xff]  ;;  %v10633_v2 = vcombine.low %v1751_v52, %v1755_v53 }
 0x33c   :  { %7621 = vmatpush1.bf16.msra.mxu0 %v10537_v27  ;;  %v1747_v59 = vld [vmem:[#allocation2 + $0x1be8] sm:$0xff] }
 0x33d   :  { %7622 = vmatprep.subr.bf16.mxu0 %v10530_v18  ;;  %v1871_v20 = vld [vmem:[#allocation2 + $0x1fc8] sm:$0xff]  ;;  %v10626_v48 = vcombine.high %v1743_v58, %v1747_v59  ;;  %v10625_v18 = vcombine.low %v1743_v58, %v1747_v59 }
 0x33e   :  { %7662 = vmatpush1.bf16.msra.mxu1 %v10665_v14  ;;  %v1875_v61 = vld [vmem:[#allocation2 + $0x1fe8] sm:$0xff] }
 0x33f   :  { %7663 = vmatprep.subr.bf16.mxu1 %v10658_v21  ;;  %v10754_v5 = vcombine.high %v1871_v20, %v1875_v61  ;;  %v1735_v9 = vld [vmem:[#allocation2 + $0x1b88] sm:$0xff]  ;;  %v10753_v21 = vcombine.low %v1871_v20, %v1875_v61 }
 0x340   :  { %7623 = vmatpush1.bf16.msra.mxu0 %v10529_v26  ;;  %v1739_v13 = vld [vmem:[#allocation2 + $0x1ba8] sm:$0xff] }
 0x341   :  { %7624 = vmatprep.subr.bf16.mxu0 %v10522_v30  ;;  %v1863_v27 = vld [vmem:[#allocation2 + $0x1f88] sm:$0xff]  ;;  %v10618_v22 = vcombine.high %v1735_v9, %v1739_v13  ;;  %v10617_v30 = vcombine.low %v1735_v9, %v1739_v13 }
 0x342   :  { %7664 = vmatpush1.bf16.msra.mxu1 %v10657_v29  ;;  %v1867_v14 = vld [vmem:[#allocation2 + $0x1fa8] sm:$0xff] }
 0x343   :  { %7665 = vmatprep.subr.bf16.mxu1 %v10650_v31  ;;  %v10746_v23 = vcombine.high %v1863_v27, %v1867_v14  ;;  %v1727_v39 = vld [vmem:[#allocation2 + $0x1b48] sm:$0xff]  ;;  %v10745_v31 = vcombine.low %v1863_v27, %v1867_v14 }
 0x344   :  { %7625 = vmatpush1.bf16.msra.mxu0 %v10521_v38  ;;  %v1731_v25 = vld [vmem:[#allocation2 + $0x1b68] sm:$0xff] }
 0x345   :  { %7626 = vmatprep.subr.bf16.mxu0 %v10514_v43  ;;  %v1855_v26 = vld [vmem:[#allocation2 + $0x1f48] sm:$0xff]  ;;  %v10610_v32 = vcombine.high %v1727_v39, %v1731_v25  ;;  %v10609_v43 = vcombine.low %v1727_v39, %v1731_v25 }
 0x346   :  { %7666 = vmatpush1.bf16.msra.mxu1 %v10649_v42  ;;  %v1859_v29 = vld [vmem:[#allocation2 + $0x1f68] sm:$0xff] }
 0x347   :  { %7667 = vmatprep.subr.bf16.mxu1 %v10642_v60  ;;  %v10738_v34 = vcombine.high %v1855_v26, %v1859_v29  ;;  %v1719_v50 = vld [vmem:[#allocation2 + $0x1b08] sm:$0xff]  ;;  %v10737_v60 = vcombine.low %v1855_v26, %v1859_v29 }
 0x348   :  { %7627 = vmatpush1.bf16.msra.mxu0 %v10513_v1  ;;  %v1723_v36 = vld [vmem:[#allocation2 + $0x1b28] sm:$0xff] }
 0x349   :  { %7628 = vmatprep.subr.bf16.mxu0 %v10506_v55  ;;  %v1847_v38 = vld [vmem:[#allocation2 + $0x1f08] sm:$0xff]  ;;  %v10602_v47 = vcombine.high %v1719_v50, %v1723_v36  ;;  %v10601_v55 = vcombine.low %v1719_v50, %v1723_v36 }
 0x34a   :  { %7668 = vmatpush1.bf16.msra.mxu1 %v10641_v54  ;;  %v1851_v42 = vld [vmem:[#allocation2 + $0x1f28] sm:$0xff] }
 0x34b   :  { %7669 = vmatprep.subr.bf16.mxu1 %v10634_v57  ;;  %v10730_v49 = vcombine.high %v1847_v38, %v1851_v42  ;;  %v1711_v52 = vld [vmem:[#allocation2 + $0x1ac8] sm:$0xff]  ;;  %v10729_v57 = vcombine.low %v1847_v38, %v1851_v42  ;;  %v912_v38 = vld [vmem:[#allocation2 + $0x1d0] sm:$0xff] }
 0x34c   :  { %7629 = vmatpush1.bf16.msra.mxu0 %v10505_v63  ;;  %v1715_v53 = vld [vmem:[#allocation2 + $0x1ae8] sm:$0xff]  ;;  %v916_v42 = vld [vmem:[#allocation2 + $0x1f0] sm:$0xff] }
 0x34d   :  { %7630 = vmatprep.subr.bf16.mxu0 %v10626_v48  ;;  %v1839_v1 = vld [vmem:[#allocation2 + $0x1ec8] sm:$0xff]  ;;  %v10594_v58 = vcombine.high %v1711_v52, %v1715_v53  ;;  %v10593_v48 = vcombine.low %v1711_v52, %v1715_v53  ;;  %v9796_v52 = vcombine.high %v912_v38, %v916_v42 }
 0x34e   :  { %7670 = vmatpush1.bf16.msra.mxu1 %v10633_v2  ;;  %v1843_v54 = vld [vmem:[#allocation2 + $0x1ee8] sm:$0xff] }
 0x34f   :  { %7671 = vmatprep.subr.bf16.mxu1 %v10754_v5  ;;  %v10722_v59 = vcombine.high %v1839_v1, %v1843_v54  ;;  %v1703_v20 = vld [vmem:[#allocation2 + $0x1a88] sm:$0xff]  ;;  %v10721_v5 = vcombine.low %v1839_v1, %v1843_v54  ;;  %v904_v1 = vld [vmem:[#allocation2 + $0x190] sm:$0xff] }
 0x350   :  { %7631 = vmatpush2.bf16.msra.mxu0 %v10625_v18  ;;  %v1707_v61 = vld [vmem:[#allocation2 + $0x1aa8] sm:$0xff]  ;;  %v908_v54 = vld [vmem:[#allocation2 + $0x1b0] sm:$0xff] }
 0x351   :  { %7632 = vmatprep.subr.bf16.mxu0 %v10618_v22  ;;  %v1831_v63 = vld [vmem:[#allocation2 + $0x1e88] sm:$0xff]  ;;  %v10586_v9 = vcombine.high %v1703_v20, %v1707_v61  ;;  %v10585_v22 = vcombine.low %v1703_v20, %v1707_v61  ;;  %v9795_v20 = vcombine.low %v912_v38, %v916_v42 }
 0x352   :  { %7672 = vmatpush2.bf16.msra.mxu1 %v10753_v21  ;;  %v1835_v2 = vld [vmem:[#allocation2 + $0x1ea8] sm:$0xff] }
 0x353   :  { %7673 = vmatprep.subr.bf16.mxu1 %v10746_v23  ;;  %v10714_v13 = vcombine.high %v1831_v63, %v1835_v2  ;;  %v1695_v27 = vld [vmem:[#allocation2 + $0x1a48] sm:$0xff]  ;;  %v10713_v23 = vcombine.low %v1831_v63, %v1835_v2  ;;  %v9788_v63 = vcombine.high %v904_v1, %v908_v54 }
 0x354   :  { %7633 = vmatpush2.bf16.msra.mxu0 %v10617_v30  ;;  %v1699_v14 = vld [vmem:[#allocation2 + $0x1a68] sm:$0xff] }
 0x355   :  { %7634 = vmatprep.subr.bf16.mxu0 %v10610_v32  ;;  %v1823_v18 = vld [vmem:[#allocation2 + $0x1e48] sm:$0xff]  ;;  %v10578_v39 = vcombine.high %v1695_v27, %v1699_v14  ;;  %v10577_v32 = vcombine.low %v1695_v27, %v1699_v14  ;;  %v1024_v27 = vld [vmem:[#allocation2 + $0x550] sm:$0xff] }
 0x356   :  { %7674 = vmatpush2.bf16.msra.mxu1 %v10745_v31  ;;  %v1827_v21 = vld [vmem:[#allocation2 + $0x1e68] sm:$0xff]  ;;  %v1028_v14 = vld [vmem:[#allocation2 + $0x570] sm:$0xff] }
 0x357   :  { %7675 = vmatprep.subr.bf16.mxu1 %v10738_v34  ;;  %v10706_v25 = vcombine.high %v1823_v18, %v1827_v21  ;;  %v1687_v26 = vld [vmem:[#allocation2 + $0x1a08] sm:$0xff]  ;;  %v10705_v34 = vcombine.low %v1823_v18, %v1827_v21 }
 0x358   :  { %7635 = vmatpush2.bf16.msra.mxu0 %v10609_v43  ;;  %v1691_v29 = vld [vmem:[#allocation2 + $0x1a28] sm:$0xff]  ;;  %v1040_v43 = vld [vmem:[#allocation2 + $0x5d0] sm:$0xff] }
 0x359   :  { %7636 = vmatprep.subr.bf16.mxu0 %v10602_v47  ;;  %v1815_v30 = vld [vmem:[#allocation2 + $0x1e08] sm:$0xff]  ;;  %v10570_v50 = vcombine.high %v1687_v26, %v1691_v29  ;;  %v10569_v47 = vcombine.low %v1687_v26, %v1691_v29  ;;  %v9908_v29 = vcombine.high %v1024_v27, %v1028_v14 }
 0x35a   :  { %7676 = vmatpush2.bf16.msra.mxu1 %v10737_v60  ;;  %v1819_v31 = vld [vmem:[#allocation2 + $0x1e28] sm:$0xff]  ;;  %v1044_v60 = vld [vmem:[#allocation2 + $0x5f0] sm:$0xff] }
 0x35b   :  { %7677 = vmatprep.subr.bf16.mxu1 %v10730_v49  ;;  %v10698_v36 = vcombine.high %v1815_v30, %v1819_v31  ;;  %v10697_v49 = vcombine.low %v1815_v30, %v1819_v31  ;;  %v9924_v53 = vcombine.high %v1040_v43, %v1044_v60  ;;  %v9923_v61 = vcombine.low %v1040_v43, %v1044_v60  ;;  %v888_v30 = vld [vmem:[#allocation2 + $0x110] sm:$0xff] }
 0x35c   :  { %7637 = vmatpush2.bf16.msra.mxu0 %v10601_v55  ;;  %v1032_v55 = vld [vmem:[#allocation2 + $0x590] sm:$0xff]  ;;  %v9907_v60 = vcombine.low %v1024_v27, %v1028_v14 }
 0x35d   :  { %7638 = vmatprep.subr.bf16.mxu0 %v10594_v58  ;;  %v11199_v58 = vld [vmem:[#allocation10] sm:$0xff] }
 0x35e   :  { %7678 = vmatpush2.bf16.msra.mxu1 %v10729_v57  ;;  %v1036_v57 = vld [vmem:[#allocation2 + $0x5b0] sm:$0xff]  ;;  %v1895_v2 = vrot.slane %v11199_v58, %v11616_v8 }
 0x35f   :  { %7679 = vmatprep.subr.bf16.mxu1 %v10722_v59  ;;  %v1891_v59 = vrot.slane %v11199_v58, %v11612_v6  ;;  %v9787_v6 = vcombine.low %v904_v1, %v908_v54  ;;  %v892_v31 = vld [vmem:[#allocation2 + $0x130] sm:$0xff] }
 0x360   :  { %7639 = vmatpush2.bf16.msra.mxu0 %v10593_v48  ;;  %v9916_v48 = vcombine.high %v1032_v55, %v1036_v57  ;;  %v884_v1 = vld [vmem:[#allocation2 + $0xf0] sm:$0xff] }
 0x361   :  { %7640 = vmatprep.subr.bf16.mxu0 %v10586_v9  ;;  %v900_v9 = vld [vmem:[#allocation2 + $0x170] sm:$0xff] }
 0x362   :  { %7680 = vmatpush2.bf16.msra.mxu1 %v10721_v5  ;;  %v896_v5 = vld [vmem:[#allocation2 + $0x150] sm:$0xff] }
 0x363   :  { %7681 = vmatprep.subr.bf16.mxu1 %v10714_v13  ;;  %v9779_v42 = vcombine.low %v896_v5, %v900_v9  ;;  %v1008_v54 = vld [vmem:[#allocation2 + $0x4d0] sm:$0xff] }
 0x364   :  { %7641 = vmatpush2.bf16.msra.mxu0 %v10585_v22  ;;  %v864_v14 = vld [vmem:[#allocation2 + $0x50] sm:$0xff] }
 0x365   :  { %7642 = vmatprep.subr.bf16.mxu0 %v10578_v39  ;;  %v9780_v39 = vcombine.high %v896_v5, %v900_v9 }
 0x366   :  { %7682 = vmatpush2.bf16.msra.mxu1 %v10713_v23  ;;  %v9915_v23 = vcombine.low %v1032_v55, %v1036_v57  ;;  %v1012_v55 = vld [vmem:[#allocation2 + $0x4f0] sm:$0xff]  ;;  %v9771_v57 = vcombine.low %v888_v30, %v892_v31 }
 0x367   :  { %7683 = vmatprep.subr.bf16.mxu1 %v10706_v25  ;;  %v9891_v9 = vcombine.low %v1008_v54, %v1012_v55 }
 0x368   :  { %7643 = vmatpush2.bf16.msra.mxu0 %v10577_v32 }
 0x369   :  { %7644 = vmatprep.subr.bf16.mxu0 %v10570_v50  ;;  %v1020_v50 = vld [vmem:[#allocation2 + $0x530] sm:$0xff] }
 0x36a   :  { %7684 = vmatpush2.bf16.msra.mxu1 %v10705_v34  ;;  %v1016_v34 = vld [vmem:[#allocation2 + $0x510] sm:$0xff] }
 0x36b   :  { %7685 = vmatprep.subr.bf16.mxu1 %v10698_v36  ;;  %v9899_v58 = vcombine.low %v1016_v34, %v1020_v50 }
 0x36c   :  { %7645 = vmatpush2.bf16.msra.mxu0 %v10569_v47  ;;  %v9772_v47 = vcombine.high %v888_v30, %v892_v31  ;;  %v984_v30 = vld [vmem:[#allocation2 + $0x410] sm:$0xff] }
 0x36d   :  { %7696 = vmatprep.subr.bf16.mxu0 %v9796_v52  ;;  %v9900_v52 = vcombine.high %v1016_v34, %v1020_v50  ;;  %v988_v31 = vld [vmem:[#allocation2 + $0x430] sm:$0xff] }
 0x36e   :  { %7686 = vmatpush2.bf16.msra.mxu1 %v10697_v49 }
 0x36f   :  { %7737 = vmatprep.subr.bf16.mxu1 %v9924_v53  ;;  %v7402_v13 = vpop.f32.mrf.mxu0  ;;  %7647 = vmatmul.mubr.bf16.vlgmr.msra.gmra.mxu0 %v11676_v3  ;;  %v880_v53 = vld [vmem:[#allocation2 + $0xd0] sm:$0xff] }
 0x370   :  { %v7403_v18 = vadd.f32 %v7402_v13, %v1891_v59  ;;  %7697 = vmatpush1.bf16.msra.mxu0 %v9795_v20  ;;  %7728 = vmatprep.mubr.bf16.mxu0 %v11637_v41  ;;  %v9764_v59 = vcombine.high %v880_v53, %v884_v1  ;;  %v9892_v20 = vcombine.high %v1008_v54, %v1012_v55  ;;  %v968_v54 = vld [vmem:[#allocation2 + $0x390] sm:$0xff] }
 0x371   :  { %v7443_v21 = vpop.f32.mrf.mxu1  ;;  %7688 = vmatmul.mubr.bf16.vlgmr.msra.gmra.mxu1 %v11678_v12  ;;  %v7404_v22 = vpop.f32.mrf.mxu0  ;;  %7698 = vmatprep.subr.bf16.mxu0 %v9788_v63  ;;  %v876_v63 = vld [vmem:[#allocation2 + $0xb0] sm:$0xff]  ;;  %v9763_v5 = vcombine.low %v880_v53, %v884_v1 }
 0x372   :  { %7738 = vmatpush1.bf16.msra.mxu1 %v9923_v61  ;;  %v11742_v8 = vadd.f32 %v7443_v21, %v7403_v18  ;;  %v7405_v25 = vadd.f32 %v7404_v22, %v1895_v2  ;;  %7769 = vmatprep.mubr.bf16.mxu1 %v11640_v45  ;;  %v872_v61 = vld [vmem:[#allocation2 + $0x90] sm:$0xff] }
 0x373   :  { %v7445_v26 = vpop.f32.mrf.mxu1  ;;  %7739 = vmatprep.subr.bf16.mxu1 %v9916_v48  ;;  %v7406_v32 = vpop.f32.mrf.mxu0  ;;  %v1000_v2 = vld [vmem:[#allocation2 + $0x490] sm:$0xff]  ;;  %v9756_v13 = vcombine.high %v872_v61, %v876_v63  ;;  %v9755_v22 = vcombine.low %v872_v61, %v876_v63 }
 0x374   :  { %v11746_v36 = vadd.f32 %v7445_v26, %v7405_v25  ;;  %7699 = vmatpush1.bf16.msra.mxu0 %v9787_v6  ;;  %v1004_v48 = vld [vmem:[#allocation2 + $0x4b0] sm:$0xff] }
 0x375   :  { %v7447_v38 = vpop.f32.mrf.mxu1  ;;  %v7407_v43 = vpop.f32.mrf.mxu0  ;;  %7700 = vmatprep.subr.bf16.mxu0 %v9780_v39  ;;  %v9884_v27 = vcombine.high %v1000_v2, %v1004_v48  ;;  %v868_v18 = vld [vmem:[#allocation2 + $0x70] sm:$0xff] }
 0x376   :  { %7740 = vmatpush1.bf16.msra.mxu1 %v9915_v23  ;;  %v992_v21 = vld [vmem:[#allocation2 + $0x450] sm:$0xff]  ;;  %v9883_v23 = vcombine.low %v1000_v2, %v1004_v48  ;;  %v9748_v39 = vcombine.high %v864_v14, %v868_v18  ;;  %v9747_v32 = vcombine.low %v864_v14, %v868_v18  ;;  %v9868_v38 = vcombine.high %v984_v30, %v988_v31 }
 0x377   :  { %v7448_v49 = vpop.f32.mrf.mxu1  ;;  %7741 = vmatprep.subr.bf16.mxu1 %v9908_v29  ;;  %v996_v6 = vld [vmem:[#allocation2 + $0x470] sm:$0xff] }
 0x378   :  { %7701 = vmatpush1.bf16.msra.mxu0 %v9779_v42  ;;  %v9876_v25 = vcombine.high %v992_v21, %v996_v6  ;;  %v856_v26 = vld [vmem:[#allocation2 + $0x10] sm:$0xff]  ;;  %v9875_v34 = vcombine.low %v992_v21, %v996_v6 }
 0x379   :  { %7702 = vmatprep.subr.bf16.mxu0 %v9772_v47  ;;  %v860_v29 = vld [vmem:[#allocation2 + $0x30] sm:$0xff] }
 0x37a   :  { %7742 = vmatpush1.bf16.msra.mxu1 %v9907_v60  ;;  %v9740_v50 = vcombine.high %v856_v26, %v860_v29  ;;  %v976_v42 = vld [vmem:[#allocation2 + $0x3d0] sm:$0xff]  ;;  %v9739_v49 = vcombine.low %v856_v26, %v860_v29 }
 0x37b   :  { %7743 = vmatprep.subr.bf16.mxu1 %v9900_v52  ;;  %v980_v43 = vld [vmem:[#allocation2 + $0x3f0] sm:$0xff]  ;;  %v9867_v52 = vcombine.low %v984_v30, %v988_v31 }
 0x37c   :  { %7703 = vmatpush1.bf16.msra.mxu0 %v9771_v57  ;;  %v1104_v60 = vld [vmem:[#allocation2 + $0x7d0] sm:$0xff]  ;;  %v9860_v53 = vcombine.high %v976_v42, %v980_v43 }
 0x37d   :  { %7704 = vmatprep.subr.bf16.mxu0 %v9764_v59  ;;  %v1108_v47 = vld [vmem:[#allocation2 + $0x7f0] sm:$0xff]  ;;  %v9859_v59 = vcombine.low %v976_v42, %v980_v43 }
 0x37e   :  { %7744 = vmatpush1.bf16.msra.mxu1 %v9899_v58  ;;  %v9988_v1 = vcombine.high %v1104_v60, %v1108_v47  ;;  %v972_v55 = vld [vmem:[#allocation2 + $0x3b0] sm:$0xff] }
 0x37f   :  { %7745 = vmatprep.subr.bf16.mxu1 %v9892_v20  ;;  %v1096_v57 = vld [vmem:[#allocation2 + $0x790] sm:$0xff]  ;;  %v9987_v20 = vcombine.low %v1104_v60, %v1108_v47  ;;  %v9852_v61 = vcombine.high %v968_v54, %v972_v55 }
 0x380   :  { %7705 = vmatpush1.bf16.msra.mxu0 %v9763_v5  ;;  %v1100_v58 = vld [vmem:[#allocation2 + $0x7b0] sm:$0xff] }
 0x381   :  { %7706 = vmatprep.subr.bf16.mxu0 %v9756_v13  ;;  %v9980_v63 = vcombine.high %v1096_v57, %v1100_v58  ;;  %v960_v2 = vld [vmem:[#allocation2 + $0x350] sm:$0xff]  ;;  %v9851_v13 = vcombine.low %v968_v54, %v972_v55 }
 0x382   :  { %7746 = vmatpush1.bf16.msra.mxu1 %v9891_v9  ;;  %v964_v48 = vld [vmem:[#allocation2 + $0x370] sm:$0xff] }
 0x383   :  { %7747 = vmatprep.subr.bf16.mxu1 %v9884_v27  ;;  %v1088_v5 = vld [vmem:[#allocation2 + $0x750] sm:$0xff]  ;;  %v9979_v27 = vcombine.low %v1096_v57, %v1100_v58  ;;  %v9844_v14 = vcombine.high %v960_v2, %v964_v48 }
 0x384   :  { %7707 = vmatpush1.bf16.msra.mxu0 %v9755_v22  ;;  %v1092_v9 = vld [vmem:[#allocation2 + $0x770] sm:$0xff] }
 0x385   :  { %7708 = vmatprep.subr.bf16.mxu0 %v9748_v39  ;;  %v9972_v18 = vcombine.high %v1088_v5, %v1092_v9  ;;  %v952_v21 = vld [vmem:[#allocation2 + $0x310] sm:$0xff]  ;;  %v9843_v39 = vcombine.low %v960_v2, %v964_v48 }
 0x386   :  { %7748 = vmatpush1.bf16.msra.mxu1 %v9883_v23  ;;  %v956_v6 = vld [vmem:[#allocation2 + $0x330] sm:$0xff] }
 0x387   :  { %7749 = vmatprep.subr.bf16.mxu1 %v9876_v25  ;;  %v1080_v22 = vld [vmem:[#allocation2 + $0x710] sm:$0xff]  ;;  %v9971_v25 = vcombine.low %v1088_v5, %v1092_v9  ;;  %v9836_v26 = vcombine.high %v952_v21, %v956_v6 }
 0x388   :  { %7709 = vmatpush1.bf16.msra.mxu0 %v9747_v32  ;;  %v1084_v23 = vld [vmem:[#allocation2 + $0x730] sm:$0xff] }
 0x389   :  { %7710 = vmatprep.subr.bf16.mxu0 %v9740_v50  ;;  %v9964_v29 = vcombine.high %v1080_v22, %v1084_v23  ;;  %v944_v30 = vld [vmem:[#allocation2 + $0x2d0] sm:$0xff]  ;;  %v9835_v50 = vcombine.low %v952_v21, %v956_v6 }
 0x38a   :  { %7750 = vmatpush1.bf16.msra.mxu1 %v9875_v34  ;;  %v948_v31 = vld [vmem:[#allocation2 + $0x2f0] sm:$0xff] }
 0x38b   :  { %7751 = vmatprep.subr.bf16.mxu1 %v9868_v38  ;;  %v1072_v32 = vld [vmem:[#allocation2 + $0x6d0] sm:$0xff]  ;;  %v9963_v38 = vcombine.low %v1080_v22, %v1084_v23  ;;  %v9828_v42 = vcombine.high %v944_v30, %v948_v31 }
 0x38c   :  { %7711 = vmatpush1.bf16.msra.mxu0 %v9739_v49  ;;  %v1076_v34 = vld [vmem:[#allocation2 + $0x6f0] sm:$0xff] }
 0x38d   :  { %7712 = vmatprep.subr.bf16.mxu0 %v9860_v53  ;;  %v9956_v43 = vcombine.high %v1072_v32, %v1076_v34  ;;  %v936_v60 = vld [vmem:[#allocation2 + $0x290] sm:$0xff]  ;;  %v9827_v53 = vcombine.low %v944_v30, %v948_v31 }
 0x38e   :  { %7752 = vmatpush1.bf16.msra.mxu1 %v9867_v52  ;;  %v940_v47 = vld [vmem:[#allocation2 + $0x2b0] sm:$0xff] }
 0x38f   :  { %7753 = vmatprep.subr.bf16.mxu1 %v9988_v1  ;;  %v1064_v49 = vld [vmem:[#allocation2 + $0x690] sm:$0xff]  ;;  %v9955_v1 = vcombine.low %v1072_v32, %v1076_v34  ;;  %v9820_v54 = vcombine.high %v936_v60, %v940_v47 }
 0x390   :  { %7713 = vmatpush2.bf16.msra.mxu0 %v9859_v59  ;;  %v1068_v52 = vld [vmem:[#allocation2 + $0x6b0] sm:$0xff] }
 0x391   :  { %7714 = vmatprep.subr.bf16.mxu0 %v9852_v61  ;;  %v9948_v55 = vcombine.high %v1064_v49, %v1068_v52  ;;  %v928_v57 = vld [vmem:[#allocation2 + $0x250] sm:$0xff]  ;;  %v9819_v61 = vcombine.low %v936_v60, %v940_v47 }
 0x392   :  { %7754 = vmatpush2.bf16.msra.mxu1 %v9987_v20  ;;  %v932_v58 = vld [vmem:[#allocation2 + $0x270] sm:$0xff] }
 0x393   :  { %7755 = vmatprep.subr.bf16.mxu1 %v9980_v63  ;;  %v1056_v59 = vld [vmem:[#allocation2 + $0x650] sm:$0xff]  ;;  %v9947_v63 = vcombine.low %v1064_v49, %v1068_v52  ;;  %v9812_v2 = vcombine.high %v928_v57, %v932_v58 }
 0x394   :  { %7715 = vmatpush2.bf16.msra.mxu0 %v9851_v13  ;;  %v1060_v20 = vld [vmem:[#allocation2 + $0x670] sm:$0xff] }
 0x395   :  { %7716 = vmatprep.subr.bf16.mxu0 %v9844_v14  ;;  %v9940_v48 = vcombine.high %v1056_v59, %v1060_v20  ;;  %v920_v5 = vld [vmem:[#allocation2 + $0x210] sm:$0xff]  ;;  %v9811_v14 = vcombine.low %v928_v57, %v932_v58 }
 0x396   :  { %7756 = vmatpush2.bf16.msra.mxu1 %v9979_v27  ;;  %v924_v9 = vld [vmem:[#allocation2 + $0x230] sm:$0xff] }
 0x397   :  { %7757 = vmatprep.subr.bf16.mxu1 %v9972_v18  ;;  %v1048_v13 = vld [vmem:[#allocation2 + $0x610] sm:$0xff]  ;;  %v9939_v18 = vcombine.low %v1056_v59, %v1060_v20  ;;  %v9804_v21 = vcombine.high %v920_v5, %v924_v9 }
 0x398   :  { %7717 = vmatpush2.bf16.msra.mxu0 %v9843_v39  ;;  %v1052_v27 = vld [vmem:[#allocation2 + $0x630] sm:$0xff] }
 0x399   :  { %7718 = vmatprep.subr.bf16.mxu0 %v9836_v26  ;;  %v9932_v6 = vcombine.high %v1048_v13, %v1052_v27  ;;  %v1168_v22 = vld [vmem:[#allocation2 + $0x9d0] sm:$0xff]  ;;  %v9803_v26 = vcombine.low %v920_v5, %v924_v9 }
 0x39a   :  { %7758 = vmatpush2.bf16.msra.mxu1 %v9971_v25  ;;  %v1172_v23 = vld [vmem:[#allocation2 + $0x9f0] sm:$0xff] }
 0x39b   :  { %7759 = vmatprep.subr.bf16.mxu1 %v9964_v29  ;;  %v1296_v39 = vld [vmem:[#allocation2 + $0xdd0] sm:$0xff]  ;;  %v9931_v29 = vcombine.low %v1048_v13, %v1052_v27  ;;  %v10052_v30 = vcombine.high %v1168_v22, %v1172_v23 }
 0x39c   :  { %7719 = vmatpush2.bf16.msra.mxu0 %v9835_v50  ;;  %v1300_v25 = vld [vmem:[#allocation2 + $0xdf0] sm:$0xff] }
 0x39d   :  { %7720 = vmatprep.subr.bf16.mxu0 %v9828_v42  ;;  %v10180_v31 = vcombine.high %v1296_v39, %v1300_v25  ;;  %v1160_v32 = vld [vmem:[#allocation2 + $0x990] sm:$0xff]  ;;  %v10051_v42 = vcombine.low %v1168_v22, %v1172_v23 }
 0x39e   :  { %7760 = vmatpush2.bf16.msra.mxu1 %v9963_v38  ;;  %v1164_v34 = vld [vmem:[#allocation2 + $0x9b0] sm:$0xff] }
 0x39f   :  { %7761 = vmatprep.subr.bf16.mxu1 %v9956_v43  ;;  %v1288_v50 = vld [vmem:[#allocation2 + $0xd90] sm:$0xff]  ;;  %v10179_v43 = vcombine.low %v1296_v39, %v1300_v25  ;;  %v10044_v60 = vcombine.high %v1160_v32, %v1164_v34  ;;  %v10043_v58 = vcombine.low %v1160_v32, %v1164_v34 }
 0x3a0   :  { %7721 = vmatpush2.bf16.msra.mxu0 %v9827_v53  ;;  %v1292_v38 = vld [vmem:[#allocation2 + $0xdb0] sm:$0xff] }
 0x3a1   :  { %7722 = vmatprep.subr.bf16.mxu0 %v9820_v54  ;;  %v10172_v47 = vcombine.high %v1288_v50, %v1292_v38  ;;  %v1152_v49 = vld [vmem:[#allocation2 + $0x950] sm:$0xff]  ;;  %v10171_v20 = vcombine.low %v1288_v50, %v1292_v38 }
 0x3a2   :  { %7762 = vmatpush2.bf16.msra.mxu1 %v9955_v1  ;;  %v1156_v52 = vld [vmem:[#allocation2 + $0x970] sm:$0xff] }
 0x3a3   :  { %7763 = vmatprep.subr.bf16.mxu1 %v9948_v55  ;;  %v1280_v1 = vld [vmem:[#allocation2 + $0xd50] sm:$0xff] }
 0x3a4   :  { %7723 = vmatpush2.bf16.msra.mxu0 %v9819_v61  ;;  %v1284_v54 = vld [vmem:[#allocation2 + $0xd70] sm:$0xff]  ;;  %v10036_v61 = vcombine.high %v1152_v49, %v1156_v52 }
 0x3a5   :  { %7724 = vmatprep.subr.bf16.mxu0 %v9812_v2  ;;  %v10164_v5 = vcombine.high %v1280_v1, %v1284_v54  ;;  %v1144_v9 = vld [vmem:[#allocation2 + $0x910] sm:$0xff] }
 0x3a6   :  { %7764 = vmatpush2.bf16.msra.mxu1 %v9947_v63  ;;  %v1148_v13 = vld [vmem:[#allocation2 + $0x930] sm:$0xff] }
 0x3a7   :  { %7765 = vmatprep.subr.bf16.mxu1 %v9940_v48  ;;  %v1272_v27 = vld [vmem:[#allocation2 + $0xd10] sm:$0xff]  ;;  %v10028_v23 = vcombine.high %v1144_v9, %v1148_v13  ;;  %v10027_v32 = vcombine.low %v1144_v9, %v1148_v13 }
 0x3a8   :  { %7725 = vmatpush2.bf16.msra.mxu0 %v9811_v14  ;;  %v1276_v14 = vld [vmem:[#allocation2 + $0xd30] sm:$0xff] }
 0x3a9   :  { %7726 = vmatprep.subr.bf16.mxu0 %v9804_v21  ;;  %v10156_v25 = vcombine.high %v1272_v27, %v1276_v14  ;;  %v10155_v34 = vcombine.low %v1272_v27, %v1276_v14  ;;  %v1240_v9 = vld [vmem:[#allocation2 + $0xc10] sm:$0xff] }
 0x3aa   :  { %7766 = vmatpush2.bf16.msra.mxu1 %v9939_v18  ;;  %v1244_v13 = vld [vmem:[#allocation2 + $0xc30] sm:$0xff] }
 0x3ab   :  { %7767 = vmatprep.subr.bf16.mxu1 %v9932_v6  ;;  %v10035_v6 = vcombine.low %v1152_v49, %v1156_v52 }
 0x3ac   :  { %7727 = vmatpush2.bf16.msra.mxu0 %v9803_v26  ;;  %v1136_v26 = vld [vmem:[#allocation2 + $0x8d0] sm:$0xff] }
 0x3ad   :  { %7778 = vmatprep.subr.bf16.mxu0 %v10052_v30  ;;  %v1264_v30 = vld [vmem:[#allocation2 + $0xcd0] sm:$0xff] }
 0x3ae   :  { %7768 = vmatpush2.bf16.msra.mxu1 %v9931_v29  ;;  %v1140_v29 = vld [vmem:[#allocation2 + $0x8f0] sm:$0xff] }
 0x3af   :  { %7819 = vmatprep.subr.bf16.mxu1 %v10180_v31  ;;  %v7484_v53 = vpop.f32.mrf.mxu0  ;;  %7729 = vmatmul.mubr.bf16.vlgmr.msra.gmra.mxu0 %v11632_v33  ;;  %v1268_v31 = vld [vmem:[#allocation2 + $0xcf0] sm:$0xff]  ;;  %v10020_v50 = vcombine.high %v1136_v26, %v1140_v29  ;;  %v10019_v49 = vcombine.low %v1136_v26, %v1140_v29 }
 0x3b0   :  { %v7485_v55 = vadd.f32 %v7484_v53, %v11742_v8  ;;  %7779 = vmatpush1.bf16.msra.mxu0 %v10051_v42  ;;  %7810 = vmatprep.mubr.bf16.mxu0 %v11654_v10  ;;  %v10148_v38 = vcombine.high %v1264_v30, %v1268_v31  ;;  %v1128_v42 = vld [vmem:[#allocation2 + $0x890] sm:$0xff]  ;;  %v10147_v52 = vcombine.low %v1264_v30, %v1268_v31 }
 0x3b1   :  { %v7525_v57 = vpop.f32.mrf.mxu1  ;;  %7770 = vmatmul.mubr.bf16.vlgmr.msra.gmra.mxu1 %v11634_v37  ;;  %v7486_v59 = vpop.f32.mrf.mxu0  ;;  %7780 = vmatprep.subr.bf16.mxu0 %v10044_v60  ;;  %v1256_v60 = vld [vmem:[#allocation2 + $0xc90] sm:$0xff] }
 0x3b2   :  { %7820 = vmatpush1.bf16.msra.mxu1 %v10179_v43  ;;  %v11751_v63 = vadd.f32 %v7525_v57, %v7485_v55  ;;  %v7487_v2 = vadd.f32 %v7486_v59, %v11746_v36  ;;  %7851 = vmatprep.mubr.bf16.mxu1 %v11658_v15  ;;  %v10163_v36 = vcombine.low %v1280_v1, %v1284_v54  ;;  %v1132_v43 = vld [vmem:[#allocation2 + $0x8b0] sm:$0xff] }
 0x3b3   :  { %v7527_v48 = vpop.f32.mrf.mxu1  ;;  %7821 = vmatprep.subr.bf16.mxu1 %v10172_v47  ;;  %v7488_v8 = vpop.f32.mrf.mxu0  ;;  %v1260_v47 = vld [vmem:[#allocation2 + $0xcb0] sm:$0xff]  ;;  %v10012_v53 = vcombine.high %v1128_v42, %v1132_v43  ;;  %v10011_v59 = vcombine.low %v1128_v42, %v1132_v43 }
 0x3b4   :  { %v11756_v18 = vadd.f32 %v7527_v48, %v7487_v2  ;;  %7781 = vmatpush1.bf16.msra.mxu0 %v10043_v58  ;;  %v10140_v1 = vcombine.high %v1256_v60, %v1260_v47  ;;  %v1120_v54 = vld [vmem:[#allocation2 + $0x850] sm:$0xff] }
 0x3b5   :  { %v7529_v21 = vpop.f32.mrf.mxu1  ;;  %v7489_v22 = vpop.f32.mrf.mxu0  ;;  %7782 = vmatprep.subr.bf16.mxu0 %v10036_v61  ;;  %v1124_v55 = vld [vmem:[#allocation2 + $0x870] sm:$0xff] }
 0x3b6   :  { %7822 = vmatpush1.bf16.msra.mxu1 %v10171_v20  ;;  %v1248_v57 = vld [vmem:[#allocation2 + $0xc50] sm:$0xff]  ;;  %v10139_v20 = vcombine.low %v1256_v60, %v1260_v47  ;;  %v10004_v61 = vcombine.high %v1120_v54, %v1124_v55  ;;  %v10003_v8 = vcombine.low %v1120_v54, %v1124_v55  ;;  %v10124_v21 = vcombine.high %v1240_v9, %v1244_v13 }
 0x3b7   :  { %v7530_v39 = vpop.f32.mrf.mxu1  ;;  %7823 = vmatprep.subr.bf16.mxu1 %v10164_v5  ;;  %v1252_v58 = vld [vmem:[#allocation2 + $0xc70] sm:$0xff] }
 0x3b8   :  { %7783 = vmatpush1.bf16.msra.mxu0 %v10035_v6  ;;  %v10132_v2 = vcombine.high %v1248_v57, %v1252_v58  ;;  %v1112_v48 = vld [vmem:[#allocation2 + $0x810] sm:$0xff]  ;;  %v10131_v27 = vcombine.low %v1248_v57, %v1252_v58 }
 0x3b9   :  { %7784 = vmatprep.subr.bf16.mxu0 %v10028_v23  ;;  %v1116_v5 = vld [vmem:[#allocation2 + $0x830] sm:$0xff] }
 0x3ba   :  { %7824 = vmatpush1.bf16.msra.mxu1 %v10163_v36  ;;  %v9996_v14 = vcombine.high %v1112_v48, %v1116_v5  ;;  %v1232_v6 = vld [vmem:[#allocation2 + $0xbd0] sm:$0xff]  ;;  %v9995_v39 = vcombine.low %v1112_v48, %v1116_v5 }
 0x3bb   :  { %7825 = vmatprep.subr.bf16.mxu1 %v10156_v25  ;;  %v1236_v22 = vld [vmem:[#allocation2 + $0xbf0] sm:$0xff]  ;;  %v10123_v25 = vcombine.low %v1240_v9, %v1244_v13 }
 0x3bc   :  { %7785 = vmatpush1.bf16.msra.mxu0 %v10027_v32  ;;  %v1360_v36 = vld [vmem:[#allocation2 + $0xfd0] sm:$0xff]  ;;  %v10116_v26 = vcombine.high %v1232_v6, %v1236_v22 }
 0x3bd   :  { %7786 = vmatprep.subr.bf16.mxu0 %v10020_v50  ;;  %v1364_v23 = vld [vmem:[#allocation2 + $0xff0] sm:$0xff]  ;;  %v10115_v50 = vcombine.low %v1232_v6, %v1236_v22 }
 0x3be   :  { %7826 = vmatpush1.bf16.msra.mxu1 %v10155_v34  ;;  %v10244_v29 = vcombine.high %v1360_v36, %v1364_v23  ;;  %v1224_v30 = vld [vmem:[#allocation2 + $0xb90] sm:$0xff] }
 0x3bf   :  { %7827 = vmatprep.subr.bf16.mxu1 %v10148_v38  ;;  %v1228_v31 = vld [vmem:[#allocation2 + $0xbb0] sm:$0xff]  ;;  %v10243_v38 = vcombine.low %v1360_v36, %v1364_v23 }
 0x3c0   :  { %7787 = vmatpush1.bf16.msra.mxu0 %v10019_v49  ;;  %v1352_v32 = vld [vmem:[#allocation2 + $0xf90] sm:$0xff]  ;;  %v10108_v42 = vcombine.high %v1224_v30, %v1228_v31 }
 0x3c1   :  { %7788 = vmatprep.subr.bf16.mxu0 %v10012_v53  ;;  %v1356_v34 = vld [vmem:[#allocation2 + $0xfb0] sm:$0xff]  ;;  %v10107_v53 = vcombine.low %v1224_v30, %v1228_v31 }
 0x3c2   :  { %7828 = vmatpush1.bf16.msra.mxu1 %v10147_v52  ;;  %v10236_v43 = vcombine.high %v1352_v32, %v1356_v34  ;;  %v1216_v60 = vld [vmem:[#allocation2 + $0xb50] sm:$0xff] }
 0x3c3   :  { %7829 = vmatprep.subr.bf16.mxu1 %v10140_v1  ;;  %v1220_v47 = vld [vmem:[#allocation2 + $0xb70] sm:$0xff]  ;;  %v10235_v1 = vcombine.low %v1352_v32, %v1356_v34 }
 0x3c4   :  { %7789 = vmatpush1.bf16.msra.mxu0 %v10011_v59  ;;  %v1344_v49 = vld [vmem:[#allocation2 + $0xf50] sm:$0xff]  ;;  %v10100_v54 = vcombine.high %v1216_v60, %v1220_v47 }
 0x3c5   :  { %7790 = vmatprep.subr.bf16.mxu0 %v10004_v61  ;;  %v1348_v52 = vld [vmem:[#allocation2 + $0xf70] sm:$0xff]  ;;  %v10099_v61 = vcombine.low %v1216_v60, %v1220_v47 }
 0x3c6   :  { %7830 = vmatpush1.bf16.msra.mxu1 %v10139_v20  ;;  %v10228_v55 = vcombine.high %v1344_v49, %v1348_v52  ;;  %v1208_v57 = vld [vmem:[#allocation2 + $0xb10] sm:$0xff] }
 0x3c7   :  { %7831 = vmatprep.subr.bf16.mxu1 %v10132_v2  ;;  %v1212_v58 = vld [vmem:[#allocation2 + $0xb30] sm:$0xff]  ;;  %v10227_v2 = vcombine.low %v1344_v49, %v1348_v52 }
 0x3c8   :  { %7791 = vmatpush1.bf16.msra.mxu0 %v10003_v8  ;;  %v1336_v59 = vld [vmem:[#allocation2 + $0xf10] sm:$0xff]  ;;  %v10092_v48 = vcombine.high %v1208_v57, %v1212_v58 }
 0x3c9   :  { %7792 = vmatprep.subr.bf16.mxu0 %v9996_v14  ;;  %v1340_v20 = vld [vmem:[#allocation2 + $0xf30] sm:$0xff]  ;;  %v10091_v14 = vcombine.low %v1208_v57, %v1212_v58 }
 0x3ca   :  { %7832 = vmatpush1.bf16.msra.mxu1 %v10131_v27  ;;  %v10220_v5 = vcombine.high %v1336_v59, %v1340_v20  ;;  %v1200_v9 = vld [vmem:[#allocation2 + $0xad0] sm:$0xff] }
 0x3cb   :  { %7833 = vmatprep.subr.bf16.mxu1 %v10124_v21  ;;  %v1204_v13 = vld [vmem:[#allocation2 + $0xaf0] sm:$0xff]  ;;  %v10219_v21 = vcombine.low %v1336_v59, %v1340_v20 }
 0x3cc   :  { %7793 = vmatpush1.bf16.msra.mxu0 %v9995_v39  ;;  %v1328_v8 = vld [vmem:[#allocation2 + $0xed0] sm:$0xff]  ;;  %v10084_v6 = vcombine.high %v1200_v9, %v1204_v13 }
 0x3cd   :  { %7794 = vmatprep.subr.bf16.mxu0 %v10116_v26  ;;  %v1332_v27 = vld [vmem:[#allocation2 + $0xef0] sm:$0xff]  ;;  %v10083_v26 = vcombine.low %v1200_v9, %v1204_v13 }
 0x3ce   :  { %7834 = vmatpush1.bf16.msra.mxu1 %v10123_v25  ;;  %v10212_v22 = vcombine.high %v1328_v8, %v1332_v27  ;;  %v1192_v36 = vld [vmem:[#allocation2 + $0xa90] sm:$0xff] }
 0x3cf   :  { %7835 = vmatprep.subr.bf16.mxu1 %v10244_v29  ;;  %v1196_v23 = vld [vmem:[#allocation2 + $0xab0] sm:$0xff]  ;;  %v10211_v29 = vcombine.low %v1328_v8, %v1332_v27 }
 0x3d0   :  { %7795 = vmatpush2.bf16.msra.mxu0 %v10115_v50  ;;  %v1320_v39 = vld [vmem:[#allocation2 + $0xe90] sm:$0xff]  ;;  %v10076_v30 = vcombine.high %v1192_v36, %v1196_v23 }
 0x3d1   :  { %7796 = vmatprep.subr.bf16.mxu0 %v10108_v42  ;;  %v1324_v25 = vld [vmem:[#allocation2 + $0xeb0] sm:$0xff]  ;;  %v10075_v42 = vcombine.low %v1192_v36, %v1196_v23 }
 0x3d2   :  { %7836 = vmatpush2.bf16.msra.mxu1 %v10243_v38  ;;  %v10204_v31 = vcombine.high %v1320_v39, %v1324_v25  ;;  %v1184_v32 = vld [vmem:[#allocation2 + $0xa50] sm:$0xff] }
 0x3d3   :  { %7837 = vmatprep.subr.bf16.mxu1 %v10236_v43  ;;  %v1188_v34 = vld [vmem:[#allocation2 + $0xa70] sm:$0xff]  ;;  %v10203_v43 = vcombine.low %v1320_v39, %v1324_v25 }
 0x3d4   :  { %7797 = vmatpush2.bf16.msra.mxu0 %v10107_v53  ;;  %v1312_v50 = vld [vmem:[#allocation2 + $0xe50] sm:$0xff]  ;;  %v10068_v60 = vcombine.high %v1184_v32, %v1188_v34 }
 0x3d5   :  { %7798 = vmatprep.subr.bf16.mxu0 %v10100_v54  ;;  %v1316_v38 = vld [vmem:[#allocation2 + $0xe70] sm:$0xff]  ;;  %v10067_v54 = vcombine.low %v1184_v32, %v1188_v34 }
 0x3d6   :  { %7838 = vmatpush2.bf16.msra.mxu1 %v10235_v1  ;;  %v10196_v47 = vcombine.high %v1312_v50, %v1316_v38  ;;  %v1176_v49 = vld [vmem:[#allocation2 + $0xa10] sm:$0xff] }
 0x3d7   :  { %7839 = vmatprep.subr.bf16.mxu1 %v10228_v55  ;;  %v1180_v52 = vld [vmem:[#allocation2 + $0xa30] sm:$0xff]  ;;  %v10195_v55 = vcombine.low %v1312_v50, %v1316_v38 }
 0x3d8   :  { %7799 = vmatpush2.bf16.msra.mxu0 %v10099_v61  ;;  %v1304_v53 = vld [vmem:[#allocation2 + $0xe10] sm:$0xff]  ;;  %v10060_v57 = vcombine.high %v1176_v49, %v1180_v52 }
 0x3d9   :  { %7800 = vmatprep.subr.bf16.mxu0 %v10092_v48  ;;  %v1308_v1 = vld [vmem:[#allocation2 + $0xe30] sm:$0xff]  ;;  %v10059_v48 = vcombine.low %v1176_v49, %v1180_v52 }
 0x3da   :  { %7840 = vmatpush2.bf16.msra.mxu1 %v10227_v2  ;;  %v10188_v58 = vcombine.high %v1304_v53, %v1308_v1  ;;  %v1424_v59 = vld [vmem:[#allocation2 + $0x11d0] sm:$0xff] }
 0x3db   :  { %7841 = vmatprep.subr.bf16.mxu1 %v10220_v5  ;;  %v1428_v20 = vld [vmem:[#allocation2 + $0x11f0] sm:$0xff]  ;;  %v10187_v5 = vcombine.low %v1304_v53, %v1308_v1 }
 0x3dc   :  { %7801 = vmatpush2.bf16.msra.mxu0 %v10091_v14  ;;  %v1552_v61 = vld [vmem:[#allocation2 + $0x15d0] sm:$0xff]  ;;  %v10308_v9 = vcombine.high %v1424_v59, %v1428_v20 }
 0x3dd   :  { %7802 = vmatprep.subr.bf16.mxu0 %v10084_v6  ;;  %v1556_v2 = vld [vmem:[#allocation2 + $0x15f0] sm:$0xff]  ;;  %v10307_v6 = vcombine.low %v1424_v59, %v1428_v20 }
 0x3de   :  { %7842 = vmatpush2.bf16.msra.mxu1 %v10219_v21  ;;  %v10436_v13 = vcombine.high %v1552_v61, %v1556_v2  ;;  %v1416_v8 = vld [vmem:[#allocation2 + $0x1190] sm:$0xff] }
 0x3df   :  { %7843 = vmatprep.subr.bf16.mxu1 %v10212_v22  ;;  %v1420_v27 = vld [vmem:[#allocation2 + $0x11b0] sm:$0xff]  ;;  %v10435_v22 = vcombine.low %v1552_v61, %v1556_v2 }
 0x3e0   :  { %7803 = vmatpush2.bf16.msra.mxu0 %v10083_v26  ;;  %v1544_v14 = vld [vmem:[#allocation2 + $0x1590] sm:$0xff]  ;;  %v10300_v36 = vcombine.high %v1416_v8, %v1420_v27  ;;  %v10299_v34 = vcombine.low %v1416_v8, %v1420_v27 }
 0x3e1   :  { %7804 = vmatprep.subr.bf16.mxu0 %v10076_v30  ;;  %v1548_v21 = vld [vmem:[#allocation2 + $0x15b0] sm:$0xff] }
 0x3e2   :  { %7844 = vmatpush2.bf16.msra.mxu1 %v10211_v29  ;;  %v10428_v23 = vcombine.high %v1544_v14, %v1548_v21  ;;  %v1408_v39 = vld [vmem:[#allocation2 + $0x1150] sm:$0xff]  ;;  %v10427_v38 = vcombine.low %v1544_v14, %v1548_v21 }
 0x3e3   :  { %7845 = vmatprep.subr.bf16.mxu1 %v10204_v31  ;;  %v1412_v25 = vld [vmem:[#allocation2 + $0x1170] sm:$0xff] }
 0x3e4   :  { %7805 = vmatpush2.bf16.msra.mxu0 %v10075_v42  ;;  %v1536_v29 = vld [vmem:[#allocation2 + $0x1550] sm:$0xff]  ;;  %v10292_v42 = vcombine.high %v1408_v39, %v1412_v25 }
 0x3e5   :  { %7806 = vmatprep.subr.bf16.mxu0 %v10068_v60  ;;  %v1540_v30 = vld [vmem:[#allocation2 + $0x1570] sm:$0xff] }
 0x3e6   :  { %7846 = vmatpush2.bf16.msra.mxu1 %v10203_v43  ;;  %v10420_v49 = vcombine.high %v1536_v29, %v1540_v30  ;;  %v1400_v52 = vld [vmem:[#allocation2 + $0x1110] sm:$0xff] }
 0x3e7   :  { %7847 = vmatprep.subr.bf16.mxu1 %v10196_v47  ;;  %v1404_v53 = vld [vmem:[#allocation2 + $0x1130] sm:$0xff] }
 0x3e8   :  { %7807 = vmatpush2.bf16.msra.mxu0 %v10067_v54  ;;  %v1528_v1 = vld [vmem:[#allocation2 + $0x1510] sm:$0xff]  ;;  %v10284_v20 = vcombine.high %v1400_v52, %v1404_v53  ;;  %v10283_v8 = vcombine.low %v1400_v52, %v1404_v53 }
 0x3e9   :  { %7808 = vmatprep.subr.bf16.mxu0 %v10060_v57  ;;  %v1532_v54 = vld [vmem:[#allocation2 + $0x1530] sm:$0xff] }
 0x3ea   :  { %7848 = vmatpush2.bf16.msra.mxu1 %v10195_v55  ;;  %v10412_v2 = vcombine.high %v1528_v1, %v1532_v54  ;;  %v10411_v27 = vcombine.low %v1528_v1, %v1532_v54  ;;  %v1496_v52 = vld [vmem:[#allocation2 + $0x1410] sm:$0xff] }
 0x3eb   :  { %7849 = vmatprep.subr.bf16.mxu1 %v10188_v58  ;;  %v10291_v58 = vcombine.low %v1408_v39, %v1412_v25  ;;  %v1500_v53 = vld [vmem:[#allocation2 + $0x1430] sm:$0xff] }
 0x3ec   :  { %7809 = vmatpush2.bf16.msra.mxu0 %v10059_v48  ;;  %v1392_v48 = vld [vmem:[#allocation2 + $0x10d0] sm:$0xff] }
 0x3ed   :  { %7860 = vmatprep.subr.bf16.mxu0 %v10308_v9  ;;  %v1520_v9 = vld [vmem:[#allocation2 + $0x14d0] sm:$0xff] }
 0x3ee   :  { %7850 = vmatpush2.bf16.msra.mxu1 %v10187_v5  ;;  %v1396_v5 = vld [vmem:[#allocation2 + $0x10f0] sm:$0xff] }
 0x3ef   :  { %7901 = vmatprep.subr.bf16.mxu1 %v10436_v13  ;;  %v7566_v26 = vpop.f32.mrf.mxu0  ;;  %7811 = vmatmul.mubr.bf16.vlgmr.msra.gmra.mxu0 %v11648_v62  ;;  %v1524_v13 = vld [vmem:[#allocation2 + $0x14f0] sm:$0xff]  ;;  %v10276_v14 = vcombine.high %v1392_v48, %v1396_v5  ;;  %v10275_v39 = vcombine.low %v1392_v48, %v1396_v5 }
 0x3f0   :  { %v7567_v31 = vadd.f32 %v7566_v26, %v11751_v63  ;;  %7861 = vmatpush1.bf16.msra.mxu0 %v10307_v6  ;;  %7892 = vmatprep.mubr.bf16.mxu0 %v11670_v46  ;;  %v10404_v21 = vcombine.high %v1520_v9, %v1524_v13  ;;  %v1384_v6 = vld [vmem:[#allocation2 + $0x1090] sm:$0xff]  ;;  %v10403_v25 = vcombine.low %v1520_v9, %v1524_v13 }
 0x3f1   :  { %v7607_v32 = vpop.f32.mrf.mxu1  ;;  %7852 = vmatmul.mubr.bf16.vlgmr.msra.gmra.mxu1 %v11650_v0  ;;  %v7568_v50 = vpop.f32.mrf.mxu0  ;;  %7862 = vmatprep.subr.bf16.mxu0 %v10300_v36  ;;  %v1512_v36 = vld [vmem:[#allocation2 + $0x1490] sm:$0xff] }
 0x3f2   :  { %7902 = vmatpush1.bf16.msra.mxu1 %v10435_v22  ;;  %v11761_v43 = vadd.f32 %v7607_v32, %v7567_v31  ;;  %v7569_v60 = vadd.f32 %v7568_v50, %v11756_v18  ;;  %7933 = vmatprep.mubr.bf16.mxu1 %v11674_v51  ;;  %v10419_v18 = vcombine.low %v1536_v29, %v1540_v30  ;;  %v1388_v22 = vld [vmem:[#allocation2 + $0x10b0] sm:$0xff] }
 0x3f3   :  { %v7609_v47 = vpop.f32.mrf.mxu1  ;;  %7903 = vmatprep.subr.bf16.mxu1 %v10428_v23  ;;  %v7570_v63 = vpop.f32.mrf.mxu0  ;;  %v1516_v23 = vld [vmem:[#allocation2 + $0x14b0] sm:$0xff]  ;;  %v10268_v26 = vcombine.high %v1384_v6, %v1388_v22  ;;  %v10267_v50 = vcombine.low %v1384_v6, %v1388_v22 }
 0x3f4   :  { %v11766_v55 = vadd.f32 %v7609_v47, %v7569_v60  ;;  %7863 = vmatpush1.bf16.msra.mxu0 %v10299_v34  ;;  %v10396_v29 = vcombine.high %v1512_v36, %v1516_v23  ;;  %v1376_v30 = vld [vmem:[#allocation2 + $0x1050] sm:$0xff] }
 0x3f5   :  { %v7611_v57 = vpop.f32.mrf.mxu1  ;;  %v7571_v59 = vpop.f32.mrf.mxu0  ;;  %7864 = vmatprep.subr.bf16.mxu0 %v10292_v42  ;;  %v1380_v31 = vld [vmem:[#allocation2 + $0x1070] sm:$0xff] }
 0x3f6   :  { %7904 = vmatpush1.bf16.msra.mxu1 %v10427_v38  ;;  %v1504_v32 = vld [vmem:[#allocation2 + $0x1450] sm:$0xff]  ;;  %v10395_v38 = vcombine.low %v1512_v36, %v1516_v23  ;;  %v10260_v42 = vcombine.high %v1376_v30, %v1380_v31  ;;  %v10259_v63 = vcombine.low %v1376_v30, %v1380_v31  ;;  %v10380_v57 = vcombine.high %v1496_v52, %v1500_v53 }
 0x3f7   :  { %v7612_v61 = vpop.f32.mrf.mxu1  ;;  %7905 = vmatprep.subr.bf16.mxu1 %v10420_v49  ;;  %v1508_v34 = vld [vmem:[#allocation2 + $0x1470] sm:$0xff] }
 0x3f8   :  { %7865 = vmatpush1.bf16.msra.mxu0 %v10291_v58  ;;  %v10388_v60 = vcombine.high %v1504_v32, %v1508_v34  ;;  %v1368_v47 = vld [vmem:[#allocation2 + $0x1010] sm:$0xff]  ;;  %v10387_v1 = vcombine.low %v1504_v32, %v1508_v34 }
 0x3f9   :  { %7866 = vmatprep.subr.bf16.mxu0 %v10284_v20  ;;  %v1372_v49 = vld [vmem:[#allocation2 + $0x1030] sm:$0xff] }
 0x3fa   :  { %7906 = vmatpush1.bf16.msra.mxu1 %v10419_v18  ;;  %v10252_v54 = vcombine.high %v1368_v47, %v1372_v49  ;;  %v1488_v58 = vld [vmem:[#allocation2 + $0x13d0] sm:$0xff]  ;;  %v10251_v61 = vcombine.low %v1368_v47, %v1372_v49 }
 0x3fb   :  { %7907 = vmatprep.subr.bf16.mxu1 %v10412_v2  ;;  %v1492_v59 = vld [vmem:[#allocation2 + $0x13f0] sm:$0xff]  ;;  %v10379_v2 = vcombine.low %v1496_v52, %v1500_v53 }
 0x3fc   :  { %7867 = vmatpush1.bf16.msra.mxu0 %v10283_v8  ;;  %v1616_v18 = vld [vmem:[#allocation2 + $0x17d0] sm:$0xff]  ;;  %v10372_v48 = vcombine.high %v1488_v58, %v1492_v59 }
 0x3fd   :  { %7868 = vmatprep.subr.bf16.mxu0 %v10276_v14  ;;  %v1620_v20 = vld [vmem:[#allocation2 + $0x17f0] sm:$0xff]  ;;  %v10371_v14 = vcombine.low %v1488_v58, %v1492_v59 }
 0x3fe   :  { %7908 = vmatpush1.bf16.msra.mxu1 %v10411_v27  ;;  %v10500_v5 = vcombine.high %v1616_v18, %v1620_v20  ;;  %v1480_v9 = vld [vmem:[#allocation2 + $0x1390] sm:$0xff] }
 0x3ff   :  { %7909 = vmatprep.subr.bf16.mxu1 %v10404_v21  ;;  %v1484_v13 = vld [vmem:[#allocation2 + $0x13b0] sm:$0xff]  ;;  %v10499_v21 = vcombine.low %v1616_v18, %v1620_v20 }
 0x400   :  { %7869 = vmatpush1.bf16.msra.mxu0 %v10275_v39  ;;  %v1608_v8 = vld [vmem:[#allocation2 + $0x1790] sm:$0xff]  ;;  %v10364_v6 = vcombine.high %v1480_v9, %v1484_v13 }
 0x401   :  { %7870 = vmatprep.subr.bf16.mxu0 %v10268_v26  ;;  %v1612_v27 = vld [vmem:[#allocation2 + $0x17b0] sm:$0xff]  ;;  %v10363_v26 = vcombine.low %v1480_v9, %v1484_v13 }
 0x402   :  { %7910 = vmatpush1.bf16.msra.mxu1 %v10403_v25  ;;  %v10492_v22 = vcombine.high %v1608_v8, %v1612_v27  ;;  %v1472_v36 = vld [vmem:[#allocation2 + $0x1350] sm:$0xff] }
 0x403   :  { %7911 = vmatprep.subr.bf16.mxu1 %v10396_v29  ;;  %v1476_v23 = vld [vmem:[#allocation2 + $0x1370] sm:$0xff]  ;;  %v10491_v29 = vcombine.low %v1608_v8, %v1612_v27 }
 0x404   :  { %7871 = vmatpush1.bf16.msra.mxu0 %v10267_v50  ;;  %v1600_v39 = vld [vmem:[#allocation2 + $0x1750] sm:$0xff]  ;;  %v10356_v30 = vcombine.high %v1472_v36, %v1476_v23 }
 0x405   :  { %7872 = vmatprep.subr.bf16.mxu0 %v10260_v42  ;;  %v1604_v25 = vld [vmem:[#allocation2 + $0x1770] sm:$0xff]  ;;  %v10355_v42 = vcombine.low %v1472_v36, %v1476_v23 }
 0x406   :  { %7912 = vmatpush1.bf16.msra.mxu1 %v10395_v38  ;;  %v10484_v31 = vcombine.high %v1600_v39, %v1604_v25  ;;  %v1464_v32 = vld [vmem:[#allocation2 + $0x1310] sm:$0xff] }
 0x407   :  { %7913 = vmatprep.subr.bf16.mxu1 %v10388_v60  ;;  %v1468_v34 = vld [vmem:[#allocation2 + $0x1330] sm:$0xff]  ;;  %v10483_v60 = vcombine.low %v1600_v39, %v1604_v25 }
 0x408   :  { %7873 = vmatpush1.bf16.msra.mxu0 %v10259_v63  ;;  %v1592_v50 = vld [vmem:[#allocation2 + $0x1710] sm:$0xff]  ;;  %v10348_v47 = vcombine.high %v1464_v32, %v1468_v34 }
 0x409   :  { %7874 = vmatprep.subr.bf16.mxu0 %v10252_v54  ;;  %v1596_v38 = vld [vmem:[#allocation2 + $0x1730] sm:$0xff]  ;;  %v10347_v54 = vcombine.low %v1464_v32, %v1468_v34 }
 0x40a   :  { %7914 = vmatpush1.bf16.msra.mxu1 %v10387_v1  ;;  %v10476_v49 = vcombine.high %v1592_v50, %v1596_v38  ;;  %v1456_v52 = vld [vmem:[#allocation2 + $0x12d0] sm:$0xff] }
 0x40b   :  { %7915 = vmatprep.subr.bf16.mxu1 %v10380_v57  ;;  %v1460_v53 = vld [vmem:[#allocation2 + $0x12f0] sm:$0xff]  ;;  %v10475_v57 = vcombine.low %v1592_v50, %v1596_v38 }
 0x40c   :  { %7875 = vmatpush1.bf16.msra.mxu0 %v10251_v61  ;;  %v1584_v63 = vld [vmem:[#allocation2 + $0x16d0] sm:$0xff]  ;;  %v10340_v58 = vcombine.high %v1456_v52, %v1460_v53 }
 0x40d   :  { %7876 = vmatprep.subr.bf16.mxu0 %v10372_v48  ;;  %v1588_v1 = vld [vmem:[#allocation2 + $0x16f0] sm:$0xff]  ;;  %v10339_v48 = vcombine.low %v1456_v52, %v1460_v53 }
 0x40e   :  { %7916 = vmatpush1.bf16.msra.mxu1 %v10379_v2  ;;  %v10468_v59 = vcombine.high %v1584_v63, %v1588_v1  ;;  %v1448_v18 = vld [vmem:[#allocation2 + $0x1290] sm:$0xff] }
 0x40f   :  { %7917 = vmatprep.subr.bf16.mxu1 %v10500_v5  ;;  %v1452_v20 = vld [vmem:[#allocation2 + $0x12b0] sm:$0xff]  ;;  %v10467_v5 = vcombine.low %v1584_v63, %v1588_v1 }
 0x410   :  { %7877 = vmatpush2.bf16.msra.mxu0 %v10371_v14  ;;  %v1576_v61 = vld [vmem:[#allocation2 + $0x1690] sm:$0xff]  ;;  %v10332_v9 = vcombine.high %v1448_v18, %v1452_v20 }
 0x411   :  { %7878 = vmatprep.subr.bf16.mxu0 %v10364_v6  ;;  %v1580_v2 = vld [vmem:[#allocation2 + $0x16b0] sm:$0xff]  ;;  %v10331_v6 = vcombine.low %v1448_v18, %v1452_v20 }
 0x412   :  { %7918 = vmatpush2.bf16.msra.mxu1 %v10499_v21  ;;  %v10460_v13 = vcombine.high %v1576_v61, %v1580_v2  ;;  %v1440_v8 = vld [vmem:[#allocation2 + $0x1250] sm:$0xff] }
 0x413   :  { %7919 = vmatprep.subr.bf16.mxu1 %v10492_v22  ;;  %v1444_v27 = vld [vmem:[#allocation2 + $0x1270] sm:$0xff]  ;;  %v10459_v22 = vcombine.low %v1576_v61, %v1580_v2 }
 0x414   :  { %7879 = vmatpush2.bf16.msra.mxu0 %v10363_v26  ;;  %v1568_v14 = vld [vmem:[#allocation2 + $0x1650] sm:$0xff]  ;;  %v10324_v36 = vcombine.high %v1440_v8, %v1444_v27 }
 0x415   :  { %7880 = vmatprep.subr.bf16.mxu0 %v10356_v30  ;;  %v1572_v21 = vld [vmem:[#allocation2 + $0x1670] sm:$0xff]  ;;  %v10323_v30 = vcombine.low %v1440_v8, %v1444_v27 }
 0x416   :  { %7920 = vmatpush2.bf16.msra.mxu1 %v10491_v29  ;;  %v10452_v23 = vcombine.high %v1568_v14, %v1572_v21  ;;  %v1432_v39 = vld [vmem:[#allocation2 + $0x1210] sm:$0xff] }
 0x417   :  { %7921 = vmatprep.subr.bf16.mxu1 %v10484_v31  ;;  %v1436_v25 = vld [vmem:[#allocation2 + $0x1230] sm:$0xff]  ;;  %v10451_v31 = vcombine.low %v1568_v14, %v1572_v21 }
 0x418   :  { %7881 = vmatpush2.bf16.msra.mxu0 %v10355_v42  ;;  %v1560_v26 = vld [vmem:[#allocation2 + $0x1610] sm:$0xff]  ;;  %v10316_v32 = vcombine.high %v1432_v39, %v1436_v25 }
 0x419   :  { %7882 = vmatprep.subr.bf16.mxu0 %v10348_v47  ;;  %v1564_v29 = vld [vmem:[#allocation2 + $0x1630] sm:$0xff]  ;;  %v10315_v47 = vcombine.low %v1432_v39, %v1436_v25 }
 0x41a   :  { %7922 = vmatpush2.bf16.msra.mxu1 %v10483_v60  ;;  %v10444_v34 = vcombine.high %v1560_v26, %v1564_v29  ;;  %v1680_v50 = vld [vmem:[#allocation2 + $0x19d0] sm:$0xff] }
 0x41b   :  { %7923 = vmatprep.subr.bf16.mxu1 %v10476_v49  ;;  %v1684_v38 = vld [vmem:[#allocation2 + $0x19f0] sm:$0xff]  ;;  %v10443_v49 = vcombine.low %v1560_v26, %v1564_v29 }
 0x41c   :  { %7883 = vmatpush2.bf16.msra.mxu0 %v10347_v54  ;;  %v1808_v42 = vld [vmem:[#allocation2 + $0x1dd0] sm:$0xff]  ;;  %v10564_v52 = vcombine.high %v1680_v50, %v1684_v38 }
 0x41d   :  { %7884 = vmatprep.subr.bf16.mxu0 %v10340_v58  ;;  %v1812_v60 = vld [vmem:[#allocation2 + $0x1df0] sm:$0xff]  ;;  %v10563_v58 = vcombine.low %v1680_v50, %v1684_v38 }
 0x41e   :  { %7924 = vmatpush2.bf16.msra.mxu1 %v10475_v57  ;;  %v10692_v53 = vcombine.high %v1808_v42, %v1812_v60  ;;  %v1672_v63 = vld [vmem:[#allocation2 + $0x1990] sm:$0xff] }
 0x41f   :  { %7925 = vmatprep.subr.bf16.mxu1 %v10468_v59  ;;  %v1676_v1 = vld [vmem:[#allocation2 + $0x19b0] sm:$0xff]  ;;  %v10691_v59 = vcombine.low %v1808_v42, %v1812_v60 }
 0x420   :  { %7885 = vmatpush2.bf16.msra.mxu0 %v10339_v48  ;;  %v1800_v54 = vld [vmem:[#allocation2 + $0x1d90] sm:$0xff]  ;;  %v10556_v18 = vcombine.high %v1672_v63, %v1676_v1  ;;  %v10555_v27 = vcombine.low %v1672_v63, %v1676_v1 }
 0x421   :  { %7886 = vmatprep.subr.bf16.mxu0 %v10332_v9  ;;  %v1804_v57 = vld [vmem:[#allocation2 + $0x1db0] sm:$0xff] }
 0x422   :  { %7926 = vmatpush2.bf16.msra.mxu1 %v10467_v5  ;;  %v10684_v20 = vcombine.high %v1800_v54, %v1804_v57  ;;  %v1664_v61 = vld [vmem:[#allocation2 + $0x1950] sm:$0xff]  ;;  %v10683_v21 = vcombine.low %v1800_v54, %v1804_v57 }
 0x423   :  { %7927 = vmatprep.subr.bf16.mxu1 %v10460_v13  ;;  %v1668_v2 = vld [vmem:[#allocation2 + $0x1970] sm:$0xff] }
 0x424   :  { %7887 = vmatpush2.bf16.msra.mxu0 %v10331_v6  ;;  %v1792_v5 = vld [vmem:[#allocation2 + $0x1d50] sm:$0xff]  ;;  %v10548_v6 = vcombine.high %v1664_v61, %v1668_v2 }
 0x425   :  { %7888 = vmatprep.subr.bf16.mxu0 %v10324_v36  ;;  %v1796_v9 = vld [vmem:[#allocation2 + $0x1d70] sm:$0xff] }
 0x426   :  { %7928 = vmatpush2.bf16.msra.mxu1 %v10459_v22  ;;  %v10676_v39 = vcombine.high %v1792_v5, %v1796_v9  ;;  %v1656_v25 = vld [vmem:[#allocation2 + $0x1910] sm:$0xff] }
 0x427   :  { %7929 = vmatprep.subr.bf16.mxu1 %v10452_v23  ;;  %v1660_v26 = vld [vmem:[#allocation2 + $0x1930] sm:$0xff] }
 0x428   :  { %7889 = vmatpush2.bf16.msra.mxu0 %v10323_v30  ;;  %v1784_v29 = vld [vmem:[#allocation2 + $0x1d10] sm:$0xff]  ;;  %v10540_v38 = vcombine.high %v1656_v25, %v1660_v26  ;;  %v10539_v63 = vcombine.low %v1656_v25, %v1660_v26 }
 0x429   :  { %7890 = vmatprep.subr.bf16.mxu0 %v10316_v32  ;;  %v1788_v30 = vld [vmem:[#allocation2 + $0x1d30] sm:$0xff] }
 0x42a   :  { %7930 = vmatpush2.bf16.msra.mxu1 %v10451_v31  ;;  %v10668_v60 = vcombine.high %v1784_v29, %v1788_v30  ;;  %v10667_v1 = vcombine.low %v1784_v29, %v1788_v30  ;;  %v1752_v25 = vld [vmem:[#allocation2 + $0x1c10] sm:$0xff] }
 0x42b   :  { %7931 = vmatprep.subr.bf16.mxu1 %v10444_v34  ;;  %v10547_v34 = vcombine.low %v1664_v61, %v1668_v2  ;;  %v1756_v26 = vld [vmem:[#allocation2 + $0x1c30] sm:$0xff] }
 0x42c   :  { %7891 = vmatpush2.bf16.msra.mxu0 %v10315_v47  ;;  %v1648_v47 = vld [vmem:[#allocation2 + $0x18d0] sm:$0xff] }
 0x42d   :  { %7942 = vmatprep.subr.bf16.mxu0 %v10564_v52  ;;  %v1776_v52 = vld [vmem:[#allocation2 + $0x1cd0] sm:$0xff] }
 0x42e   :  { %7932 = vmatpush2.bf16.msra.mxu1 %v10443_v49  ;;  %v1652_v49 = vld [vmem:[#allocation2 + $0x18f0] sm:$0xff] }
 0x42f   :  { %7983 = vmatprep.subr.bf16.mxu1 %v10692_v53  ;;  %v7648_v48 = vpop.f32.mrf.mxu0  ;;  %7893 = vmatmul.mubr.bf16.vlgmr.msra.gmra.mxu0 %v11664_v35  ;;  %v1780_v53 = vld [vmem:[#allocation2 + $0x1cf0] sm:$0xff]  ;;  %v10532_v54 = vcombine.high %v1648_v47, %v1652_v49  ;;  %v10531_v61 = vcombine.low %v1648_v47, %v1652_v49 }
 0x430   :  { %v7649_v13 = vadd.f32 %v7648_v48, %v11761_v43  ;;  %7943 = vmatpush1.bf16.msra.mxu0 %v10563_v58  ;;  %7974 = vmatprep.mubr.bf16.mxu0 %v11680_v16  ;;  %v10660_v57 = vcombine.high %v1776_v52, %v1780_v53  ;;  %v1640_v58 = vld [vmem:[#allocation2 + $0x1890] sm:$0xff]  ;;  %v10659_v2 = vcombine.low %v1776_v52, %v1780_v53 }
 0x431   :  { %v7689_v8 = vpop.f32.mrf.mxu1  ;;  %7934 = vmatmul.mubr.bf16.vlgmr.msra.gmra.mxu1 %v11666_v40  ;;  %v7650_v14 = vpop.f32.mrf.mxu0  ;;  %7944 = vmatprep.subr.bf16.mxu0 %v10556_v18  ;;  %v1768_v18 = vld [vmem:[#allocation2 + $0x1c90] sm:$0xff] }
 0x432   :  { %7984 = vmatpush1.bf16.msra.mxu1 %v10691_v59  ;;  %v11771_v22 = vadd.f32 %v7689_v8, %v7649_v13  ;;  %v7651_v36 = vadd.f32 %v7650_v14, %v11766_v55  ;;  %8015 = vmatprep.mubr.bf16.mxu1 %v11682_v19  ;;  %v10675_v55 = vcombine.low %v1792_v5, %v1796_v9  ;;  %v1644_v59 = vld [vmem:[#allocation2 + $0x18b0] sm:$0xff] }
 0x433   :  { %v7691_v23 = vpop.f32.mrf.mxu1  ;;  %7985 = vmatprep.subr.bf16.mxu1 %v10684_v20  ;;  %v7652_v43 = vpop.f32.mrf.mxu0  ;;  %v1772_v20 = vld [vmem:[#allocation2 + $0x1cb0] sm:$0xff]  ;;  %v10524_v48 = vcombine.high %v1640_v58, %v1644_v59  ;;  %v10523_v14 = vcombine.low %v1640_v58, %v1644_v59 }
 0x434   :  { %v11776_v31 = vadd.f32 %v7691_v23, %v7651_v36  ;;  %7945 = vmatpush1.bf16.msra.mxu0 %v10555_v27  ;;  %v10652_v5 = vcombine.high %v1768_v18, %v1772_v20  ;;  %v1632_v9 = vld [vmem:[#allocation2 + $0x1850] sm:$0xff]  ;;  %vm8354_vm5 = vcmp.gt.f32.partialorder %v11771_v22, 0.0 }
 0x435   :  { %v7693_v32 = vpop.f32.mrf.mxu1  ;;  %v7653_v50 = vpop.f32.mrf.mxu0  ;;  %7946 = vmatprep.subr.bf16.mxu0 %v10548_v6  ;;  %v1636_v13 = vld [vmem:[#allocation2 + $0x1870] sm:$0xff] }
 0x436   :  { %7986 = vmatpush1.bf16.msra.mxu1 %v10683_v21  ;;  %v1760_v8 = vld [vmem:[#allocation2 + $0x1c50] sm:$0xff]  ;;  %v10651_v21 = vcombine.low %v1768_v18, %v1772_v20  ;;  %v10516_v6 = vcombine.high %v1632_v9, %v1636_v13  ;;  %v10515_v43 = vcombine.low %v1632_v9, %v1636_v13  ;;  %v10636_v32 = vcombine.high %v1752_v25, %v1756_v26 }
 0x437   :  { %v7694_v42 = vpop.f32.mrf.mxu1  ;;  %7987 = vmatprep.subr.bf16.mxu1 %v10676_v39  ;;  %v1764_v27 = vld [vmem:[#allocation2 + $0x1c70] sm:$0xff]  ;;  %vm8355_vm3 = vcmp.gt.f32.partialorder %v11776_v31, 0.0 }
 0x438   :  { %7947 = vmatpush1.bf16.msra.mxu0 %v10547_v34  ;;  %v10644_v36 = vcombine.high %v1760_v8, %v1764_v27  ;;  %v1624_v23 = vld [vmem:[#allocation2 + $0x1810] sm:$0xff]  ;;  %v10643_v29 = vcombine.low %v1760_v8, %v1764_v27 }
 0x439   :  { %7948 = vmatprep.subr.bf16.mxu0 %v10540_v38  ;;  %v1628_v39 = vld [vmem:[#allocation2 + $0x1830] sm:$0xff] }
 0x43a   :  { %7988 = vmatpush1.bf16.msra.mxu1 %v10675_v55  ;;  %v10508_v30 = vcombine.high %v1624_v23, %v1628_v39  ;;  %v1744_v34 = vld [vmem:[#allocation2 + $0x1bd0] sm:$0xff]  ;;  %v10507_v42 = vcombine.low %v1624_v23, %v1628_v39 }
 0x43b   :  { %7989 = vmatprep.subr.bf16.mxu1 %v10668_v60  ;;  %v1748_v50 = vld [vmem:[#allocation2 + $0x1bf0] sm:$0xff]  ;;  %v10635_v60 = vcombine.low %v1752_v25, %v1756_v26 }
 0x43c   :  { %7949 = vmatpush1.bf16.msra.mxu0 %v10539_v63  ;;  %v1872_v55 = vld [vmem:[#allocation2 + $0x1fd0] sm:$0xff]  ;;  %v10628_v47 = vcombine.high %v1744_v34, %v1748_v50 }
 0x43d   :  { %7950 = vmatprep.subr.bf16.mxu0 %v10532_v54  ;;  %v1876_v38 = vld [vmem:[#allocation2 + $0x1ff0] sm:$0xff]  ;;  %v10627_v54 = vcombine.low %v1744_v34, %v1748_v50 }
 0x43e   :  { %7990 = vmatpush1.bf16.msra.mxu1 %v10667_v1  ;;  %v10756_v49 = vcombine.high %v1872_v55, %v1876_v38  ;;  %v1736_v52 = vld [vmem:[#allocation2 + $0x1b90] sm:$0xff] }
 0x43f   :  { %7991 = vmatprep.subr.bf16.mxu1 %v10660_v57  ;;  %v1740_v53 = vld [vmem:[#allocation2 + $0x1bb0] sm:$0xff]  ;;  %v10755_v57 = vcombine.low %v1872_v55, %v1876_v38 }
 0x440   :  { %7951 = vmatpush1.bf16.msra.mxu0 %v10531_v61  ;;  %v1864_v63 = vld [vmem:[#allocation2 + $0x1f90] sm:$0xff]  ;;  %v10620_v58 = vcombine.high %v1736_v52, %v1740_v53 }
 0x441   :  { %7952 = vmatprep.subr.bf16.mxu0 %v10524_v48  ;;  %v1868_v1 = vld [vmem:[#allocation2 + $0x1fb0] sm:$0xff]  ;;  %v10619_v48 = vcombine.low %v1736_v52, %v1740_v53 }
 0x442   :  { %7992 = vmatpush1.bf16.msra.mxu1 %v10659_v2  ;;  %v10748_v59 = vcombine.high %v1864_v63, %v1868_v1  ;;  %v1728_v18 = vld [vmem:[#allocation2 + $0x1b50] sm:$0xff] }
 0x443   :  { %7993 = vmatprep.subr.bf16.mxu1 %v10652_v5  ;;  %v1732_v20 = vld [vmem:[#allocation2 + $0x1b70] sm:$0xff]  ;;  %v10747_v5 = vcombine.low %v1864_v63, %v1868_v1 }
 0x444   :  { %7953 = vmatpush1.bf16.msra.mxu0 %v10523_v14  ;;  %v1856_v61 = vld [vmem:[#allocation2 + $0x1f50] sm:$0xff]  ;;  %v10612_v9 = vcombine.high %v1728_v18, %v1732_v20 }
 0x445   :  { %7954 = vmatprep.subr.bf16.mxu0 %v10516_v6  ;;  %v1860_v2 = vld [vmem:[#allocation2 + $0x1f70] sm:$0xff]  ;;  %v10611_v6 = vcombine.low %v1728_v18, %v1732_v20 }
 0x446   :  { %7994 = vmatpush1.bf16.msra.mxu1 %v10651_v21  ;;  %v10740_v13 = vcombine.high %v1856_v61, %v1860_v2  ;;  %v1720_v8 = vld [vmem:[#allocation2 + $0x1b10] sm:$0xff] }
 0x447   :  { %7995 = vmatprep.subr.bf16.mxu1 %v10644_v36  ;;  %v1724_v27 = vld [vmem:[#allocation2 + $0x1b30] sm:$0xff]  ;;  %v10739_v36 = vcombine.low %v1856_v61, %v1860_v2 }
 0x448   :  { %7955 = vmatpush1.bf16.msra.mxu0 %v10515_v43  ;;  %v1848_v14 = vld [vmem:[#allocation2 + $0x1f10] sm:$0xff]  ;;  %v10604_v23 = vcombine.high %v1720_v8, %v1724_v27 }
 0x449   :  { %7956 = vmatprep.subr.bf16.mxu0 %v10508_v30  ;;  %v1852_v21 = vld [vmem:[#allocation2 + $0x1f30] sm:$0xff]  ;;  %v10603_v30 = vcombine.low %v1720_v8, %v1724_v27 }
 0x44a   :  { %7996 = vmatpush1.bf16.msra.mxu1 %v10643_v29  ;;  %v10732_v39 = vcombine.high %v1848_v14, %v1852_v21  ;;  %v1712_v25 = vld [vmem:[#allocation2 + $0x1ad0] sm:$0xff] }
 0x44b   :  { %7997 = vmatprep.subr.bf16.mxu1 %v10636_v32  ;;  %v1716_v26 = vld [vmem:[#allocation2 + $0x1af0] sm:$0xff]  ;;  %v10731_v32 = vcombine.low %v1848_v14, %v1852_v21  ;;  %v913_v14 = vld [vmem:[#allocation2 + $0x1d8] sm:$0xff] }
 0x44c   :  { %7957 = vmatpush1.bf16.msra.mxu0 %v10507_v42  ;;  %v1840_v43 = vld [vmem:[#allocation2 + $0x1ed0] sm:$0xff]  ;;  %v10596_v34 = vcombine.high %v1712_v25, %v1716_v26  ;;  %v917_v21 = vld [vmem:[#allocation2 + $0x1f8] sm:$0xff] }
 0x44d   :  { %7958 = vmatprep.subr.bf16.mxu0 %v10628_v47  ;;  %v1844_v29 = vld [vmem:[#allocation2 + $0x1ef0] sm:$0xff]  ;;  %v10595_v47 = vcombine.low %v1712_v25, %v1716_v26  ;;  %v9798_v25 = vcombine.high %v913_v14, %v917_v21 }
 0x44e   :  { %7998 = vmatpush1.bf16.msra.mxu1 %v10635_v60  ;;  %v10724_v50 = vcombine.high %v1840_v43, %v1844_v29  ;;  %v1704_v55 = vld [vmem:[#allocation2 + $0x1a90] sm:$0xff] }
 0x44f   :  { %7999 = vmatprep.subr.bf16.mxu1 %v10756_v49  ;;  %v1708_v38 = vld [vmem:[#allocation2 + $0x1ab0] sm:$0xff]  ;;  %v10723_v49 = vcombine.low %v1840_v43, %v1844_v29  ;;  %v905_v43 = vld [vmem:[#allocation2 + $0x198] sm:$0xff] }
 0x450   :  { %7959 = vmatpush2.bf16.msra.mxu0 %v10627_v54  ;;  %v1832_v42 = vld [vmem:[#allocation2 + $0x1e90] sm:$0xff]  ;;  %v10588_v52 = vcombine.high %v1704_v55, %v1708_v38  ;;  %v909_v29 = vld [vmem:[#allocation2 + $0x1b8] sm:$0xff] }
 0x451   :  { %7960 = vmatprep.subr.bf16.mxu0 %v10620_v58  ;;  %v1836_v60 = vld [vmem:[#allocation2 + $0x1eb0] sm:$0xff]  ;;  %v10587_v58 = vcombine.low %v1704_v55, %v1708_v38  ;;  %v9797_v55 = vcombine.low %v913_v14, %v917_v21 }
 0x452   :  { %8000 = vmatpush2.bf16.msra.mxu1 %v10755_v57  ;;  %v10716_v53 = vcombine.high %v1832_v42, %v1836_v60  ;;  %v1696_v63 = vld [vmem:[#allocation2 + $0x1a50] sm:$0xff] }
 0x453   :  { %8001 = vmatprep.subr.bf16.mxu1 %v10748_v59  ;;  %v1700_v1 = vld [vmem:[#allocation2 + $0x1a70] sm:$0xff]  ;;  %v10715_v59 = vcombine.low %v1832_v42, %v1836_v60  ;;  %v9790_v42 = vcombine.high %v905_v43, %v909_v29 }
 0x454   :  { %7961 = vmatpush2.bf16.msra.mxu0 %v10619_v48  ;;  %v1824_v54 = vld [vmem:[#allocation2 + $0x1e50] sm:$0xff]  ;;  %v10580_v18 = vcombine.high %v1696_v63, %v1700_v1 }
 0x455   :  { %7962 = vmatprep.subr.bf16.mxu0 %v10612_v9  ;;  %v1828_v57 = vld [vmem:[#allocation2 + $0x1e70] sm:$0xff]  ;;  %v10579_v9 = vcombine.low %v1696_v63, %v1700_v1  ;;  %v1025_v63 = vld [vmem:[#allocation2 + $0x558] sm:$0xff] }
 0x456   :  { %8002 = vmatpush2.bf16.msra.mxu1 %v10747_v5  ;;  %v10708_v20 = vcombine.high %v1824_v54, %v1828_v57  ;;  %v1688_v61 = vld [vmem:[#allocation2 + $0x1a10] sm:$0xff]  ;;  %v1029_v1 = vld [vmem:[#allocation2 + $0x578] sm:$0xff] }
 0x457   :  { %8003 = vmatprep.subr.bf16.mxu1 %v10740_v13  ;;  %v1692_v2 = vld [vmem:[#allocation2 + $0x1a30] sm:$0xff]  ;;  %v10707_v13 = vcombine.low %v1824_v54, %v1828_v57 }
 0x458   :  { %7963 = vmatpush2.bf16.msra.mxu0 %v10611_v6  ;;  %v1816_v48 = vld [vmem:[#allocation2 + $0x1e10] sm:$0xff]  ;;  %v10572_v8 = vcombine.high %v1688_v61, %v1692_v2  ;;  %v1041_v6 = vld [vmem:[#allocation2 + $0x5d8] sm:$0xff] }
 0x459   :  { %7964 = vmatprep.subr.bf16.mxu0 %v10604_v23  ;;  %v1820_v5 = vld [vmem:[#allocation2 + $0x1e30] sm:$0xff]  ;;  %v10571_v23 = vcombine.low %v1688_v61, %v1692_v2  ;;  %v9910_v2 = vcombine.high %v1025_v63, %v1029_v1 }
 0x45a   :  { %8004 = vmatpush2.bf16.msra.mxu1 %v10739_v36  ;;  %v10700_v27 = vcombine.high %v1816_v48, %v1820_v5  ;;  %v1045_v36 = vld [vmem:[#allocation2 + $0x5f8] sm:$0xff] }
 0x45b   :  { %8005 = vmatprep.subr.bf16.mxu1 %v10732_v39  ;;  %v10699_v39 = vcombine.low %v1816_v48, %v1820_v5  ;;  %v9926_v26 = vcombine.high %v1041_v6, %v1045_v36  ;;  %v9925_v38 = vcombine.low %v1041_v6, %v1045_v36  ;;  %v889_v48 = vld [vmem:[#allocation2 + $0x118] sm:$0xff]  ;;  %v9909_v36 = vcombine.low %v1025_v63, %v1029_v1 }
 0x45c   :  { %7965 = vmatpush2.bf16.msra.mxu0 %v10603_v30  ;;  %v1033_v30 = vld [vmem:[#allocation2 + $0x598] sm:$0xff] }
 0x45d   :  { %7966 = vmatprep.subr.bf16.mxu0 %v10596_v34  ;;  %v11200_v34 = vld [vmem:[#allocation10] sm:$0xff] }
 0x45e   :  { %8006 = vmatpush2.bf16.msra.mxu1 %v10731_v32  ;;  %v1037_v32 = vld [vmem:[#allocation2 + $0x5b8] sm:$0xff]  ;;  %v1903_v60 = vrot.slane %v11200_v34, %v11627_v24 }
 0x45f   :  { %8007 = vmatprep.subr.bf16.mxu1 %v10724_v50  ;;  %v1899_v50 = vrot.slane %v11200_v34, %v11620_v11  ;;  %v9789_v11 = vcombine.low %v905_v43, %v909_v29  ;;  %v893_v5 = vld [vmem:[#allocation2 + $0x138] sm:$0xff] }
 0x460   :  { %7967 = vmatpush2.bf16.msra.mxu0 %v10595_v47  ;;  %v9918_v47 = vcombine.high %v1033_v30, %v1037_v32  ;;  %v1009_v43 = vld [vmem:[#allocation2 + $0x4d8] sm:$0xff] }
 0x461   :  { %7968 = vmatprep.subr.bf16.mxu0 %v10588_v52  ;;  %v901_v52 = vld [vmem:[#allocation2 + $0x178] sm:$0xff] }
 0x462   :  { %8008 = vmatpush2.bf16.msra.mxu1 %v10723_v49  ;;  %v897_v49 = vld [vmem:[#allocation2 + $0x158] sm:$0xff] }
 0x463   :  { %8009 = vmatprep.subr.bf16.mxu1 %v10716_v53  ;;  %v9781_v21 = vcombine.low %v897_v49, %v901_v52  ;;  %v1013_v29 = vld [vmem:[#allocation2 + $0x4f8] sm:$0xff] }
 0x464   :  { %7969 = vmatpush2.bf16.msra.mxu0 %v10587_v58  ;;  %v9894_v34 = vcombine.high %v1009_v43, %v1013_v29  ;;  %v869_v63 = vld [vmem:[#allocation2 + $0x78] sm:$0xff] }
 0x465   :  { %7970 = vmatprep.subr.bf16.mxu0 %v10580_v18  ;;  %v9782_v18 = vcombine.high %v897_v49, %v901_v52  ;;  %v993_v1 = vld [vmem:[#allocation2 + $0x458] sm:$0xff] }
 0x466   :  { %8010 = vmatpush2.bf16.msra.mxu1 %v10715_v59  ;;  %v9917_v59 = vcombine.low %v1033_v30, %v1037_v32  ;;  %v9773_v30 = vcombine.low %v889_v48, %v893_v5 }
 0x467   :  { %8011 = vmatprep.subr.bf16.mxu1 %v10708_v20 }
 0x468   :  { %7971 = vmatpush2.bf16.msra.mxu0 %v10579_v9 }
 0x469   :  { %7972 = vmatprep.subr.bf16.mxu0 %v10572_v8  ;;  %v1021_v8 = vld [vmem:[#allocation2 + $0x538] sm:$0xff] }
 0x46a   :  { %8012 = vmatpush2.bf16.msra.mxu1 %v10707_v13  ;;  %v1017_v13 = vld [vmem:[#allocation2 + $0x518] sm:$0xff] }
 0x46b   :  { %8013 = vmatprep.subr.bf16.mxu1 %v10700_v27 }
 0x46c   :  { %7973 = vmatpush2.bf16.msra.mxu0 %v10571_v23  ;;  %v9774_v23 = vcombine.high %v889_v48, %v893_v5 }
 0x46d   :  { %8024 = vmatprep.subr.bf16.mxu0 %v9798_v25  ;;  %v9902_v25 = vcombine.high %v1017_v13, %v1021_v8 }
 0x46e   :  { %8014 = vmatpush2.bf16.msra.mxu1 %v10699_v39 }
 0x46f   :  { %8065 = vmatprep.subr.bf16.mxu1 %v9926_v26  ;;  %v7730_v53 = vpop.f32.mrf.mxu0  ;;  %7975 = vmatmul.mubr.bf16.vlgmr.msra.gmra.mxu0 %v11676_v3  ;;  %v881_v26 = vld [vmem:[#allocation2 + $0xd8] sm:$0xff] }
 0x470   :  { %v7731_v54 = vadd.f32 %v7730_v53, %v1899_v50  ;;  %8025 = vmatpush1.bf16.msra.mxu0 %v9797_v55  ;;  %8056 = vmatprep.mubr.bf16.mxu0 %v11637_v41  ;;  %v885_v41 = vld [vmem:[#allocation2 + $0xf8] sm:$0xff] }
 0x471   :  { %v7771_v57 = vpop.f32.mrf.mxu1  ;;  %8016 = vmatmul.mubr.bf16.vlgmr.msra.gmra.mxu1 %v11678_v12  ;;  %v7732_v58 = vpop.f32.mrf.mxu0  ;;  %8026 = vmatprep.subr.bf16.mxu0 %v9790_v42  ;;  %v9766_v32 = vcombine.high %v881_v26, %v885_v41  ;;  %v873_v50 = vld [vmem:[#allocation2 + $0x98] sm:$0xff] }
 0x472   :  { %8066 = vmatpush1.bf16.msra.mxu1 %v9925_v38  ;;  %v11782_v24 = vadd.f32 %v7771_v57, %v7731_v54  ;;  %v7733_v20 = vadd.f32 %v7732_v58, %v1903_v60  ;;  %8097 = vmatprep.mubr.bf16.mxu1 %v11640_v45  ;;  %v9901_v45 = vcombine.low %v1017_v13, %v1021_v8  ;;  %v877_v55 = vld [vmem:[#allocation2 + $0xb8] sm:$0xff] }
 0x473   :  { %v7773_v61 = vpop.f32.mrf.mxu1  ;;  %8067 = vmatprep.subr.bf16.mxu1 %v9918_v47  ;;  %v7734_v9 = vpop.f32.mrf.mxu0  ;;  %v1001_v38 = vld [vmem:[#allocation2 + $0x498] sm:$0xff]  ;;  %v9765_v60 = vcombine.low %v881_v26, %v885_v41  ;;  %v9893_v47 = vcombine.low %v1009_v43, %v1013_v29  ;;  %v9758_v49 = vcombine.high %v873_v50, %v877_v55  ;;  %v9757_v57 = vcombine.low %v873_v50, %v877_v55 }
 0x474   :  { %v11786_v27 = vadd.f32 %v7773_v61, %v7733_v20  ;;  %8027 = vmatpush1.bf16.msra.mxu0 %v9789_v11  ;;  %v1005_v42 = vld [vmem:[#allocation2 + $0x4b8] sm:$0xff] }
 0x475   :  { %v7775_v14 = vpop.f32.mrf.mxu1  ;;  %v7735_v6 = vpop.f32.mrf.mxu0  ;;  %8028 = vmatprep.subr.bf16.mxu0 %v9782_v18  ;;  %v9886_v52 = vcombine.high %v1001_v38, %v1005_v42  ;;  %v865_v53 = vld [vmem:[#allocation2 + $0x58] sm:$0xff]  ;;  %v9885_v11 = vcombine.low %v1001_v38, %v1005_v42 }
 0x476   :  { %8068 = vmatpush1.bf16.msra.mxu1 %v9917_v59  ;;  %v997_v54 = vld [vmem:[#allocation2 + $0x478] sm:$0xff]  ;;  %v9750_v58 = vcombine.high %v865_v53, %v869_v63  ;;  %v9749_v48 = vcombine.low %v865_v53, %v869_v63 }
 0x477   :  { %v7776_v39 = vpop.f32.mrf.mxu1  ;;  %8069 = vmatprep.subr.bf16.mxu1 %v9910_v2  ;;  %v9878_v59 = vcombine.high %v993_v1, %v997_v54  ;;  %v857_v18 = vld [vmem:[#allocation2 + $0x18] sm:$0xff]  ;;  %v9877_v5 = vcombine.low %v993_v1, %v997_v54 }
 0x478   :  { %8029 = vmatpush1.bf16.msra.mxu0 %v9781_v21  ;;  %v861_v20 = vld [vmem:[#allocation2 + $0x38] sm:$0xff] }
 0x479   :  { %8030 = vmatprep.subr.bf16.mxu0 %v9774_v23  ;;  %v985_v61 = vld [vmem:[#allocation2 + $0x418] sm:$0xff]  ;;  %v9742_v9 = vcombine.high %v857_v18, %v861_v20 }
 0x47a   :  { %8070 = vmatpush1.bf16.msra.mxu1 %v9909_v36  ;;  %v989_v2 = vld [vmem:[#allocation2 + $0x438] sm:$0xff]  ;;  %v9741_v36 = vcombine.low %v857_v18, %v861_v20 }
 0x47b   :  { %8071 = vmatprep.subr.bf16.mxu1 %v9902_v25  ;;  %v9870_v13 = vcombine.high %v985_v61, %v989_v2  ;;  %v977_v8 = vld [vmem:[#allocation2 + $0x3d8] sm:$0xff]  ;;  %v9869_v23 = vcombine.low %v985_v61, %v989_v2 }
 0x47c   :  { %8031 = vmatpush1.bf16.msra.mxu0 %v9773_v30  ;;  %v981_v14 = vld [vmem:[#allocation2 + $0x3f8] sm:$0xff] }
 0x47d   :  { %8032 = vmatprep.subr.bf16.mxu0 %v9766_v32  ;;  %v1105_v21 = vld [vmem:[#allocation2 + $0x7d8] sm:$0xff]  ;;  %v9862_v39 = vcombine.high %v977_v8, %v981_v14  ;;  %v9861_v30 = vcombine.low %v977_v8, %v981_v14 }
 0x47e   :  { %8072 = vmatpush1.bf16.msra.mxu1 %v9901_v45  ;;  %v1109_v6 = vld [vmem:[#allocation2 + $0x7f8] sm:$0xff] }
 0x47f   :  { %8073 = vmatprep.subr.bf16.mxu1 %v9894_v34  ;;  %v9990_v25 = vcombine.high %v1105_v21, %v1109_v6  ;;  %v969_v26 = vld [vmem:[#allocation2 + $0x398] sm:$0xff]  ;;  %v9989_v45 = vcombine.low %v1105_v21, %v1109_v6 }
 0x480   :  { %8033 = vmatpush1.bf16.msra.mxu0 %v9765_v60  ;;  %v973_v41 = vld [vmem:[#allocation2 + $0x3b8] sm:$0xff] }
 0x481   :  { %8034 = vmatprep.subr.bf16.mxu0 %v9758_v49  ;;  %v1097_v43 = vld [vmem:[#allocation2 + $0x798] sm:$0xff]  ;;  %v9854_v32 = vcombine.high %v969_v26, %v973_v41  ;;  %v9853_v60 = vcombine.low %v969_v26, %v973_v41 }
 0x482   :  { %8074 = vmatpush1.bf16.msra.mxu1 %v9893_v47  ;;  %v1101_v29 = vld [vmem:[#allocation2 + $0x7b8] sm:$0xff] }
 0x483   :  { %8075 = vmatprep.subr.bf16.mxu1 %v9886_v52  ;;  %v9982_v34 = vcombine.high %v1097_v43, %v1101_v29  ;;  %v961_v50 = vld [vmem:[#allocation2 + $0x358] sm:$0xff]  ;;  %v9981_v47 = vcombine.low %v1097_v43, %v1101_v29 }
 0x484   :  { %8035 = vmatpush1.bf16.msra.mxu0 %v9757_v57  ;;  %v965_v55 = vld [vmem:[#allocation2 + $0x378] sm:$0xff] }
 0x485   :  { %8036 = vmatprep.subr.bf16.mxu0 %v9750_v58  ;;  %v1089_v38 = vld [vmem:[#allocation2 + $0x758] sm:$0xff]  ;;  %v9846_v49 = vcombine.high %v961_v50, %v965_v55  ;;  %v9845_v57 = vcombine.low %v961_v50, %v965_v55 }
 0x486   :  { %8076 = vmatpush1.bf16.msra.mxu1 %v9885_v11  ;;  %v1093_v42 = vld [vmem:[#allocation2 + $0x778] sm:$0xff] }
 0x487   :  { %8077 = vmatprep.subr.bf16.mxu1 %v9878_v59  ;;  %v9974_v52 = vcombine.high %v1089_v38, %v1093_v42  ;;  %v953_v53 = vld [vmem:[#allocation2 + $0x318] sm:$0xff]  ;;  %v9973_v11 = vcombine.low %v1089_v38, %v1093_v42 }
 0x488   :  { %8037 = vmatpush1.bf16.msra.mxu0 %v9749_v48  ;;  %v957_v63 = vld [vmem:[#allocation2 + $0x338] sm:$0xff] }
 0x489   :  { %8038 = vmatprep.subr.bf16.mxu0 %v9742_v9  ;;  %v1081_v1 = vld [vmem:[#allocation2 + $0x718] sm:$0xff]  ;;  %v9838_v58 = vcombine.high %v953_v53, %v957_v63  ;;  %v9837_v48 = vcombine.low %v953_v53, %v957_v63 }
 0x48a   :  { %8078 = vmatpush1.bf16.msra.mxu1 %v9877_v5  ;;  %v1085_v54 = vld [vmem:[#allocation2 + $0x738] sm:$0xff] }
 0x48b   :  { %8079 = vmatprep.subr.bf16.mxu1 %v9870_v13  ;;  %v9966_v59 = vcombine.high %v1081_v1, %v1085_v54  ;;  %v945_v18 = vld [vmem:[#allocation2 + $0x2d8] sm:$0xff]  ;;  %v9965_v5 = vcombine.low %v1081_v1, %v1085_v54 }
 0x48c   :  { %8039 = vmatpush1.bf16.msra.mxu0 %v9741_v36  ;;  %v949_v20 = vld [vmem:[#allocation2 + $0x2f8] sm:$0xff] }
 0x48d   :  { %8040 = vmatprep.subr.bf16.mxu0 %v9862_v39  ;;  %v1073_v61 = vld [vmem:[#allocation2 + $0x6d8] sm:$0xff]  ;;  %v9830_v9 = vcombine.high %v945_v18, %v949_v20  ;;  %v9829_v36 = vcombine.low %v945_v18, %v949_v20 }
 0x48e   :  { %8080 = vmatpush1.bf16.msra.mxu1 %v9869_v23  ;;  %v1077_v2 = vld [vmem:[#allocation2 + $0x6f8] sm:$0xff] }
 0x48f   :  { %8081 = vmatprep.subr.bf16.mxu1 %v9990_v25  ;;  %v9958_v13 = vcombine.high %v1073_v61, %v1077_v2  ;;  %v937_v8 = vld [vmem:[#allocation2 + $0x298] sm:$0xff]  ;;  %v9957_v23 = vcombine.low %v1073_v61, %v1077_v2 }
 0x490   :  { %8041 = vmatpush2.bf16.msra.mxu0 %v9861_v30  ;;  %v941_v14 = vld [vmem:[#allocation2 + $0x2b8] sm:$0xff] }
 0x491   :  { %8042 = vmatprep.subr.bf16.mxu0 %v9854_v32  ;;  %v1065_v21 = vld [vmem:[#allocation2 + $0x698] sm:$0xff]  ;;  %v9822_v39 = vcombine.high %v937_v8, %v941_v14  ;;  %v9821_v30 = vcombine.low %v937_v8, %v941_v14 }
 0x492   :  { %8082 = vmatpush2.bf16.msra.mxu1 %v9989_v45  ;;  %v1069_v6 = vld [vmem:[#allocation2 + $0x6b8] sm:$0xff] }
 0x493   :  { %8083 = vmatprep.subr.bf16.mxu1 %v9982_v34  ;;  %v9950_v25 = vcombine.high %v1065_v21, %v1069_v6  ;;  %v929_v26 = vld [vmem:[#allocation2 + $0x258] sm:$0xff]  ;;  %v9949_v45 = vcombine.low %v1065_v21, %v1069_v6 }
 0x494   :  { %8043 = vmatpush2.bf16.msra.mxu0 %v9853_v60  ;;  %v933_v41 = vld [vmem:[#allocation2 + $0x278] sm:$0xff] }
 0x495   :  { %8044 = vmatprep.subr.bf16.mxu0 %v9846_v49  ;;  %v1057_v43 = vld [vmem:[#allocation2 + $0x658] sm:$0xff]  ;;  %v9814_v32 = vcombine.high %v929_v26, %v933_v41  ;;  %v9813_v60 = vcombine.low %v929_v26, %v933_v41 }
 0x496   :  { %8084 = vmatpush2.bf16.msra.mxu1 %v9981_v47  ;;  %v1061_v29 = vld [vmem:[#allocation2 + $0x678] sm:$0xff] }
 0x497   :  { %8085 = vmatprep.subr.bf16.mxu1 %v9974_v52  ;;  %v9942_v34 = vcombine.high %v1057_v43, %v1061_v29  ;;  %v921_v50 = vld [vmem:[#allocation2 + $0x218] sm:$0xff]  ;;  %v9941_v47 = vcombine.low %v1057_v43, %v1061_v29 }
 0x498   :  { %8045 = vmatpush2.bf16.msra.mxu0 %v9845_v57  ;;  %v925_v55 = vld [vmem:[#allocation2 + $0x238] sm:$0xff] }
 0x499   :  { %8046 = vmatprep.subr.bf16.mxu0 %v9838_v58  ;;  %v1049_v38 = vld [vmem:[#allocation2 + $0x618] sm:$0xff]  ;;  %v9806_v49 = vcombine.high %v921_v50, %v925_v55  ;;  %v9805_v57 = vcombine.low %v921_v50, %v925_v55 }
 0x49a   :  { %8086 = vmatpush2.bf16.msra.mxu1 %v9973_v11  ;;  %v1053_v42 = vld [vmem:[#allocation2 + $0x638] sm:$0xff] }
 0x49b   :  { %8087 = vmatprep.subr.bf16.mxu1 %v9966_v59  ;;  %v9934_v52 = vcombine.high %v1049_v38, %v1053_v42  ;;  %v1169_v53 = vld [vmem:[#allocation2 + $0x9d8] sm:$0xff]  ;;  %v9933_v11 = vcombine.low %v1049_v38, %v1053_v42 }
 0x49c   :  { %8047 = vmatpush2.bf16.msra.mxu0 %v9837_v48  ;;  %v1173_v63 = vld [vmem:[#allocation2 + $0x9f8] sm:$0xff] }
 0x49d   :  { %8048 = vmatprep.subr.bf16.mxu0 %v9830_v9  ;;  %v1297_v1 = vld [vmem:[#allocation2 + $0xdd8] sm:$0xff]  ;;  %v10054_v58 = vcombine.high %v1169_v53, %v1173_v63  ;;  %v10053_v48 = vcombine.low %v1169_v53, %v1173_v63 }
 0x49e   :  { %8088 = vmatpush2.bf16.msra.mxu1 %v9965_v5  ;;  %v1301_v54 = vld [vmem:[#allocation2 + $0xdf8] sm:$0xff] }
 0x49f   :  { %8089 = vmatprep.subr.bf16.mxu1 %v9958_v13  ;;  %v10182_v59 = vcombine.high %v1297_v1, %v1301_v54  ;;  %v1161_v18 = vld [vmem:[#allocation2 + $0x998] sm:$0xff]  ;;  %v10181_v5 = vcombine.low %v1297_v1, %v1301_v54 }
 0x4a0   :  { %8049 = vmatpush2.bf16.msra.mxu0 %v9829_v36  ;;  %v1165_v20 = vld [vmem:[#allocation2 + $0x9b8] sm:$0xff] }
 0x4a1   :  { %8050 = vmatprep.subr.bf16.mxu0 %v9822_v39  ;;  %v1289_v61 = vld [vmem:[#allocation2 + $0xd98] sm:$0xff]  ;;  %v10046_v9 = vcombine.high %v1161_v18, %v1165_v20 }
 0x4a2   :  { %8090 = vmatpush2.bf16.msra.mxu1 %v9957_v23  ;;  %v1293_v2 = vld [vmem:[#allocation2 + $0xdb8] sm:$0xff] }
 0x4a3   :  { %8091 = vmatprep.subr.bf16.mxu1 %v9950_v25  ;;  %v10174_v13 = vcombine.high %v1289_v61, %v1293_v2  ;;  %v1153_v8 = vld [vmem:[#allocation2 + $0x958] sm:$0xff]  ;;  %v10045_v25 = vcombine.low %v1161_v18, %v1165_v20  ;;  %v10173_v41 = vcombine.low %v1289_v61, %v1293_v2 }
 0x4a4   :  { %8051 = vmatpush2.bf16.msra.mxu0 %v9821_v30  ;;  %v1157_v14 = vld [vmem:[#allocation2 + $0x978] sm:$0xff] }
 0x4a5   :  { %8052 = vmatprep.subr.bf16.mxu0 %v9814_v32  ;;  %v1281_v6 = vld [vmem:[#allocation2 + $0xd58] sm:$0xff]  ;;  %v10038_v43 = vcombine.high %v1153_v8, %v1157_v14  ;;  %v10037_v42 = vcombine.low %v1153_v8, %v1157_v14 }
 0x4a6   :  { %8092 = vmatpush2.bf16.msra.mxu1 %v9949_v45  ;;  %v1285_v36 = vld [vmem:[#allocation2 + $0xd78] sm:$0xff] }
 0x4a7   :  { %8093 = vmatprep.subr.bf16.mxu1 %v9942_v34  ;;  %v1145_v32 = vld [vmem:[#allocation2 + $0x918] sm:$0xff] }
 0x4a8   :  { %8053 = vmatpush2.bf16.msra.mxu0 %v9813_v60  ;;  %v1149_v34 = vld [vmem:[#allocation2 + $0x938] sm:$0xff] }
 0x4a9   :  { %8054 = vmatprep.subr.bf16.mxu0 %v9806_v49  ;;  %v1277_v50 = vld [vmem:[#allocation2 + $0xd38] sm:$0xff]  ;;  %v10029_v54 = vcombine.low %v1145_v32, %v1149_v34 }
 0x4aa   :  { %8094 = vmatpush2.bf16.msra.mxu1 %v9941_v47  ;;  %v10030_v47 = vcombine.high %v1145_v32, %v1149_v34  ;;  %v1137_v53 = vld [vmem:[#allocation2 + $0x8d8] sm:$0xff] }
 0x4ab   :  { %8095 = vmatprep.subr.bf16.mxu1 %v9934_v52  ;;  %v1265_v63 = vld [vmem:[#allocation2 + $0xcd8] sm:$0xff] }
 0x4ac   :  { %8055 = vmatpush2.bf16.msra.mxu0 %v9805_v57  ;;  %v1269_v1 = vld [vmem:[#allocation2 + $0xcf8] sm:$0xff] }
 0x4ad   :  { %8106 = vmatprep.subr.bf16.mxu0 %v10054_v58  ;;  %v1129_v58 = vld [vmem:[#allocation2 + $0x898] sm:$0xff]  ;;  %v10149_v2 = vcombine.low %v1265_v63, %v1269_v1 }
 0x4ae   :  { %8096 = vmatpush2.bf16.msra.mxu1 %v9933_v11  ;;  %v10150_v11 = vcombine.high %v1265_v63, %v1269_v1  ;;  %v1257_v18 = vld [vmem:[#allocation2 + $0xc98] sm:$0xff] }
 0x4af   :  { %8147 = vmatprep.subr.bf16.mxu1 %v10182_v59  ;;  %v7812_v21 = vpop.f32.mrf.mxu0  ;;  %8057 = vmatmul.mubr.bf16.vlgmr.msra.gmra.mxu0 %v11632_v33  ;;  %v10166_v33 = vcombine.high %v1281_v6, %v1285_v36  ;;  %v1133_v59 = vld [vmem:[#allocation2 + $0x8b8] sm:$0xff] }
 0x4b0   :  { %v7813_v23 = vadd.f32 %v7812_v21, %v11782_v24  ;;  %8107 = vmatpush1.bf16.msra.mxu0 %v10053_v48  ;;  %8138 = vmatprep.mubr.bf16.mxu0 %v11654_v10  ;;  %v1141_v10 = vld [vmem:[#allocation2 + $0x8f8] sm:$0xff]  ;;  %v10014_v48 = vcombine.high %v1129_v58, %v1133_v59  ;;  %v10013_v21 = vcombine.low %v1129_v58, %v1133_v59 }
 0x4b1   :  { %v7853_v39 = vpop.f32.mrf.mxu1  ;;  %8098 = vmatmul.mubr.bf16.vlgmr.msra.gmra.mxu1 %v11634_v37  ;;  %v7814_v26 = vpop.f32.mrf.mxu0  ;;  %8108 = vmatprep.subr.bf16.mxu0 %v10046_v9  ;;  %v1273_v37 = vld [vmem:[#allocation2 + $0xd18] sm:$0xff]  ;;  %v10022_v57 = vcombine.high %v1137_v53, %v1141_v10  ;;  %v10021_v61 = vcombine.low %v1137_v53, %v1141_v10 }
 0x4b2   :  { %8148 = vmatpush1.bf16.msra.mxu1 %v10181_v5  ;;  %v11791_v29 = vadd.f32 %v7853_v39, %v7813_v23  ;;  %v7815_v30 = vadd.f32 %v7814_v26, %v11786_v27  ;;  %8179 = vmatprep.mubr.bf16.mxu1 %v11658_v15  ;;  %v10165_v27 = vcombine.low %v1281_v6, %v1285_v36  ;;  %v1261_v20 = vld [vmem:[#allocation2 + $0xcb8] sm:$0xff] }
 0x4b3   :  { %v7855_v45 = vpop.f32.mrf.mxu1  ;;  %8149 = vmatprep.subr.bf16.mxu1 %v10174_v13  ;;  %v7816_v24 = vpop.f32.mrf.mxu0  ;;  %v10158_v52 = vcombine.high %v1273_v37, %v1277_v50  ;;  %v10157_v15 = vcombine.low %v1273_v37, %v1277_v50  ;;  %v10142_v5 = vcombine.high %v1257_v18, %v1261_v20  ;;  %v1121_v9 = vld [vmem:[#allocation2 + $0x858] sm:$0xff]  ;;  %v10141_v6 = vcombine.low %v1257_v18, %v1261_v20 }
 0x4b4   :  { %v11796_v55 = vadd.f32 %v7855_v45, %v7815_v30  ;;  %8109 = vmatpush1.bf16.msra.mxu0 %v10045_v25  ;;  %v1125_v13 = vld [vmem:[#allocation2 + $0x878] sm:$0xff] }
 0x4b5   :  { %v7857_v38 = vpop.f32.mrf.mxu1  ;;  %v7817_v60 = vpop.f32.mrf.mxu0  ;;  %8110 = vmatprep.subr.bf16.mxu0 %v10038_v43  ;;  %v1249_v8 = vld [vmem:[#allocation2 + $0xc58] sm:$0xff]  ;;  %v10006_v36 = vcombine.high %v1121_v9, %v1125_v13  ;;  %v10005_v43 = vcombine.low %v1121_v9, %v1125_v13 }
 0x4b6   :  { %8150 = vmatpush1.bf16.msra.mxu1 %v10173_v41  ;;  %v1253_v14 = vld [vmem:[#allocation2 + $0xc78] sm:$0xff] }
 0x4b7   :  { %v7858_v49 = vpop.f32.mrf.mxu1  ;;  %8151 = vmatprep.subr.bf16.mxu1 %v10166_v33  ;;  %v10134_v23 = vcombine.high %v1249_v8, %v1253_v14  ;;  %v1113_v39 = vld [vmem:[#allocation2 + $0x818] sm:$0xff]  ;;  %v10133_v30 = vcombine.low %v1249_v8, %v1253_v14 }
 0x4b8   :  { %8111 = vmatpush1.bf16.msra.mxu0 %v10037_v42  ;;  %v1117_v25 = vld [vmem:[#allocation2 + $0x838] sm:$0xff] }
 0x4b9   :  { %8112 = vmatprep.subr.bf16.mxu0 %v10030_v47  ;;  %v1241_v26 = vld [vmem:[#allocation2 + $0xc18] sm:$0xff]  ;;  %v9998_v45 = vcombine.high %v1113_v39, %v1117_v25  ;;  %v9997_v50 = vcombine.low %v1113_v39, %v1117_v25 }
 0x4ba   :  { %8152 = vmatpush1.bf16.msra.mxu1 %v10165_v27  ;;  %v1245_v41 = vld [vmem:[#allocation2 + $0xc38] sm:$0xff] }
 0x4bb   :  { %8153 = vmatprep.subr.bf16.mxu1 %v10158_v52  ;;  %v10126_v33 = vcombine.high %v1241_v26, %v1245_v41  ;;  %v1233_v32 = vld [vmem:[#allocation2 + $0xbd8] sm:$0xff]  ;;  %v10125_v38 = vcombine.low %v1241_v26, %v1245_v41 }
 0x4bc   :  { %8113 = vmatpush1.bf16.msra.mxu0 %v10029_v54  ;;  %v1237_v34 = vld [vmem:[#allocation2 + $0xbf8] sm:$0xff] }
 0x4bd   :  { %8114 = vmatprep.subr.bf16.mxu0 %v10022_v57  ;;  %v1361_v24 = vld [vmem:[#allocation2 + $0xfd8] sm:$0xff]  ;;  %v10118_v42 = vcombine.high %v1233_v32, %v1237_v34  ;;  %v10117_v53 = vcombine.low %v1233_v32, %v1237_v34 }
 0x4be   :  { %8154 = vmatpush1.bf16.msra.mxu1 %v10157_v15  ;;  %v1365_v37 = vld [vmem:[#allocation2 + $0xff8] sm:$0xff] }
 0x4bf   :  { %8155 = vmatprep.subr.bf16.mxu1 %v10150_v11  ;;  %v10246_v60 = vcombine.high %v1361_v24, %v1365_v37  ;;  %v1225_v27 = vld [vmem:[#allocation2 + $0xb98] sm:$0xff]  ;;  %v10245_v10 = vcombine.low %v1361_v24, %v1365_v37 }
 0x4c0   :  { %8115 = vmatpush1.bf16.msra.mxu0 %v10021_v61  ;;  %v1229_v47 = vld [vmem:[#allocation2 + $0xbb8] sm:$0xff] }
 0x4c1   :  { %8116 = vmatprep.subr.bf16.mxu0 %v10014_v48  ;;  %v1353_v49 = vld [vmem:[#allocation2 + $0xf98] sm:$0xff]  ;;  %v10110_v63 = vcombine.high %v1225_v27, %v1229_v47  ;;  %v10109_v58 = vcombine.low %v1225_v27, %v1229_v47 }
 0x4c2   :  { %8156 = vmatpush1.bf16.msra.mxu1 %v10149_v2  ;;  %v1357_v52 = vld [vmem:[#allocation2 + $0xfb8] sm:$0xff] }
 0x4c3   :  { %8157 = vmatprep.subr.bf16.mxu1 %v10142_v5  ;;  %v10238_v1 = vcombine.high %v1353_v49, %v1357_v52  ;;  %v1217_v54 = vld [vmem:[#allocation2 + $0xb58] sm:$0xff]  ;;  %v10237_v59 = vcombine.low %v1353_v49, %v1357_v52 }
 0x4c4   :  { %8117 = vmatpush1.bf16.msra.mxu0 %v10013_v21  ;;  %v1221_v15 = vld [vmem:[#allocation2 + $0xb78] sm:$0xff] }
 0x4c5   :  { %8118 = vmatprep.subr.bf16.mxu0 %v10006_v36  ;;  %v1345_v57 = vld [vmem:[#allocation2 + $0xf58] sm:$0xff]  ;;  %v10102_v18 = vcombine.high %v1217_v54, %v1221_v15  ;;  %v10101_v9 = vcombine.low %v1217_v54, %v1221_v15 }
 0x4c6   :  { %8158 = vmatpush1.bf16.msra.mxu1 %v10141_v6  ;;  %v1349_v11 = vld [vmem:[#allocation2 + $0xf78] sm:$0xff] }
 0x4c7   :  { %8159 = vmatprep.subr.bf16.mxu1 %v10134_v23  ;;  %v10230_v20 = vcombine.high %v1345_v57, %v1349_v11  ;;  %v1209_v61 = vld [vmem:[#allocation2 + $0xb18] sm:$0xff]  ;;  %v10229_v13 = vcombine.low %v1345_v57, %v1349_v11 }
 0x4c8   :  { %8119 = vmatpush1.bf16.msra.mxu0 %v10005_v43  ;;  %v1213_v2 = vld [vmem:[#allocation2 + $0xb38] sm:$0xff] }
 0x4c9   :  { %8120 = vmatprep.subr.bf16.mxu0 %v9998_v45  ;;  %v1337_v48 = vld [vmem:[#allocation2 + $0xf18] sm:$0xff]  ;;  %v10094_v8 = vcombine.high %v1209_v61, %v1213_v2  ;;  %v10093_v39 = vcombine.low %v1209_v61, %v1213_v2 }
 0x4ca   :  { %8160 = vmatpush1.bf16.msra.mxu1 %v10133_v30  ;;  %v1341_v5 = vld [vmem:[#allocation2 + $0xf38] sm:$0xff] }
 0x4cb   :  { %8161 = vmatprep.subr.bf16.mxu1 %v10126_v33  ;;  %v10222_v14 = vcombine.high %v1337_v48, %v1341_v5  ;;  %v1201_v21 = vld [vmem:[#allocation2 + $0xad8] sm:$0xff]  ;;  %v10221_v25 = vcombine.low %v1337_v48, %v1341_v5 }
 0x4cc   :  { %8121 = vmatpush1.bf16.msra.mxu0 %v9997_v50  ;;  %v1205_v6 = vld [vmem:[#allocation2 + $0xaf8] sm:$0xff] }
 0x4cd   :  { %8122 = vmatprep.subr.bf16.mxu0 %v10118_v42  ;;  %v1329_v36 = vld [vmem:[#allocation2 + $0xed8] sm:$0xff]  ;;  %v10086_v26 = vcombine.high %v1201_v21, %v1205_v6  ;;  %v10085_v32 = vcombine.low %v1201_v21, %v1205_v6 }
 0x4ce   :  { %8162 = vmatpush1.bf16.msra.mxu1 %v10125_v38  ;;  %v1333_v23 = vld [vmem:[#allocation2 + $0xef8] sm:$0xff] }
 0x4cf   :  { %8163 = vmatprep.subr.bf16.mxu1 %v10246_v60  ;;  %v10214_v41 = vcombine.high %v1329_v36, %v1333_v23  ;;  %v1193_v43 = vld [vmem:[#allocation2 + $0xa98] sm:$0xff]  ;;  %v10213_v34 = vcombine.low %v1329_v36, %v1333_v23 }
 0x4d0   :  { %8123 = vmatpush2.bf16.msra.mxu0 %v10117_v53  ;;  %v1197_v30 = vld [vmem:[#allocation2 + $0xab8] sm:$0xff] }
 0x4d1   :  { %8124 = vmatprep.subr.bf16.mxu0 %v10110_v63  ;;  %v1321_v45 = vld [vmem:[#allocation2 + $0xe98] sm:$0xff]  ;;  %v10078_v24 = vcombine.high %v1193_v43, %v1197_v30  ;;  %v10077_v27 = vcombine.low %v1193_v43, %v1197_v30 }
 0x4d2   :  { %8164 = vmatpush2.bf16.msra.mxu1 %v10245_v10  ;;  %v1325_v33 = vld [vmem:[#allocation2 + $0xeb8] sm:$0xff] }
 0x4d3   :  { %8165 = vmatprep.subr.bf16.mxu1 %v10238_v1  ;;  %v10206_v37 = vcombine.high %v1321_v45, %v1325_v33  ;;  %v1185_v50 = vld [vmem:[#allocation2 + $0xa58] sm:$0xff]  ;;  %v10205_v47 = vcombine.low %v1321_v45, %v1325_v33 }
 0x4d4   :  { %8125 = vmatpush2.bf16.msra.mxu0 %v10109_v58  ;;  %v1189_v38 = vld [vmem:[#allocation2 + $0xa78] sm:$0xff] }
 0x4d5   :  { %8126 = vmatprep.subr.bf16.mxu0 %v10102_v18  ;;  %v1313_v42 = vld [vmem:[#allocation2 + $0xe58] sm:$0xff]  ;;  %v10070_v49 = vcombine.high %v1185_v50, %v1189_v38  ;;  %v10069_v54 = vcombine.low %v1185_v50, %v1189_v38 }
 0x4d6   :  { %8166 = vmatpush2.bf16.msra.mxu1 %v10237_v59  ;;  %v1317_v60 = vld [vmem:[#allocation2 + $0xe78] sm:$0xff] }
 0x4d7   :  { %8167 = vmatprep.subr.bf16.mxu1 %v10230_v20  ;;  %v10198_v52 = vcombine.high %v1313_v42, %v1317_v60  ;;  %v1177_v53 = vld [vmem:[#allocation2 + $0xa18] sm:$0xff]  ;;  %v10197_v15 = vcombine.low %v1313_v42, %v1317_v60 }
 0x4d8   :  { %8127 = vmatpush2.bf16.msra.mxu0 %v10101_v9  ;;  %v1181_v10 = vld [vmem:[#allocation2 + $0xa38] sm:$0xff] }
 0x4d9   :  { %8128 = vmatprep.subr.bf16.mxu0 %v10094_v8  ;;  %v1305_v63 = vld [vmem:[#allocation2 + $0xe18] sm:$0xff]  ;;  %v10062_v57 = vcombine.high %v1177_v53, %v1181_v10  ;;  %v10061_v61 = vcombine.low %v1177_v53, %v1181_v10 }
 0x4da   :  { %8168 = vmatpush2.bf16.msra.mxu1 %v10229_v13  ;;  %v1309_v1 = vld [vmem:[#allocation2 + $0xe38] sm:$0xff] }
 0x4db   :  { %8169 = vmatprep.subr.bf16.mxu1 %v10222_v14  ;;  %v10190_v11 = vcombine.high %v1305_v63, %v1309_v1  ;;  %v1425_v58 = vld [vmem:[#allocation2 + $0x11d8] sm:$0xff]  ;;  %v10189_v2 = vcombine.low %v1305_v63, %v1309_v1 }
 0x4dc   :  { %8129 = vmatpush2.bf16.msra.mxu0 %v10093_v39  ;;  %v1429_v59 = vld [vmem:[#allocation2 + $0x11f8] sm:$0xff] }
 0x4dd   :  { %8130 = vmatprep.subr.bf16.mxu0 %v10086_v26  ;;  %v1553_v18 = vld [vmem:[#allocation2 + $0x15d8] sm:$0xff]  ;;  %v10310_v48 = vcombine.high %v1425_v58, %v1429_v59  ;;  %v10309_v21 = vcombine.low %v1425_v58, %v1429_v59 }
 0x4de   :  { %8170 = vmatpush2.bf16.msra.mxu1 %v10221_v25  ;;  %v1557_v20 = vld [vmem:[#allocation2 + $0x15f8] sm:$0xff] }
 0x4df   :  { %8171 = vmatprep.subr.bf16.mxu1 %v10214_v41  ;;  %v10438_v5 = vcombine.high %v1553_v18, %v1557_v20  ;;  %v1417_v9 = vld [vmem:[#allocation2 + $0x1198] sm:$0xff]  ;;  %v10437_v6 = vcombine.low %v1553_v18, %v1557_v20 }
 0x4e0   :  { %8131 = vmatpush2.bf16.msra.mxu0 %v10085_v32  ;;  %v1421_v13 = vld [vmem:[#allocation2 + $0x11b8] sm:$0xff] }
 0x4e1   :  { %8132 = vmatprep.subr.bf16.mxu0 %v10078_v24  ;;  %v1545_v8 = vld [vmem:[#allocation2 + $0x1598] sm:$0xff]  ;;  %v10302_v36 = vcombine.high %v1417_v9, %v1421_v13  ;;  %v10301_v33 = vcombine.low %v1417_v9, %v1421_v13 }
 0x4e2   :  { %8172 = vmatpush2.bf16.msra.mxu1 %v10213_v34  ;;  %v1549_v14 = vld [vmem:[#allocation2 + $0x15b8] sm:$0xff] }
 0x4e3   :  { %8173 = vmatprep.subr.bf16.mxu1 %v10206_v37  ;;  %v10430_v23 = vcombine.high %v1545_v8, %v1549_v14  ;;  %v1409_v39 = vld [vmem:[#allocation2 + $0x1158] sm:$0xff]  ;;  %v10429_v34 = vcombine.low %v1545_v8, %v1549_v14 }
 0x4e4   :  { %8133 = vmatpush2.bf16.msra.mxu0 %v10077_v27  ;;  %v1413_v25 = vld [vmem:[#allocation2 + $0x1178] sm:$0xff] }
 0x4e5   :  { %8134 = vmatprep.subr.bf16.mxu0 %v10070_v49  ;;  %v1537_v41 = vld [vmem:[#allocation2 + $0x1558] sm:$0xff]  ;;  %v10294_v24 = vcombine.high %v1409_v39, %v1413_v25 }
 0x4e6   :  { %8174 = vmatpush2.bf16.msra.mxu1 %v10205_v47  ;;  %v1541_v43 = vld [vmem:[#allocation2 + $0x1578] sm:$0xff] }
 0x4e7   :  { %8175 = vmatprep.subr.bf16.mxu1 %v10198_v52  ;;  %v1401_v42 = vld [vmem:[#allocation2 + $0x1118] sm:$0xff]  ;;  %v10293_v52 = vcombine.low %v1409_v39, %v1413_v25 }
 0x4e8   :  { %8135 = vmatpush2.bf16.msra.mxu0 %v10069_v54  ;;  %v1405_v60 = vld [vmem:[#allocation2 + $0x1138] sm:$0xff] }
 0x4e9   :  { %8136 = vmatprep.subr.bf16.mxu0 %v10062_v57  ;;  %v1533_v27 = vld [vmem:[#allocation2 + $0x1538] sm:$0xff]  ;;  %v10286_v10 = vcombine.high %v1401_v42, %v1405_v60 }
 0x4ea   :  { %8176 = vmatpush2.bf16.msra.mxu1 %v10197_v15  ;;  %v1393_v54 = vld [vmem:[#allocation2 + $0x10d8] sm:$0xff] }
 0x4eb   :  { %8177 = vmatprep.subr.bf16.mxu1 %v10190_v11  ;;  %v1521_v15 = vld [vmem:[#allocation2 + $0x14d8] sm:$0xff]  ;;  %v10285_v11 = vcombine.low %v1401_v42, %v1405_v60 }
 0x4ec   :  { %8137 = vmatpush2.bf16.msra.mxu0 %v10061_v61  ;;  %v1525_v57 = vld [vmem:[#allocation2 + $0x14f8] sm:$0xff] }
 0x4ed   :  { %8188 = vmatprep.subr.bf16.mxu0 %v10310_v48  ;;  %v10406_v59 = vcombine.high %v1521_v15, %v1525_v57  ;;  %v1385_v18 = vld [vmem:[#allocation2 + $0x1098] sm:$0xff] }
 0x4ee   :  { %8178 = vmatpush2.bf16.msra.mxu1 %v10189_v2  ;;  %v1389_v20 = vld [vmem:[#allocation2 + $0x10b8] sm:$0xff] }
 0x4ef   :  { %8229 = vmatprep.subr.bf16.mxu1 %v10438_v5  ;;  %v7894_v26 = vpop.f32.mrf.mxu0  ;;  %8139 = vmatmul.mubr.bf16.vlgmr.msra.gmra.mxu0 %v11648_v62  ;;  %v10422_v62 = vcombine.high %v1537_v41, %v1541_v43  ;;  %v1513_v61 = vld [vmem:[#allocation2 + $0x1498] sm:$0xff]  ;;  %v10405_v5 = vcombine.low %v1521_v15, %v1525_v57  ;;  %v10270_v9 = vcombine.high %v1385_v18, %v1389_v20 }
 0x4f0   :  { %v7895_v30 = vadd.f32 %v7894_v26, %v11791_v29  ;;  %8189 = vmatpush1.bf16.msra.mxu0 %v10309_v21  ;;  %8220 = vmatprep.mubr.bf16.mxu0 %v11670_v46  ;;  %v1397_v46 = vld [vmem:[#allocation2 + $0x10f8] sm:$0xff] }
 0x4f1   :  { %v7935_v45 = vpop.f32.mrf.mxu1  ;;  %8180 = vmatmul.mubr.bf16.vlgmr.msra.gmra.mxu1 %v11650_v0  ;;  %v7896_v32 = vpop.f32.mrf.mxu0  ;;  %8190 = vmatprep.subr.bf16.mxu0 %v10302_v36  ;;  %v1529_v0 = vld [vmem:[#allocation2 + $0x1518] sm:$0xff]  ;;  %v10278_v58 = vcombine.high %v1393_v54, %v1397_v46  ;;  %v10277_v48 = vcombine.low %v1393_v54, %v1397_v46  ;;  %v10269_v36 = vcombine.low %v1385_v18, %v1389_v20 }
 0x4f2   :  { %8230 = vmatpush1.bf16.msra.mxu1 %v10437_v6  ;;  %v11801_v37 = vadd.f32 %v7935_v45, %v7895_v30  ;;  %v7897_v50 = vadd.f32 %v7896_v32, %v11796_v55  ;;  %8261 = vmatprep.mubr.bf16.mxu1 %v11674_v51  ;;  %v10421_v55 = vcombine.low %v1537_v41, %v1541_v43  ;;  %v1517_v2 = vld [vmem:[#allocation2 + $0x14b8] sm:$0xff] }
 0x4f3   :  { %v7937_v38 = vpop.f32.mrf.mxu1  ;;  %8231 = vmatprep.subr.bf16.mxu1 %v10430_v23  ;;  %v7898_v29 = vpop.f32.mrf.mxu0  ;;  %v10414_v1 = vcombine.high %v1529_v0, %v1533_v27  ;;  %v10413_v51 = vcombine.low %v1529_v0, %v1533_v27  ;;  %v10398_v13 = vcombine.high %v1513_v61, %v1517_v2  ;;  %v1377_v8 = vld [vmem:[#allocation2 + $0x1058] sm:$0xff]  ;;  %v10397_v23 = vcombine.low %v1513_v61, %v1517_v2 }
 0x4f4   :  { %v11806_v47 = vadd.f32 %v7937_v38, %v7897_v50  ;;  %8191 = vmatpush1.bf16.msra.mxu0 %v10301_v33  ;;  %v1381_v14 = vld [vmem:[#allocation2 + $0x1078] sm:$0xff] }
 0x4f5   :  { %v7939_v49 = vpop.f32.mrf.mxu1  ;;  %v7899_v53 = vpop.f32.mrf.mxu0  ;;  %8192 = vmatprep.subr.bf16.mxu0 %v10294_v24  ;;  %v1505_v21 = vld [vmem:[#allocation2 + $0x1458] sm:$0xff]  ;;  %v10262_v39 = vcombine.high %v1377_v8, %v1381_v14  ;;  %v10261_v45 = vcombine.low %v1377_v8, %v1381_v14 }
 0x4f6   :  { %8232 = vmatpush1.bf16.msra.mxu1 %v10429_v34  ;;  %v1509_v6 = vld [vmem:[#allocation2 + $0x1478] sm:$0xff] }
 0x4f7   :  { %v7940_v63 = vpop.f32.mrf.mxu1  ;;  %8233 = vmatprep.subr.bf16.mxu1 %v10422_v62  ;;  %v10390_v25 = vcombine.high %v1505_v21, %v1509_v6  ;;  %v1369_v26 = vld [vmem:[#allocation2 + $0x1018] sm:$0xff]  ;;  %v10389_v33 = vcombine.low %v1505_v21, %v1509_v6 }
 0x4f8   :  { %8193 = vmatpush1.bf16.msra.mxu0 %v10293_v52  ;;  %v1373_v41 = vld [vmem:[#allocation2 + $0x1038] sm:$0xff] }
 0x4f9   :  { %8194 = vmatprep.subr.bf16.mxu0 %v10286_v10  ;;  %v1497_v43 = vld [vmem:[#allocation2 + $0x1418] sm:$0xff]  ;;  %v10254_v32 = vcombine.high %v1369_v26, %v1373_v41  ;;  %v10253_v42 = vcombine.low %v1369_v26, %v1373_v41 }
 0x4fa   :  { %8234 = vmatpush1.bf16.msra.mxu1 %v10421_v55  ;;  %v1501_v30 = vld [vmem:[#allocation2 + $0x1438] sm:$0xff] }
 0x4fb   :  { %8235 = vmatprep.subr.bf16.mxu1 %v10414_v1  ;;  %v10382_v34 = vcombine.high %v1497_v43, %v1501_v30  ;;  %v1489_v24 = vld [vmem:[#allocation2 + $0x13d8] sm:$0xff]  ;;  %v10381_v60 = vcombine.low %v1497_v43, %v1501_v30 }
 0x4fc   :  { %8195 = vmatpush1.bf16.msra.mxu0 %v10285_v11  ;;  %v1493_v50 = vld [vmem:[#allocation2 + $0x13f8] sm:$0xff] }
 0x4fd   :  { %8196 = vmatprep.subr.bf16.mxu0 %v10278_v58  ;;  %v1617_v38 = vld [vmem:[#allocation2 + $0x17d8] sm:$0xff]  ;;  %v10374_v29 = vcombine.high %v1489_v24, %v1493_v50  ;;  %v10373_v55 = vcombine.low %v1489_v24, %v1493_v50 }
 0x4fe   :  { %8236 = vmatpush1.bf16.msra.mxu1 %v10413_v51  ;;  %v1621_v62 = vld [vmem:[#allocation2 + $0x17f8] sm:$0xff] }
 0x4ff   :  { %8237 = vmatprep.subr.bf16.mxu1 %v10406_v59  ;;  %v10502_v0 = vcombine.high %v1617_v38, %v1621_v62  ;;  %v1481_v27 = vld [vmem:[#allocation2 + $0x1398] sm:$0xff]  ;;  %v10501_v10 = vcombine.low %v1617_v38, %v1621_v62 }
 0x500   :  { %8197 = vmatpush1.bf16.msra.mxu0 %v10277_v48  ;;  %v1485_v49 = vld [vmem:[#allocation2 + $0x13b8] sm:$0xff] }
 0x501   :  { %8198 = vmatprep.subr.bf16.mxu0 %v10270_v9  ;;  %v1609_v52 = vld [vmem:[#allocation2 + $0x1798] sm:$0xff]  ;;  %v10366_v63 = vcombine.high %v1481_v27, %v1485_v49  ;;  %v10365_v11 = vcombine.low %v1481_v27, %v1485_v49 }
 0x502   :  { %8238 = vmatpush1.bf16.msra.mxu1 %v10405_v5  ;;  %v1613_v53 = vld [vmem:[#allocation2 + $0x17b8] sm:$0xff] }
 0x503   :  { %8239 = vmatprep.subr.bf16.mxu1 %v10398_v13  ;;  %v10494_v1 = vcombine.high %v1609_v52, %v1613_v53  ;;  %v1473_v54 = vld [vmem:[#allocation2 + $0x1358] sm:$0xff]  ;;  %v10493_v51 = vcombine.low %v1609_v52, %v1613_v53 }
 0x504   :  { %8199 = vmatpush1.bf16.msra.mxu0 %v10269_v36  ;;  %v1477_v46 = vld [vmem:[#allocation2 + $0x1378] sm:$0xff] }
 0x505   :  { %8200 = vmatprep.subr.bf16.mxu0 %v10262_v39  ;;  %v1601_v15 = vld [vmem:[#allocation2 + $0x1758] sm:$0xff]  ;;  %v10358_v58 = vcombine.high %v1473_v54, %v1477_v46  ;;  %v10357_v48 = vcombine.low %v1473_v54, %v1477_v46 }
 0x506   :  { %8240 = vmatpush1.bf16.msra.mxu1 %v10397_v23  ;;  %v1605_v57 = vld [vmem:[#allocation2 + $0x1778] sm:$0xff] }
 0x507   :  { %8241 = vmatprep.subr.bf16.mxu1 %v10390_v25  ;;  %v10486_v59 = vcombine.high %v1601_v15, %v1605_v57  ;;  %v1465_v18 = vld [vmem:[#allocation2 + $0x1318] sm:$0xff]  ;;  %v10485_v5 = vcombine.low %v1601_v15, %v1605_v57 }
 0x508   :  { %8201 = vmatpush1.bf16.msra.mxu0 %v10261_v45  ;;  %v1469_v20 = vld [vmem:[#allocation2 + $0x1338] sm:$0xff] }
 0x509   :  { %8202 = vmatprep.subr.bf16.mxu0 %v10254_v32  ;;  %v1593_v61 = vld [vmem:[#allocation2 + $0x1718] sm:$0xff]  ;;  %v10350_v9 = vcombine.high %v1465_v18, %v1469_v20  ;;  %v10349_v36 = vcombine.low %v1465_v18, %v1469_v20 }
 0x50a   :  { %8242 = vmatpush1.bf16.msra.mxu1 %v10389_v33  ;;  %v1597_v2 = vld [vmem:[#allocation2 + $0x1738] sm:$0xff] }
 0x50b   :  { %8243 = vmatprep.subr.bf16.mxu1 %v10382_v34  ;;  %v10478_v13 = vcombine.high %v1593_v61, %v1597_v2  ;;  %v1457_v8 = vld [vmem:[#allocation2 + $0x12d8] sm:$0xff]  ;;  %v10477_v23 = vcombine.low %v1593_v61, %v1597_v2 }
 0x50c   :  { %8203 = vmatpush1.bf16.msra.mxu0 %v10253_v42  ;;  %v1461_v14 = vld [vmem:[#allocation2 + $0x12f8] sm:$0xff] }
 0x50d   :  { %8204 = vmatprep.subr.bf16.mxu0 %v10374_v29  ;;  %v1585_v21 = vld [vmem:[#allocation2 + $0x16d8] sm:$0xff]  ;;  %v10342_v39 = vcombine.high %v1457_v8, %v1461_v14  ;;  %v10341_v45 = vcombine.low %v1457_v8, %v1461_v14 }
 0x50e   :  { %8244 = vmatpush1.bf16.msra.mxu1 %v10381_v60  ;;  %v1589_v6 = vld [vmem:[#allocation2 + $0x16f8] sm:$0xff] }
 0x50f   :  { %8245 = vmatprep.subr.bf16.mxu1 %v10502_v0  ;;  %v10470_v25 = vcombine.high %v1585_v21, %v1589_v6  ;;  %v1449_v26 = vld [vmem:[#allocation2 + $0x1298] sm:$0xff]  ;;  %v10469_v33 = vcombine.low %v1585_v21, %v1589_v6 }
 0x510   :  { %8205 = vmatpush2.bf16.msra.mxu0 %v10373_v55  ;;  %v1453_v41 = vld [vmem:[#allocation2 + $0x12b8] sm:$0xff] }
 0x511   :  { %8206 = vmatprep.subr.bf16.mxu0 %v10366_v63  ;;  %v1577_v43 = vld [vmem:[#allocation2 + $0x1698] sm:$0xff]  ;;  %v10334_v32 = vcombine.high %v1449_v26, %v1453_v41  ;;  %v10333_v42 = vcombine.low %v1449_v26, %v1453_v41 }
 0x512   :  { %8246 = vmatpush2.bf16.msra.mxu1 %v10501_v10  ;;  %v1581_v30 = vld [vmem:[#allocation2 + $0x16b8] sm:$0xff] }
 0x513   :  { %8247 = vmatprep.subr.bf16.mxu1 %v10494_v1  ;;  %v10462_v34 = vcombine.high %v1577_v43, %v1581_v30  ;;  %v1441_v24 = vld [vmem:[#allocation2 + $0x1258] sm:$0xff]  ;;  %v10461_v60 = vcombine.low %v1577_v43, %v1581_v30 }
 0x514   :  { %8207 = vmatpush2.bf16.msra.mxu0 %v10365_v11  ;;  %v1445_v50 = vld [vmem:[#allocation2 + $0x1278] sm:$0xff] }
 0x515   :  { %8208 = vmatprep.subr.bf16.mxu0 %v10358_v58  ;;  %v1569_v38 = vld [vmem:[#allocation2 + $0x1658] sm:$0xff]  ;;  %v10326_v29 = vcombine.high %v1441_v24, %v1445_v50  ;;  %v10325_v55 = vcombine.low %v1441_v24, %v1445_v50 }
 0x516   :  { %8248 = vmatpush2.bf16.msra.mxu1 %v10493_v51  ;;  %v1573_v62 = vld [vmem:[#allocation2 + $0x1678] sm:$0xff] }
 0x517   :  { %8249 = vmatprep.subr.bf16.mxu1 %v10486_v59  ;;  %v10454_v0 = vcombine.high %v1569_v38, %v1573_v62  ;;  %v1433_v27 = vld [vmem:[#allocation2 + $0x1218] sm:$0xff]  ;;  %v10453_v10 = vcombine.low %v1569_v38, %v1573_v62 }
 0x518   :  { %8209 = vmatpush2.bf16.msra.mxu0 %v10357_v48  ;;  %v1437_v49 = vld [vmem:[#allocation2 + $0x1238] sm:$0xff] }
 0x519   :  { %8210 = vmatprep.subr.bf16.mxu0 %v10350_v9  ;;  %v1561_v52 = vld [vmem:[#allocation2 + $0x1618] sm:$0xff]  ;;  %v10318_v63 = vcombine.high %v1433_v27, %v1437_v49  ;;  %v10317_v11 = vcombine.low %v1433_v27, %v1437_v49 }
 0x51a   :  { %8250 = vmatpush2.bf16.msra.mxu1 %v10485_v5  ;;  %v1565_v53 = vld [vmem:[#allocation2 + $0x1638] sm:$0xff] }
 0x51b   :  { %8251 = vmatprep.subr.bf16.mxu1 %v10478_v13  ;;  %v10446_v1 = vcombine.high %v1561_v52, %v1565_v53  ;;  %v1681_v54 = vld [vmem:[#allocation2 + $0x19d8] sm:$0xff]  ;;  %v10445_v51 = vcombine.low %v1561_v52, %v1565_v53 }
 0x51c   :  { %8211 = vmatpush2.bf16.msra.mxu0 %v10349_v36  ;;  %v1685_v46 = vld [vmem:[#allocation2 + $0x19f8] sm:$0xff] }
 0x51d   :  { %8212 = vmatprep.subr.bf16.mxu0 %v10342_v39  ;;  %v1809_v15 = vld [vmem:[#allocation2 + $0x1dd8] sm:$0xff]  ;;  %v10566_v58 = vcombine.high %v1681_v54, %v1685_v46  ;;  %v10565_v48 = vcombine.low %v1681_v54, %v1685_v46 }
 0x51e   :  { %8252 = vmatpush2.bf16.msra.mxu1 %v10477_v23  ;;  %v1813_v57 = vld [vmem:[#allocation2 + $0x1df8] sm:$0xff] }
 0x51f   :  { %8253 = vmatprep.subr.bf16.mxu1 %v10470_v25  ;;  %v10694_v59 = vcombine.high %v1809_v15, %v1813_v57  ;;  %v1673_v18 = vld [vmem:[#allocation2 + $0x1998] sm:$0xff]  ;;  %v10693_v5 = vcombine.low %v1809_v15, %v1813_v57 }
 0x520   :  { %8213 = vmatpush2.bf16.msra.mxu0 %v10341_v45  ;;  %v1677_v20 = vld [vmem:[#allocation2 + $0x19b8] sm:$0xff] }
 0x521   :  { %8214 = vmatprep.subr.bf16.mxu0 %v10334_v32  ;;  %v1801_v61 = vld [vmem:[#allocation2 + $0x1d98] sm:$0xff]  ;;  %v10558_v9 = vcombine.high %v1673_v18, %v1677_v20  ;;  %v10557_v25 = vcombine.low %v1673_v18, %v1677_v20 }
 0x522   :  { %8254 = vmatpush2.bf16.msra.mxu1 %v10469_v33  ;;  %v1805_v2 = vld [vmem:[#allocation2 + $0x1db8] sm:$0xff] }
 0x523   :  { %8255 = vmatprep.subr.bf16.mxu1 %v10462_v34  ;;  %v10686_v13 = vcombine.high %v1801_v61, %v1805_v2  ;;  %v1665_v8 = vld [vmem:[#allocation2 + $0x1958] sm:$0xff]  ;;  %v10685_v41 = vcombine.low %v1801_v61, %v1805_v2 }
 0x524   :  { %8215 = vmatpush2.bf16.msra.mxu0 %v10333_v42  ;;  %v1669_v14 = vld [vmem:[#allocation2 + $0x1978] sm:$0xff] }
 0x525   :  { %8216 = vmatprep.subr.bf16.mxu0 %v10326_v29  ;;  %v1793_v6 = vld [vmem:[#allocation2 + $0x1d58] sm:$0xff]  ;;  %v10550_v43 = vcombine.high %v1665_v8, %v1669_v14  ;;  %v10549_v62 = vcombine.low %v1665_v8, %v1669_v14 }
 0x526   :  { %8256 = vmatpush2.bf16.msra.mxu1 %v10461_v60  ;;  %v1797_v36 = vld [vmem:[#allocation2 + $0x1d78] sm:$0xff] }
 0x527   :  { %8257 = vmatprep.subr.bf16.mxu1 %v10454_v0  ;;  %v1657_v32 = vld [vmem:[#allocation2 + $0x1918] sm:$0xff] }
 0x528   :  { %8217 = vmatpush2.bf16.msra.mxu0 %v10325_v55  ;;  %v1661_v34 = vld [vmem:[#allocation2 + $0x1938] sm:$0xff] }
 0x529   :  { %8218 = vmatprep.subr.bf16.mxu0 %v10318_v63  ;;  %v1789_v24 = vld [vmem:[#allocation2 + $0x1d38] sm:$0xff]  ;;  %v10542_v60 = vcombine.high %v1657_v32, %v1661_v34  ;;  %v10541_v53 = vcombine.low %v1657_v32, %v1661_v34 }
 0x52a   :  { %8258 = vmatpush2.bf16.msra.mxu1 %v10453_v10  ;;  %v1649_v27 = vld [vmem:[#allocation2 + $0x18d8] sm:$0xff] }
 0x52b   :  { %8259 = vmatprep.subr.bf16.mxu1 %v10446_v1  ;;  %v1777_v49 = vld [vmem:[#allocation2 + $0x1cd8] sm:$0xff] }
 0x52c   :  { %8219 = vmatpush2.bf16.msra.mxu0 %v10317_v11  ;;  %v1781_v52 = vld [vmem:[#allocation2 + $0x1cf8] sm:$0xff] }
 0x52d   :  { %8270 = vmatprep.subr.bf16.mxu0 %v10566_v58  ;;  %v10662_v10 = vcombine.high %v1777_v49, %v1781_v52  ;;  %v1641_v63 = vld [vmem:[#allocation2 + $0x1898] sm:$0xff]  ;;  %v10661_v57 = vcombine.low %v1777_v49, %v1781_v52 }
 0x52e   :  { %8260 = vmatpush2.bf16.msra.mxu1 %v10445_v51  ;;  %v1645_v1 = vld [vmem:[#allocation2 + $0x18b8] sm:$0xff] }
 0x52f   :  { %8311 = vmatprep.subr.bf16.mxu1 %v10694_v59  ;;  %v7976_v21 = vpop.f32.mrf.mxu0  ;;  %8221 = vmatmul.mubr.bf16.vlgmr.msra.gmra.mxu0 %v11664_v35  ;;  %v10678_v35 = vcombine.high %v1793_v6, %v1797_v36  ;;  %v1769_v54 = vld [vmem:[#allocation2 + $0x1c98] sm:$0xff]  ;;  %v10526_v11 = vcombine.high %v1641_v63, %v1645_v1  ;;  %v10525_v61 = vcombine.low %v1641_v63, %v1645_v1 }
 0x530   :  { %v7977_v23 = vadd.f32 %v7976_v21, %v11801_v37  ;;  %8271 = vmatpush1.bf16.msra.mxu0 %v10565_v48  ;;  %8302 = vmatprep.mubr.bf16.mxu0 %v11680_v16  ;;  %v1653_v16 = vld [vmem:[#allocation2 + $0x18f8] sm:$0xff] }
 0x531   :  { %v8017_v39 = vpop.f32.mrf.mxu1  ;;  %8262 = vmatmul.mubr.bf16.vlgmr.msra.gmra.mxu1 %v11666_v40  ;;  %v7978_v26 = vpop.f32.mrf.mxu0  ;;  %8272 = vmatprep.subr.bf16.mxu0 %v10558_v9  ;;  %v1785_v40 = vld [vmem:[#allocation2 + $0x1d18] sm:$0xff]  ;;  %v10534_v55 = vcombine.high %v1649_v27, %v1653_v16  ;;  %v10533_v15 = vcombine.low %v1649_v27, %v1653_v16 }
 0x532   :  { %8312 = vmatpush1.bf16.msra.mxu1 %v10693_v5  ;;  %v11811_v30 = vadd.f32 %v8017_v39, %v7977_v23  ;;  %v7979_v45 = vadd.f32 %v7978_v26, %v11806_v47  ;;  %8343 = vmatprep.mubr.bf16.mxu1 %v11682_v19  ;;  %v10677_v47 = vcombine.low %v1793_v6, %v1797_v36  ;;  %v1773_v46 = vld [vmem:[#allocation2 + $0x1cb8] sm:$0xff] }
 0x533   :  { %v8019_v33 = vpop.f32.mrf.mxu1  ;;  %8313 = vmatprep.subr.bf16.mxu1 %v10686_v13  ;;  %v7980_v37 = vpop.f32.mrf.mxu0  ;;  %v10670_v0 = vcombine.high %v1785_v40, %v1789_v24  ;;  %v10669_v19 = vcombine.low %v1785_v40, %v1789_v24  ;;  %v10654_v51 = vcombine.high %v1769_v54, %v1773_v46  ;;  %v1633_v58 = vld [vmem:[#allocation2 + $0x1858] sm:$0xff]  ;;  %v10653_v2 = vcombine.low %v1769_v54, %v1773_v46 }
 0x534   :  { %v11816_v50 = vadd.f32 %v8019_v33, %v7979_v45  ;;  %8273 = vmatpush1.bf16.msra.mxu0 %v10557_v25  ;;  %v1637_v59 = vld [vmem:[#allocation2 + $0x1878] sm:$0xff]  ;;  %vm8356_vm7 = vcmp.gt.f32.partialorder %v11811_v30, 0.0 }
 0x535   :  { %v8021_v38 = vpop.f32.mrf.mxu1  ;;  %v7981_v42 = vpop.f32.mrf.mxu0  ;;  %8274 = vmatprep.subr.bf16.mxu0 %v10550_v43  ;;  %v1761_v18 = vld [vmem:[#allocation2 + $0x1c58] sm:$0xff]  ;;  %v10518_v48 = vcombine.high %v1633_v58, %v1637_v59  ;;  %v10517_v21 = vcombine.low %v1633_v58, %v1637_v59 }
 0x536   :  { %8314 = vmatpush1.bf16.msra.mxu1 %v10685_v41  ;;  %v1765_v20 = vld [vmem:[#allocation2 + $0x1c78] sm:$0xff]  ;;  %vm8357_vm6 = vcmp.gt.f32.partialorder %v11816_v50, 0.0 }
 0x537   :  { %v8022_v29 = vpop.f32.mrf.mxu1  ;;  %8315 = vmatprep.subr.bf16.mxu1 %v10678_v35  ;;  %v10646_v5 = vcombine.high %v1761_v18, %v1765_v20  ;;  %v1625_v9 = vld [vmem:[#allocation2 + $0x1818] sm:$0xff]  ;;  %v10645_v6 = vcombine.low %v1761_v18, %v1765_v20 }
 0x538   :  { %8275 = vmatpush1.bf16.msra.mxu0 %v10549_v62  ;;  %v1629_v13 = vld [vmem:[#allocation2 + $0x1838] sm:$0xff] }
 0x539   :  { %8276 = vmatprep.subr.bf16.mxu0 %v10542_v60  ;;  %v1753_v8 = vld [vmem:[#allocation2 + $0x1c18] sm:$0xff]  ;;  %v10510_v36 = vcombine.high %v1625_v9, %v1629_v13  ;;  %v10509_v43 = vcombine.low %v1625_v9, %v1629_v13 }
 0x53a   :  { %8316 = vmatpush1.bf16.msra.mxu1 %v10677_v47  ;;  %v1757_v14 = vld [vmem:[#allocation2 + $0x1c38] sm:$0xff] }
 0x53b   :  { %8317 = vmatprep.subr.bf16.mxu1 %v10670_v0  ;;  %v10638_v23 = vcombine.high %v1753_v8, %v1757_v14  ;;  %v1745_v39 = vld [vmem:[#allocation2 + $0x1bd8] sm:$0xff]  ;;  %v10637_v45 = vcombine.low %v1753_v8, %v1757_v14 }
 0x53c   :  { %8277 = vmatpush1.bf16.msra.mxu0 %v10541_v53  ;;  %v1749_v25 = vld [vmem:[#allocation2 + $0x1bf8] sm:$0xff] }
 0x53d   :  { %8278 = vmatprep.subr.bf16.mxu0 %v10534_v55  ;;  %v1873_v26 = vld [vmem:[#allocation2 + $0x1fd8] sm:$0xff]  ;;  %v10630_v33 = vcombine.high %v1745_v39, %v1749_v25  ;;  %v10629_v24 = vcombine.low %v1745_v39, %v1749_v25 }
 0x53e   :  { %8318 = vmatpush1.bf16.msra.mxu1 %v10669_v19  ;;  %v1877_v41 = vld [vmem:[#allocation2 + $0x1ff8] sm:$0xff] }
 0x53f   :  { %8319 = vmatprep.subr.bf16.mxu1 %v10662_v10  ;;  %v10758_v35 = vcombine.high %v1873_v26, %v1877_v41  ;;  %v1737_v32 = vld [vmem:[#allocation2 + $0x1b98] sm:$0xff]  ;;  %v10757_v38 = vcombine.low %v1873_v26, %v1877_v41 }
 0x540   :  { %8279 = vmatpush1.bf16.msra.mxu0 %v10533_v15  ;;  %v1741_v34 = vld [vmem:[#allocation2 + $0x1bb8] sm:$0xff] }
 0x541   :  { %8280 = vmatprep.subr.bf16.mxu0 %v10526_v11  ;;  %v1865_v37 = vld [vmem:[#allocation2 + $0x1f98] sm:$0xff]  ;;  %v10622_v62 = vcombine.high %v1737_v32, %v1741_v34  ;;  %v10621_v27 = vcombine.low %v1737_v32, %v1741_v34 }
 0x542   :  { %8320 = vmatpush1.bf16.msra.mxu1 %v10661_v57  ;;  %v1869_v40 = vld [vmem:[#allocation2 + $0x1fb8] sm:$0xff] }
 0x543   :  { %8321 = vmatprep.subr.bf16.mxu1 %v10654_v51  ;;  %v10750_v42 = vcombine.high %v1865_v37, %v1869_v40  ;;  %v1729_v47 = vld [vmem:[#allocation2 + $0x1b58] sm:$0xff]  ;;  %v10749_v16 = vcombine.low %v1865_v37, %v1869_v40 }
 0x544   :  { %8281 = vmatpush1.bf16.msra.mxu0 %v10525_v61  ;;  %v1733_v60 = vld [vmem:[#allocation2 + $0x1b78] sm:$0xff] }
 0x545   :  { %8282 = vmatprep.subr.bf16.mxu0 %v10518_v48  ;;  %v1857_v29 = vld [vmem:[#allocation2 + $0x1f58] sm:$0xff]  ;;  %v10614_v49 = vcombine.high %v1729_v47, %v1733_v60  ;;  %v10613_v63 = vcombine.low %v1729_v47, %v1733_v60 }
 0x546   :  { %8322 = vmatpush1.bf16.msra.mxu1 %v10653_v2  ;;  %v1861_v0 = vld [vmem:[#allocation2 + $0x1f78] sm:$0xff] }
 0x547   :  { %8323 = vmatprep.subr.bf16.mxu1 %v10646_v5  ;;  %v10742_v52 = vcombine.high %v1857_v29, %v1861_v0  ;;  %v1721_v53 = vld [vmem:[#allocation2 + $0x1b18] sm:$0xff]  ;;  %v10741_v1 = vcombine.low %v1857_v29, %v1861_v0 }
 0x548   :  { %8283 = vmatpush1.bf16.msra.mxu0 %v10517_v21  ;;  %v1725_v19 = vld [vmem:[#allocation2 + $0x1b38] sm:$0xff] }
 0x549   :  { %8284 = vmatprep.subr.bf16.mxu0 %v10510_v36  ;;  %v1849_v55 = vld [vmem:[#allocation2 + $0x1f18] sm:$0xff]  ;;  %v10606_v54 = vcombine.high %v1721_v53, %v1725_v19  ;;  %v10605_v58 = vcombine.low %v1721_v53, %v1725_v19  ;;  %v10993_v19 = vld [vmem:[#allocation12 + $0x64] ss:$8 sps:$4 sm:$0xff]  }
 0x54a   :  { %8324 = vmatpush1.bf16.msra.mxu1 %v10645_v6  ;;  %v1853_v10 = vld [vmem:[#allocation2 + $0x1f38] sm:$0xff] }
 0x54b   :  { %8325 = vmatprep.subr.bf16.mxu1 %v10638_v23  ;;  %v10734_v46 = vcombine.high %v1849_v55, %v1853_v10  ;;  %v1713_v15 = vld [vmem:[#allocation2 + $0x1ad8] sm:$0xff]  ;;  %v10733_v59 = vcombine.low %v1849_v55, %v1853_v10 }
 0x54c   :  { %8285 = vmatpush1.bf16.msra.mxu0 %v10509_v43  ;;  %v1717_v57 = vld [vmem:[#allocation2 + $0x1af8] sm:$0xff] }
 0x54d   :  { %8286 = vmatprep.subr.bf16.mxu0 %v10630_v33  ;;  %v1841_v11 = vld [vmem:[#allocation2 + $0x1ed8] sm:$0xff]  ;;  %v10598_v18 = vcombine.high %v1713_v15, %v1717_v57  ;;  %v10597_v9 = vcombine.low %v1713_v15, %v1717_v57 }
 0x54e   :  { %8326 = vmatpush1.bf16.msra.mxu1 %v10637_v45  ;;  %v1845_v51 = vld [vmem:[#allocation2 + $0x1ef8] sm:$0xff] }
 0x54f   :  { %8327 = vmatprep.subr.bf16.mxu1 %v10758_v35  ;;  %v10726_v20 = vcombine.high %v1841_v11, %v1845_v51  ;;  %v1705_v61 = vld [vmem:[#allocation2 + $0x1a98] sm:$0xff]  ;;  %v10725_v13 = vcombine.low %v1841_v11, %v1845_v51 }
 0x550   :  { %8287 = vmatpush2.bf16.msra.mxu0 %v10629_v24  ;;  %v1709_v2 = vld [vmem:[#allocation2 + $0x1ab8] sm:$0xff]  ;;  %v8361_v24 = vmul.f32 0.2, %v11736_v56 }
 0x551   :  { %8288 = vmatprep.subr.bf16.mxu0 %v10622_v62  ;;  %v1833_v48 = vld [vmem:[#allocation2 + $0x1e98] sm:$0xff]  ;;  %v10590_v8 = vcombine.high %v1705_v61, %v1709_v2  ;;  %v10589_v39 = vcombine.low %v1705_v61, %v1709_v2  ;;  %v8363_v62 = vmul.f32 0.2, %v11776_v31  ;;  %v11005_v61 = vld [vmem:[#allocation12 + $0x44] ss:$8 sps:$4 sm:$0xff]  }
 0x552   :  { %8328 = vmatpush2.bf16.msra.mxu1 %v10757_v38  ;;  %v1837_v5 = vld [vmem:[#allocation2 + $0x1eb8] sm:$0xff] }
 0x553   :  { %8329 = vmatprep.subr.bf16.mxu1 %v10750_v42  ;;  %v10718_v14 = vcombine.high %v1833_v48, %v1837_v5  ;;  %v1697_v21 = vld [vmem:[#allocation2 + $0x1a58] sm:$0xff]  ;;  %v10717_v25 = vcombine.low %v1833_v48, %v1837_v5  ;;  %v11008_v48 = vld [vmem:[#allocation12 + $0x144] ss:$8 sps:$4 sm:$0xff]  }
 0x554   :  { %8289 = vmatpush2.bf16.msra.mxu0 %v10621_v27  ;;  %v1701_v6 = vld [vmem:[#allocation2 + $0x1a78] sm:$0xff]  ;;  %v10985_v27 = vld [vmem:[#allocation12 + $0x70] ss:$8 sps:$4 sm:$0xff]  }
 0x555   :  { %8290 = vmatprep.subr.bf16.mxu0 %v10614_v49  ;;  %v1825_v36 = vld [vmem:[#allocation2 + $0x1e58] sm:$0xff]  ;;  %v10582_v26 = vcombine.high %v1697_v21, %v1701_v6  ;;  %v10581_v32 = vcombine.low %v1697_v21, %v1701_v6  ;;  %v10988_v49 = vld [vmem:[#allocation12 + $0x170] ss:$8 sps:$4 sm:$0xff]   ;;  %v11017_v6 = vld [vmem:[#allocation12 + $0x24] ss:$8 sps:$4 sm:$0xff]  }
 0x556   :  { %8330 = vmatpush2.bf16.msra.mxu1 %v10749_v16  ;;  %v1829_v23 = vld [vmem:[#allocation2 + $0x1e78] sm:$0xff]  ;;  %v8369_v16 = vsel %vm8353_vm2, %v11736_v56, %v8361_v24  ;;  %v11012_v21 = vld [vmem:[#allocation12 + $0x130] ss:$8 sps:$4 sm:$0xff]  }
 0x557   :  { %8331 = vmatprep.subr.bf16.mxu1 %v10742_v52  ;;  %v10710_v41 = vcombine.high %v1825_v36, %v1829_v23  ;;  %v1689_v43 = vld [vmem:[#allocation2 + $0x1a18] sm:$0xff]  ;;  %v10709_v34 = vcombine.low %v1825_v36, %v1829_v23  ;;  %v8371_v52 = vsel %vm8355_vm3, %v11776_v31, %v8363_v62  ;;  %v8377_v10 = vpack.c.bf16 %v8369_v16, %v8369_v16  ;;  %v11020_v36 = vld [vmem:[#allocation12 + $0x124] ss:$8 sps:$4 sm:$0xff]   ;;  %v11036_v24 = vld [vmem:[#allocation12 + $0x1f0] ss:$8 sps:$4 sm:$0xff]  }
 0x558   :  { %8291 = vmatpush2.bf16.msra.mxu0 %v10613_v63  ;;  %v1693_v45 = vld [vmem:[#allocation2 + $0x1a38] sm:$0xff]  ;;  %v10996_v63 = vld [vmem:[#allocation12 + $0x164] ss:$8 sps:$4 sm:$0xff]  }
 0x559   :  { %8292 = vmatprep.subr.bf16.mxu0 %v10606_v54  ;;  %v1817_v33 = vld [vmem:[#allocation2 + $0x1e18] sm:$0xff]  ;;  %v10574_v37 = vcombine.high %v1689_v43, %v1693_v45  ;;  %v10573_v38 = vcombine.low %v1689_v43, %v1693_v45  ;;  %v11024_v43 = vld [vmem:[#allocation12 + $0x110] ss:$8 sps:$4 sm:$0xff]   ;;  %v11029_v45 = vld [vmem:[#allocation12 + $0x4] ss:$8 sps:$4 sm:$0xff]  }
 0x55a   :  { %8332 = vmatpush2.bf16.msra.mxu1 %v10741_v1  ;;  %v1821_v35 = vld [vmem:[#allocation2 + $0x1e38] sm:$0xff]  ;;  %v11044_v62 = vld [vmem:[#allocation12 + $0x1e4] ss:$8 sps:$4 sm:$0xff]  }
 0x55b   :  { %8333 = vmatprep.subr.bf16.mxu1 %v10734_v46  ;;  %v10702_v40 = vcombine.high %v1817_v33, %v1821_v35  ;;  %v10701_v42 = vcombine.low %v1817_v33, %v1821_v35  ;;  %v10987_v47 = vld [vmem:[#allocation12 + $0x74] ss:$8 sps:$4 sm:$0xff]   ;;  %v10991_v56 = vld [vmem:[#allocation12 + $0x60] ss:$8 sps:$4 sm:$0xff]   ;;  %v11032_v33 = vld [vmem:[#allocation12 + $0x104] ss:$8 sps:$4 sm:$0xff]  }
 0x55c   :  { %8293 = vmatpush2.bf16.msra.mxu0 %v10605_v58  ;;  %v10990_v60 = vld [vmem:[#allocation12 + $0x174] ss:$8 sps:$4 sm:$0xff]   ;;  %v10994_v31 = vld [vmem:[#allocation12 + $0x160] ss:$8 sps:$4 sm:$0xff]   ;;  %v11053_v16 = vld [vmem:[#allocation12 + $0xc4] ss:$8 sps:$4 sm:$0xff]  }
 0x55d   :  { %8294 = vmatprep.subr.bf16.mxu0 %v10598_v18  ;;  %v11201_v29 = vld [vmem:[#allocation10] sm:$0xff]  ;;  %v11003_v5 = vld [vmem:[#allocation12 + $0x40] ss:$8 sps:$4 sm:$0xff]  }
 0x55e   :  { %8334 = vmatpush2.bf16.msra.mxu1 %v10733_v59  ;;  %v1907_v0 = vrot.slane %v11201_v29, %v11624_v17  ;;  %v1911_v53 = vrot.slane %v11201_v29, %v11629_v28  ;;  %v8379_v17 = vpack.c.bf16 %v8371_v52, %v8371_v52  ;;  %v10999_v15 = vld [vmem:[#allocation12 + $0x54] ss:$8 sps:$4 sm:$0xff]   ;;  %v10997_v59 = vld [vmem:[#allocation12 + $0x50] ss:$8 sps:$4 sm:$0xff]   ;;  %v11015_v23 = vld [vmem:[#allocation12 + $0x20] ss:$8 sps:$4 sm:$0xff]  }
 0x55f   :  { %8335 = vmatprep.subr.bf16.mxu1 %v10726_v20  ;;  %v11000_v20 = vld [vmem:[#allocation12 + $0x150] ss:$8 sps:$4 sm:$0xff]   ;;  %v11027_v35 = vld [vmem:[#allocation12] ss:$8 sps:$4 sm:$0xff]   ;;  %v11050_v29 = vld [vmem:[#allocation12 + $0x1d4] ss:$8 sps:$4 sm:$0xff]  }
 0x560   :  { %8295 = vmatpush2.bf16.msra.mxu0 %v10597_v9  ;;  %v11006_v9 = vld [vmem:[#allocation12 + $0x140] ss:$8 sps:$4 sm:$0xff]  }
 0x561   :  { %8296 = vmatprep.subr.bf16.mxu0 %v10590_v8  ;;  %v11014_v8 = vld [vmem:[#allocation12 + $0x134] ss:$8 sps:$4 sm:$0xff]   ;;  %v11051_v52 = vld [vmem:[#allocation12 + $0xc0] ss:$8 sps:$4 sm:$0xff]  }
 0x562   :  { %8336 = vmatpush2.bf16.msra.mxu1 %v10725_v13  ;;  %v11011_v13 = vld [vmem:[#allocation12 + $0x34] ss:$8 sps:$4 sm:$0xff]  }
 0x563   :  { %8337 = vmatprep.subr.bf16.mxu1 %v10718_v14  ;;  %v11009_v14 = vld [vmem:[#allocation12 + $0x30] ss:$8 sps:$4 sm:$0xff]  }
 0x564   :  { %8297 = vmatpush2.bf16.msra.mxu0 %v10589_v39  ;;  %v11018_v39 = vld [vmem:[#allocation12 + $0x120] ss:$8 sps:$4 sm:$0xff]  }
 0x565   :  { %8298 = vmatprep.subr.bf16.mxu0 %v10582_v26  ;;  %v11026_v26 = vld [vmem:[#allocation12 + $0x114] ss:$8 sps:$4 sm:$0xff]  }
 0x566   :  { %8338 = vmatpush2.bf16.msra.mxu1 %v10717_v25  ;;  %v11023_v25 = vld [vmem:[#allocation12 + $0x14] ss:$8 sps:$4 sm:$0xff]  }
 0x567   :  { %8339 = vmatprep.subr.bf16.mxu1 %v10710_v41  ;;  %v11021_v41 = vld [vmem:[#allocation12 + $0x10] ss:$8 sps:$4 sm:$0xff]  }
 0x568   :  { %8299 = vmatpush2.bf16.msra.mxu0 %v10581_v32  ;;  %v11030_v32 = vld [vmem:[#allocation12 + $0x100] ss:$8 sps:$4 sm:$0xff]  }
 0x569   :  { %8300 = vmatprep.subr.bf16.mxu0 %v10574_v37  ;;  %v11038_v37 = vld [vmem:[#allocation12 + $0x1f4] ss:$8 sps:$4 sm:$0xff]  }
 0x56a   :  { %8340 = vmatpush2.bf16.msra.mxu1 %v10709_v34  ;;  %v11035_v34 = vld [vmem:[#allocation12 + $0xf4] ss:$8 sps:$4 sm:$0xff]  }
 0x56b   :  { %8341 = vmatprep.subr.bf16.mxu1 %v10702_v40  ;;  %v11033_v40 = vld [vmem:[#allocation12 + $0xf0] ss:$8 sps:$4 sm:$0xff]  }
 0x56c   :  { %8301 = vmatpush2.bf16.msra.mxu0 %v10573_v38  ;;  %v11041_v38 = vld [vmem:[#allocation12 + $0xe4] ss:$8 sps:$4 sm:$0xff]  }
 0x56d   :  { %9164 = vmatprep.subr.bf16.mxu0 %v10987_v47  ;;  %v11042_v47 = vld [vmem:[#allocation12 + $0x1e0] ss:$8 sps:$4 sm:$0xff]  }
 0x56e   :  { %8342 = vmatpush2.bf16.msra.mxu1 %v10701_v42  ;;  %v11039_v42 = vld [vmem:[#allocation12 + $0xe0] ss:$8 sps:$4 sm:$0xff]  }
 0x56f   :  { %9205 = vmatprep.subr.bf16.mxu1 %v10990_v60  ;;  %v8058_v55 = vpop.f32.mrf.mxu0  ;;  %8303 = vmatmul.mubr.bf16.vlgmr.msra.gmra.mxu0 %v11676_v3  ;;  %v11002_v3 = vld [vmem:[#allocation12 + $0x154] ss:$8 sps:$4 sm:$0xff]  }
 0x570   :  { %v8059_v1 = vadd.f32 %v8058_v55, %v1907_v0  ;;  %9165 = vmatpush1.bf16.msra.mxu0 %v10985_v27  ;;  %9196 = vmatprep.mubr.bf16.mxu0 %v8377_v10  ;;  %v11047_v60 = vld [vmem:[#allocation12 + $0xd4] ss:$8 sps:$4 sm:$0xff]   ;;  %v11045_v0 = vld [vmem:[#allocation12 + $0xd0] ss:$8 sps:$4 sm:$0xff]  }
 0x571   :  { %v8099_v54 = vpop.f32.mrf.mxu1  ;;  %8344 = vmatmul.mubr.bf16.vlgmr.msra.gmra.mxu1 %v11678_v12  ;;  %v8060_v46 = vpop.f32.mrf.mxu0  ;;  %9166 = vmatprep.subr.bf16.mxu0 %v10993_v19  ;;  %v11048_v27 = vld [vmem:[#allocation12 + $0x1d0] ss:$8 sps:$4 sm:$0xff]   ;;  %v11059_v19 = vld [vmem:[#allocation12 + $0xb4] ss:$8 sps:$4 sm:$0xff]  }
 0x572   :  { %9206 = vmatpush1.bf16.msra.mxu1 %v10988_v49  ;;  %v11828_v57 = vadd.f32 %v8099_v54, %v8059_v1  ;;  %9237 = vmatprep.mubr.bf16.mxu1 %v8379_v17  ;;  %v8061_v28 = vadd.f32 %v8060_v46, %v1911_v53  ;;  %v11056_v49 = vld [vmem:[#allocation12 + $0x1c4] ss:$8 sps:$4 sm:$0xff]   ;;  %v11054_v53 = vld [vmem:[#allocation12 + $0x1c0] ss:$8 sps:$4 sm:$0xff]   ;;  %v11062_v55 = vld [vmem:[#allocation12 + $0x1b4] ss:$8 sps:$4 sm:$0xff]  }
 0x573   :  { %v8101_v11 = vpop.f32.mrf.mxu1  ;;  %v8062_v51 = vpop.f32.mrf.mxu0  ;;  %9207 = vmatprep.subr.bf16.mxu1 %v10996_v63  ;;  %v11057_v10 = vld [vmem:[#allocation12 + $0xb0] ss:$8 sps:$4 sm:$0xff]   ;;  %v11065_v1 = vld [vmem:[#allocation12 + $0xa4] ss:$8 sps:$4 sm:$0xff]   ;;  %v11063_v17 = vld [vmem:[#allocation12 + $0xa0] ss:$8 sps:$4 sm:$0xff]  }
 0x574   :  { %v11830_v58 = vadd.f32 %v8101_v11, %v8061_v28  ;;  %9167 = vmatpush1.bf16.msra.mxu0 %v10991_v56  ;;  %v11060_v63 = vld [vmem:[#allocation12 + $0x1b0] ss:$8 sps:$4 sm:$0xff]   ;;  %v11068_v54 = vld [vmem:[#allocation12 + $0x1a4] ss:$8 sps:$4 sm:$0xff]   ;;  %v11066_v56 = vld [vmem:[#allocation12 + $0x1a0] ss:$8 sps:$4 sm:$0xff]  }
 0x575   :  { %v8103_v12 = vpop.f32.mrf.mxu1  ;;  %v8063_v18 = vpop.f32.mrf.mxu0  ;;  %9168 = vmatprep.subr.bf16.mxu0 %v10999_v15  ;;  %v11071_v46 = vld [vmem:[#allocation12 + $0x94] ss:$8 sps:$4 sm:$0xff]   ;;  %v11069_v15 = vld [vmem:[#allocation12 + $0x90] ss:$8 sps:$4 sm:$0xff]   ;;  %v11077_v11 = vld [vmem:[#allocation12 + $0x84] ss:$8 sps:$4 sm:$0xff]  }
 0x576   :  { %9208 = vmatpush1.bf16.msra.mxu1 %v10994_v31  ;;  %v11074_v31 = vld [vmem:[#allocation12 + $0x194] ss:$8 sps:$4 sm:$0xff]   ;;  %v11072_v28 = vld [vmem:[#allocation12 + $0x190] ss:$8 sps:$4 sm:$0xff]   ;;  %v11080_v51 = vld [vmem:[#allocation12 + $0x184] ss:$8 sps:$4 sm:$0xff]  }
 0x577   :  { %v8104_v2 = vpop.f32.mrf.mxu1  ;;  %9209 = vmatprep.subr.bf16.mxu1 %v11002_v3  ;;  %v8360_v3 = vmul.f32 0.2, %v11731_v44  ;;  %v8362_v12 = vmul.f32 0.2, %v11771_v22  ;;  %v11075_v18 = vld [vmem:[#allocation12 + $0x80] ss:$8 sps:$4 sm:$0xff]  }
 0x578   :  { %9169 = vmatpush1.bf16.msra.mxu0 %v10997_v59  ;;  %v8365_v59 = vmul.f32 0.2, %v11816_v50 }
 0x579   :  { %9170 = vmatprep.subr.bf16.mxu0 %v11005_v61  ;;  %v11083_v61 = vld [vmem:[#allocation12 + $0x274] ss:$8 sps:$4 sm:$0xff]   ;;  %v8368_v2 = vsel %vm8352_vm4, %v11731_v44, %v8360_v3  ;;  %v11158_v3 = vld [vmem:[#allocation12 + $0x3e4] ss:$8 sps:$4 sm:$0xff]  }
 0x57a   :  { %9210 = vmatpush1.bf16.msra.mxu1 %v11000_v20  ;;  %v11078_v20 = vld [vmem:[#allocation12 + $0x180] ss:$8 sps:$4 sm:$0xff]  }
 0x57b   :  { %9211 = vmatprep.subr.bf16.mxu1 %v11008_v48  ;;  %v11131_v48 = vld [vmem:[#allocation12 + $0x374] ss:$8 sps:$4 sm:$0xff]  }
 0x57c   :  { %9171 = vmatpush1.bf16.msra.mxu0 %v11003_v5  ;;  %v8370_v5 = vsel %vm8354_vm5, %v11771_v22, %v8362_v12  ;;  %v11084_v22 = vld [vmem:[#allocation12 + $0x260] ss:$8 sps:$4 sm:$0xff]   ;;  %v11113_v12 = vld [vmem:[#allocation12 + $0x2d4] ss:$8 sps:$4 sm:$0xff]  }
 0x57d   :  { %9172 = vmatprep.subr.bf16.mxu0 %v11011_v13  ;;  %v8373_v13 = vsel %vm8357_vm6, %v11816_v50, %v8365_v59  ;;  %v11089_v50 = vld [vmem:[#allocation12 + $0x254] ss:$8 sps:$4 sm:$0xff]   ;;  %v11156_v59 = vld [vmem:[#allocation12 + $0x3e0] ss:$8 sps:$4 sm:$0xff]  }
 0x57e   :  { %9212 = vmatpush1.bf16.msra.mxu1 %v11006_v9  ;;  %v11081_v9 = vld [vmem:[#allocation12 + $0x270] ss:$8 sps:$4 sm:$0xff]  }
 0x57f   :  { %9213 = vmatprep.subr.bf16.mxu1 %v11014_v8  ;;  %v8376_v8 = vpack.c.bf16 %v8368_v2, %v8368_v2  ;;  %v11159_v2 = vld [vmem:[#allocation12 + $0x3d0] ss:$8 sps:$4 sm:$0xff]  }
 0x580   :  { %9173 = vmatpush1.bf16.msra.mxu0 %v11009_v14  ;;  %v11086_v14 = vld [vmem:[#allocation12 + $0x264] ss:$8 sps:$4 sm:$0xff]  }
 0x581   :  { %9174 = vmatprep.subr.bf16.mxu0 %v11017_v6  ;;  %v11129_v6 = vld [vmem:[#allocation12 + $0x370] ss:$8 sps:$4 sm:$0xff]  }
 0x582   :  { %9214 = vmatpush1.bf16.msra.mxu1 %v11012_v21  ;;  %v8378_v21 = vpack.c.bf16 %v8370_v5, %v8370_v5  ;;  %v11114_v5 = vld [vmem:[#allocation12 + $0x2c0] ss:$8 sps:$4 sm:$0xff]  }
 0x583   :  { %9215 = vmatprep.subr.bf16.mxu1 %v11020_v36 }
 0x584   :  { %9175 = vmatpush1.bf16.msra.mxu0 %v11015_v23  ;;  %v8381_v23 = vpack.c.bf16 %v8373_v13, %v8373_v13  ;;  %v11162_v13 = vld [vmem:[#allocation12 + $0x3c0] ss:$8 sps:$4 sm:$0xff]  }
 0x585   :  { %9176 = vmatprep.subr.bf16.mxu0 %v11023_v25 }
 0x586   :  { %9216 = vmatpush1.bf16.msra.mxu1 %v11018_v39  ;;  %v11134_v39 = vld [vmem:[#allocation12 + $0x364] ss:$8 sps:$4 sm:$0xff]  }
 0x587   :  { %9217 = vmatprep.subr.bf16.mxu1 %v11026_v26 }
 0x588   :  { %9177 = vmatpush1.bf16.msra.mxu0 %v11021_v41 }
 0x589   :  { %9178 = vmatprep.subr.bf16.mxu0 %v11029_v45 }
 0x58a   :  { %9218 = vmatpush1.bf16.msra.mxu1 %v11024_v43 }
 0x58b   :  { %9219 = vmatprep.subr.bf16.mxu1 %v11032_v33  ;;  %v11132_v33 = vld [vmem:[#allocation12 + $0x360] ss:$8 sps:$4 sm:$0xff]  }
 0x58c   :  { %9179 = vmatpush1.bf16.msra.mxu0 %v11027_v35 }
 0x58d   :  { %9180 = vmatprep.subr.bf16.mxu0 %v11035_v34 }
 0x58e   :  { %9220 = vmatpush1.bf16.msra.mxu1 %v11030_v32  ;;  %v11137_v32 = vld [vmem:[#allocation12 + $0x354] ss:$8 sps:$4 sm:$0xff]  }
 0x58f   :  { %9221 = vmatprep.subr.bf16.mxu1 %v11038_v37  ;;  %v11087_v37 = vld [vmem:[#allocation12 + $0x250] ss:$8 sps:$4 sm:$0xff]  }
 0x590   :  { %9181 = vmatpush2.bf16.msra.mxu0 %v11033_v40 }
 0x591   :  { %9182 = vmatprep.subr.bf16.mxu0 %v11041_v38 }
 0x592   :  { %9222 = vmatpush2.bf16.msra.mxu1 %v11036_v24  ;;  %v11092_v24 = vld [vmem:[#allocation12 + $0x244] ss:$8 sps:$4 sm:$0xff]  }
 0x593   :  { %9223 = vmatprep.subr.bf16.mxu1 %v11044_v62  ;;  %v11135_v62 = vld [vmem:[#allocation12 + $0x350] ss:$8 sps:$4 sm:$0xff]  }
 0x594   :  { %9183 = vmatpush2.bf16.msra.mxu0 %v11039_v42  ;;  %v11140_v42 = vld [vmem:[#allocation12 + $0x344] ss:$8 sps:$4 sm:$0xff]  }
 0x595   :  { %9184 = vmatprep.subr.bf16.mxu0 %v11047_v60  ;;  %v11138_v60 = vld [vmem:[#allocation12 + $0x340] ss:$8 sps:$4 sm:$0xff]  }
 0x596   :  { %9224 = vmatpush2.bf16.msra.mxu1 %v11042_v47  ;;  %v11095_v47 = vld [vmem:[#allocation12 + $0x234] ss:$8 sps:$4 sm:$0xff]  }
 0x597   :  { %9225 = vmatprep.subr.bf16.mxu1 %v11050_v29  ;;  %v11143_v29 = vld [vmem:[#allocation12 + $0x334] ss:$8 sps:$4 sm:$0xff]  }
 0x598   :  { %9185 = vmatpush2.bf16.msra.mxu0 %v11045_v0  ;;  %v11093_v0 = vld [vmem:[#allocation12 + $0x230] ss:$8 sps:$4 sm:$0xff]  }
 0x599   :  { %9186 = vmatprep.subr.bf16.mxu0 %v11053_v16  ;;  %v11141_v16 = vld [vmem:[#allocation12 + $0x330] ss:$8 sps:$4 sm:$0xff]  }
 0x59a   :  { %9226 = vmatpush2.bf16.msra.mxu1 %v11048_v27  ;;  %v11098_v27 = vld [vmem:[#allocation12 + $0x224] ss:$8 sps:$4 sm:$0xff]  }
 0x59b   :  { %9227 = vmatprep.subr.bf16.mxu1 %v11056_v49  ;;  %v11146_v49 = vld [vmem:[#allocation12 + $0x324] ss:$8 sps:$4 sm:$0xff]  }
 0x59c   :  { %9187 = vmatpush2.bf16.msra.mxu0 %v11051_v52  ;;  %v11096_v52 = vld [vmem:[#allocation12 + $0x220] ss:$8 sps:$4 sm:$0xff]  }
 0x59d   :  { %9188 = vmatprep.subr.bf16.mxu0 %v11059_v19  ;;  %v11144_v19 = vld [vmem:[#allocation12 + $0x320] ss:$8 sps:$4 sm:$0xff]  }
 0x59e   :  { %9228 = vmatpush2.bf16.msra.mxu1 %v11054_v53  ;;  %v11101_v53 = vld [vmem:[#allocation12 + $0x214] ss:$8 sps:$4 sm:$0xff]  }
 0x59f   :  { %9229 = vmatprep.subr.bf16.mxu1 %v11062_v55  ;;  %v11149_v55 = vld [vmem:[#allocation12 + $0x314] ss:$8 sps:$4 sm:$0xff]  }
 0x5a0   :  { %9189 = vmatpush2.bf16.msra.mxu0 %v11057_v10  ;;  %v11099_v10 = vld [vmem:[#allocation12 + $0x210] ss:$8 sps:$4 sm:$0xff]  }
 0x5a1   :  { %9190 = vmatprep.subr.bf16.mxu0 %v11065_v1  ;;  %v11147_v1 = vld [vmem:[#allocation12 + $0x310] ss:$8 sps:$4 sm:$0xff]  }
 0x5a2   :  { %9230 = vmatpush2.bf16.msra.mxu1 %v11060_v63  ;;  %v11104_v63 = vld [vmem:[#allocation12 + $0x204] ss:$8 sps:$4 sm:$0xff]  }
 0x5a3   :  { %9231 = vmatprep.subr.bf16.mxu1 %v11068_v54  ;;  %v11152_v54 = vld [vmem:[#allocation12 + $0x304] ss:$8 sps:$4 sm:$0xff]  }
 0x5a4   :  { %9191 = vmatpush2.bf16.msra.mxu0 %v11063_v17  ;;  %v11102_v17 = vld [vmem:[#allocation12 + $0x200] ss:$8 sps:$4 sm:$0xff]  }
 0x5a5   :  { %9192 = vmatprep.subr.bf16.mxu0 %v11071_v46  ;;  %v11150_v46 = vld [vmem:[#allocation12 + $0x300] ss:$8 sps:$4 sm:$0xff]  }
 0x5a6   :  { %9232 = vmatpush2.bf16.msra.mxu1 %v11066_v56  ;;  %v11107_v56 = vld [vmem:[#allocation12 + $0x2f4] ss:$8 sps:$4 sm:$0xff]  }
 0x5a7   :  { %9233 = vmatprep.subr.bf16.mxu1 %v11074_v31  ;;  %v11155_v31 = vld [vmem:[#allocation12 + $0x3f4] ss:$8 sps:$4 sm:$0xff]  }
 0x5a8   :  { %9193 = vmatpush2.bf16.msra.mxu0 %v11069_v15  ;;  %v11105_v15 = vld [vmem:[#allocation12 + $0x2f0] ss:$8 sps:$4 sm:$0xff]  }
 0x5a9   :  { %9194 = vmatprep.subr.bf16.mxu0 %v11077_v11  ;;  %v11153_v11 = vld [vmem:[#allocation12 + $0x3f0] ss:$8 sps:$4 sm:$0xff]  }
 0x5aa   :  { %9234 = vmatpush2.bf16.msra.mxu1 %v11072_v28  ;;  %v11110_v28 = vld [vmem:[#allocation12 + $0x2e4] ss:$8 sps:$4 sm:$0xff]  }
 0x5ab   :  { %9235 = vmatprep.subr.bf16.mxu1 %v11080_v51  ;;  %v11108_v51 = vld [vmem:[#allocation12 + $0x2e0] ss:$8 sps:$4 sm:$0xff]  }
 0x5ac   :  { %9195 = vmatpush2.bf16.msra.mxu0 %v11075_v18  ;;  %v11161_v18 = vld [vmem:[#allocation12 + $0x3d4] ss:$8 sps:$4 sm:$0xff]  }
 0x5ad   :  { %9246 = vmatprep.subr.bf16.mxu0 %v11083_v61  ;;  %v11116_v61 = vld [vmem:[#allocation12 + $0x2c4] ss:$8 sps:$4 sm:$0xff]  }
 0x5ae   :  { %9236 = vmatpush2.bf16.msra.mxu1 %v11078_v20  ;;  %v11111_v20 = vld [vmem:[#allocation12 + $0x2d0] ss:$8 sps:$4 sm:$0xff]  }
 0x5af   :  { %9287 = vmatprep.subr.bf16.mxu1 %v11131_v48  ;;  %v8140_v36 = vpop.f32.mrf.mxu0  ;;  %9197 = vmatmul.mubr.bf16.vlgmr.msra.gmra.mxu0 %v8376_v8  ;;  %v11164_v48 = vld [vmem:[#allocation12 + $0x3c4] ss:$8 sps:$4 sm:$0xff]   ;;  %v11167_v8 = vld [vmem:[#allocation12 + $0x3b4] ss:$8 sps:$4 sm:$0xff]  }
 0x5b0   :  { %v8141_v44 = vadd.f32 %v8140_v36, %v11828_v57  ;;  %9247 = vmatpush1.bf16.msra.mxu0 %v11081_v9  ;;  %9278 = vmatprep.mubr.bf16.mxu0 %v8381_v23  ;;  %v11119_v9 = vld [vmem:[#allocation12 + $0x2b4] ss:$8 sps:$4 sm:$0xff]   ;;  %v11170_v36 = vld [vmem:[#allocation12 + $0x3a4] ss:$8 sps:$4 sm:$0xff]   ;;  %v11120_v23 = vld [vmem:[#allocation12 + $0x2a0] ss:$8 sps:$4 sm:$0xff]  }
 0x5b1   :  { %v8181_v25 = vpop.f32.mrf.mxu1  ;;  %9238 = vmatmul.mubr.bf16.vlgmr.msra.gmra.mxu1 %v8378_v21  ;;  %v8142_v26 = vpop.f32.mrf.mxu0  ;;  %9248 = vmatprep.subr.bf16.mxu0 %v11086_v14  ;;  %v11117_v14 = vld [vmem:[#allocation12 + $0x2b0] ss:$8 sps:$4 sm:$0xff]   ;;  %v11122_v21 = vld [vmem:[#allocation12 + $0x2a4] ss:$8 sps:$4 sm:$0xff]  }
 0x5b2   :  { %v11842_v41 = vadd.f32 %v8181_v25, %v8141_v44  ;;  %v8143_v43 = vadd.f32 %v8142_v26, %v11830_v58  ;;  %9288 = vmatpush1.bf16.msra.mxu1 %v11129_v6  ;;  %v11090_v58 = vld [vmem:[#allocation12 + $0x240] ss:$8 sps:$4 sm:$0xff]   ;;  %v11165_v6 = vld [vmem:[#allocation12 + $0x3b0] ss:$8 sps:$4 sm:$0xff]   ;;  %v11173_v25 = vld [vmem:[#allocation12 + $0x394] ss:$8 sps:$4 sm:$0xff]  }
 0x5b3   :  { %v8183_v45 = vpop.f32.mrf.mxu1  ;;  %v8144_v35 = vpop.f32.mrf.mxu0  ;;  %9289 = vmatprep.subr.bf16.mxu1 %v11134_v39  ;;  %v11125_v39 = vld [vmem:[#allocation12 + $0x294] ss:$8 sps:$4 sm:$0xff]   ;;  %v11168_v44 = vld [vmem:[#allocation12 + $0x3a0] ss:$8 sps:$4 sm:$0xff]   ;;  %v11128_v26 = vld [vmem:[#allocation12 + $0x284] ss:$8 sps:$4 sm:$0xff]  }
 0x5b4   :  { %v11845_v34 = vadd.f32 %v8183_v45, %v8143_v43  ;;  %9249 = vmatpush1.bf16.msra.mxu0 %v11084_v22  ;;  %v11123_v22 = vld [vmem:[#allocation12 + $0x290] ss:$8 sps:$4 sm:$0xff]   ;;  %v11176_v45 = vld [vmem:[#allocation12 + $0x384] ss:$8 sps:$4 sm:$0xff]  }
 0x5b5   :  { %v8185_v57 = vpop.f32.mrf.mxu1  ;;  %v8145_v40 = vpop.f32.mrf.mxu0  ;;  %9250 = vmatprep.subr.bf16.mxu0 %v11089_v50  ;;  %v8364_v50 = vmul.f32 0.2, %v11811_v30  ;;  %v11171_v43 = vld [vmem:[#allocation12 + $0x390] ss:$8 sps:$4 sm:$0xff]  }
 0x5b6   :  { %9290 = vmatpush1.bf16.msra.mxu1 %v11132_v33  ;;  %v11126_v33 = vld [vmem:[#allocation12 + $0x280] ss:$8 sps:$4 sm:$0xff]  }
 0x5b7   :  { %v8186_v38 = vpop.f32.mrf.mxu1  ;;  %9291 = vmatprep.subr.bf16.mxu1 %v11137_v32  ;;  %v8372_v35 = vsel %vm8356_vm7, %v11811_v30, %v8364_v50  ;;  %v11174_v32 = vld [vmem:[#allocation12 + $0x380] ss:$8 sps:$4 sm:$0xff]  }
 0x5b8   :  { %9251 = vmatpush1.bf16.msra.mxu0 %v11087_v37  ;;  %v8380_v57 = vpack.c.bf16 %v8372_v35, %v8372_v35  ;;  %v11193_v35 = vld [vmem:[%s11929_s9 + $0x18] sm:$0xff]  }
 0x5b9   :  { %9252 = vmatprep.subr.bf16.mxu0 %v11092_v24 }
 0x5ba   :  { %9292 = vmatpush1.bf16.msra.mxu1 %v11135_v62 }
 0x5bb   :  { %9293 = vmatprep.subr.bf16.mxu1 %v11140_v42 }
 0x5bc   :  { %9253 = vmatpush1.bf16.msra.mxu0 %v11090_v58 }
 0x5bd   :  { %9254 = vmatprep.subr.bf16.mxu0 %v11095_v47 }
 0x5be   :  { %9294 = vmatpush1.bf16.msra.mxu1 %v11138_v60 }
 0x5bf   :  { %9295 = vmatprep.subr.bf16.mxu1 %v11143_v29 }
 0x5c0   :  { %9255 = vmatpush1.bf16.msra.mxu0 %v11093_v0 }
 0x5c1   :  { %9256 = vmatprep.subr.bf16.mxu0 %v11098_v27 }
 0x5c2   :  { %9296 = vmatpush1.bf16.msra.mxu1 %v11141_v16 }
 0x5c3   :  { %9297 = vmatprep.subr.bf16.mxu1 %v11146_v49 }
 0x5c4   :  { %9257 = vmatpush1.bf16.msra.mxu0 %v11096_v52 }
 0x5c5   :  { %9258 = vmatprep.subr.bf16.mxu0 %v11101_v53 }
 0x5c6   :  { %9298 = vmatpush1.bf16.msra.mxu1 %v11144_v19 }
 0x5c7   :  { %9299 = vmatprep.subr.bf16.mxu1 %v11149_v55 }
 0x5c8   :  { %9259 = vmatpush1.bf16.msra.mxu0 %v11099_v10 }
 0x5c9   :  { %9260 = vmatprep.subr.bf16.mxu0 %v11104_v63 }
 0x5ca   :  { %9300 = vmatpush1.bf16.msra.mxu1 %v11147_v1 }
 0x5cb   :  { %9301 = vmatprep.subr.bf16.mxu1 %v11152_v54 }
 0x5cc   :  { %9261 = vmatpush1.bf16.msra.mxu0 %v11102_v17  ;;  %v11177_v17 = vld [vmem:[%s11927_s7 + $0x78] sm:$0xff]  }
 0x5cd   :  { %9262 = vmatprep.subr.bf16.mxu0 %v11107_v56  ;;  %v11179_v56 = vld [vmem:[%s11927_s7 + $0x70] sm:$0xff]  }
 0x5ce   :  { %9302 = vmatpush1.bf16.msra.mxu1 %v11150_v46 }
 0x5cf   :  { %9303 = vmatprep.subr.bf16.mxu1 %v11155_v31 }
 0x5d0   :  { %9263 = vmatpush2.bf16.msra.mxu0 %v11105_v15 }
 0x5d1   :  { %9264 = vmatprep.subr.bf16.mxu0 %v11110_v28 }
 0x5d2   :  { %9304 = vmatpush2.bf16.msra.mxu1 %v11153_v11  ;;  %v11180_v11 = vld [vmem:[%s11927_s7 + $0x30] sm:$0xff]  }
 0x5d3   :  { %9305 = vmatprep.subr.bf16.mxu1 %v11158_v3 }
 0x5d4   :  { %9265 = vmatpush2.bf16.msra.mxu0 %v11108_v51  ;;  %v11181_v51 = vld [vmem:[%s11927_s7 + $0x68] sm:$0xff]  }
 0x5d5   :  { %9266 = vmatprep.subr.bf16.mxu0 %v11113_v12 }
 0x5d6   :  { %9306 = vmatpush2.bf16.msra.mxu1 %v11156_v59  ;;  %v11182_v59 = vld [vmem:[%s11927_s7 + $0x28] sm:$0xff]  }
 0x5d7   :  { %9307 = vmatprep.subr.bf16.mxu1 %v11161_v18  ;;  %v11183_v18 = vld [vmem:[%s11927_s7 + $0x60] sm:$0xff]  }
 0x5d8   :  { %9267 = vmatpush2.bf16.msra.mxu0 %v11111_v20  ;;  %v11184_v20 = vld [vmem:[%s11927_s7 + $0x20] sm:$0xff]  }
 0x5d9   :  { %9268 = vmatprep.subr.bf16.mxu0 %v11116_v61  ;;  %v11185_v61 = vld [vmem:[%s11927_s7 + $0x58] sm:$0xff]  }
 0x5da   :  { %9308 = vmatpush2.bf16.msra.mxu1 %v11159_v2  ;;  %v11186_v2 = vld [vmem:[%s11927_s7 + $0x18] sm:$0xff]  }
 0x5db   :  { %9309 = vmatprep.subr.bf16.mxu1 %v11164_v48  ;;  %v11187_v48 = vld [vmem:[%s11927_s7 + $0x50] sm:$0xff]  }
 0x5dc   :  { %9269 = vmatpush2.bf16.msra.mxu0 %v11114_v5  ;;  %v8512_v5 = vld [vmem:[#allocation13] sm:$0x3] }
 0x5dd   :  { %9270 = vmatprep.subr.bf16.mxu0 %v11119_v9  ;;  %v8517_v9 = vrot.slane %v8512_v5, %v11610_v4  ;;  %v11189_v4 = vld [vmem:[%s11927_s7 + $0x48] sm:$0xff]  }
 0x5de   :  { %9310 = vmatpush2.bf16.msra.mxu1 %v11162_v13  ;;  %v8521_v13 = vrot.slane %v8512_v5, %v11614_v7  ;;  %v11190_v7 = vld [vmem:[%s11927_s7 + $0x8] sm:$0xff]   ;;  %v10910_v5 = vld [vmem:[#allocation19] ss:$0 sm:$0xff] }
 0x5df   :  { %9311 = vmatprep.subr.bf16.mxu1 %v11167_v8 }
 0x5e0   :  { %9271 = vmatpush2.bf16.msra.mxu0 %v11117_v14 }
 0x5e1   :  { %9272 = vmatprep.subr.bf16.mxu0 %v11122_v21 }
 0x5e2   :  { %9312 = vmatpush2.bf16.msra.mxu1 %v11165_v6 }
 0x5e3   :  { %9313 = vmatprep.subr.bf16.mxu1 %v11170_v36 }
 0x5e4   :  { %9273 = vmatpush2.bf16.msra.mxu0 %v11120_v23 }
 0x5e5   :  { %9274 = vmatprep.subr.bf16.mxu0 %v11125_v39 }
 0x5e6   :  { %9314 = vmatpush2.bf16.msra.mxu1 %v11168_v44 }
 0x5e7   :  { %9315 = vmatprep.subr.bf16.mxu1 %v11173_v25 }
 0x5e8   :  { %9275 = vmatpush2.bf16.msra.mxu0 %v11123_v22 }
 0x5e9   :  { %9276 = vmatprep.subr.bf16.mxu0 %v11128_v26 }
 0x5ea   :  { %9316 = vmatpush2.bf16.msra.mxu1 %v11171_v43  ;;  %v11188_v43 = vld [vmem:[%s11927_s7 + $0x10] sm:$0xff]  }
 0x5eb   :  { %9317 = vmatprep.subr.bf16.mxu1 %v11176_v45  ;;  %v11191_v45 = vld [vmem:[%s11927_s7 + $0x40] sm:$0xff]  }
 0x5ec   :  { %9277 = vmatpush2.bf16.msra.mxu0 %v11126_v33  ;;  %v11192_v33 = vld [vmem:[%s11927_s7] sm:$0xff]  }
 0x5ed   :  { %10915 = vmatprep.subr.bf16.mxu0 %v11177_v17 }
 0x5ee   :  { %9318 = vmatpush2.bf16.msra.mxu1 %v11174_v32  ;;  %v11475_v32 = vmov 0.0  }
 0x5ef   :  { %v8222_v37 = vpop.f32.mrf.mxu0  ;;  %9279 = vmatmul.mubr.bf16.vlgmr.msra.gmra.mxu0 %v8380_v57  ;;  %10945 = vmatprep.subr.bf16.mxu1 %v11475_v32 }
 0x5f0   :  { %v8223_v40 = vadd.f32 %v8222_v37, %v11842_v41 }
 0x5f1   :  { %v8263_v24 = vpop.f32.mrf.mxu1  ;;  %v8224_v38 = vpop.f32.mrf.mxu0 }
 0x5f2   :  { %v8264_v62 = vadd.f32 %v8263_v24, %v8223_v40  ;;  %v8225_v30 = vadd.f32 %v8224_v38, %v11845_v34  ;;  %v11178_v34 = vld [vmem:[%s11927_s7 + $0x38] sm:$0xff]  }
 0x5f3   :  { %v8265_v42 = vpop.f32.mrf.mxu1  ;;  %v8226_v58 = vpop.f32.mrf.mxu0  ;;  %10916 = vmatpush3.bf16.msra.mxu0 %v11178_v34 }
 0x5f4   :  { %v8266_v27 = vadd.f32 %v8265_v42, %v8225_v30  ;;  %10917 = vmatprep.subr.bf16.mxu0 %v11179_v56 }
 0x5f5   :  { %v8267_v47 = vpop.f32.mrf.mxu1  ;;  %v8227_v60 = vpop.f32.mrf.mxu0 }
 0x5f7   :  { %v8268_v29 = vpop.f32.mrf.mxu1  ;;  %10918 = vmatpush3.bf16.msra.mxu0 %v11180_v11  ;;  %v11198_v11 = vld [vmem:[#allocation18] sm:$0xff]  }
 0x5f8   :  { %10919 = vmatprep.subr.bf16.mxu0 %v11181_v51 }
 0x5fb   :  { %10920 = vmatpush3.bf16.msra.mxu0 %v11182_v59 }
 0x5fc   :  { %10921 = vmatprep.subr.bf16.mxu0 %v11183_v18 }
 0x5ff   :  { %10922 = vmatpush3.bf16.msra.mxu0 %v11184_v20 }
 0x600   :  { %10923 = vmatprep.subr.bf16.mxu0 %v11185_v61 }
 0x603   :  { %10924 = vmatpush3.bf16.msra.mxu0 %v11186_v2 }
 0x604   :  { %10925 = vmatprep.subr.bf16.mxu0 %v11187_v48 }
 0x607   :  { %10926 = vmatpush3.bf16.msra.mxu0 %v11188_v43 }
 0x608   :  { %10927 = vmatprep.subr.bf16.mxu0 %v11189_v4 }
 0x60b   :  { %10928 = vmatpush3.bf16.msra.mxu0 %v11190_v7 }
 0x60c   :  { %10929 = vmatprep.subr.bf16.mxu0 %v11191_v45 }
 0x60f   :  { %10930 = vmatpush3.bf16.msra.mxu0 %v11192_v33 }
 0x62f   :  { %v8304_v0 = vpop.f32.mrf.mxu0 }
 0x630   :  { %v8305_v16 = vadd.f32 %v8304_v0, %v8264_v62 }
 0x631   :  { %v8345_v49 = vpop.f32.mrf.mxu1  ;;  %v8306_v52 = vpop.f32.mrf.mxu0 }
 0x632   :  { %v8346_v53 = vadd.f32 %v8345_v49, %v8305_v16  ;;  %v8307_v19 = vadd.f32 %v8306_v52, %v8266_v27 }
 0x633   :  { %v8347_v55 = vpop.f32.mrf.mxu1  ;;  %v8308_v10 = vpop.f32.mrf.mxu0 }
 0x634   :  { %vm8358_vm8 = vcmp.gt.f32.partialorder %v8346_v53, 0.0  ;;  %v8366_v41 = vmul.f32 0.2, %v8346_v53  ;;  %v8348_v63 = vadd.f32 %v8347_v55, %v8307_v19  ;;  %v11194_v19 = vld [vmem:[%s11929_s9 + $0x10] sm:$0xff]   ;;  %v11195_v55 = vld [vmem:[%s11929_s9 + $0x8] sm:$0xff]   ;;  %v11196_v10 = vld [vmem:[%s11929_s9] sm:$0xff]  }
 0x635   :  { %v8349_v1 = vpop.f32.mrf.mxu1  ;;  %v8309_v54 = vpop.f32.mrf.mxu0  ;;  %s11477_s9 = smov [#allocation21]  }
 0x636   :  { %vm8359_vm9 = vcmp.gt.f32.partialorder %v8348_v63, 0.0  ;;  %v8367_v46 = vmul.f32 0.2, %v8348_v63  ;;  %v8374_v15 = vsel %vm8358_vm8, %v8346_v53, %v8366_v41  ;;  %s9675_s14 = sshll.u32 %s11477_s9, 4  ;;  %s9676_s14 = int_to_ptr.vmem [resolvable:$true] %s9675_s14 }
 0x637   :  { %v8350_v31 = vpop.f32.mrf.mxu1  ;;  %v8382_v12 = vpack.c.bf16 %v8374_v15, %v8374_v15  ;;  %s11422_s15 = scalar_lea.vmem %s9676_s14, 128  ;;  %p11427_p0 = scmp.lt.s32.totalorder %s9676_s14, %s9676_s14 }
 0x638   :  { %v8375_v28 = vsel %vm8359_vm9, %v8348_v63, %v8367_v46  ;;  %v10887_v63 = vld [vmem:[#allocation15] ss:$0 sm:$0xff]  ;;  %p11423_p13 = scmp.ne.s32.totalorder %s9676_s14, %s11422_s15  ;;  %p11428_p1 = scmp.lt.s32.totalorder %s11422_s15, %s11422_s15 }
 0x639   :  { %v8383_v3 = vpack.c.bf16 %v8375_v28, %v8375_v28  ;;  %v11197_v28 = vld [vmem:[#allocation18 + $0x8] sm:$0xff]  }
 0x63a   :  { %p11429_p2 = por %p11428_p1, %p11427_p0 }
 0x63b   :  { %9319 = vmatprep.mubr.bf16.mxu1 %v8383_v3  ;;  %v10904_v3 = vld [vmem:[#allocation16] ss:$0 sm:$0xff] }
 0x63c   :  { %9320 = vmatmul.mubr.bf16.vlgmr.msra.gmra.mxu1 %v8382_v12  ;;  %p11430_p3 = pnand %p11429_p2, %p11423_p13 }
 0x63d   :  { %10946 = vmatpush3.bf16.msra.mxu1 %v11193_v35  ;;  %10953 = vmatprep.mubr.msk.bf16.mxu1 %vm11476_vm12, %v11475_v32 }
 0x63e   :  { %10947 = vmatprep.subr.bf16.mxu1 %v11475_v32 }
 0x641   :  { %10948 = vmatpush3.bf16.msra.mxu1 %v11194_v19 }
 0x642   :  { %10949 = vmatprep.subr.bf16.mxu1 %v11475_v32 }
 0x645   :  { %10950 = vmatpush3.bf16.msra.mxu1 %v11195_v55 }
 0x646   :  { %10951 = vmatprep.subr.bf16.mxu1 %v11475_v32 }
 0x649   :  { %10952 = vmatpush3.bf16.msra.mxu1 %v11196_v10 }
 0x64a   :  { %10957 = vmatprep.subr.bf16.mxu1 %v11475_v32 }
 0x66f   :  { %v9198_v8 = vpop.f32.mrf.mxu0 }
 0x670   :  { %v9199_v14 = vadd.f32 %v9198_v8, %v8517_v9 }
 0x671   :  { %v9239_v21 = vpop.f32.mrf.mxu1  ;;  %v9200_v6 = vpop.f32.mrf.mxu0 }
 0x672   :  { %v9240_v36 = vadd.f32 %v9239_v21, %v9199_v14  ;;  %v9201_v23 = vadd.f32 %v9200_v6, %v8521_v13 }
 0x673   :  { %v9241_v39 = vpop.f32.mrf.mxu1  ;;  %v9202_v44 = vpop.f32.mrf.mxu0 }
 0x674   :  { %v9242_v25 = vadd.f32 %v9241_v39, %v9201_v23 }
 0x675   :  { %v9243_v22 = vpop.f32.mrf.mxu1  ;;  %v9203_v26 = vpop.f32.mrf.mxu0 }
 0x677   :  { %v9244_v50 = vpop.f32.mrf.mxu1 }
 0x6af   :  { %v9280_v57 = vpop.f32.mrf.mxu0 }
 0x6b0   :  { %v9281_v37 = vadd.f32 %v9280_v57, %v9240_v36 }
 0x6b1   :  { %v9282_v40 = vpop.f32.mrf.mxu0 }
 0x6b2   :  { %v9283_v24 = vadd.f32 %v9282_v40, %v9242_v25 }
 0x6b3   :  { %v9284_v38 = vpop.f32.mrf.mxu0 }
 0x6b5   :  { %v9285_v62 = vpop.f32.mrf.mxu0 }
 0x6fc   :  { %v9321_v42 = vpop.f32.mrf.mxu1 }
 0x6fd   :  { %v9322_v58 = vadd.f32 %v9321_v42, %v9281_v37 }
 0x6fe   :  { %v9323_v47 = vpop.f32.mrf.mxu1 }
 0x6ff   :  { %vm9328_vm10 = vcmp.gt.f32.partialorder %v9322_v58, 0.0  ;;  %v9330_v60 = vmul.f32 0.2, %v9322_v58  ;;  %v9324_v29 = vadd.f32 %v9323_v47, %v9283_v24 }
 0x700   :  { %v9325_v30 = vpop.f32.mrf.mxu1 }
 0x701   :  { %vm9329_vm11 = vcmp.gt.f32.partialorder %v9324_v29, 0.0  ;;  %v9331_v0 = vmul.f32 0.2, %v9324_v29  ;;  %v9332_v27 = vsel %vm9328_vm10, %v9322_v58, %v9330_v60 }
 0x702   :  { %v9326_v16 = vpop.f32.mrf.mxu1  ;;  %v9334_v53 = vpack.c.bf16 %v9332_v27, %v9332_v27 }
 0x703   :  { %v9333_v49 = vsel %vm9329_vm11, %v9324_v29, %v9331_v0 }
 0x704   :  { %v9335_v52 = vpack.c.bf16 %v9333_v49, %v9333_v49 }
 0x706   :  { %9503 = vmatprep.mubr.bf16.mxu0 %v9335_v52 }
 0x707   :  { %9504 = vmatmul.mubr.bf16.vlgmr.msra.gmra.mxu0 %v9334_v53 }
 0x7c7   :  { %v10931_v41 = vpop.f32.mrf.mxu0 }
 0x7c9   :  { %v10932_v1 = vpop.f32.mrf.mxu0 }
 0x7ca   :  { %v10933_v54 = vadd.f32 %v10932_v1, %v10931_v41 }
 0x7cb   :  { %v10934_v17 = vpop.f32.mrf.mxu0 }
 0x7cc   :  { %v9506_v34 = vadd.f32 %v10933_v54, %v10887_v63 }
 0x7cd   :  { %v10935_v56 = vpop.f32.mrf.mxu0 }
 0x7ce   :  { %vm9511_vm13 = vcmp.gt.f32.partialorder %v9506_v34, 0.0  ;;  %v9512_v46 = vmul.f32 0.2, %v9506_v34 }
 0x7d0   :  { %v9513_v31 = vsel %vm9511_vm13, %v9506_v34, %v9512_v46 }
 0x7d1   :  { %v9514_v15 = vpack.c.bf16 %v9513_v31, %v9513_v31 }
 0x7d3   :  { %10954 = vmatmul.mubr.msk.bf16.vlgmr.msra.gmra.mxu1 %vm9554_vm14, %v9514_v15 }
 0x7d4   :  { %10961 = vmatprep.mubr.msk.bf16.mxu1 %vm11476_vm12, %v11475_v32  ;;  %10958 = vmatpush3.bf16.msra.mxu1 %v11197_v28 }
 0x7d5   :  { %10959 = vmatprep.subr.bf16.mxu1 %v11475_v32 }
 0x7d8   :  { %10960 = vmatpush3.bf16.msra.mxu1 %v11198_v11 }
 0x893   :  { %v9592_v51 = vpop.f32.mrf.mxu1 }
 0x894   :  { %v9593_v12 = vadd.f32 %v10904_v3, %v9592_v51 }
 0x895   :  { %v10955_v59 = vpop.f32.mrf.mxu1 }
 0x896   :  { %vm9598_vm15 = vcmp.gt.f32.partialorder %v9593_v12, 0.0  ;;  %v9599_v18 = vmul.f32 0.2, %v9593_v12 }
 0x897   :  { %v9595_v20 = vpop.f32.mrf.mxu1 }
 0x898   :  { %v9600_v61 = vsel %vm9598_vm15, %v9593_v12, %v9599_v18 }
 0x899   :  { %v9601_v2 = vpack.c.bf16 %v9600_v61, %v9600_v61  ;;  %v10956_v48 = vpop.f32.mrf.mxu1 }
 0x89b   :  { %10962 = vmatmul.mubr.msk.bf16.vlgmr.msra.gmra.mxu1 %vm454_vm0, %v9601_v2 }
 0x95b   :  { %v9662_v9 = vpop.f32.mrf.mxu1 }
 0x95c   :  { %v9663_v13 = vadd.f32 %v10910_v5, %v9662_v9 }
 0x95d   :  { %v10963_v8 = vpop.f32.mrf.mxu1 }
 0x95e   :  { %9668 = vst [vmem:[#allocation21] sm:$0xff] %v9663_v13 }
 0x95f   :  { %v9665_v14 = vpop.f32.mrf.mxu1 }
 0x960   :  { %11433 = shalt.err (!%p11430_p3)
}
 0x961   :  { %9678 = dma.vmem_to_hbm [thread:$0]  %s9676_s14, 128, %s11933_s13, [#allocation6]   ;;  %v10964_v21 = vpop.f32.mrf.mxu1 }
 0x962   :  { %11456 = dma.done.wait [#allocation6], 128  }
 0x963   :  { %11457 = vsyncadd [#allocation6], 4294967168 }
 0x964   :  { %9682 = vsyncpa [#allocation5], 1 }
 0x965   :  { %9683 = vsyncpa [#allocation8], 1 }
 0x966   :  { %9684 = vsyncpa [#allocation11], 1 }
 0x967   :  { %9685 = vsyncpa [#allocation14], 1 }
 0x968   :  { %9686 = vsyncpa [#allocation17], 1 }
 0x969   :  { %9687 = vsyncpa [#allocation20], 1 }
 0x96a   :  { %9688 = vsyncpa [#allocation6], 1 }
 0x96b   :  { %9689 = vsyncmov [#allocation3] }
 0x96e   :  { %s9690_s16 = vpop.sfrf %9689 }
 0x96f   :  { %p10914_p4 = scmp.ne.s32.totalorder %s9690_s16, 0 }
 0x971   :  { %9694 = shalt.err (%p10914_p4)  }

</bundles_post_ra>
